<compile_context>
chip_gen: v6e
topology: v6e:2x2x1
jax: 0.10.0
libtpu: 0.0.40
codegen_flags: <defaults>
</compile_context>

<pallas_src>
import functools
import math

import jax
import jax.numpy as jnp
import numpy as np
from jax.experimental import pallas as pl
from jax.experimental.pallas import tpu as pltpu


def _gat_block_kernel(tm_ref, x_ref, m_ref, wac_ref, wqkv_ref, wb_ref, wch_ref,
                      o_ref, *, W, n_img, imgs, loop_num):
    """One grid step = `imgs` images packed on the lane axis (M = imgs*H*W)."""
    f32, bf16 = jnp.float32, jnp.bfloat16
    M = imgs * n_img
    inter = wqkv_ref.shape[1]
    Cin = x_ref.shape[1]

    x = x_ref[0]                                   # (Cin, M) f32
    mask = m_ref[0]                                # (1, M)  f32

    # Hoisted per-width mask broadcasts (JAX does not CSE broadcast_in_dim):
    # one set for the Cin-wide patch, one shared by the two inter-wide patches.
    tap = [tm_ref[t] for t in range(9)]            # each (1, M) f32
    masks_ci = [jnp.broadcast_to(tap[t], (Cin, M)) for t in range(9)]
    masks_it = [jnp.broadcast_to(tap[t], (inter, M)) for t in range(9)]

    def im2col(a, masks):
        """(Ca, M) -> (9*Ca, M): 9 shifted+masked taps stacked along K.

        The roll wraps across image boundaries on the packed lane axis, but
        those positions are exactly the border pixels zeroed by the tap masks.
        """
        taps = []
        t = 0
        for ky in range(3):
            for kx in range(3):
                dy, dx = ky - 1, kx - 1
                if dy == 0 and dx == 0:
                    taps.append(a)
                else:
                    s = dy * W + dx
                    shifted = pltpu.roll(a, shift=(-s) % M, axis=1)
                    taps.append(shifted * masks[t])
                t += 1
        return jnp.concatenate(taps, axis=0)

    # conva (+ convc's x contribution): one shared im2col patch, one bf16 matmul.
    p_x = im2col(x, masks_ci).astype(bf16)                           # (9*Cin, M)
    ac = jnp.dot(wac_ref[...], p_x, preferred_element_type=f32)      # (inter+Cout, M)
    f = jnp.maximum(ac[0:inter], 0.0)                                # conva + ReLU
    cx = ac[inter:]                                                  # convc x-part

    # loop_num x GraphAttention (shared weights); 1/sqrt(inter) folded into wq.
    wqkv = wqkv_ref[...]                                             # (3*inter, inter) bf16
    for _ in range(loop_num):
        qkv = jnp.dot(wqkv, f.astype(bf16), preferred_element_type=f32)
        q = qkv[0:inter].astype(bf16)
        k = qkv[inter:2 * inter].astype(bf16)
        v = qkv[2 * inter:].astype(bf16)
        parts = []
        for i in range(imgs):                                        # attention is per-image
            sl = slice(i * n_img, (i + 1) * n_img)
            qi, ki, vi, fi = q[:, sl], k[:, sl], v[:, sl], f[:, sl]
            # s[n, m] = <q_n, k_m>  (scale already folded into wq)
            s = jax.lax.dot_general(qi, ki, (((0,), (0,)), ((), ())),
                                    preferred_element_type=f32)      # (N, N)
            s = s - jnp.max(s, axis=-1, keepdims=True)
            e = jnp.exp(s)                                           # f32 EUP
            p = (e * pl.reciprocal(jnp.sum(e, axis=-1, keepdims=True),
                                   approx=True)).astype(bf16)
            # attn[c, n] = sum_m p[n, m] * v[c, m]
            attn = jax.lax.dot_general(vi, p, (((1,), (1,)), ((), ())),
                                       preferred_element_type=f32)   # (inter, N)
            parts.append(attn + fi)                                  # residual
        f = parts[0] if imgs == 1 else jnp.concatenate(parts, axis=1)

    # convb + ReLU
    h = jnp.maximum(
        jnp.dot(wb_ref[...], im2col(f, masks_it).astype(bf16),
                preferred_element_type=f32), 0.0)

    # convc over concat([x, h], channels) == Wc_x @ im2col(x) + Wc_h @ im2col(h)
    out = cx + jnp.dot(wch_ref[...], im2col(h, masks_it).astype(bf16),
                       preferred_element_type=f32)
    out = jnp.maximum(out, 0.0) * mask                               # ReLU, map_mask
    o_ref[0] = out.astype(o_ref.dtype)


def _im2col_weight(w):
    """(Cout, Cin, 3, 3) torch-layout conv weight -> (Cout, 9*Cin) im2col matrix."""
    co, ci, kh, kw = w.shape
    return jnp.transpose(w, (0, 2, 3, 1)).reshape(co, kh * kw * ci)


@functools.partial(jax.jit, static_argnames=("loop_num", "imgs_per_step"))
def gat_block_forward(x, map_mask, params, loop_num, imgs_per_step=None):
    """x: (B, Cin, H, W) NCHW; map_mask: (B, 1, H, W).  Returns (B, Cout, H, W)."""
    B, Cin, H, W = x.shape
    N = H * W
    inter = params["wa"].shape[0]
    Cout = params["wc"].shape[0]
    f32, bf16 = jnp.float32, jnp.bfloat16

    imgs = imgs_per_step if imgs_per_step is not None else (2 if B % 2 == 0 else 1)
    assert B % imgs == 0
    G = B // imgs
    M = imgs * N

    # Pack `imgs` images per grid step along the lane axis: (G, C, imgs*N).
    x_g = (x.reshape(G, imgs, Cin, N).transpose(0, 2, 1, 3)
           .reshape(G, Cin, M).astype(f32))
    m_g = (map_mask.astype(f32).reshape(G, imgs, 1, N).transpose(0, 2, 1, 3)
           .reshape(G, 1, M))

    # 9 conv-tap border-validity masks: trace-time numpy constant, periodic in N.
    rr, cc = np.divmod(np.arange(N), W)
    taps = []
    for ky in range(3):
        for kx in range(3):
            dy, dx = ky - 1, kx - 1
            taps.append((rr + dy >= 0) & (rr + dy < H) &
                        (cc + dx >= 0) & (cc + dx < W))
    tap_masks = jnp.asarray(
        np.tile(np.stack(taps).astype(np.float32), (1, imgs))).reshape(9, 1, M)

    # Weight prep: merge conva + convc-x (shared patch), fold attention scale
    # into wq, cast everything the MXU sees to bf16.
    scale = 1.0 / math.sqrt(inter)
    wac = jnp.concatenate(
        [_im2col_weight(params["wa"]),                 # (inter, 9*Cin)
         _im2col_weight(params["wc"][:, :Cin])],       # (Cout, 9*Cin)
        axis=0).astype(bf16)                           # (inter+Cout, 9*Cin)
    wqkv = jnp.concatenate(
        [params["wq"] * scale, params["wk"], params["wv"]], axis=0).astype(bf16)
    wb = _im2col_weight(params["wb"]).astype(bf16)     # (inter, 9*inter)
    wch = _im2col_weight(params["wc"][:, Cin:]).astype(bf16)  # (Cout, 9*inter)

    flops = 2 * B * N * ((inter + Cout) * 9 * Cin
                         + loop_num * (3 * inter * inter + 2 * inter * N)
                         + inter * 9 * inter + Cout * 9 * inter)
    bytes_accessed = (4 * (x_g.size + m_g.size + B * Cout * N + tap_masks.size)
                      + 2 * (wac.size + wqkv.size + wb.size + wch.size))
    cost = pl.CostEstimate(flops=int(flops),
                           transcendentals=int(B * loop_num * N * N),
                           bytes_accessed=int(bytes_accessed))

    kernel = functools.partial(_gat_block_kernel, W=W, n_img=N, imgs=imgs,
                               loop_num=loop_num)
    out_g = pl.pallas_call(
        kernel,
        out_shape=jax.ShapeDtypeStruct((G, Cout, M), f32),
        grid=(G,),
        in_specs=[
            pl.BlockSpec((9, 1, M), lambda g: (0, 0, 0)),      # tap masks (resident)
            pl.BlockSpec((1, Cin, M), lambda g: (g, 0, 0)),    # x
            pl.BlockSpec((1, 1, M), lambda g: (g, 0, 0)),      # map_mask
            pl.BlockSpec(wac.shape, lambda g: (0, 0)),
            pl.BlockSpec(wqkv.shape, lambda g: (0, 0)),
            pl.BlockSpec(wb.shape, lambda g: (0, 0)),
            pl.BlockSpec(wch.shape, lambda g: (0, 0)),
        ],
        out_specs=pl.BlockSpec((1, Cout, M), lambda g: (g, 0, 0)),
        compiler_params=pltpu.CompilerParams(
            dimension_semantics=("parallel",)),
        cost_estimate=cost,
    )(tap_masks, x_g, m_g, wac, wqkv, wb, wch)

    return (out_g.reshape(G, Cout, imgs, N).transpose(0, 2, 1, 3)
            .reshape(B, Cout, H, W))


def reference_forward(x, map_mask, params, loop_num):
    """Pure JAX/XLA (f32) reference of the same forward pass (NCHW)."""
    dn = ("NCHW", "OIHW", "NCHW")

    def conv(inp, w):
        return jax.lax.conv_general_dilated(
            inp, w, (1, 1), ((1, 1), (1, 1)), dimension_numbers=dn)

    relu = lambda t: jnp.maximum(t, 0.0)
    mask = map_mask.astype(jnp.float32)
    out = relu(conv(x, params["wa"]))
    B, C, H, W = out.shape
    f = out.reshape(B, C, H * W)
    for _ in range(loop_num):
        q = jnp.einsum("oc,bcn->bon", params["wq"], f)
        k = jnp.einsum("oc,bcn->bon", params["wk"], f)
        v = jnp.einsum("oc,bcn->bon", params["wv"], f)
        s = jnp.einsum("bcn,bcm->bnm", q, k) / math.sqrt(C)
        p = jax.nn.softmax(s, axis=-1)
        f = jnp.einsum("bnm,bcm->bcn", p, v) + f
    out = f.reshape(B, C, H, W)
    out = relu(conv(out, params["wb"]))
    out = relu(conv(jnp.concatenate([x, out], axis=1), params["wc"])) * mask
    return out


if __name__ == "__main__":
    # cfg: INPUT_SIZE=32, INTER_PROP=4 (-> inter=8), OUTPUT_SIZE=32, LOOP_NUM=2
    INPUT_SIZE, INTER_PROP, OUTPUT_SIZE, LOOP_NUM = 32, 4, 32, 2
    inter = INPUT_SIZE // INTER_PROP
    B, H, W = 2, 16, 16

    key = jax.random.PRNGKey(0)
    kx, km, k1, k2, k3, k4, k5, k6 = jax.random.split(key, 8)

    x = jax.random.normal(kx, (B, INPUT_SIZE, H, W), jnp.float32)          # NCHW
    map_mask = (jax.random.uniform(km, (B, 1, H, W)) > 0.3).astype(jnp.float32)

    params = dict(
        wa=jax.random.normal(k1, (inter, INPUT_SIZE, 3, 3), jnp.float32) * 0.1,
        wq=jax.random.normal(k2, (inter, inter), jnp.float32) * 0.1,
        wk=jax.random.normal(k3, (inter, inter), jnp.float32) * 0.1,
        wv=jax.random.normal(k4, (inter, inter), jnp.float32) * 0.1,
        wb=jax.random.normal(k5, (inter, inter, 3, 3), jnp.float32) * 0.1,
        wc=jax.random.normal(
            k6, (OUTPUT_SIZE, INPUT_SIZE + inter, 3, 3), jnp.float32) * 0.1,
    )

    out = gat_block_forward(x, map_mask, params, loop_num=LOOP_NUM)
    out = jax.block_until_ready(out)
    assert out.shape == (B, OUTPUT_SIZE, H, W)
    assert out.dtype == jnp.float32

    # Cross-check the fused bf16-MXU kernel against a plain-XLA f32 reference.
    # (bf16 matmul inputs + approx reciprocal => loose-ish tolerance.)
    ref = reference_forward(x, map_mask, params, LOOP_NUM)
    np.testing.assert_allclose(np.asarray(out), np.asarray(ref),
                               rtol=5e-2, atol=5e-2)
    print("KERNEL_OK")
</pallas_src>

<mosaic_0001>
module attributes {stable_mosaic.version = 11 : i64} {
  func.func @_gat_block_kernel(%arg0: i32, %arg1: memref<9x1x512xf32, #tpu.memory_space<vmem>>, %arg2: memref<1x32x512xf32, #tpu.memory_space<vmem>>, %arg3: memref<1x1x512xf32, #tpu.memory_space<vmem>>, %arg4: memref<40x288xbf16, #tpu.memory_space<vmem>>, %arg5: memref<24x8xbf16, #tpu.memory_space<vmem>>, %arg6: memref<8x72xbf16, #tpu.memory_space<vmem>>, %arg7: memref<32x72xbf16, #tpu.memory_space<vmem>>, %arg8: memref<1x32x512xf32, #tpu.memory_space<vmem>>) attributes {dimension_semantics = [#tpu.dimension_semantics<parallel>], iteration_bounds = array<i64: 1>, scalar_prefetch = 0 : i64, scratch_operands = 0 : i64, tpu.core_type = #tpu.core_type<tc>, window_params = [{pipeline_mode = #tpu.pipeline_mode<synchronous>, transform_indices = @transform_0, window_bounds = array<i64: 9, 1, 512>}, {transform_indices = @transform_1, window_bounds = array<i64: 1, 32, 512>}, {transform_indices = @transform_2, window_bounds = array<i64: 1, 1, 512>}, {pipeline_mode = #tpu.pipeline_mode<synchronous>, transform_indices = @transform_3, window_bounds = array<i64: 40, 288>}, {pipeline_mode = #tpu.pipeline_mode<synchronous>, transform_indices = @transform_4, window_bounds = array<i64: 24, 8>}, {pipeline_mode = #tpu.pipeline_mode<synchronous>, transform_indices = @transform_5, window_bounds = array<i64: 8, 72>}, {pipeline_mode = #tpu.pipeline_mode<synchronous>, transform_indices = @transform_6, window_bounds = array<i64: 32, 72>}, {transform_indices = @transform_7, window_bounds = array<i64: 1, 32, 512>}]} {
    %c0 = arith.constant 0 : index
    %c0_0 = arith.constant 0 : index
    %c0_1 = arith.constant 0 : index
    %0 = vector.load %arg2[%c0, %c0_0, %c0_1] : memref<1x32x512xf32, #tpu.memory_space<vmem>>, vector<1x32x512xf32>
    %1 = vector.shape_cast %0 : vector<1x32x512xf32> to vector<32x512xf32>
    %c0_2 = arith.constant 0 : index
    %c0_3 = arith.constant 0 : index
    %c0_4 = arith.constant 0 : index
    %2 = vector.load %arg3[%c0_2, %c0_3, %c0_4] : memref<1x1x512xf32, #tpu.memory_space<vmem>>, vector<1x1x512xf32>
    %3 = vector.shape_cast %2 : vector<1x1x512xf32> to vector<1x512xf32>
    %c0_5 = arith.constant 0 : index
    %c0_6 = arith.constant 0 : index
    %c0_7 = arith.constant 0 : index
    %4 = vector.load %arg1[%c0_5, %c0_6, %c0_7] : memref<9x1x512xf32, #tpu.memory_space<vmem>>, vector<1x1x512xf32>
    %5 = vector.shape_cast %4 : vector<1x1x512xf32> to vector<1x512xf32>
    %c1 = arith.constant 1 : index
    %c0_8 = arith.constant 0 : index
    %c0_9 = arith.constant 0 : index
    %6 = vector.load %arg1[%c1, %c0_8, %c0_9] : memref<9x1x512xf32, #tpu.memory_space<vmem>>, vector<1x1x512xf32>
    %7 = vector.shape_cast %6 : vector<1x1x512xf32> to vector<1x512xf32>
    %c2 = arith.constant 2 : index
    %c0_10 = arith.constant 0 : index
    %c0_11 = arith.constant 0 : index
    %8 = vector.load %arg1[%c2, %c0_10, %c0_11] : memref<9x1x512xf32, #tpu.memory_space<vmem>>, vector<1x1x512xf32>
    %9 = vector.shape_cast %8 : vector<1x1x512xf32> to vector<1x512xf32>
    %c3 = arith.constant 3 : index
    %c0_12 = arith.constant 0 : index
    %c0_13 = arith.constant 0 : index
    %10 = vector.load %arg1[%c3, %c0_12, %c0_13] : memref<9x1x512xf32, #tpu.memory_space<vmem>>, vector<1x1x512xf32>
    %11 = vector.shape_cast %10 : vector<1x1x512xf32> to vector<1x512xf32>
    %c5 = arith.constant 5 : index
    %c0_14 = arith.constant 0 : index
    %c0_15 = arith.constant 0 : index
    %12 = vector.load %arg1[%c5, %c0_14, %c0_15] : memref<9x1x512xf32, #tpu.memory_space<vmem>>, vector<1x1x512xf32>
    %13 = vector.shape_cast %12 : vector<1x1x512xf32> to vector<1x512xf32>
    %c6 = arith.constant 6 : index
    %c0_16 = arith.constant 0 : index
    %c0_17 = arith.constant 0 : index
    %14 = vector.load %arg1[%c6, %c0_16, %c0_17] : memref<9x1x512xf32, #tpu.memory_space<vmem>>, vector<1x1x512xf32>
    %15 = vector.shape_cast %14 : vector<1x1x512xf32> to vector<1x512xf32>
    %c7 = arith.constant 7 : index
    %c0_18 = arith.constant 0 : index
    %c0_19 = arith.constant 0 : index
    %16 = vector.load %arg1[%c7, %c0_18, %c0_19] : memref<9x1x512xf32, #tpu.memory_space<vmem>>, vector<1x1x512xf32>
    %17 = vector.shape_cast %16 : vector<1x1x512xf32> to vector<1x512xf32>
    %c8 = arith.constant 8 : index
    %c0_20 = arith.constant 0 : index
    %c0_21 = arith.constant 0 : index
    %18 = vector.load %arg1[%c8, %c0_20, %c0_21] : memref<9x1x512xf32, #tpu.memory_space<vmem>>, vector<1x1x512xf32>
    %19 = vector.shape_cast %18 : vector<1x1x512xf32> to vector<1x512xf32>
    %20 = vector.shape_cast %5 : vector<1x512xf32> to vector<1x512xf32>
    %21 = vector.broadcast %20 : vector<1x512xf32> to vector<32x512xf32>
    %22 = vector.shape_cast %7 : vector<1x512xf32> to vector<1x512xf32>
    %23 = vector.broadcast %22 : vector<1x512xf32> to vector<32x512xf32>
    %24 = vector.shape_cast %9 : vector<1x512xf32> to vector<1x512xf32>
    %25 = vector.broadcast %24 : vector<1x512xf32> to vector<32x512xf32>
    %26 = vector.shape_cast %11 : vector<1x512xf32> to vector<1x512xf32>
    %27 = vector.broadcast %26 : vector<1x512xf32> to vector<32x512xf32>
    %28 = vector.shape_cast %13 : vector<1x512xf32> to vector<1x512xf32>
    %29 = vector.broadcast %28 : vector<1x512xf32> to vector<32x512xf32>
    %30 = vector.shape_cast %15 : vector<1x512xf32> to vector<1x512xf32>
    %31 = vector.broadcast %30 : vector<1x512xf32> to vector<32x512xf32>
    %32 = vector.shape_cast %17 : vector<1x512xf32> to vector<1x512xf32>
    %33 = vector.broadcast %32 : vector<1x512xf32> to vector<32x512xf32>
    %34 = vector.shape_cast %19 : vector<1x512xf32> to vector<1x512xf32>
    %35 = vector.broadcast %34 : vector<1x512xf32> to vector<32x512xf32>
    %36 = vector.shape_cast %5 : vector<1x512xf32> to vector<1x512xf32>
    %37 = vector.broadcast %36 : vector<1x512xf32> to vector<8x512xf32>
    %38 = vector.shape_cast %7 : vector<1x512xf32> to vector<1x512xf32>
    %39 = vector.broadcast %38 : vector<1x512xf32> to vector<8x512xf32>
    %40 = vector.shape_cast %9 : vector<1x512xf32> to vector<1x512xf32>
    %41 = vector.broadcast %40 : vector<1x512xf32> to vector<8x512xf32>
    %42 = vector.shape_cast %11 : vector<1x512xf32> to vector<1x512xf32>
    %43 = vector.broadcast %42 : vector<1x512xf32> to vector<8x512xf32>
    %44 = vector.shape_cast %13 : vector<1x512xf32> to vector<1x512xf32>
    %45 = vector.broadcast %44 : vector<1x512xf32> to vector<8x512xf32>
    %46 = vector.shape_cast %15 : vector<1x512xf32> to vector<1x512xf32>
    %47 = vector.broadcast %46 : vector<1x512xf32> to vector<8x512xf32>
    %48 = vector.shape_cast %17 : vector<1x512xf32> to vector<1x512xf32>
    %49 = vector.broadcast %48 : vector<1x512xf32> to vector<8x512xf32>
    %50 = vector.shape_cast %19 : vector<1x512xf32> to vector<1x512xf32>
    %51 = vector.broadcast %50 : vector<1x512xf32> to vector<8x512xf32>
    %c17_i32 = arith.constant 17 : i32
    %52 = tpu.dynamic_rotate %1 by %c17_i32 dim 1 : vector<32x512xf32>, i32 -> vector<32x512xf32>
    %53 = arith.mulf %52, %21 : vector<32x512xf32>
    %c16_i32 = arith.constant 16 : i32
    %54 = tpu.dynamic_rotate %1 by %c16_i32 dim 1 : vector<32x512xf32>, i32 -> vector<32x512xf32>
    %55 = arith.mulf %54, %23 : vector<32x512xf32>
    %c15_i32 = arith.constant 15 : i32
    %56 = tpu.dynamic_rotate %1 by %c15_i32 dim 1 : vector<32x512xf32>, i32 -> vector<32x512xf32>
    %57 = arith.mulf %56, %25 : vector<32x512xf32>
    %c1_i32 = arith.constant 1 : i32
    %58 = tpu.dynamic_rotate %1 by %c1_i32 dim 1 : vector<32x512xf32>, i32 -> vector<32x512xf32>
    %59 = arith.mulf %58, %27 : vector<32x512xf32>
    %c511_i32 = arith.constant 511 : i32
    %60 = tpu.dynamic_rotate %1 by %c511_i32 dim 1 : vector<32x512xf32>, i32 -> vector<32x512xf32>
    %61 = arith.mulf %60, %29 : vector<32x512xf32>
    %c497_i32 = arith.constant 497 : i32
    %62 = tpu.dynamic_rotate %1 by %c497_i32 dim 1 : vector<32x512xf32>, i32 -> vector<32x512xf32>
    %63 = arith.mulf %62, %31 : vector<32x512xf32>
    %c496_i32 = arith.constant 496 : i32
    %64 = tpu.dynamic_rotate %1 by %c496_i32 dim 1 : vector<32x512xf32>, i32 -> vector<32x512xf32>
    %65 = arith.mulf %64, %33 : vector<32x512xf32>
    %c495_i32 = arith.constant 495 : i32
    %66 = tpu.dynamic_rotate %1 by %c495_i32 dim 1 : vector<32x512xf32>, i32 -> vector<32x512xf32>
    %67 = arith.mulf %66, %35 : vector<32x512xf32>
    %68 = tpu.concatenate %53, %55, %57, %59, %1, %61, %63, %65, %67 in 0 : vector<32x512xf32>, vector<32x512xf32>, vector<32x512xf32>, vector<32x512xf32>, vector<32x512xf32>, vector<32x512xf32>, vector<32x512xf32>, vector<32x512xf32>, vector<32x512xf32> -> vector<288x512xf32>
    %69 = arith.truncf %68 : vector<288x512xf32> to vector<288x512xbf16>
    %c0_22 = arith.constant 0 : index
    %c0_23 = arith.constant 0 : index
    %70 = vector.load %arg4[%c0_22, %c0_23] : memref<40x288xbf16, #tpu.memory_space<vmem>>, vector<40x288xbf16>
    %cst = arith.constant dense<0.000000e+00> : vector<40x512xf32>
    %71 = tpu.matmul %70, %69, %cst {dimension_numbers = #tpu.dot_dimension_numbers<[1], [0], [0], [1], [0, 0, 1, 1], [], []>} : vector<40x288xbf16>, vector<288x512xbf16>, vector<40x512xf32> -> vector<40x512xf32>
    %72 = vector.extract_strided_slice %71 {offsets = [0, 0], sizes = [8, 512], strides = [1, 1]} : vector<40x512xf32> to vector<8x512xf32>
    %cst_24 = arith.constant 0.000000e+00 : f32
    %73 = vector.broadcast %cst_24 : f32 to vector<8x512xf32>
    %74 = arith.maximumf %72, %73 : vector<8x512xf32>
    %75 = vector.extract_strided_slice %71 {offsets = [8, 0], sizes = [32, 512], strides = [1, 1]} : vector<40x512xf32> to vector<32x512xf32>
    %c0_25 = arith.constant 0 : index
    %c0_26 = arith.constant 0 : index
    %76 = vector.load %arg5[%c0_25, %c0_26] : memref<24x8xbf16, #tpu.memory_space<vmem>>, vector<24x8xbf16>
    %77 = arith.truncf %74 : vector<8x512xf32> to vector<8x512xbf16>
    %cst_27 = arith.constant dense<0.000000e+00> : vector<24x512xf32>
    %78 = tpu.matmul %76, %77, %cst_27 {dimension_numbers = #tpu.dot_dimension_numbers<[1], [0], [0], [1], [0, 0, 1, 1], [], []>} : vector<24x8xbf16>, vector<8x512xbf16>, vector<24x512xf32> -> vector<24x512xf32>
    %79 = vector.extract_strided_slice %78 {offsets = [0, 0], sizes = [8, 512], strides = [1, 1]} : vector<24x512xf32> to vector<8x512xf32>
    %80 = arith.truncf %79 : vector<8x512xf32> to vector<8x512xbf16>
    %81 = vector.extract_strided_slice %78 {offsets = [8, 0], sizes = [8, 512], strides = [1, 1]} : vector<24x512xf32> to vector<8x512xf32>
    %82 = arith.truncf %81 : vector<8x512xf32> to vector<8x512xbf16>
    %83 = vector.extract_strided_slice %78 {offsets = [16, 0], sizes = [8, 512], strides = [1, 1]} : vector<24x512xf32> to vector<8x512xf32>
    %84 = arith.truncf %83 : vector<8x512xf32> to vector<8x512xbf16>
    %85 = vector.extract_strided_slice %80 {offsets = [0, 0], sizes = [8, 256], strides = [1, 1]} : vector<8x512xbf16> to vector<8x256xbf16>
    %86 = vector.extract_strided_slice %82 {offsets = [0, 0], sizes = [8, 256], strides = [1, 1]} : vector<8x512xbf16> to vector<8x256xbf16>
    %87 = vector.extract_strided_slice %84 {offsets = [0, 0], sizes = [8, 256], strides = [1, 1]} : vector<8x512xbf16> to vector<8x256xbf16>
    %88 = vector.extract_strided_slice %74 {offsets = [0, 0], sizes = [8, 256], strides = [1, 1]} : vector<8x512xf32> to vector<8x256xf32>
    %cst_28 = arith.constant dense<0.000000e+00> : vector<256x256xf32>
    %89 = tpu.matmul %85, %86, %cst_28 {dimension_numbers = #tpu.dot_dimension_numbers<[0], [0], [1], [1], [0, 1, 1, 1], [], []>} : vector<8x256xbf16>, vector<8x256xbf16>, vector<256x256xf32> -> vector<256x256xf32>
    %cst_29 = arith.constant dense<0xFF800000> : vector<256xf32>
    %90 = vector.multi_reduction <maximumf>, %89, %cst_29 [1] : vector<256x256xf32> to vector<256xf32>
    %91 = vector.shape_cast %90 : vector<256xf32> to vector<256x1xf32>
    %92 = vector.broadcast %91 : vector<256x1xf32> to vector<256x256xf32>
    %93 = arith.subf %89, %92 : vector<256x256xf32>
    %94 = math.exp %93 : vector<256x256xf32>
    %cst_30 = arith.constant dense<0.000000e+00> : vector<256xf32>
    %95 = vector.multi_reduction <add>, %94, %cst_30 [1] : vector<256x256xf32> to vector<256xf32>
    %96 = vector.shape_cast %95 : vector<256xf32> to vector<256x1xf32>
    %97 = tpu.reciprocal %96 {approx = true} : vector<256x1xf32> -> vector<256x1xf32>
    %98 = vector.broadcast %97 : vector<256x1xf32> to vector<256x256xf32>
    %99 = arith.mulf %94, %98 : vector<256x256xf32>
    %100 = arith.truncf %99 : vector<256x256xf32> to vector<256x256xbf16>
    %cst_31 = arith.constant dense<0.000000e+00> : vector<8x256xf32>
    %101 = tpu.matmul %87, %100, %cst_31 {dimension_numbers = #tpu.dot_dimension_numbers<[1], [1], [0], [0], [0, 0, 1, 0], [], []>} : vector<8x256xbf16>, vector<256x256xbf16>, vector<8x256xf32> -> vector<8x256xf32>
    %102 = arith.addf %101, %88 : vector<8x256xf32>
    %103 = vector.extract_strided_slice %80 {offsets = [0, 256], sizes = [8, 256], strides = [1, 1]} : vector<8x512xbf16> to vector<8x256xbf16>
    %104 = vector.extract_strided_slice %82 {offsets = [0, 256], sizes = [8, 256], strides = [1, 1]} : vector<8x512xbf16> to vector<8x256xbf16>
    %105 = vector.extract_strided_slice %84 {offsets = [0, 256], sizes = [8, 256], strides = [1, 1]} : vector<8x512xbf16> to vector<8x256xbf16>
    %106 = vector.extract_strided_slice %74 {offsets = [0, 256], sizes = [8, 256], strides = [1, 1]} : vector<8x512xf32> to vector<8x256xf32>
    %cst_32 = arith.constant dense<0.000000e+00> : vector<256x256xf32>
    %107 = tpu.matmul %103, %104, %cst_32 {dimension_numbers = #tpu.dot_dimension_numbers<[0], [0], [1], [1], [0, 1, 1, 1], [], []>} : vector<8x256xbf16>, vector<8x256xbf16>, vector<256x256xf32> -> vector<256x256xf32>
    %cst_33 = arith.constant dense<0xFF800000> : vector<256xf32>
    %108 = vector.multi_reduction <maximumf>, %107, %cst_33 [1] : vector<256x256xf32> to vector<256xf32>
    %109 = vector.shape_cast %108 : vector<256xf32> to vector<256x1xf32>
    %110 = vector.broadcast %109 : vector<256x1xf32> to vector<256x256xf32>
    %111 = arith.subf %107, %110 : vector<256x256xf32>
    %112 = math.exp %111 : vector<256x256xf32>
    %cst_34 = arith.constant dense<0.000000e+00> : vector<256xf32>
    %113 = vector.multi_reduction <add>, %112, %cst_34 [1] : vector<256x256xf32> to vector<256xf32>
    %114 = vector.shape_cast %113 : vector<256xf32> to vector<256x1xf32>
    %115 = tpu.reciprocal %114 {approx = true} : vector<256x1xf32> -> vector<256x1xf32>
    %116 = vector.broadcast %115 : vector<256x1xf32> to vector<256x256xf32>
    %117 = arith.mulf %112, %116 : vector<256x256xf32>
    %118 = arith.truncf %117 : vector<256x256xf32> to vector<256x256xbf16>
    %cst_35 = arith.constant dense<0.000000e+00> : vector<8x256xf32>
    %119 = tpu.matmul %105, %118, %cst_35 {dimension_numbers = #tpu.dot_dimension_numbers<[1], [1], [0], [0], [0, 0, 1, 0], [], []>} : vector<8x256xbf16>, vector<256x256xbf16>, vector<8x256xf32> -> vector<8x256xf32>
    %120 = arith.addf %119, %106 : vector<8x256xf32>
    %121 = tpu.concatenate %102, %120 in 1 : vector<8x256xf32>, vector<8x256xf32> -> vector<8x512xf32>
    %122 = arith.truncf %121 : vector<8x512xf32> to vector<8x512xbf16>
    %cst_36 = arith.constant dense<0.000000e+00> : vector<24x512xf32>
    %123 = tpu.matmul %76, %122, %cst_36 {dimension_numbers = #tpu.dot_dimension_numbers<[1], [0], [0], [1], [0, 0, 1, 1], [], []>} : vector<24x8xbf16>, vector<8x512xbf16>, vector<24x512xf32> -> vector<24x512xf32>
    %124 = vector.extract_strided_slice %123 {offsets = [0, 0], sizes = [8, 512], strides = [1, 1]} : vector<24x512xf32> to vector<8x512xf32>
    %125 = arith.truncf %124 : vector<8x512xf32> to vector<8x512xbf16>
    %126 = vector.extract_strided_slice %123 {offsets = [8, 0], sizes = [8, 512], strides = [1, 1]} : vector<24x512xf32> to vector<8x512xf32>
    %127 = arith.truncf %126 : vector<8x512xf32> to vector<8x512xbf16>
    %128 = vector.extract_strided_slice %123 {offsets = [16, 0], sizes = [8, 512], strides = [1, 1]} : vector<24x512xf32> to vector<8x512xf32>
    %129 = arith.truncf %128 : vector<8x512xf32> to vector<8x512xbf16>
    %130 = vector.extract_strided_slice %125 {offsets = [0, 0], sizes = [8, 256], strides = [1, 1]} : vector<8x512xbf16> to vector<8x256xbf16>
    %131 = vector.extract_strided_slice %127 {offsets = [0, 0], sizes = [8, 256], strides = [1, 1]} : vector<8x512xbf16> to vector<8x256xbf16>
    %132 = vector.extract_strided_slice %129 {offsets = [0, 0], sizes = [8, 256], strides = [1, 1]} : vector<8x512xbf16> to vector<8x256xbf16>
    %133 = vector.extract_strided_slice %121 {offsets = [0, 0], sizes = [8, 256], strides = [1, 1]} : vector<8x512xf32> to vector<8x256xf32>
    %cst_37 = arith.constant dense<0.000000e+00> : vector<256x256xf32>
    %134 = tpu.matmul %130, %131, %cst_37 {dimension_numbers = #tpu.dot_dimension_numbers<[0], [0], [1], [1], [0, 1, 1, 1], [], []>} : vector<8x256xbf16>, vector<8x256xbf16>, vector<256x256xf32> -> vector<256x256xf32>
    %cst_38 = arith.constant dense<0xFF800000> : vector<256xf32>
    %135 = vector.multi_reduction <maximumf>, %134, %cst_38 [1] : vector<256x256xf32> to vector<256xf32>
    %136 = vector.shape_cast %135 : vector<256xf32> to vector<256x1xf32>
    %137 = vector.broadcast %136 : vector<256x1xf32> to vector<256x256xf32>
    %138 = arith.subf %134, %137 : vector<256x256xf32>
    %139 = math.exp %138 : vector<256x256xf32>
    %cst_39 = arith.constant dense<0.000000e+00> : vector<256xf32>
    %140 = vector.multi_reduction <add>, %139, %cst_39 [1] : vector<256x256xf32> to vector<256xf32>
    %141 = vector.shape_cast %140 : vector<256xf32> to vector<256x1xf32>
    %142 = tpu.reciprocal %141 {approx = true} : vector<256x1xf32> -> vector<256x1xf32>
    %143 = vector.broadcast %142 : vector<256x1xf32> to vector<256x256xf32>
    %144 = arith.mulf %139, %143 : vector<256x256xf32>
    %145 = arith.truncf %144 : vector<256x256xf32> to vector<256x256xbf16>
    %cst_40 = arith.constant dense<0.000000e+00> : vector<8x256xf32>
    %146 = tpu.matmul %132, %145, %cst_40 {dimension_numbers = #tpu.dot_dimension_numbers<[1], [1], [0], [0], [0, 0, 1, 0], [], []>} : vector<8x256xbf16>, vector<256x256xbf16>, vector<8x256xf32> -> vector<8x256xf32>
    %147 = arith.addf %146, %133 : vector<8x256xf32>
    %148 = vector.extract_strided_slice %125 {offsets = [0, 256], sizes = [8, 256], strides = [1, 1]} : vector<8x512xbf16> to vector<8x256xbf16>
    %149 = vector.extract_strided_slice %127 {offsets = [0, 256], sizes = [8, 256], strides = [1, 1]} : vector<8x512xbf16> to vector<8x256xbf16>
    %150 = vector.extract_strided_slice %129 {offsets = [0, 256], sizes = [8, 256], strides = [1, 1]} : vector<8x512xbf16> to vector<8x256xbf16>
    %151 = vector.extract_strided_slice %121 {offsets = [0, 256], sizes = [8, 256], strides = [1, 1]} : vector<8x512xf32> to vector<8x256xf32>
    %cst_41 = arith.constant dense<0.000000e+00> : vector<256x256xf32>
    %152 = tpu.matmul %148, %149, %cst_41 {dimension_numbers = #tpu.dot_dimension_numbers<[0], [0], [1], [1], [0, 1, 1, 1], [], []>} : vector<8x256xbf16>, vector<8x256xbf16>, vector<256x256xf32> -> vector<256x256xf32>
    %cst_42 = arith.constant dense<0xFF800000> : vector<256xf32>
    %153 = vector.multi_reduction <maximumf>, %152, %cst_42 [1] : vector<256x256xf32> to vector<256xf32>
    %154 = vector.shape_cast %153 : vector<256xf32> to vector<256x1xf32>
    %155 = vector.broadcast %154 : vector<256x1xf32> to vector<256x256xf32>
    %156 = arith.subf %152, %155 : vector<256x256xf32>
    %157 = math.exp %156 : vector<256x256xf32>
    %cst_43 = arith.constant dense<0.000000e+00> : vector<256xf32>
    %158 = vector.multi_reduction <add>, %157, %cst_43 [1] : vector<256x256xf32> to vector<256xf32>
    %159 = vector.shape_cast %158 : vector<256xf32> to vector<256x1xf32>
    %160 = tpu.reciprocal %159 {approx = true} : vector<256x1xf32> -> vector<256x1xf32>
    %161 = vector.broadcast %160 : vector<256x1xf32> to vector<256x256xf32>
    %162 = arith.mulf %157, %161 : vector<256x256xf32>
    %163 = arith.truncf %162 : vector<256x256xf32> to vector<256x256xbf16>
    %cst_44 = arith.constant dense<0.000000e+00> : vector<8x256xf32>
    %164 = tpu.matmul %150, %163, %cst_44 {dimension_numbers = #tpu.dot_dimension_numbers<[1], [1], [0], [0], [0, 0, 1, 0], [], []>} : vector<8x256xbf16>, vector<256x256xbf16>, vector<8x256xf32> -> vector<8x256xf32>
    %165 = arith.addf %164, %151 : vector<8x256xf32>
    %166 = tpu.concatenate %147, %165 in 1 : vector<8x256xf32>, vector<8x256xf32> -> vector<8x512xf32>
    %c0_45 = arith.constant 0 : index
    %c0_46 = arith.constant 0 : index
    %167 = vector.load %arg6[%c0_45, %c0_46] : memref<8x72xbf16, #tpu.memory_space<vmem>>, vector<8x72xbf16>
    %c17_i32_47 = arith.constant 17 : i32
    %168 = tpu.dynamic_rotate %166 by %c17_i32_47 dim 1 : vector<8x512xf32>, i32 -> vector<8x512xf32>
    %169 = arith.mulf %168, %37 : vector<8x512xf32>
    %c16_i32_48 = arith.constant 16 : i32
    %170 = tpu.dynamic_rotate %166 by %c16_i32_48 dim 1 : vector<8x512xf32>, i32 -> vector<8x512xf32>
    %171 = arith.mulf %170, %39 : vector<8x512xf32>
    %c15_i32_49 = arith.constant 15 : i32
    %172 = tpu.dynamic_rotate %166 by %c15_i32_49 dim 1 : vector<8x512xf32>, i32 -> vector<8x512xf32>
    %173 = arith.mulf %172, %41 : vector<8x512xf32>
    %c1_i32_50 = arith.constant 1 : i32
    %174 = tpu.dynamic_rotate %166 by %c1_i32_50 dim 1 : vector<8x512xf32>, i32 -> vector<8x512xf32>
    %175 = arith.mulf %174, %43 : vector<8x512xf32>
    %c511_i32_51 = arith.constant 511 : i32
    %176 = tpu.dynamic_rotate %166 by %c511_i32_51 dim 1 : vector<8x512xf32>, i32 -> vector<8x512xf32>
    %177 = arith.mulf %176, %45 : vector<8x512xf32>
    %c497_i32_52 = arith.constant 497 : i32
    %178 = tpu.dynamic_rotate %166 by %c497_i32_52 dim 1 : vector<8x512xf32>, i32 -> vector<8x512xf32>
    %179 = arith.mulf %178, %47 : vector<8x512xf32>
    %c496_i32_53 = arith.constant 496 : i32
    %180 = tpu.dynamic_rotate %166 by %c496_i32_53 dim 1 : vector<8x512xf32>, i32 -> vector<8x512xf32>
    %181 = arith.mulf %180, %49 : vector<8x512xf32>
    %c495_i32_54 = arith.constant 495 : i32
    %182 = tpu.dynamic_rotate %166 by %c495_i32_54 dim 1 : vector<8x512xf32>, i32 -> vector<8x512xf32>
    %183 = arith.mulf %182, %51 : vector<8x512xf32>
    %184 = tpu.concatenate %169, %171, %173, %175, %166, %177, %179, %181, %183 in 0 : vector<8x512xf32>, vector<8x512xf32>, vector<8x512xf32>, vector<8x512xf32>, vector<8x512xf32>, vector<8x512xf32>, vector<8x512xf32>, vector<8x512xf32>, vector<8x512xf32> -> vector<72x512xf32>
    %185 = arith.truncf %184 : vector<72x512xf32> to vector<72x512xbf16>
    %cst_55 = arith.constant dense<0.000000e+00> : vector<8x512xf32>
    %186 = tpu.matmul %167, %185, %cst_55 {dimension_numbers = #tpu.dot_dimension_numbers<[1], [0], [0], [1], [0, 0, 1, 1], [], []>} : vector<8x72xbf16>, vector<72x512xbf16>, vector<8x512xf32> -> vector<8x512xf32>
    %cst_56 = arith.constant 0.000000e+00 : f32
    %187 = vector.broadcast %cst_56 : f32 to vector<8x512xf32>
    %188 = arith.maximumf %186, %187 : vector<8x512xf32>
    %c0_57 = arith.constant 0 : index
    %c0_58 = arith.constant 0 : index
    %189 = vector.load %arg7[%c0_57, %c0_58] : memref<32x72xbf16, #tpu.memory_space<vmem>>, vector<32x72xbf16>
    %c17_i32_59 = arith.constant 17 : i32
    %190 = tpu.dynamic_rotate %188 by %c17_i32_59 dim 1 : vector<8x512xf32>, i32 -> vector<8x512xf32>
    %191 = arith.mulf %190, %37 : vector<8x512xf32>
    %c16_i32_60 = arith.constant 16 : i32
    %192 = tpu.dynamic_rotate %188 by %c16_i32_60 dim 1 : vector<8x512xf32>, i32 -> vector<8x512xf32>
    %193 = arith.mulf %192, %39 : vector<8x512xf32>
    %c15_i32_61 = arith.constant 15 : i32
    %194 = tpu.dynamic_rotate %188 by %c15_i32_61 dim 1 : vector<8x512xf32>, i32 -> vector<8x512xf32>
    %195 = arith.mulf %194, %41 : vector<8x512xf32>
    %c1_i32_62 = arith.constant 1 : i32
    %196 = tpu.dynamic_rotate %188 by %c1_i32_62 dim 1 : vector<8x512xf32>, i32 -> vector<8x512xf32>
    %197 = arith.mulf %196, %43 : vector<8x512xf32>
    %c511_i32_63 = arith.constant 511 : i32
    %198 = tpu.dynamic_rotate %188 by %c511_i32_63 dim 1 : vector<8x512xf32>, i32 -> vector<8x512xf32>
    %199 = arith.mulf %198, %45 : vector<8x512xf32>
    %c497_i32_64 = arith.constant 497 : i32
    %200 = tpu.dynamic_rotate %188 by %c497_i32_64 dim 1 : vector<8x512xf32>, i32 -> vector<8x512xf32>
    %201 = arith.mulf %200, %47 : vector<8x512xf32>
    %c496_i32_65 = arith.constant 496 : i32
    %202 = tpu.dynamic_rotate %188 by %c496_i32_65 dim 1 : vector<8x512xf32>, i32 -> vector<8x512xf32>
    %203 = arith.mulf %202, %49 : vector<8x512xf32>
    %c495_i32_66 = arith.constant 495 : i32
    %204 = tpu.dynamic_rotate %188 by %c495_i32_66 dim 1 : vector<8x512xf32>, i32 -> vector<8x512xf32>
    %205 = arith.mulf %204, %51 : vector<8x512xf32>
    %206 = tpu.concatenate %191, %193, %195, %197, %188, %199, %201, %203, %205 in 0 : vector<8x512xf32>, vector<8x512xf32>, vector<8x512xf32>, vector<8x512xf32>, vector<8x512xf32>, vector<8x512xf32>, vector<8x512xf32>, vector<8x512xf32>, vector<8x512xf32> -> vector<72x512xf32>
    %207 = arith.truncf %206 : vector<72x512xf32> to vector<72x512xbf16>
    %cst_67 = arith.constant dense<0.000000e+00> : vector<32x512xf32>
    %208 = tpu.matmul %189, %207, %cst_67 {dimension_numbers = #tpu.dot_dimension_numbers<[1], [0], [0], [1], [0, 0, 1, 1], [], []>} : vector<32x72xbf16>, vector<72x512xbf16>, vector<32x512xf32> -> vector<32x512xf32>
    %209 = arith.addf %75, %208 : vector<32x512xf32>
    %cst_68 = arith.constant 0.000000e+00 : f32
    %210 = vector.broadcast %cst_68 : f32 to vector<32x512xf32>
    %211 = arith.maximumf %209, %210 : vector<32x512xf32>
    %212 = vector.broadcast %3 : vector<1x512xf32> to vector<32x512xf32>
    %213 = arith.mulf %211, %212 : vector<32x512xf32>
    %c0_69 = arith.constant 0 : index
    %c0_70 = arith.constant 0 : index
    %c0_71 = arith.constant 0 : index
    %214 = vector.load %arg8[%c0_69, %c0_70, %c0_71] : memref<1x32x512xf32, #tpu.memory_space<vmem>>, vector<1x32x512xf32>
    %215 = vector.shape_cast %214 : vector<1x32x512xf32> to vector<32x512xf32>
    %216 = vector.shape_cast %213 : vector<32x512xf32> to vector<1x32x512xf32>
    tpu.vector_store %arg8[%c0_69, %c0_70, %c0_71], %216 {strides = array<i32>} : memref<1x32x512xf32, #tpu.memory_space<vmem>>, vector<1x32x512xf32>,
    return
  }
  func.func @transform_0(%arg0: i32) -> (i32, i32, i32) {
    %c0_i32 = arith.constant 0 : i32
    %c0_i32_0 = arith.constant 0 : i32
    %c0_i32_1 = arith.constant 0 : i32
    %c0_i32_2 = arith.constant 0 : i32
    return %c0_i32, %c0_i32_0, %c0_i32_1 : i32, i32, i32
  }
  func.func @transform_1(%arg0: i32) -> (i32, i32, i32) {
    %c0_i32 = arith.constant 0 : i32
    %c0_i32_0 = arith.constant 0 : i32
    %c0_i32_1 = arith.constant 0 : i32
    return %arg0, %c0_i32, %c0_i32_0 : i32, i32, i32
  }
  func.func @transform_2(%arg0: i32) -> (i32, i32, i32) {
    %c0_i32 = arith.constant 0 : i32
    %c0_i32_0 = arith.constant 0 : i32
    %c0_i32_1 = arith.constant 0 : i32
    return %arg0, %c0_i32, %c0_i32_0 : i32, i32, i32
  }
  func.func @transform_3(%arg0: i32) -> (i32, i32) {
    %c0_i32 = arith.constant 0 : i32
    %c0_i32_0 = arith.constant 0 : i32
    %c0_i32_1 = arith.constant 0 : i32
    return %c0_i32, %c0_i32_0 : i32, i32
  }
  func.func @transform_4(%arg0: i32) -> (i32, i32) {
    %c0_i32 = arith.constant 0 : i32
    %c0_i32_0 = arith.constant 0 : i32
    %c0_i32_1 = arith.constant 0 : i32
    return %c0_i32, %c0_i32_0 : i32, i32
  }
  func.func @transform_5(%arg0: i32) -> (i32, i32) {
    %c0_i32 = arith.constant 0 : i32
    %c0_i32_0 = arith.constant 0 : i32
    %c0_i32_1 = arith.constant 0 : i32
    return %c0_i32, %c0_i32_0 : i32, i32
  }
  func.func @transform_6(%arg0: i32) -> (i32, i32) {
    %c0_i32 = arith.constant 0 : i32
    %c0_i32_0 = arith.constant 0 : i32
    %c0_i32_1 = arith.constant 0 : i32
    return %c0_i32, %c0_i32_0 : i32, i32
  }
  func.func @transform_7(%arg0: i32) -> (i32, i32, i32) {
    %c0_i32 = arith.constant 0 : i32
    %c0_i32_0 = arith.constant 0 : i32
    %c0_i32_1 = arith.constant 0 : i32
    return %arg0, %c0_i32, %c0_i32_0 : i32, i32, i32
  }
}

</mosaic_0001>

<bundles_post_ra>
// kernel: gat_block_forward.1
= control target key start
LH: loop header
LB: loop body
LE: loop exit
PB: predicated region body
PF: predicated region fallthrough
CT: control target
= control target key end

     0   :  { %s6282_s28 = smov 1   ;;  %s6283_s26 = smov 15   ;;  %v60_v14 = vlaneseq  ;;  %vm871_vm8 = vcmask 261120   ;;  %vm1151_vm9 = vcmask 1043456   ;;  %vm1144_vm10 = vcmask 64512   ;;  %s10491_s1 = inlined_call_operand.vmem [shape: f32[1,32,512], index: 1, kind: input, shape index: {}]   ;;  %s10492_s0 = inlined_call_operand.vmem [shape: f32[9,1,512], index: 0, kind: input, shape index: {}]   ;;  %s10493_s3 = inlined_call_operand.vmem [shape: bf16[40,288], index: 3, kind: input, shape index: {}]   ;;  %s10494_s4 = inlined_call_operand.vmem [shape: bf16[24,8], index: 4, kind: input, shape index: {}]   ;;  %s10495_s5 = inlined_call_operand.vmem [shape: bf16[8,72], index: 5, kind: input, shape index: {}]   ;;  %s10496_s6 = inlined_call_operand.vmem [shape: bf16[32,72], index: 6, kind: input, shape index: {}]   ;;  %s10497_s2 = inlined_call_operand.vmem [shape: f32[1,1,512], index: 2, kind: input, shape index: {}]   ;;  %s10498_s7 = inlined_call_operand.vmem [shape: f32[1,32,512], index: 7, kind: output, shape index: {}]  }
   0x1   :  { %v6334_v0 = vld [vmem:[%s10491_s1 + $0x48] sm:$0xff]  ;;  %v6339_v1 = vld [vmem:[%s10491_s1 + $0x40] sm:$0xff]  ;;  %v6362_v4 = vld [vmem:[%s10491_s1 + $0x78] sm:$0xff]  ;;  %s6284_s27 = smov 16   ;;  %s6285_s29 = smov 17   ;;  %vm4885_vm11 = vcmask 588800  }
   0x2   :  { %436 = vrot.lane.b32.xlu1 %v6334_v0, %s6282_s28  ;;  %428 = vrot.lane.b32.xlu0 %v6339_v1, %s6282_s28  ;;  %v6348_v2 = vld [vmem:[%s10491_s1 + $0x68] sm:$0xff]  ;;  %v6353_v3 = vld [vmem:[%s10491_s1 + $0x60] sm:$0xff]  ;;  %s6286_s30 = smov 112   ;;  %v6513_v15 = vshrl.u32 %v60_v14, 7  ;;  %v6525_v18 = vand.u32 127, %v60_v14  ;;  %s6287_s18 = smov 113  }
   0x3   :  { %v6367_v5 = vld [vmem:[%s10491_s1 + $0x58] sm:$0xff]  ;;  %v6376_v6 = vld [vmem:[%s10491_s1 + $0x20] sm:$0xff]  ;;  %v6390_v8 = vld [vmem:[%s10491_s1 + $0x28] sm:$0xff]  ;;  %s6288_s21 = smov 127   ;;  %s6289_s24 = smov 111  }
   0x4   :  { %v6381_v7 = vld [vmem:[%s10491_s1] sm:$0xff]  ;;  %v6395_v9 = vld [vmem:[%s10491_s1 + $0x8] sm:$0xff]  ;;  %v6404_v10 = vld [vmem:[%s10491_s1 + $0x38] sm:$0xff]  ;;  %10729 = vst [vmem:[#allocation2_spill] sm:$0xff] %v6525_v18  ;;  %v6532_v19 = vsub.s32 1, %v6513_v15  ;;  %vm456_vm0 = vcmp.lt.s32.totalorder %v6525_v18, 1 }
   0x5   :  { %v6409_v11 = vld [vmem:[%s10491_s1 + $0x18] sm:$0xff]  ;;  %v6494_v12 = vld [vmem:[%s10491_s1 + $0x70] sm:$0xff]  ;;  %v6537_v20 = vld [vmem:[%s10492_s0 + $0xc] sm:$0xf]  ;;  %v6551_v24 = vsub.s32 0, %v6513_v15  ;;  %vm391_vm1 = vcmp.lt.s32.totalorder %v6525_v18, 15 }
   0x6   :  { %438 = vrot.lane.b32.xlu1 %v6348_v2, %s6282_s28  ;;  %430 = vrot.lane.b32.xlu0 %v6353_v3, %s6282_s28  ;;  %v6499_v13 = vld [vmem:[%s10491_s1 + $0x50] sm:$0xff]  ;;  %10730 = vst [vmem:[#allocation3_spill] sm:$0xff] %v6532_v19  ;;  %v6548_v23 = vrot.slane %v6537_v20, %v6532_v19  ;;  %v6626_v55 = vld [vmem:[%s10492_s0 + $0x8] sm:$0xf]  ;;  %vm326_vm2 = vcmp.lt.s32.totalorder %v6525_v18, 16  ;;  %vm261_vm3 = vcmp.lt.s32.totalorder %v6525_v18, 17 }
   0x7   :  { %v6518_v16 = vld [vmem:[%s10491_s1 + $0x30] sm:$0xff]  ;;  %10732 = vst [vmem:[#allocation5_spill] sm:$0xff] %v6551_v24  ;;  %v6569_v31 = vrot.slane %v6537_v20, %v6551_v24  ;;  %v6635_v59 = vrot.slane %v6626_v55, %v6532_v19  ;;  %vm651_vm4 = vcmp.lt.s32.totalorder %v6525_v18, 112  ;;  %vm586_vm5 = vcmp.lt.s32.totalorder %v6525_v18, 113 }
   0x8   :  { %v6523_v17 = vld [vmem:[%s10491_s1 + $0x10] sm:$0xff]  ;;  %10731 = vst [vmem:[#allocation4_spill] sm:$0xff] %v6548_v23  ;;  %vm521_vm6 = vcmp.lt.s32.totalorder %v6525_v18, 127  ;;  %vm716_vm7 = vcmp.lt.s32.totalorder %v6525_v18, 111 }
   0x9   :  { %10733 = vst [vmem:[#allocation6_spill] sm:$0xff] %v6569_v31  ;;  %10734 = vst [vmem:[#allocation7_spill] sm:$0xff] %v6635_v59 }
   0xa   :  { %454 = vrot.lane.b32.xlu1 %v6362_v4, %s6282_s28  ;;  %452 = vrot.lane.b32.xlu0 %v6367_v5, %s6282_s28 }
   0xe   :  { %426 = vrot.lane.b32.xlu1 %v6376_v6, %s6282_s28  ;;  %424 = vrot.lane.b32.xlu0 %v6381_v7, %s6282_s28 }
  0x12   :  { %434 = vrot.lane.b32.xlu1 %v6390_v8, %s6282_s28  ;;  %432 = vrot.lane.b32.xlu0 %v6395_v9, %s6282_s28 }
  0x16   :  { %450 = vrot.lane.b32.xlu1 %v6404_v10, %s6282_s28  ;;  %448 = vrot.lane.b32.xlu0 %v6409_v11, %s6282_s28 }
  0x1a   :  { %365 = vrot.lane.b32.xlu1 %v6353_v3, %s6283_s26  ;;  %363 = vrot.lane.b32.xlu0 %v6339_v1, %s6283_s26 }
  0x1e   :  { %373 = vrot.lane.b32.xlu1 %v6348_v2, %s6283_s26  ;;  %371 = vrot.lane.b32.xlu0 %v6334_v0, %s6283_s26 }
  0x22   :  { %389 = vrot.lane.b32.xlu1 %v6362_v4, %s6283_s26  ;;  %387 = vrot.lane.b32.xlu0 %v6367_v5, %s6283_s26 }
  0x26   :  { %361 = vrot.lane.b32.xlu1 %v6376_v6, %s6283_s26  ;;  %359 = vrot.lane.b32.xlu0 %v6381_v7, %s6283_s26 }
  0x2a   :  { %369 = vrot.lane.b32.xlu1 %v6390_v8, %s6283_s26  ;;  %367 = vrot.lane.b32.xlu0 %v6395_v9, %s6283_s26 }
  0x2e   :  { %385 = vrot.lane.b32.xlu1 %v6404_v10, %s6283_s26  ;;  %383 = vrot.lane.b32.xlu0 %v6409_v11, %s6283_s26 }
  0x32   :  { %300 = vrot.lane.b32.xlu1 %v6353_v3, %s6284_s27  ;;  %298 = vrot.lane.b32.xlu0 %v6339_v1, %s6284_s27 }
  0x36   :  { %308 = vrot.lane.b32.xlu1 %v6348_v2, %s6284_s27  ;;  %306 = vrot.lane.b32.xlu0 %v6334_v0, %s6284_s27 }
  0x3a   :  { %324 = vrot.lane.b32.xlu1 %v6362_v4, %s6284_s27  ;;  %322 = vrot.lane.b32.xlu0 %v6367_v5, %s6284_s27 }
  0x3e   :  { %296 = vrot.lane.b32.xlu1 %v6376_v6, %s6284_s27  ;;  %294 = vrot.lane.b32.xlu0 %v6381_v7, %s6284_s27 }
  0x42   :  { %304 = vrot.lane.b32.xlu1 %v6390_v8, %s6284_s27  ;;  %302 = vrot.lane.b32.xlu0 %v6395_v9, %s6284_s27 }
  0x46   :  { %320 = vrot.lane.b32.xlu1 %v6404_v10, %s6284_s27  ;;  %318 = vrot.lane.b32.xlu0 %v6409_v11, %s6284_s27 }
  0x4a   :  { %233 = vrot.lane.b32.xlu1 %v6353_v3, %s6285_s29  ;;  %231 = vrot.lane.b32.xlu0 %v6339_v1, %s6285_s29 }
  0x4e   :  { %241 = vrot.lane.b32.xlu1 %v6348_v2, %s6285_s29  ;;  %239 = vrot.lane.b32.xlu0 %v6334_v0, %s6285_s29 }
  0x52   :  { %257 = vrot.lane.b32.xlu1 %v6362_v4, %s6285_s29  ;;  %255 = vrot.lane.b32.xlu0 %v6367_v5, %s6285_s29 }
  0x56   :  { %229 = vrot.lane.b32.xlu1 %v6376_v6, %s6285_s29  ;;  %227 = vrot.lane.b32.xlu0 %v6381_v7, %s6285_s29 }
  0x5a   :  { %237 = vrot.lane.b32.xlu1 %v6390_v8, %s6285_s29  ;;  %235 = vrot.lane.b32.xlu0 %v6395_v9, %s6285_s29 }
  0x5e   :  { %253 = vrot.lane.b32.xlu1 %v6404_v10, %s6285_s29  ;;  %251 = vrot.lane.b32.xlu0 %v6409_v11, %s6285_s29 }
  0x62   :  { %633 = vrot.lane.b32.xlu1 %v6348_v2, %s6286_s30  ;;  %631 = vrot.lane.b32.xlu0 %v6334_v0, %s6286_s30 }
  0x66   :  { %641 = vrot.lane.b32.xlu1 %v6494_v12, %s6286_s30  ;;  %639 = vrot.lane.b32.xlu0 %v6499_v13, %s6286_s30 }
  0x6a   :  { %625 = vrot.lane.b32.xlu1 %v6353_v3, %s6286_s30  ;;  %623 = vrot.lane.b32.xlu0 %v6339_v1, %s6286_s30 }
  0x6e   :  { %629 = vrot.lane.b32.xlu1 %v6390_v8, %s6286_s30  ;;  %627 = vrot.lane.b32.xlu0 %v6395_v9, %s6286_s30 }
  0x72   :  { %637 = vrot.lane.b32.xlu1 %v6518_v16, %s6286_s30  ;;  %635 = vrot.lane.b32.xlu0 %v6523_v17, %s6286_s30 }
  0x74   :  { %v6539_v21 = vpop.permute.xlu1 %436  ;;  %v429_v22 = vpop.permute.xlu0 %428 }
  0x75   :  { %v467_v25 = vsel %vm456_vm0, %v429_v22, %v6539_v21 }
  0x76   :  { %621 = vrot.lane.b32.xlu1 %v6376_v6, %s6286_s30  ;;  %619 = vrot.lane.b32.xlu0 %v6381_v7, %s6286_s30  ;;  %v482_v29 = vmul.f32 %v467_v25, %v6548_v23  ;;  %v6655_v25 = vrot.slane %v6626_v55, %v6551_v24 }
  0x78   :  { %v6556_v26 = vpop.permute.xlu1 %438  ;;  %v431_v27 = vpop.permute.xlu0 %430  ;;  %10735 = vst [vmem:[#allocation8_spill] sm:$0xff] %v6655_v25 }
  0x79   :  { %v468_v28 = vsel %vm456_vm0, %v431_v27, %v6556_v26 }
  0x7a   :  { %568 = vrot.lane.b32.xlu1 %v6348_v2, %s6287_s18  ;;  %566 = vrot.lane.b32.xlu0 %v6334_v0, %s6287_s18  ;;  %v486_v30 = vmul.f32 %v468_v28, %v6548_v23 }
  0x7c   :  { %v6571_v32 = vpop.permute.xlu1 %454  ;;  %v6573_v33 = vpop.permute.xlu0 %452  ;;  %v778_v34 = vpack.c.bf16 %v486_v30, %v482_v29 }
  0x7d   :  { %v472_v35 = vsel %vm456_vm0, %v6571_v32, %v431_v27  ;;  %v471_v36 = vsel %vm456_vm0, %v6573_v33, %v429_v22 }
  0x7e   :  { %576 = vrot.lane.b32.xlu1 %v6494_v12, %s6287_s18  ;;  %574 = vrot.lane.b32.xlu0 %v6499_v13, %s6287_s18  ;;  %v481_v37 = vmul.f32 %v471_v36, %v6569_v31  ;;  %v485_v38 = vmul.f32 %v472_v35, %v6569_v31 }
  0x7f   :  { %881 = vmatprep.subr.bf16.mxu0 %v778_v34 }
  0x80   :  { %v427_v39 = vpop.permute.xlu1 %426  ;;  %v425_v40 = vpop.permute.xlu0 %424  ;;  %v777_v41 = vpack.c.bf16 %v485_v38, %v481_v37 }
  0x82   :  { %560 = vrot.lane.b32.xlu1 %v6353_v3, %s6287_s18  ;;  %558 = vrot.lane.b32.xlu0 %v6339_v1, %s6287_s18 }
  0x83   :  { %882 = vmatpush1.bf16.msra.mxu0 %v777_v41 }
  0x84   :  { %v6591_v42 = vpop.permute.xlu1 %434  ;;  %v6593_v43 = vpop.permute.xlu0 %432 }
  0x85   :  { %v466_v44 = vsel %vm456_vm0, %v427_v39, %v6591_v42  ;;  %v465_v45 = vsel %vm456_vm0, %v425_v40, %v6593_v43 }
  0x86   :  { %v478_v46 = vmul.f32 %v466_v44, %v6548_v23  ;;  %v474_v47 = vmul.f32 %v465_v45, %v6548_v23  ;;  %564 = vrot.lane.b32.xlu1 %v6390_v8, %s6287_s18  ;;  %562 = vrot.lane.b32.xlu0 %v6395_v9, %s6287_s18 }
  0x88   :  { %v6607_v48 = vpop.permute.xlu1 %450  ;;  %v6609_v49 = vpop.permute.xlu0 %448  ;;  %v774_v50 = vpack.c.bf16 %v478_v46, %v474_v47 }
  0x89   :  { %v470_v51 = vsel %vm456_vm0, %v6607_v48, %v427_v39  ;;  %v469_v52 = vsel %vm456_vm0, %v6609_v49, %v425_v40 }
  0x8a   :  { %v477_v53 = vmul.f32 %v470_v51, %v6569_v31  ;;  %v473_v54 = vmul.f32 %v469_v52, %v6569_v31  ;;  %572 = vrot.lane.b32.xlu1 %v6518_v16, %s6287_s18  ;;  %570 = vrot.lane.b32.xlu0 %v6523_v17, %s6287_s18 }
  0x8b   :  { %883 = vmatprep.subr.bf16.mxu0 %v774_v50 }
  0x8c   :  { %v366_v56 = vpop.permute.xlu1 %365  ;;  %v364_v57 = vpop.permute.xlu0 %363  ;;  %v773_v58 = vpack.c.bf16 %v477_v53, %v473_v54 }
  0x8e   :  { %556 = vrot.lane.b32.xlu1 %v6376_v6, %s6287_s18  ;;  %554 = vrot.lane.b32.xlu0 %v6381_v7, %s6287_s18 }
  0x8f   :  { %884 = vmatpush1.bf16.msra.mxu0 %v773_v58  ;;  %v6712_v58 = vld [vmem:[%s10492_s0 + $0x4] sm:$0xf] }
  0x90   :  { %v6637_v60 = vpop.permute.xlu1 %373  ;;  %v6639_v61 = vpop.permute.xlu0 %371 }
  0x91   :  { %v403_v62 = vsel %vm391_vm1, %v366_v56, %v6637_v60  ;;  %v402_v63 = vsel %vm391_vm1, %v364_v57, %v6639_v61 }
  0x92   :  { %v421_v14 = vmul.f32 %v403_v62, %v6635_v59  ;;  %v417_v22 = vmul.f32 %v402_v63, %v6635_v59  ;;  %503 = vrot.lane.b32.xlu1 %v6348_v2, %s6288_s21  ;;  %501 = vrot.lane.b32.xlu0 %v6334_v0, %s6288_s21 }
  0x94   :  { %v6657_v27 = vpop.permute.xlu1 %389  ;;  %v6659_v28 = vpop.permute.xlu0 %387  ;;  %v770_v29 = vpack.c.bf16 %v421_v14, %v417_v22  ;;  %v6721_v22 = vrot.slane %v6712_v58, %v6532_v19 }
  0x95   :  { %v407_v30 = vsel %vm391_vm1, %v6657_v27, %v366_v56  ;;  %v406_v34 = vsel %vm391_vm1, %v6659_v28, %v364_v57 }
  0x96   :  { %v420_v35 = vmul.f32 %v407_v30, %v6655_v25  ;;  %v416_v36 = vmul.f32 %v406_v34, %v6655_v25  ;;  %511 = vrot.lane.b32.xlu1 %v6494_v12, %s6288_s21  ;;  %509 = vrot.lane.b32.xlu0 %v6499_v13, %s6288_s21  ;;  %10736 = vst [vmem:[#allocation9_spill] sm:$0xff] %v6721_v22 }
  0x97   :  { %885 = vmatprep.subr.bf16.mxu0 %v770_v29 }
  0x98   :  { %v362_v37 = vpop.permute.xlu1 %361  ;;  %v360_v38 = vpop.permute.xlu0 %359  ;;  %v769_v39 = vpack.c.bf16 %v420_v35, %v416_v36 }
  0x9a   :  { %495 = vrot.lane.b32.xlu1 %v6353_v3, %s6288_s21  ;;  %493 = vrot.lane.b32.xlu0 %v6339_v1, %s6288_s21 }
  0x9b   :  { %886 = vmatpush1.bf16.msra.mxu0 %v769_v39 }
  0x9c   :  { %v6677_v40 = vpop.permute.xlu1 %369  ;;  %v6679_v41 = vpop.permute.xlu0 %367 }
  0x9d   :  { %v401_v44 = vsel %vm391_vm1, %v362_v37, %v6677_v40  ;;  %v400_v45 = vsel %vm391_vm1, %v360_v38, %v6679_v41 }
  0x9e   :  { %v413_v46 = vmul.f32 %v401_v44, %v6635_v59  ;;  %v409_v47 = vmul.f32 %v400_v45, %v6635_v59  ;;  %499 = vrot.lane.b32.xlu1 %v6390_v8, %s6288_s21  ;;  %497 = vrot.lane.b32.xlu0 %v6395_v9, %s6288_s21 }
  0xa0   :  { %v6693_v50 = vpop.permute.xlu1 %385  ;;  %v6695_v51 = vpop.permute.xlu0 %383  ;;  %v766_v52 = vpack.c.bf16 %v413_v46, %v409_v47 }
  0xa1   :  { %v405_v53 = vsel %vm391_vm1, %v6693_v50, %v362_v37  ;;  %v404_v54 = vsel %vm391_vm1, %v6695_v51, %v360_v38  ;;  %v6741_v38 = vrot.slane %v6712_v58, %v6551_v24 }
  0xa2   :  { %v412_v56 = vmul.f32 %v405_v53, %v6655_v25  ;;  %v408_v57 = vmul.f32 %v404_v54, %v6655_v25  ;;  %507 = vrot.lane.b32.xlu1 %v6518_v16, %s6288_s21  ;;  %505 = vrot.lane.b32.xlu0 %v6523_v17, %s6288_s21 }
  0xa3   :  { %887 = vmatprep.subr.bf16.mxu0 %v766_v52  ;;  %10737 = vst [vmem:[#allocation10_spill] sm:$0xff] %v6741_v38 }
  0xa4   :  { %v301_v62 = vpop.permute.xlu1 %300  ;;  %v299_v63 = vpop.permute.xlu0 %298  ;;  %v765_v14 = vpack.c.bf16 %v412_v56, %v408_v57 }
  0xa6   :  { %491 = vrot.lane.b32.xlu1 %v6376_v6, %s6288_s21  ;;  %489 = vrot.lane.b32.xlu0 %v6381_v7, %s6288_s21 }
  0xa7   :  { %888 = vmatpush1.bf16.msra.mxu0 %v765_v14 }
  0xa8   :  { %v6723_v29 = vpop.permute.xlu1 %308  ;;  %v6725_v30 = vpop.permute.xlu0 %306 }
  0xa9   :  { %v338_v34 = vsel %vm326_vm2, %v301_v62, %v6723_v29  ;;  %v337_v35 = vsel %vm326_vm2, %v299_v63, %v6725_v30 }
  0xaa   :  { %v356_v36 = vmul.f32 %v338_v34, %v6721_v22  ;;  %v352_v37 = vmul.f32 %v337_v35, %v6721_v22  ;;  %698 = vrot.lane.b32.xlu1 %v6348_v2, %s6289_s24  ;;  %696 = vrot.lane.b32.xlu0 %v6334_v0, %s6289_s24 }
  0xac   :  { %v6743_v39 = vpop.permute.xlu1 %324  ;;  %v6745_v44 = vpop.permute.xlu0 %322  ;;  %v762_v45 = vpack.c.bf16 %v356_v36, %v352_v37 }
  0xad   :  { %v342_v46 = vsel %vm326_vm2, %v6743_v39, %v301_v62  ;;  %v341_v47 = vsel %vm326_vm2, %v6745_v44, %v299_v63  ;;  %v6762_v62 = vld [vmem:[%s10493_s3 + $0x4] ss:$12 sps:$4 sm:$0xff]  }
  0xae   :  { %v355_v52 = vmul.f32 %v342_v46, %v6741_v38  ;;  %v351_v53 = vmul.f32 %v341_v47, %v6741_v38  ;;  %706 = vrot.lane.b32.xlu1 %v6494_v12, %s6289_s24  ;;  %704 = vrot.lane.b32.xlu0 %v6499_v13, %s6289_s24 }
  0xaf   :  { %889 = vmatprep.subr.bf16.mxu0 %v762_v45  ;;  %913 = vmatprep.mubr.bf16.mxu0 %v6762_v62 }
  0xb0   :  { %v297_v54 = vpop.permute.xlu1 %296  ;;  %v295_v56 = vpop.permute.xlu0 %294  ;;  %v761_v57 = vpack.c.bf16 %v355_v52, %v351_v53 }
  0xb2   :  { %690 = vrot.lane.b32.xlu1 %v6353_v3, %s6289_s24  ;;  %688 = vrot.lane.b32.xlu0 %v6339_v1, %s6289_s24 }
  0xb3   :  { %890 = vmatpush1.bf16.msra.mxu0 %v761_v57  ;;  %v10499_v57 = vmov 0  }
  0xb4   :  { %v6769_v63 = vpop.permute.xlu1 %304  ;;  %v6771_v14 = vpop.permute.xlu0 %302  ;;  %974 = vmatprep.mubr.bf16.mxu1 %v10499_v57 }
  0xb5   :  { %v336_v34 = vsel %vm326_vm2, %v297_v54, %v6769_v63  ;;  %v335_v35 = vsel %vm326_vm2, %v295_v56, %v6771_v14 }
  0xb6   :  { %v348_v36 = vmul.f32 %v336_v34, %v6721_v22  ;;  %v344_v37 = vmul.f32 %v335_v35, %v6721_v22  ;;  %694 = vrot.lane.b32.xlu1 %v6390_v8, %s6289_s24  ;;  %692 = vrot.lane.b32.xlu0 %v6395_v9, %s6289_s24 }
  0xb8   :  { %v6785_v45 = vpop.permute.xlu1 %320  ;;  %v6787_v46 = vpop.permute.xlu0 %318  ;;  %v758_v47 = vpack.c.bf16 %v348_v36, %v344_v37 }
  0xb9   :  { %v340_v52 = vsel %vm326_vm2, %v6785_v45, %v297_v54  ;;  %v339_v53 = vsel %vm326_vm2, %v6787_v46, %v295_v56  ;;  %v6805_v54 = vld [vmem:[%s10492_s0] sm:$0xf] }
  0xba   :  { %v347_v34 = vmul.f32 %v340_v52, %v6741_v38  ;;  %v343_v35 = vmul.f32 %v339_v53, %v6741_v38  ;;  %702 = vrot.lane.b32.xlu1 %v6518_v16, %s6289_s24  ;;  %700 = vrot.lane.b32.xlu0 %v6523_v17, %s6289_s24  ;;  %v6814_v52 = vrot.slane %v6805_v54, %v6532_v19 }
  0xbb   :  { %891 = vmatprep.subr.bf16.mxu0 %v758_v47 }
  0xbc   :  { %v234_v56 = vpop.permute.xlu1 %233  ;;  %v232_v36 = vpop.permute.xlu0 %231  ;;  %v757_v37 = vpack.c.bf16 %v347_v34, %v343_v35  ;;  %10738 = vst [vmem:[#allocation11_spill] sm:$0xff] %v6814_v52 }
  0xbe   :  { %686 = vrot.lane.b32.xlu1 %v6376_v6, %s6289_s24  ;;  %684 = vrot.lane.b32.xlu0 %v6381_v7, %s6289_s24 }
  0xbf   :  { %892 = vmatpush1.bf16.msra.mxu0 %v757_v37  ;;  %v6834_v37 = vrot.slane %v6805_v54, %v6551_v24 }
  0xc0   :  { %v6816_v47 = vpop.permute.xlu1 %241  ;;  %v6818_v53 = vpop.permute.xlu0 %239 }
  0xc1   :  { %10739 = vst [vmem:[#allocation12_spill] sm:$0xff] %v6818_v53  ;;  %v273_v34 = vsel %vm261_vm3, %v234_v56, %v6816_v47  ;;  %v272_v35 = vsel %vm261_vm3, %v232_v36, %v6818_v53  ;;  %10740 = vst [vmem:[#allocation13_spill] sm:$0xff] %v6834_v37 }
  0xc2   :  { %v291_v57 = vmul.f32 %v273_v34, %v6814_v52  ;;  %v287_v38 = vmul.f32 %v272_v35, %v6814_v52  ;;  %446 = vrot.lane.b32.xlu1 %v6494_v12, %s6282_s28  ;;  %444 = vrot.lane.b32.xlu0 %v6499_v13, %s6282_s28 }
  0xc4   :  { %v6836_v31 = vpop.permute.xlu1 %257  ;;  %v6838_v25 = vpop.permute.xlu0 %255  ;;  %v754_v22 = vpack.c.bf16 %v291_v57, %v287_v38 }
  0xc5   :  { %10741 = vst [vmem:[#allocation14_spill] sm:$0xff] %v6838_v25  ;;  %v277_v34 = vsel %vm261_vm3, %v6836_v31, %v234_v56  ;;  %v276_v35 = vsel %vm261_vm3, %v6838_v25, %v232_v36 }
  0xc6   :  { %v290_v59 = vmul.f32 %v277_v34, %v6834_v37  ;;  %v286_v23 = vmul.f32 %v276_v35, %v6834_v37  ;;  %442 = vrot.lane.b32.xlu1 %v6518_v16, %s6282_s28  ;;  %440 = vrot.lane.b32.xlu0 %v6523_v17, %s6282_s28 }
  0xc7   :  { %893 = vmatprep.subr.bf16.mxu0 %v754_v22 }
  0xc8   :  { %v230_v38 = vpop.permute.xlu1 %229  ;;  %v228_v57 = vpop.permute.xlu0 %227  ;;  %v753_v53 = vpack.c.bf16 %v290_v59, %v286_v23 }
  0xca   :  { %381 = vrot.lane.b32.xlu1 %v6494_v12, %s6283_s26  ;;  %379 = vrot.lane.b32.xlu0 %v6499_v13, %s6283_s26 }
  0xcb   :  { %894 = vmatpush1.bf16.msra.mxu0 %v753_v53 }
  0xcc   :  { %v6856_v56 = vpop.permute.xlu1 %237  ;;  %v6858_v36 = vpop.permute.xlu0 %235 }
  0xcd   :  { %10742 = vst [vmem:[#allocation15_spill] sm:$0xff] %v6856_v56  ;;  %10743 = vst [vmem:[#allocation16_spill] sm:$0xff] %v6858_v36  ;;  %v271_v34 = vsel %vm261_vm3, %v230_v38, %v6856_v56  ;;  %v270_v22 = vsel %vm261_vm3, %v228_v57, %v6858_v36 }
  0xce   :  { %v283_v23 = vmul.f32 %v271_v34, %v6814_v52  ;;  %v279_v59 = vmul.f32 %v270_v22, %v6814_v52  ;;  %377 = vrot.lane.b32.xlu1 %v6518_v16, %s6283_s26  ;;  %375 = vrot.lane.b32.xlu0 %v6523_v17, %s6283_s26 }
  0xd0   :  { %v6872_v53 = vpop.permute.xlu1 %253  ;;  %v6874_v35 = vpop.permute.xlu0 %251  ;;  %v750_v25 = vpack.c.bf16 %v283_v23, %v279_v59  ;;  %v6891_v23 = vld [vmem:[%s10492_s0 + $0x1c] sm:$0xf] }
  0xd1   :  { %10744 = vst [vmem:[#allocation17_spill] sm:$0xff] %v6872_v53  ;;  %10745 = vst [vmem:[#allocation18_spill] sm:$0xff] %v6874_v35  ;;  %v275_v56 = vsel %vm261_vm3, %v6872_v53, %v230_v38  ;;  %v274_v34 = vsel %vm261_vm3, %v6874_v35, %v228_v57  ;;  %v6900_v57 = vrot.slane %v6891_v23, %v6532_v19 }
  0xd2   :  { %v282_v22 = vmul.f32 %v275_v56, %v6834_v37  ;;  %v278_v52 = vmul.f32 %v274_v34, %v6834_v37  ;;  %316 = vrot.lane.b32.xlu1 %v6494_v12, %s6284_s27  ;;  %314 = vrot.lane.b32.xlu0 %v6499_v13, %s6284_s27 }
  0xd3   :  { %895 = vmatprep.subr.bf16.mxu0 %v750_v25  ;;  %10746 = vst [vmem:[#allocation19_spill] sm:$0xff] %v6900_v57 }
  0xd4   :  { %v634_v38 = vpop.permute.xlu1 %633  ;;  %v632_v59 = vpop.permute.xlu0 %631  ;;  %v749_v36 = vpack.c.bf16 %v282_v22, %v278_v52 }
  0xd6   :  { %312 = vrot.lane.b32.xlu1 %v6518_v16, %s6284_s27  ;;  %310 = vrot.lane.b32.xlu0 %v6523_v17, %s6284_s27 }
  0xd7   :  { %896 = vmatpush1.bf16.msra.mxu0 %v749_v36  ;;  %v6920_v36 = vrot.slane %v6891_v23, %v6551_v24 }
  0xd8   :  { %v6902_v25 = vpop.permute.xlu1 %641  ;;  %v6904_v56 = vpop.permute.xlu0 %639 }
  0xd9   :  { %10747 = vst [vmem:[#allocation20_spill] sm:$0xff] %v6902_v25  ;;  %10748 = vst [vmem:[#allocation21_spill] sm:$0xff] %v6904_v56  ;;  %v659_v52 = vsel %vm651_vm4, %v634_v38, %v6902_v25  ;;  %v658_v34 = vsel %vm651_vm4, %v632_v59, %v6904_v56 }
  0xda   :  { %v681_v22 = vmul.f32 %v659_v52, %v6900_v57  ;;  %v677_v37 = vmul.f32 %v658_v34, %v6900_v57  ;;  %249 = vrot.lane.b32.xlu1 %v6494_v12, %s6285_s29  ;;  %247 = vrot.lane.b32.xlu0 %v6499_v13, %s6285_s29  ;;  %10749 = vst [vmem:[#allocation22_spill] sm:$0xff] %v6920_v36 }
  0xdc   :  { %v6922_v35 = vpop.permute.xlu1 %625  ;;  %v6924_v25 = vpop.permute.xlu0 %623  ;;  %v810_v53 = vpack.c.bf16 %v681_v22, %v677_v37 }
  0xdd   :  { %v663_v52 = vsel %vm651_vm4, %v6922_v35, %v634_v38  ;;  %v662_v12 = vsel %vm651_vm4, %v6924_v25, %v632_v59 }
  0xde   :  { %v680_v34 = vmul.f32 %v663_v52, %v6920_v36  ;;  %v676_v13 = vmul.f32 %v662_v12, %v6920_v36  ;;  %245 = vrot.lane.b32.xlu1 %v6518_v16, %s6285_s29  ;;  %243 = vrot.lane.b32.xlu0 %v6523_v17, %s6285_s29 }
  0xdf   :  { %897 = vmatprep.subr.bf16.mxu0 %v810_v53 }
  0xe0   :  { %v630_v37 = vpop.permute.xlu1 %629  ;;  %v628_v22 = vpop.permute.xlu0 %627  ;;  %v809_v56 = vpack.c.bf16 %v680_v34, %v676_v13 }
  0xe2   :  { %649 = vrot.lane.b32.xlu1 %v6362_v4, %s6286_s30  ;;  %647 = vrot.lane.b32.xlu0 %v6367_v5, %s6286_s30 }
  0xe3   :  { %898 = vmatpush2.bf16.msra.mxu0 %v809_v56 }
  0xe4   :  { %v6942_v38 = vpop.permute.xlu1 %637  ;;  %v6944_v59 = vpop.permute.xlu0 %635 }
  0xe5   :  { %10750 = vst [vmem:[#allocation23_spill] sm:$0xff] %v6942_v38  ;;  %10751 = vst [vmem:[#allocation24_spill] sm:$0xff] %v6944_v59  ;;  %v657_v16 = vsel %vm651_vm4, %v630_v37, %v6942_v38  ;;  %v656_v17 = vsel %vm651_vm4, %v628_v22, %v6944_v59 }
  0xe6   :  { %v673_v53 = vmul.f32 %v657_v16, %v6900_v57  ;;  %v669_v52 = vmul.f32 %v656_v17, %v6900_v57  ;;  %645 = vrot.lane.b32.xlu1 %v6404_v10, %s6286_s30  ;;  %643 = vrot.lane.b32.xlu0 %v6409_v11, %s6286_s30 }
  0xe8   :  { %v6958_v56 = vpop.permute.xlu1 %621  ;;  %v6960_v12 = vpop.permute.xlu0 %619  ;;  %v806_v34 = vpack.c.bf16 %v673_v53, %v669_v52  ;;  %v6977_v53 = vld [vmem:[%s10492_s0 + $0x18] sm:$0xf] }
  0xe9   :  { %10752 = vst [vmem:[#allocation25_spill] sm:$0xff] %v6958_v56  ;;  %10753 = vst [vmem:[#allocation26_spill] sm:$0xff] %v6960_v12  ;;  %v661_v13 = vsel %vm651_vm4, %v6958_v56, %v630_v37  ;;  %v660_v16 = vsel %vm651_vm4, %v6960_v12, %v628_v22  ;;  %v6986_v22 = vrot.slane %v6977_v53, %v6532_v19 }
  0xea   :  { %v672_v17 = vmul.f32 %v661_v13, %v6920_v36  ;;  %v668_v57 = vmul.f32 %v660_v16, %v6920_v36  ;;  %584 = vrot.lane.b32.xlu1 %v6362_v4, %s6287_s18  ;;  %582 = vrot.lane.b32.xlu0 %v6367_v5, %s6287_s18  ;;  %10754 = vst [vmem:[#allocation27_spill] sm:$0xff] %v6977_v53 }
  0xeb   :  { %899 = vmatprep.subr.bf16.mxu0 %v806_v34  ;;  %10755 = vst [vmem:[#allocation28_spill] sm:$0xff] %v6986_v22 }
  0xec   :  { %v569_v37 = vpop.permute.xlu1 %568  ;;  %v567_v52 = vpop.permute.xlu0 %566  ;;  %v805_v59 = vpack.c.bf16 %v672_v17, %v668_v57 }
  0xee   :  { %580 = vrot.lane.b32.xlu1 %v6404_v10, %s6287_s18  ;;  %578 = vrot.lane.b32.xlu0 %v6409_v11, %s6287_s18 }
  0xef   :  { %900 = vmatpush2.bf16.msra.mxu0 %v805_v59  ;;  %v7006_v59 = vrot.slane %v6977_v53, %v6551_v24 }
  0xf0   :  { %v6988_v34 = vpop.permute.xlu1 %576  ;;  %v6990_v13 = vpop.permute.xlu0 %574 }
  0xf1   :  { %10756 = vst [vmem:[#allocation29_spill] sm:$0xff] %v6988_v34  ;;  %10757 = vst [vmem:[#allocation30_spill] sm:$0xff] %v6990_v13  ;;  %v594_v57 = vsel %vm586_vm5, %v569_v37, %v6988_v34  ;;  %v593_v16 = vsel %vm586_vm5, %v567_v52, %v6990_v13 }
  0xf2   :  { %v616_v17 = vmul.f32 %v594_v57, %v6986_v22  ;;  %v612_v36 = vmul.f32 %v593_v16, %v6986_v22  ;;  %519 = vrot.lane.b32.xlu1 %v6362_v4, %s6288_s21  ;;  %517 = vrot.lane.b32.xlu0 %v6367_v5, %s6288_s21  ;;  %10758 = vst [vmem:[#allocation31_spill] sm:$0xff] %v7006_v59 }
  0xf4   :  { %v7008_v12 = vpop.permute.xlu1 %560  ;;  %v7010_v34 = vpop.permute.xlu0 %558  ;;  %v802_v56 = vpack.c.bf16 %v616_v17, %v612_v36 }
  0xf5   :  { %10759 = vst [vmem:[#allocation32_spill] sm:$0xff] %v7010_v34  ;;  %v598_v57 = vsel %vm586_vm5, %v7008_v12, %v569_v37  ;;  %v597_v16 = vsel %vm586_vm5, %v7010_v34, %v567_v52 }
  0xf6   :  { %v615_v13 = vmul.f32 %v598_v57, %v7006_v59  ;;  %v611_v38 = vmul.f32 %v597_v16, %v7006_v59  ;;  %515 = vrot.lane.b32.xlu1 %v6404_v10, %s6288_s21  ;;  %513 = vrot.lane.b32.xlu0 %v6409_v11, %s6288_s21 }
  0xf7   :  { %901 = vmatprep.subr.bf16.mxu0 %v802_v56 }
  0xf8   :  { %v565_v36 = vpop.permute.xlu1 %564  ;;  %v563_v17 = vpop.permute.xlu0 %562  ;;  %v801_v53 = vpack.c.bf16 %v615_v13, %v611_v38 }
  0xfa   :  { %714 = vrot.lane.b32.xlu1 %v6362_v4, %s6289_s24  ;;  %712 = vrot.lane.b32.xlu0 %v6367_v5, %s6289_s24 }
  0xfb   :  { %902 = vmatpush2.bf16.msra.mxu0 %v801_v53 }
  0xfc   :  { %v7028_v37 = vpop.permute.xlu1 %572  ;;  %v7030_v52 = vpop.permute.xlu0 %570 }
  0xfd   :  { %10760 = vst [vmem:[#allocation33_spill] sm:$0xff] %v7028_v37  ;;  %10761 = vst [vmem:[#allocation34_spill] sm:$0xff] %v7030_v52  ;;  %v592_v57 = vsel %vm586_vm5, %v565_v36, %v7028_v37  ;;  %v591_v56 = vsel %vm586_vm5, %v563_v17, %v7030_v52 }
  0xfe   :  { %v608_v38 = vmul.f32 %v592_v57, %v6986_v22  ;;  %v604_v4 = vmul.f32 %v591_v56, %v6986_v22  ;;  %710 = vrot.lane.b32.xlu1 %v6404_v10, %s6289_s24  ;;  %708 = vrot.lane.b32.xlu0 %v6409_v11, %s6289_s24  ;;  %v7059_v11 = vld [vmem:[%s10492_s0 + $0x14] sm:$0xf] }
  0xff   :  { %10764 = vst [vmem:[#allocation37_spill] sm:$0xff] %v7059_v11 }
 0x100   :  { %v7044_v5 = vpop.permute.xlu1 %556  ;;  %v7046_v53 = vpop.permute.xlu0 %554  ;;  %v798_v13 = vpack.c.bf16 %v608_v38, %v604_v4 }
 0x101   :  { %10762 = vst [vmem:[#allocation35_spill] sm:$0xff] %v7044_v5  ;;  %10763 = vst [vmem:[#allocation36_spill] sm:$0xff] %v7046_v53  ;;  %v596_v16 = vsel %vm586_vm5, %v7044_v5, %v565_v36  ;;  %v595_v57 = vsel %vm586_vm5, %v7046_v53, %v563_v17  ;;  %v7064_v36 = vrot.slane %v7059_v11, %v6532_v19 }
 0x102   :  { %v607_v56 = vmul.f32 %v596_v16, %v7006_v59  ;;  %v603_v10 = vmul.f32 %v595_v57, %v7006_v59  ;;  %903 = vmatprep.subr.bf16.mxu0 %v798_v13 }
 0x103   :  { %10765 = vst [vmem:[#allocation38_spill] sm:$0xff] %v7064_v36 }
 0x104   :  { %v504_v22 = vpop.permute.xlu1 %503  ;;  %v502_v38 = vpop.permute.xlu0 %501  ;;  %v797_v4 = vpack.c.bf16 %v607_v56, %v603_v10 }
 0x106   :  { %904 = vmatpush2.bf16.msra.mxu0 %v797_v4  ;;  %v7080_v4 = vrot.slane %v7059_v11, %v6551_v24 }
 0x108   :  { %v7066_v17 = vpop.permute.xlu1 %511  ;;  %v7068_v16 = vpop.permute.xlu0 %509  ;;  %10768 = vst [vmem:[#allocation41_spill] sm:$0xff] %v7080_v4 }
 0x109   :  { %10766 = vst [vmem:[#allocation39_spill] sm:$0xff] %v7066_v17  ;;  %10767 = vst [vmem:[#allocation40_spill] sm:$0xff] %v7068_v16  ;;  %v529_v13 = vsel %vm521_vm6, %v504_v22, %v7066_v17  ;;  %v528_v57 = vsel %vm521_vm6, %v502_v38, %v7068_v16 }
 0x10a   :  { %v551_v56 = vmul.f32 %v529_v13, %v7064_v36  ;;  %v547_v10 = vmul.f32 %v528_v57, %v7064_v36 }
 0x10c   :  { %v7082_v59 = vpop.permute.xlu1 %495  ;;  %v7084_v53 = vpop.permute.xlu0 %493  ;;  %v794_v52 = vpack.c.bf16 %v551_v56, %v547_v10 }
 0x10d   :  { %v533_v17 = vsel %vm521_vm6, %v7082_v59, %v504_v22  ;;  %v532_v16 = vsel %vm521_vm6, %v7084_v53, %v502_v38 }
 0x10e   :  { %v550_v13 = vmul.f32 %v533_v17, %v7080_v4  ;;  %v546_v57 = vmul.f32 %v532_v16, %v7080_v4  ;;  %905 = vmatprep.subr.bf16.mxu0 %v794_v52 }
 0x110   :  { %v500_v5 = vpop.permute.xlu1 %499  ;;  %v498_v37 = vpop.permute.xlu0 %497  ;;  %v793_v11 = vpack.c.bf16 %v550_v13, %v546_v57 }
 0x112   :  { %906 = vmatpush2.bf16.msra.mxu0 %v793_v11 }
 0x114   :  { %v7094_v34 = vpop.permute.xlu1 %507  ;;  %v7096_v56 = vpop.permute.xlu0 %505 }
 0x115   :  { %10769 = vst [vmem:[#allocation42_spill] sm:$0xff] %v7094_v34  ;;  %10770 = vst [vmem:[#allocation43_spill] sm:$0xff] %v7096_v56  ;;  %v527_v22 = vsel %vm521_vm6, %v500_v5, %v7094_v34  ;;  %v526_v38 = vsel %vm521_vm6, %v498_v37, %v7096_v56 }
 0x116   :  { %v543_v17 = vmul.f32 %v527_v22, %v7064_v36  ;;  %v539_v52 = vmul.f32 %v526_v38, %v7064_v36  ;;  %v7121_v22 = vld [vmem:[%s10492_s0 + $0x20] sm:$0xf]  ;;  %v786_v38 = vpack.c.bf16 %v6348_v2, %v6334_v0 }
 0x118   :  { %v7106_v16 = vpop.permute.xlu1 %491  ;;  %v7108_v10 = vpop.permute.xlu0 %489  ;;  %v790_v11 = vpack.c.bf16 %v543_v17, %v539_v52 }
 0x119   :  { %v531_v13 = vsel %vm521_vm6, %v7106_v16, %v500_v5  ;;  %v530_v57 = vsel %vm521_vm6, %v7108_v10, %v498_v37  ;;  %v7128_v37 = vrot.slane %v7121_v22, %v6532_v19 }
 0x11a   :  { %v542_v34 = vmul.f32 %v531_v13, %v7080_v4  ;;  %v538_v56 = vmul.f32 %v530_v57, %v7080_v4  ;;  %907 = vmatprep.subr.bf16.mxu0 %v790_v11  ;;  %v785_v11 = vpack.c.bf16 %v6353_v3, %v6339_v1  ;;  %v782_v13 = vpack.c.bf16 %v6390_v8, %v6395_v9 }
 0x11b   :  { %10771 = vst [vmem:[#allocation44_spill] sm:$0xff] %v7128_v37  ;;  %v7148_v3 = vrot.slane %v7121_v22, %v6551_v24  ;;  %v781_v8 = vpack.c.bf16 %v6376_v6, %v6381_v7  ;;  %v7200_v24 = vsub.s32 3, %v6513_v15 }
 0x11c   :  { %v699_v17 = vpop.permute.xlu1 %698  ;;  %v697_v52 = vpop.permute.xlu0 %696  ;;  %v789_v5 = vpack.c.bf16 %v542_v34, %v538_v56 }
 0x11d   :  { %10772 = vst [vmem:[#allocation45_spill] sm:$0xff] %v7148_v3  ;;  %10778 = vst [vmem:[#allocation51_spill] sm:$0xff] %v7200_v24 }
 0x11e   :  { %908 = vmatpush2.bf16.msra.mxu0 %v789_v5 }
 0x11f   :  { %909 = vmatprep.subr.bf16.mxu0 %v786_v38 }
 0x120   :  { %v7134_v57 = vpop.permute.xlu1 %706  ;;  %v7136_v0 = vpop.permute.xlu0 %704 }
 0x121   :  { %v723_v2 = vsel %vm716_vm7, %v697_v52, %v7136_v0  ;;  %v724_v34 = vsel %vm716_vm7, %v699_v17, %v7134_v57 }
 0x122   :  { %v742_v56 = vmul.f32 %v723_v2, %v7128_v37  ;;  %v746_v1 = vmul.f32 %v724_v34, %v7128_v37  ;;  %910 = vmatpush2.bf16.msra.mxu0 %v785_v11  ;;  %v7165_v11 = vld [vmem:[%s10493_s3] ss:$12 sps:$4 sm:$0xff]  }
 0x123   :  { %911 = vmatprep.subr.bf16.mxu0 %v782_v13  ;;  %10773 = vst [vmem:[#allocation46_spill] sm:$0xff] %v7165_v11  ;;  %v7172_v13 = vld [vmem:[%s10493_s3 + $0x1c] ss:$12 sps:$4 sm:$0xff]  }
 0x124   :  { %v7152_v9 = vpop.permute.xlu1 %690  ;;  %v7154_v38 = vpop.permute.xlu0 %688  ;;  %v818_v5 = vpack.c.bf16 %v746_v1, %v742_v56  ;;  %10774 = vst [vmem:[#allocation47_spill] sm:$0xff] %v7172_v13 }
 0x125   :  { %v728_v2 = vsel %vm716_vm7, %v7152_v9, %v699_v17  ;;  %v727_v34 = vsel %vm716_vm7, %v7154_v38, %v697_v52 }
 0x126   :  { %954 = vmatprep.subr.bf16.mxu1 %v818_v5  ;;  %v741_v6 = vmul.f32 %v727_v34, %v7148_v3  ;;  %v745_v7 = vmul.f32 %v728_v2, %v7148_v3  ;;  %912 = vmatpush2.bf16.msra.mxu0 %v781_v8  ;;  %v7187_v34 = vsub.s32 2, %v6513_v15 }
 0x128   :  { %v695_v17 = vpop.permute.xlu1 %694  ;;  %v693_v56 = vpop.permute.xlu0 %692  ;;  %v817_v1 = vpack.c.bf16 %v745_v7, %v741_v6  ;;  %10777 = vst [vmem:[#allocation50_spill] sm:$0xff] %v7187_v34  ;;  %v7192_v6 = vld [vmem:[%s10493_s3 + $0x18] ss:$12 sps:$4 sm:$0xff]   ;;  %v829_v7 = vld [vmem:[%s10493_s3 + $0x30] sm:$0xff] }
 0x129   :  { %914 = vmatmul.mubr.bf16.vlgmr.msra.gmra.mxu0 %v7165_v11  ;;  %v7206_v11 = vcombine.high %v829_v7, %v829_v7 }
 0x12a   :  { %955 = vmatpush1.bf16.msra.mxu1 %v817_v1  ;;  %923 = vmatprep.mubr.bf16.mxu0 %v7172_v13 }
 0x12b   :  { %10779 = vst [vmem:[#allocation52_spill] sm:$0xff] %v7206_v11 }
 0x12c   :  { %v7176_v52 = vpop.permute.xlu1 %702  ;;  %v7178_v5 = vpop.permute.xlu0 %700 }
 0x12d   :  { %10775 = vst [vmem:[#allocation48_spill] sm:$0xff] %v7176_v52  ;;  %10776 = vst [vmem:[#allocation49_spill] sm:$0xff] %v7178_v5  ;;  %v722_v8 = vsel %vm716_vm7, %v695_v17, %v7176_v52  ;;  %v721_v2 = vsel %vm716_vm7, %v693_v56, %v7178_v5 }
 0x12e   :  { %v738_v1 = vmul.f32 %v722_v8, %v7128_v37  ;;  %v734_v19 = vmul.f32 %v721_v2, %v7128_v37  ;;  %v7216_v2 = vrot.slane %v6537_v20, %v7187_v34 }
 0x130   :  { %v7202_v36 = vpop.permute.xlu1 %686  ;;  %v7204_v4 = vpop.permute.xlu0 %684  ;;  %v814_v13 = vpack.c.bf16 %v738_v1, %v734_v19  ;;  %10780 = vst [vmem:[#allocation53_spill] sm:$0xff] %v7216_v2  ;;  %v7223_v1 = vrot.slane %v6537_v20, %v7200_v24 }
 0x131   :  { %v726_v5 = vsel %vm716_vm7, %v7202_v36, %v695_v17  ;;  %v725_v8 = vsel %vm716_vm7, %v7204_v4, %v693_v56  ;;  %924 = vmatmul.mubr.bf16.gmra.mxu0 %v7192_v6 }
 0x132   :  { %v737_v15 = vmul.f32 %v726_v5, %v7148_v3  ;;  %v733_v19 = vmul.f32 %v725_v8, %v7148_v3  ;;  %956 = vmatprep.subr.bf16.mxu1 %v814_v13  ;;  %10781 = vst [vmem:[#allocation54_spill] sm:$0xff] %v7223_v1  ;;  %933 = vmatprep.mubr.bf16.mxu0 %v7206_v11  ;;  %v7241_v8 = vld [vmem:[%s10493_s3 + $0x8] ss:$12 sps:$4 sm:$0xff]  }
 0x133   :  { %v7253_v11 = vrot.slane %v6626_v55, %v7200_v24 }
 0x134   :  { %v447_v17 = vpop.permute.xlu1 %446  ;;  %v445_v37 = vpop.permute.xlu0 %444  ;;  %v813_v56 = vpack.c.bf16 %v737_v15, %v733_v19 }
 0x135   :  { %v460_v52 = vsel %vm456_vm0, %v447_v17, %v6571_v32  ;;  %v464_v5 = vsel %vm456_vm0, %v6556_v26, %v447_v17  ;;  %v459_v13 = vsel %vm456_vm0, %v445_v37, %v6573_v33  ;;  %v463_v20 = vsel %vm456_vm0, %v6539_v21, %v445_v37  ;;  %10783 = vst [vmem:[#allocation56_spill] sm:$0xff] %v7253_v11 }
 0x136   :  { %v487_v15 = vmul.f32 %v464_v5, %v7216_v2  ;;  %v488_v32 = vmul.f32 %v460_v52, %v7223_v1  ;;  %v483_v19 = vmul.f32 %v463_v20, %v7216_v2  ;;  %v484_v26 = vmul.f32 %v459_v13, %v7223_v1  ;;  %957 = vmatpush1.bf16.msra.mxu1 %v813_v56 }
 0x137   :  { %v7249_v33 = vrot.slane %v6626_v55, %v7187_v34  ;;  %v7255_v5 = vcombine.low %v829_v7, %v829_v7 }
 0x138   :  { %v779_v17 = vpack.c.bf16 %v487_v15, %v483_v19  ;;  %v443_v21 = vpop.permute.xlu1 %442  ;;  %v441_v37 = vpop.permute.xlu0 %440  ;;  %v780_v3 = vpack.c.bf16 %v488_v32, %v484_v26 }
 0x139   :  { %10782 = vst [vmem:[#allocation55_spill] sm:$0xff] %v7249_v33  ;;  %v458_v52 = vsel %vm456_vm0, %v443_v21, %v6607_v48  ;;  %v462_v56 = vsel %vm456_vm0, %v6591_v42, %v443_v21  ;;  %v457_v13 = vsel %vm456_vm0, %v441_v37, %v6609_v49  ;;  %v461_v20 = vsel %vm456_vm0, %v6593_v43, %v441_v37  ;;  %v7292_v37 = vld [vmem:[%s10493_s3 + $0x20] ss:$12 sps:$4 sm:$0xff]  }
 0x13a   :  { %5378 = vmatmul.mubr.msk.bf16.vlgmr.msra.gmra.mxu1 %vm871_vm8, %v7241_v8  ;;  %v479_v55 = vmul.f32 %v462_v56, %v7216_v2  ;;  %v480_v7 = vmul.f32 %v458_v52, %v7223_v1  ;;  %v475_v48 = vmul.f32 %v461_v20, %v7216_v2  ;;  %v476_v15 = vmul.f32 %v457_v13, %v7223_v1 }
 0x13b   :  { %1003 = vmatprep.subr.bf16.mxu1 %v780_v3  ;;  %v10784_v42 = vmov 0   ;;  %934 = vmatmul.mubr.bf16.gmra.mxu0 %v7255_v5 }
 0x13c   :  { %1004 = vmatpush1.bf16.msra.mxu1 %v779_v17  ;;  %984 = vmatprep.mubr.bf16.mxu1 %v10784_v42  ;;  %v775_v49 = vpack.c.bf16 %v479_v55, %v475_v48  ;;  %v382_v32 = vpop.permute.xlu1 %381  ;;  %v380_v19 = vpop.permute.xlu0 %379  ;;  %v776_v26 = vpack.c.bf16 %v480_v7, %v476_v15  ;;  %v7301_v55 = vrot.slane %v6712_v58, %v7187_v34 }
 0x13d   :  { %v395_v43 = vsel %vm391_vm1, %v382_v32, %v6657_v27  ;;  %v399_v21 = vsel %vm391_vm1, %v6637_v60, %v382_v32  ;;  %v394_v3 = vsel %vm391_vm1, %v380_v19, %v6659_v28  ;;  %v398_v17 = vsel %vm391_vm1, %v6639_v61, %v380_v19  ;;  %1247 = vmatprep.mubr.bf16.mxu0 %v10784_v42 }
 0x13e   :  { %v422_v27 = vmul.f32 %v399_v21, %v7249_v33  ;;  %v423_v52 = vmul.f32 %v395_v43, %v7253_v11  ;;  %v418_v60 = vmul.f32 %v398_v17, %v7249_v33  ;;  %v419_v56 = vmul.f32 %v394_v3, %v7253_v11  ;;  %1005 = vmatprep.subr.bf16.mxu1 %v776_v26 }
 0x13f   :  { %10785 = vst [vmem:[#allocation57_spill] sm:$0xff] %v7301_v55  ;;  %v7305_v7 = vrot.slane %v6712_v58, %v7200_v24 }
 0x140   :  { %1006 = vmatpush1.bf16.msra.mxu1 %v775_v49  ;;  %v771_v28 = vpack.c.bf16 %v422_v27, %v418_v60  ;;  %v378_v13 = vpop.permute.xlu1 %377  ;;  %v376_v61 = vpop.permute.xlu0 %375  ;;  %v772_v20 = vpack.c.bf16 %v423_v52, %v419_v56  ;;  %v7341_v52 = vld [vmem:[%s10493_s3 + $0x38] ss:$0 sps:$4 sm:$0xff]  }
 0x141   :  { %10786 = vst [vmem:[#allocation58_spill] sm:$0xff] %v7305_v7  ;;  %v393_v48 = vsel %vm391_vm1, %v378_v13, %v6693_v50  ;;  %v397_v15 = vsel %vm391_vm1, %v6677_v40, %v378_v13  ;;  %v392_v49 = vsel %vm391_vm1, %v376_v61, %v6695_v51  ;;  %v396_v32 = vsel %vm391_vm1, %v6679_v41, %v376_v61 }
 0x142   :  { %5379 = vmatmul.mubr.msk.bf16.gmra.mxu1 %vm871_vm8, %v7292_v37  ;;  %v414_v58 = vmul.f32 %v397_v15, %v7249_v33  ;;  %v415_v19 = vmul.f32 %v393_v48, %v7253_v11  ;;  %v410_v50 = vmul.f32 %v396_v32, %v7249_v33  ;;  %v411_v26 = vmul.f32 %v392_v49, %v7253_v11 }
 0x143   :  { %1007 = vmatprep.subr.bf16.mxu1 %v772_v20  ;;  %994 = vmatprep.mubr.bf16.mxu1 %v10784_v42  ;;  %v7353_v20 = vrot.slane %v6805_v54, %v7200_v24 }
 0x144   :  { %1008 = vmatpush1.bf16.msra.mxu1 %v771_v28  ;;  %v767_v40 = vpack.c.bf16 %v414_v58, %v410_v50  ;;  %v317_v51 = vpop.permute.xlu1 %316  ;;  %v315_v43 = vpop.permute.xlu0 %314  ;;  %v768_v21 = vpack.c.bf16 %v415_v19, %v411_v26 }
 0x145   :  { %v330_v41 = vsel %vm326_vm2, %v317_v51, %v6743_v39  ;;  %v334_v3 = vsel %vm326_vm2, %v6723_v29, %v317_v51  ;;  %v329_v17 = vsel %vm326_vm2, %v315_v43, %v6745_v44  ;;  %v333_v27 = vsel %vm326_vm2, %v6725_v30, %v315_v43  ;;  %10788 = vst [vmem:[#allocation60_spill] sm:$0xff] %v7353_v20  ;;  %v10789_v51 = vld [vmem:[#allocation14_spill] sm:$0xff] }
 0x146   :  { %v357_v60 = vmul.f32 %v334_v3, %v7301_v55  ;;  %v358_v39 = vmul.f32 %v330_v41, %v7305_v7  ;;  %v353_v56 = vmul.f32 %v333_v27, %v7301_v55  ;;  %v354_v29 = vmul.f32 %v329_v17, %v7305_v7  ;;  %1009 = vmatprep.subr.bf16.mxu1 %v768_v21  ;;  %v10790_v21 = vld [vmem:[#allocation12_spill] sm:$0xff] }
 0x147   :  { %v7349_v30 = vrot.slane %v6805_v54, %v7187_v34 }
 0x148   :  { %1010 = vmatpush1.bf16.msra.mxu1 %v767_v40  ;;  %v763_v44 = vpack.c.bf16 %v357_v60, %v353_v56  ;;  %v313_v28 = vpop.permute.xlu1 %312  ;;  %v311_v13 = vpop.permute.xlu0 %310  ;;  %v764_v61 = vpack.c.bf16 %v358_v39, %v354_v29  ;;  %v7392_v56 = vrot.slane %v6891_v23, %v7187_v34  ;;  %v7396_v29 = vrot.slane %v6891_v23, %v7200_v24 }
 0x149   :  { %10787 = vst [vmem:[#allocation59_spill] sm:$0xff] %v7349_v30  ;;  %v328_v48 = vsel %vm326_vm2, %v313_v28, %v6785_v45  ;;  %v332_v15 = vsel %vm326_vm2, %v6769_v63, %v313_v28  ;;  %v327_v49 = vsel %vm326_vm2, %v311_v13, %v6787_v46  ;;  %v331_v32 = vsel %vm326_vm2, %v6771_v14, %v311_v13  ;;  %v10794_v13 = vld [vmem:[#allocation15_spill] sm:$0xff] }
 0x14a   :  { %5380 = vmatmul.mubr.msk.bf16.gmra.mxu1 %vm871_vm8, %v7341_v52  ;;  %v349_v54 = vmul.f32 %v332_v15, %v7301_v55  ;;  %v350_v58 = vmul.f32 %v328_v48, %v7305_v7  ;;  %v345_v45 = vmul.f32 %v331_v32, %v7301_v55  ;;  %v346_v19 = vmul.f32 %v327_v49, %v7305_v7  ;;  %v10795_v48 = vld [vmem:[#allocation18_spill] sm:$0xff]  ;;  %v10796_v49 = vld [vmem:[#allocation16_spill] sm:$0xff] }
 0x14b   :  { %1011 = vmatprep.subr.bf16.mxu1 %v764_v61  ;;  %1035 = vmatprep.mubr.bf16.mxu1 %v6762_v62  ;;  %10791 = vst [vmem:[#allocation14_spill] sm:$0xff] %v7392_v56  ;;  %10792 = vst [vmem:[#allocation12_spill] sm:$0xff] %v7396_v29 }
 0x14c   :  { %1012 = vmatpush1.bf16.msra.mxu1 %v763_v44  ;;  %v759_v63 = vpack.c.bf16 %v349_v54, %v345_v45  ;;  %v250_v46 = vpop.permute.xlu1 %249  ;;  %v248_v50 = vpop.permute.xlu0 %247  ;;  %v760_v26 = vpack.c.bf16 %v350_v58, %v346_v19  ;;  %v10793_v44 = vld [vmem:[#allocation17_spill] sm:$0xff] }
 0x14d   :  { %v265_v14 = vsel %vm261_vm3, %v250_v46, %v6836_v31  ;;  %v269_v40 = vsel %vm261_vm3, %v6816_v47, %v250_v46  ;;  %v264_v43 = vsel %vm261_vm3, %v248_v50, %v10789_v51  ;;  %v268_v62 = vsel %vm261_vm3, %v10790_v21, %v248_v50  ;;  %v10798_v51 = vld [vmem:[#allocation21_spill] sm:$0xff] }
 0x14e   :  { %v292_v41 = vmul.f32 %v269_v40, %v7349_v30  ;;  %v293_v3 = vmul.f32 %v265_v14, %v7353_v20  ;;  %v288_v17 = vmul.f32 %v268_v62, %v7349_v30  ;;  %v289_v31 = vmul.f32 %v264_v43, %v7353_v20  ;;  %1013 = vmatprep.subr.bf16.mxu1 %v760_v26  ;;  %v10797_v26 = vld [vmem:[#allocation20_spill] sm:$0xff] }
 0x150   :  { %1014 = vmatpush1.bf16.msra.mxu1 %v759_v63  ;;  %v755_v27 = vpack.c.bf16 %v292_v41, %v288_v17  ;;  %v246_v47 = vpop.permute.xlu1 %245  ;;  %v244_v60 = vpop.permute.xlu0 %243  ;;  %v756_v39 = vpack.c.bf16 %v293_v3, %v289_v31 }
 0x151   :  { %v263_v28 = vsel %vm261_vm3, %v246_v47, %v10793_v44  ;;  %v267_v61 = vsel %vm261_vm3, %v10794_v13, %v246_v47  ;;  %v262_v15 = vsel %vm261_vm3, %v244_v60, %v10795_v48  ;;  %v266_v32 = vsel %vm261_vm3, %v10796_v49, %v244_v60  ;;  %v10799_v60 = vld [vmem:[#allocation27_spill] sm:$0xff]  ;;  %v10803_v13 = vld [vmem:[#allocation25_spill] sm:$0xff]  ;;  %v10804_v48 = vld [vmem:[#allocation24_spill] sm:$0xff] }
 0x152   :  { %v284_v54 = vmul.f32 %v267_v61, %v7349_v30  ;;  %v285_v23 = vmul.f32 %v263_v28, %v7353_v20  ;;  %v280_v58 = vmul.f32 %v266_v32, %v7349_v30  ;;  %v281_v45 = vmul.f32 %v262_v15, %v7353_v20  ;;  %1015 = vmatprep.subr.bf16.mxu1 %v756_v39  ;;  %v10802_v44 = vld [vmem:[#allocation23_spill] sm:$0xff]  ;;  %v10805_v49 = vld [vmem:[#allocation26_spill] sm:$0xff] }
 0x153   :  { %v7432_v39 = vrot.slane %v10799_v60, %v7187_v34 }
 0x154   :  { %1016 = vmatpush1.bf16.msra.mxu1 %v755_v27  ;;  %v751_v19 = vpack.c.bf16 %v284_v54, %v280_v58  ;;  %v650_v63 = vpop.permute.xlu1 %649  ;;  %v648_v46 = vpop.permute.xlu0 %647  ;;  %v752_v50 = vpack.c.bf16 %v285_v23, %v281_v45 }
 0x155   :  { %v655_v14 = vsel %vm651_vm4, %v10797_v26, %v650_v63  ;;  %v667_v40 = vsel %vm651_vm4, %v650_v63, %v6922_v35  ;;  %v654_v43 = vsel %vm651_vm4, %v10798_v51, %v648_v46  ;;  %v666_v21 = vsel %vm651_vm4, %v648_v46, %v6924_v25  ;;  %10800 = vst [vmem:[#allocation17_spill] sm:$0xff] %v7432_v39  ;;  %v10806_v26 = vld [vmem:[#allocation29_spill] sm:$0xff]  ;;  %v10807_v51 = vld [vmem:[#allocation30_spill] sm:$0xff] }
 0x156   :  { %v682_v62 = vmul.f32 %v655_v14, %v7392_v56  ;;  %v683_v41 = vmul.f32 %v667_v40, %v7396_v29  ;;  %v678_v3 = vmul.f32 %v654_v43, %v7392_v56  ;;  %v679_v17 = vmul.f32 %v666_v21, %v7396_v29  ;;  %1017 = vmatprep.subr.bf16.mxu1 %v752_v50  ;;  %v10808_v21 = vld [vmem:[#allocation32_spill] sm:$0xff] }
 0x157   :  { %v7436_v25 = vrot.slane %v10799_v60, %v7200_v24  ;;  %v10809_v60 = vld [vmem:[#allocation37_spill] sm:$0xff] }
 0x158   :  { %1018 = vmatpush1.bf16.msra.mxu1 %v751_v19  ;;  %v811_v31 = vpack.c.bf16 %v682_v62, %v678_v3  ;;  %v646_v35 = vpop.permute.xlu1 %645  ;;  %v644_v27 = vpop.permute.xlu0 %643  ;;  %v812_v47 = vpack.c.bf16 %v683_v41, %v679_v17 }
 0x159   :  { %10801 = vst [vmem:[#allocation15_spill] sm:$0xff] %v7436_v25  ;;  %v653_v28 = vsel %vm651_vm4, %v10802_v44, %v646_v35  ;;  %v665_v61 = vsel %vm651_vm4, %v646_v35, %v10803_v13  ;;  %v652_v15 = vsel %vm651_vm4, %v10804_v48, %v644_v27  ;;  %v664_v32 = vsel %vm651_vm4, %v644_v27, %v10805_v49  ;;  %v10812_v13 = vld [vmem:[#allocation33_spill] sm:$0xff]  ;;  %v10813_v48 = vld [vmem:[#allocation35_spill] sm:$0xff]  ;;  %v10814_v49 = vld [vmem:[#allocation34_spill] sm:$0xff] }
 0x15a   :  { %v674_v54 = vmul.f32 %v653_v28, %v7392_v56  ;;  %v675_v23 = vmul.f32 %v665_v61, %v7396_v29  ;;  %v670_v58 = vmul.f32 %v652_v15, %v7392_v56  ;;  %v671_v45 = vmul.f32 %v664_v32, %v7396_v29  ;;  %1019 = vmatprep.subr.bf16.mxu1 %v812_v47 }
 0x15b   :  { %v7472_v44 = vrot.slane %v10809_v60, %v7187_v34  ;;  %v7476_v28 = vrot.slane %v10809_v60, %v7200_v24  ;;  %v10818_v60 = vld [vmem:[#allocation42_spill] sm:$0xff] }
 0x15c   :  { %1020 = vmatpush2.bf16.msra.mxu1 %v811_v31  ;;  %v807_v19 = vpack.c.bf16 %v674_v54, %v670_v58  ;;  %v585_v63 = vpop.permute.xlu1 %584  ;;  %v583_v46 = vpop.permute.xlu0 %582  ;;  %v808_v50 = vpack.c.bf16 %v675_v23, %v671_v45  ;;  %v10815_v54 = vld [vmem:[#allocation36_spill] sm:$0xff] }
 0x15d   :  { %v590_v14 = vsel %vm586_vm5, %v10806_v26, %v585_v63  ;;  %v602_v40 = vsel %vm586_vm5, %v585_v63, %v7008_v12  ;;  %v589_v43 = vsel %vm586_vm5, %v10807_v51, %v583_v46  ;;  %v601_v62 = vsel %vm586_vm5, %v583_v46, %v10808_v21  ;;  %10810 = vst [vmem:[#allocation18_spill] sm:$0xff] %v7472_v44  ;;  %v10817_v21 = vld [vmem:[#allocation40_spill] sm:$0xff] }
 0x15e   :  { %v617_v41 = vmul.f32 %v590_v14, %v7432_v39  ;;  %v618_v3 = vmul.f32 %v602_v40, %v7436_v25  ;;  %v613_v17 = vmul.f32 %v589_v43, %v7432_v39  ;;  %v614_v31 = vmul.f32 %v601_v62, %v7436_v25  ;;  %1021 = vmatprep.subr.bf16.mxu1 %v808_v50  ;;  %v10816_v40 = vld [vmem:[#allocation39_spill] sm:$0xff] }
 0x15f   :  { %10811 = vst [vmem:[#allocation16_spill] sm:$0xff] %v7476_v28 }
 0x160   :  { %1022 = vmatpush2.bf16.msra.mxu1 %v807_v19  ;;  %v803_v35 = vpack.c.bf16 %v617_v41, %v613_v17  ;;  %v581_v12 = vpop.permute.xlu1 %580  ;;  %v579_v27 = vpop.permute.xlu0 %578  ;;  %v804_v47 = vpack.c.bf16 %v618_v3, %v614_v31 }
 0x161   :  { %v588_v61 = vsel %vm586_vm5, %v10812_v13, %v581_v12  ;;  %v600_v15 = vsel %vm586_vm5, %v581_v12, %v10813_v48  ;;  %v587_v32 = vsel %vm586_vm5, %v10814_v49, %v579_v27  ;;  %v599_v23 = vsel %vm586_vm5, %v579_v27, %v10815_v54 }
 0x162   :  { %v609_v58 = vmul.f32 %v588_v61, %v7432_v39  ;;  %v610_v45 = vmul.f32 %v600_v15, %v7436_v25  ;;  %v605_v19 = vmul.f32 %v587_v32, %v7432_v39  ;;  %v606_v63 = vmul.f32 %v599_v23, %v7436_v25  ;;  %1023 = vmatprep.subr.bf16.mxu1 %v804_v47  ;;  %v10819_v61 = vld [vmem:[#allocation43_spill] sm:$0xff] }
 0x164   :  { %1024 = vmatpush2.bf16.msra.mxu1 %v803_v35  ;;  %v799_v46 = vpack.c.bf16 %v609_v58, %v605_v19  ;;  %v520_v50 = vpop.permute.xlu1 %519  ;;  %v518_v26 = vpop.permute.xlu0 %517  ;;  %v800_v14 = vpack.c.bf16 %v610_v45, %v606_v63  ;;  %v6270_v63 = vld [vmem:[%s10491_s1 + $0x78] sm:$0xff] }
 0x165   :  { %v525_v51 = vsel %vm521_vm6, %v10816_v40, %v520_v50  ;;  %v537_v43 = vsel %vm521_vm6, %v520_v50, %v7082_v59  ;;  %v524_v62 = vsel %vm521_vm6, %v10817_v21, %v518_v26  ;;  %v536_v41 = vsel %vm521_vm6, %v518_v26, %v7084_v53  ;;  %v6272_v40 = vld [vmem:[%s10491_s1 + $0x70] sm:$0xff] }
 0x166   :  { %v552_v3 = vmul.f32 %v525_v51, %v7472_v44  ;;  %v553_v17 = vmul.f32 %v537_v43, %v7476_v28  ;;  %v548_v31 = vmul.f32 %v524_v62, %v7472_v44  ;;  %v549_v35 = vmul.f32 %v536_v41, %v7476_v28  ;;  %1025 = vmatprep.subr.bf16.mxu1 %v800_v14  ;;  %v6273_v51 = vld [vmem:[%s10491_s1 + $0x50] sm:$0xff] }
 0x167   :  { %v7534_v50 = vrot.slane %v7121_v22, %v7200_v24  ;;  %v787_v43 = vpack.c.bf16 %v6272_v40, %v6273_v51 }
 0x168   :  { %1026 = vmatpush2.bf16.msra.mxu1 %v799_v46  ;;  %v795_v12 = vpack.c.bf16 %v552_v3, %v548_v31  ;;  %v516_v59 = vpop.permute.xlu1 %515  ;;  %v514_v27 = vpop.permute.xlu0 %513  ;;  %v796_v47 = vpack.c.bf16 %v553_v17, %v549_v35  ;;  %v7556_v3 = vrot.slane %v7121_v22, %v7187_v34 }
 0x169   :  { %v523_v13 = vsel %vm521_vm6, %v10818_v60, %v516_v59  ;;  %v535_v53 = vsel %vm521_vm6, %v516_v59, %v7106_v16  ;;  %v522_v48 = vsel %vm521_vm6, %v10819_v61, %v514_v27  ;;  %v534_v15 = vsel %vm521_vm6, %v514_v27, %v7108_v10  ;;  %v6271_v10 = vld [vmem:[%s10491_s1 + $0x58] sm:$0xff]  ;;  %10820 = vst [vmem:[#allocation20_spill] sm:$0xff] %v7534_v50  ;;  %v6276_v27 = vld [vmem:[%s10491_s1 + $0x30] sm:$0xff] }
 0x16a   :  { %v544_v49 = vmul.f32 %v523_v13, %v7472_v44  ;;  %v545_v32 = vmul.f32 %v535_v53, %v7476_v28  ;;  %v540_v54 = vmul.f32 %v522_v48, %v7472_v44  ;;  %v541_v23 = vmul.f32 %v534_v15, %v7476_v28  ;;  %1027 = vmatprep.subr.bf16.mxu1 %v796_v47  ;;  %v10822_v13 = vld [vmem:[#allocation48_spill] sm:$0xff]  ;;  %v10823_v61 = vld [vmem:[#allocation49_spill] sm:$0xff] }
 0x16b   :  { %v788_v46 = vpack.c.bf16 %v6270_v63, %v6271_v10  ;;  %10821 = vst [vmem:[#allocation21_spill] sm:$0xff] %v7556_v3 }
 0x16c   :  { %1028 = vmatpush2.bf16.msra.mxu1 %v795_v12  ;;  %v791_v58 = vpack.c.bf16 %v544_v49, %v540_v54  ;;  %v715_v16 = vpop.permute.xlu1 %714  ;;  %v713_v45 = vpop.permute.xlu0 %712  ;;  %v792_v19 = vpack.c.bf16 %v545_v32, %v541_v23  ;;  %v10824_v23 = vld [vmem:[#allocation46_spill] sm:$0xff] }
 0x16d   :  { %v732_v26 = vsel %vm716_vm7, %v715_v16, %v7152_v9  ;;  %v731_v14 = vsel %vm716_vm7, %v713_v45, %v7154_v38  ;;  %v6274_v9 = vld [vmem:[%s10491_s1 + $0x38] sm:$0xff]  ;;  %v720_v35 = vsel %vm716_vm7, %v7134_v57, %v715_v16  ;;  %v719_v12 = vsel %vm716_vm7, %v7136_v0, %v713_v45  ;;  %v6277_v57 = vld [vmem:[%s10491_s1 + $0x10] sm:$0xff]  ;;  %v10825_v16 = vld [vmem:[#allocation47_spill] sm:$0xff] }
 0x16e   :  { %1029 = vmatprep.subr.bf16.mxu1 %v792_v19  ;;  %v6275_v38 = vld [vmem:[%s10491_s1 + $0x18] sm:$0xff]  ;;  %v748_v17 = vmul.f32 %v732_v26, %v7534_v50  ;;  %v744_v31 = vmul.f32 %v731_v14, %v7534_v50  ;;  %v783_v47 = vpack.c.bf16 %v6276_v27, %v6277_v57  ;;  %v747_v0 = vmul.f32 %v720_v35, %v7556_v3  ;;  %v10826_v19 = vld [vmem:[#allocation52_spill] sm:$0xff]  ;;  %v5498_v27 = vld [vmem:[%s10494_s4] sm:$0xff]  }
 0x16f   :  { %v784_v41 = vpack.c.bf16 %v6274_v9, %v6275_v38  ;;  %v743_v60 = vmul.f32 %v719_v12, %v7556_v3 }
 0x170   :  { %1030 = vmatpush2.bf16.msra.mxu1 %v791_v58  ;;  %v711_v21 = vpop.permute.xlu1 %710  ;;  %v709_v62 = vpop.permute.xlu0 %708 }
 0x171   :  { %1031 = vmatprep.subr.bf16.mxu1 %v788_v46  ;;  %v730_v59 = vsel %vm716_vm7, %v711_v21, %v7202_v36  ;;  %v729_v22 = vsel %vm716_vm7, %v709_v62, %v7204_v4  ;;  %v820_v36 = vpack.c.bf16 %v748_v17, %v744_v31  ;;  %v718_v4 = vsel %vm716_vm7, %v10822_v13, %v711_v21 }
 0x172   :  { %v740_v53 = vmul.f32 %v730_v59, %v7534_v50  ;;  %v717_v48 = vsel %vm716_vm7, %v10823_v61, %v709_v62  ;;  %v736_v15 = vmul.f32 %v729_v22, %v7534_v50  ;;  %v819_v49 = vpack.c.bf16 %v747_v0, %v743_v60 }
 0x173   :  { %v739_v32 = vmul.f32 %v718_v4, %v7556_v3  ;;  %v735_v54 = vmul.f32 %v717_v48, %v7556_v3 }
 0x174   :  { %1032 = vmatpush2.bf16.msra.mxu1 %v787_v43  ;;  %v816_v58 = vpack.c.bf16 %v740_v53, %v736_v15 }
 0x175   :  { %1033 = vmatprep.subr.bf16.mxu1 %v784_v41  ;;  %v815_v45 = vpack.c.bf16 %v739_v32, %v735_v54 }
 0x178   :  { %1034 = vmatpush2.bf16.msra.mxu1 %v783_v47 }
 0x179   :  { %1076 = vmatprep.subr.bf16.mxu1 %v820_v36 }
 0x17b   :  { %1036 = vmatmul.mubr.bf16.vlgmr.msra.gmra.mxu1 %v10824_v23 }
 0x17c   :  { %1077 = vmatpush1.bf16.msra.mxu1 %v819_v49  ;;  %1045 = vmatprep.mubr.bf16.mxu1 %v10825_v16 }
 0x17d   :  { %1078 = vmatprep.subr.bf16.mxu1 %v816_v58 }
 0x180   :  { %1079 = vmatpush1.bf16.msra.mxu1 %v815_v45 }
 0x183   :  { %1046 = vmatmul.mubr.bf16.gmra.mxu1 %v7192_v6 }
 0x184   :  { %1055 = vmatprep.mubr.bf16.mxu1 %v10826_v19 }
 0x18b   :  { %1056 = vmatmul.mubr.bf16.gmra.mxu1 %v7255_v5 }
 0x18c   :  { %1096 = vmatprep.mubr.bf16.mxu1 %v10784_v42 }
 0x193   :  { %5381 = vmatmul.mubr.msk.bf16.vlgmr.msra.gmra.mxu1 %vm871_vm8, %v7241_v8 }
 0x194   :  { %1106 = vmatprep.mubr.bf16.mxu1 %v10784_v42 }
 0x19b   :  { %5382 = vmatmul.mubr.msk.bf16.gmra.mxu1 %vm871_vm8, %v7292_v37 }
 0x19c   :  { %1116 = vmatprep.mubr.bf16.mxu1 %v10784_v42 }
 0x1a3   :  { %5383 = vmatmul.mubr.msk.bf16.gmra.mxu1 %vm871_vm8, %v7341_v52 }
 0x1a4   :  { %1196 = vmatprep.mubr.bf16.mxu1 %v10784_v42 }
 0x1e9   :  { %v915_v6 = vpop.f32.mrf.mxu0 }
 0x1eb   :  { %v917_v63 = vpop.f32.mrf.mxu0 }
 0x1ed   :  { %v919_v5 = vpop.f32.mrf.mxu0 }
 0x1ef   :  { %v7605_v10 = vpop.f32.mrf.mxu0 }
 0x1f0   :  { %10827 = vst [vmem:[#allocation27_spill] sm:$0xff] %v7605_v10 }
 0x1f1   :  { %v925_v46 = vpop.f32.mrf.mxu0 }
 0x1f3   :  { %v927_v26 = vpop.f32.mrf.mxu0 }
 0x1f5   :  { %v929_v8 = vpop.f32.mrf.mxu0 }
 0x1f7   :  { %v7607_v51 = vpop.f32.mrf.mxu0 }
 0x1f8   :  { %10828 = vst [vmem:[#allocation23_spill] sm:$0xff] %v7607_v51 }
 0x1fa   :  { %v976_v14 = vpop.f32.mrf.mxu1 }
 0x1fb   :  { %v977_v40 = vadd.f32 %v976_v14, %v915_v6  ;;  %v935_v62 = vpop.f32.mrf.mxu0  ;;  %v5499_v14 = vld [vmem:[%s10494_s4 + $0x8] ss:$0 sps:$4 sm:$0xff]  }
 0x1fc   :  { %v978_v37 = vpop.f32.mrf.mxu1 }
 0x1fd   :  { %v7609_v43 = vmax.f32 %v977_v40, 0.0  ;;  %v979_v21 = vadd.f32 %v978_v37, %v917_v63  ;;  %v937_v17 = vpop.f32.mrf.mxu0 }
 0x1fe   :  { %v980_v52 = vpop.f32.mrf.mxu1 }
 0x1ff   :  { %10829 = vst [vmem:[#allocation25_spill] sm:$0xff] %v7609_v43  ;;  %v1132_v9 = vpack.c.bf16 %v7609_v43, %v7609_v43  ;;  %v7613_v38 = vmax.f32 %v979_v21, 0.0  ;;  %v7615_v41 = vadd.f32 %v980_v52, %v919_v5  ;;  %v939_v12 = vpop.f32.mrf.mxu0 }
 0x200   :  { %v7617_v31 = vpop.f32.mrf.mxu1 }
 0x201   :  { %10830 = vst [vmem:[#allocation24_spill] sm:$0xff] %v7613_v38  ;;  %10831 = vst [vmem:[#allocation26_spill] sm:$0xff] %v7615_v41  ;;  %v1133_v35 = vpack.c.bf16 %v7613_v38, %v7613_v38  ;;  %v1153_v22 = vsel %vm1151_vm9, %v1132_v9, 0  ;;  %v940_v47 = vpop.f32.mrf.mxu0 }
 0x202   :  { %10832 = vst [vmem:[#allocation29_spill] sm:$0xff] %v7617_v31  ;;  %v986_v59 = vpop.f32.mrf.mxu1 }
 0x203   :  { %5386 = vmatprep.subr.msk.bf16.mxu1 %vm1151_vm9, %v1133_v35  ;;  %v7626_v57 = vadd.f32 %v986_v59, %v925_v46 }
 0x204   :  { %1179 = vmatpush1.bf16.msra.mxu1 %v1153_v22  ;;  %v988_v0 = vpop.f32.mrf.mxu1 }
 0x205   :  { %10833 = vst [vmem:[#allocation30_spill] sm:$0xff] %v7626_v57  ;;  %v7628_v60 = vadd.f32 %v988_v0, %v927_v26 }
 0x206   :  { %v990_v36 = vpop.f32.mrf.mxu1 }
 0x207   :  { %10834 = vst [vmem:[#allocation32_spill] sm:$0xff] %v7628_v60  ;;  %5387 = vmatmul.mubr.msk.bf16.vlgmr.msra.gmra.mxu1 %vm1144_vm10, %v5498_v27  ;;  %v7631_v13 = vadd.f32 %v990_v36, %v929_v8 }
 0x208   :  { %v7633_v4 = vpop.f32.mrf.mxu1  ;;  %1206 = vmatprep.mubr.bf16.mxu1 %v10784_v42 }
 0x209   :  { %10835 = vst [vmem:[#allocation37_spill] sm:$0xff] %v7631_v13  ;;  %10836 = vst [vmem:[#allocation33_spill] sm:$0xff] %v7633_v4 }
 0x20a   :  { %v996_v53 = vpop.f32.mrf.mxu1 }
 0x20b   :  { %v7636_v61 = vadd.f32 %v996_v53, %v935_v62 }
 0x20c   :  { %v998_v48 = vpop.f32.mrf.mxu1 }
 0x20d   :  { %10837 = vst [vmem:[#allocation35_spill] sm:$0xff] %v7636_v61  ;;  %v7638_v15 = vadd.f32 %v998_v48, %v937_v17 }
 0x20e   :  { %v1000_v49 = vpop.f32.mrf.mxu1 }
 0x20f   :  { %10838 = vst [vmem:[#allocation34_spill] sm:$0xff] %v7638_v15  ;;  %5388 = vmatmul.mubr.msk.bf16.gmra.mxu1 %vm1144_vm10, %v5499_v14 }
 0x210   :  { %v1001_v32 = vpop.f32.mrf.mxu1  ;;  %1396 = vmatprep.mubr.bf16.mxu1 %v10784_v42 }
 0x23b   :  { %v1037_v54 = vpop.f32.mrf.mxu1 }
 0x23d   :  { %v1039_v23 = vpop.f32.mrf.mxu1 }
 0x23f   :  { %v1041_v58 = vpop.f32.mrf.mxu1 }
 0x241   :  { %v7640_v16 = vpop.f32.mrf.mxu1 }
 0x242   :  { %10839 = vst [vmem:[#allocation36_spill] sm:$0xff] %v7640_v16 }
 0x243   :  { %v1047_v45 = vpop.f32.mrf.mxu1 }
 0x245   :  { %v1049_v19 = vpop.f32.mrf.mxu1 }
 0x247   :  { %v1051_v6 = vpop.f32.mrf.mxu1 }
 0x249   :  { %v7642_v63 = vpop.f32.mrf.mxu1 }
 0x24a   :  { %10840 = vst [vmem:[#allocation39_spill] sm:$0xff] %v7642_v63 }
 0x24b   :  { %v1057_v5 = vpop.f32.mrf.mxu1 }
 0x24d   :  { %v1059_v46 = vpop.f32.mrf.mxu1 }
 0x24f   :  { %v1061_v26 = vpop.f32.mrf.mxu1 }
 0x251   :  { %v1062_v8 = vpop.f32.mrf.mxu1 }
 0x253   :  { %v1098_v40 = vpop.f32.mrf.mxu1 }
 0x254   :  { %v1099_v37 = vadd.f32 %v1098_v40, %v1037_v54 }
 0x255   :  { %v1100_v21 = vpop.f32.mrf.mxu1 }
 0x256   :  { %v7649_v62 = vmax.f32 %v1099_v37, 0.0  ;;  %v1101_v52 = vadd.f32 %v1100_v21, %v1039_v23 }
 0x257   :  { %v1102_v9 = vpop.f32.mrf.mxu1 }
 0x258   :  { %10841 = vst [vmem:[#allocation40_spill] sm:$0xff] %v7649_v62  ;;  %v1134_v17 = vpack.c.bf16 %v7649_v62, %v7649_v62  ;;  %v7653_v35 = vmax.f32 %v1101_v52, 0.0  ;;  %v7655_v12 = vadd.f32 %v1102_v9, %v1041_v58 }
 0x259   :  { %v7657_v59 = vpop.f32.mrf.mxu1 }
 0x25a   :  { %10842 = vst [vmem:[#allocation42_spill] sm:$0xff] %v7653_v35  ;;  %10843 = vst [vmem:[#allocation43_spill] sm:$0xff] %v7655_v12  ;;  %v1135_v22 = vpack.c.bf16 %v7653_v35, %v7653_v35  ;;  %v1159_v47 = vsel %vm1151_vm9, %v1134_v17, 0 }
 0x25b   :  { %10844 = vst [vmem:[#allocation48_spill] sm:$0xff] %v7657_v59  ;;  %v1108_v0 = vpop.f32.mrf.mxu1 }
 0x25c   :  { %v7662_v36 = vadd.f32 %v1108_v0, %v1047_v45  ;;  %5389 = vmatprep.subr.msk.bf16.mxu0 %vm1151_vm9, %v1135_v22 }
 0x25d   :  { %v1110_v53 = vpop.f32.mrf.mxu1  ;;  %1230 = vmatpush1.bf16.msra.mxu0 %v1159_v47 }
 0x25e   :  { %10845 = vst [vmem:[#allocation49_spill] sm:$0xff] %v7662_v36  ;;  %v7665_v48 = vadd.f32 %v1110_v53, %v1049_v19 }
 0x25f   :  { %v1112_v49 = vpop.f32.mrf.mxu1 }
 0x260   :  { %10846 = vst [vmem:[#allocation46_spill] sm:$0xff] %v7665_v48  ;;  %v7667_v32 = vadd.f32 %v1112_v49, %v1051_v6  ;;  %5390 = vmatmul.mubr.msk.bf16.vlgmr.msra.gmra.mxu0 %vm1144_vm10, %v5498_v27 }
 0x261   :  { %v7670_v54 = vpop.f32.mrf.mxu1  ;;  %1257 = vmatprep.mubr.bf16.mxu0 %v10784_v42 }
 0x262   :  { %10847 = vst [vmem:[#allocation47_spill] sm:$0xff] %v7667_v32  ;;  %10848 = vst [vmem:[#allocation52_spill] sm:$0xff] %v7670_v54 }
 0x263   :  { %v1118_v23 = vpop.f32.mrf.mxu1 }
 0x264   :  { %v7673_v58 = vadd.f32 %v1118_v23, %v1057_v5 }
 0x265   :  { %v1120_v45 = vpop.f32.mrf.mxu1 }
 0x266   :  { %10849 = vst [vmem:[#allocation61_spill] sm:$0xff] %v7673_v58  ;;  %v7675_v26 = vadd.f32 %v1120_v45, %v1059_v46 }
 0x267   :  { %v1122_v8 = vpop.f32.mrf.mxu1 }
 0x268   :  { %10850 = vst [vmem:[#allocation62_spill] sm:$0xff] %v7675_v26  ;;  %5391 = vmatmul.mubr.msk.bf16.gmra.mxu0 %vm1144_vm10, %v5499_v14 }
 0x269   :  { %v1123_v19 = vpop.f32.mrf.mxu1  ;;  %2228 = vmatprep.mubr.bf16.mxu0 %v10784_v42 }
 0x2c7   :  { %v1198_v6 = vpop.f32.mrf.mxu1 }
 0x2c8   :  { %v1266_v40 = vpack.c.bf16 %v1198_v6, %v1198_v6 }
 0x2c9   :  { %v1200_v37 = vpop.f32.mrf.mxu1 }
 0x2ca   :  { %1278 = vxpose.xlu0.c.b16.start.end [1/1] (short) %v1266_v40, 128  ;;  %v1267_v27 = vpack.c.bf16 %v1200_v37, %v1200_v37 }
 0x2cb   :  { %v1202_v21 = vpop.f32.mrf.mxu1 }
 0x2cc   :  { %v1270_v52 = vpack.c.bf16 %v1202_v21, %v1202_v21  ;;  %1294 = vxpose.xlu1.c.b16.start.end [1/1] (short) %v1267_v27, 128 }
 0x2cd   :  { %v1204_v9 = vpop.f32.mrf.mxu1 }
 0x2ce   :  { %v1271_v5 = vpack.c.bf16 %v1204_v9, %v1204_v9  ;;  %v1359_v17 = vsel %vm1151_vm9, %v1270_v52, 0 }
 0x2cf   :  { %v7681_v46 = vpop.f32.mrf.mxu1 }
 0x2d0   :  { %5392 = vmatprep.subr.msk.bf16.mxu1 %vm1151_vm9, %v1271_v5  ;;  %10851 = vst [vmem:[#allocation63_spill] sm:$0xff] %v7681_v46 }
 0x2d1   :  { %1379 = vmatpush1.bf16.msra.mxu1 %v1359_v17  ;;  %v1210_v14 = vpop.f32.mrf.mxu1 }
 0x2d3   :  { %v1212_v22 = vpop.f32.mrf.mxu1 }
 0x2d4   :  { %v1275_v22 = vpack.c.bf16 %v1210_v14, %v1210_v14 }
 0x2d5   :  { %v1213_v47 = vpop.f32.mrf.mxu1 }
 0x32c   :  { %v1286_v0 = vpop.trf.xlu0 }
 0x32d   :  { %5393 = vmatmul.mubr.msk.bf16.vlgmr.msra.gmra.mxu1 %vm1144_vm10, %v1286_v0 }
 0x32e   :  { %1406 = vmatprep.mubr.bf16.mxu1 %v10784_v42  ;;  %v1302_v40 = vpop.trf.xlu1 }
 0x330   :  { %v1287_v53 = vpop.trf.xlu0 }
 0x332   :  { %v1303_v37 = vpop.trf.xlu1 }
 0x334   :  { %v1288_v49 = vpop.trf.xlu0 }
 0x335   :  { %5394 = vmatmul.mubr.msk.bf16.gmra.mxu1 %vm1144_vm10, %v1287_v53 }
 0x336   :  { %1416 = vmatprep.mubr.bf16.mxu1 %v10784_v42  ;;  %v1304_v27 = vpop.trf.xlu1 }
 0x338   :  { %v1289_v23 = vpop.trf.xlu0 }
 0x33a   :  { %v1305_v21 = vpop.trf.xlu1 }
 0x33c   :  { %v1290_v45 = vpop.trf.xlu0 }
 0x33d   :  { %5395 = vmatmul.mubr.msk.bf16.gmra.mxu1 %vm1144_vm10, %v1288_v49 }
 0x33e   :  { %1426 = vmatprep.mubr.bf16.mxu1 %v10784_v42  ;;  %v1306_v52 = vpop.trf.xlu1 }
 0x340   :  { %v1291_v8 = vpop.trf.xlu0 }
 0x342   :  { %v1307_v9 = vpop.trf.xlu1 }
 0x344   :  { %v1292_v19 = vpop.trf.xlu0 }
 0x345   :  { %5396 = vmatmul.mubr.msk.bf16.gmra.mxu1 %vm1144_vm10, %v1289_v23 }
 0x346   :  { %1436 = vmatprep.mubr.bf16.mxu1 %v10784_v42  ;;  %v1308_v5 = vpop.trf.xlu1 }
 0x348   :  { %v1293_v6 = vpop.trf.xlu0 }
 0x34a   :  { %v1309_v17 = vpop.trf.xlu1 }
 0x34d   :  { %5397 = vmatmul.mubr.msk.bf16.gmra.mxu1 %vm1144_vm10, %v1290_v45 }
 0x34e   :  { %1446 = vmatprep.mubr.bf16.mxu1 %v10784_v42 }
 0x355   :  { %5398 = vmatmul.mubr.msk.bf16.gmra.mxu1 %vm1144_vm10, %v1291_v8 }
 0x356   :  { %1456 = vmatprep.mubr.bf16.mxu1 %v10784_v42 }
 0x35d   :  { %5399 = vmatmul.mubr.msk.bf16.gmra.mxu1 %vm1144_vm10, %v1292_v19 }
 0x35e   :  { %1466 = vmatprep.mubr.bf16.mxu1 %v10784_v42 }
 0x365   :  { %5400 = vmatmul.mubr.msk.bf16.gmra.mxu1 %vm1144_vm10, %v1293_v6 }
 0x366   :  { %1476 = vmatprep.mubr.bf16.mxu1 %v10784_v42 }
 0x36d   :  { %5401 = vmatmul.mubr.msk.bf16.gmra.mxu1 %vm1144_vm10, %v1302_v40 }
 0x36e   :  { %1486 = vmatprep.mubr.bf16.mxu1 %v10784_v42 }
 0x375   :  { %5402 = vmatmul.mubr.msk.bf16.gmra.mxu1 %vm1144_vm10, %v1303_v37 }
 0x376   :  { %1496 = vmatprep.mubr.bf16.mxu1 %v10784_v42 }
 0x37d   :  { %5403 = vmatmul.mubr.msk.bf16.gmra.mxu1 %vm1144_vm10, %v1304_v27 }
 0x37e   :  { %1506 = vmatprep.mubr.bf16.mxu1 %v10784_v42 }
 0x385   :  { %5404 = vmatmul.mubr.msk.bf16.gmra.mxu1 %vm1144_vm10, %v1305_v21 }
 0x386   :  { %1516 = vmatprep.mubr.bf16.mxu1 %v10784_v42 }
 0x38d   :  { %5405 = vmatmul.mubr.msk.bf16.gmra.mxu1 %vm1144_vm10, %v1306_v52 }
 0x38e   :  { %1526 = vmatprep.mubr.bf16.mxu1 %v10784_v42 }
 0x395   :  { %5406 = vmatmul.mubr.msk.bf16.gmra.mxu1 %vm1144_vm10, %v1307_v9 }
 0x396   :  { %1536 = vmatprep.mubr.bf16.mxu1 %v10784_v42 }
 0x39d   :  { %5407 = vmatmul.mubr.msk.bf16.gmra.mxu1 %vm1144_vm10, %v1308_v5 }
 0x39e   :  { %1546 = vmatprep.mubr.bf16.mxu1 %v10784_v42 }
 0x3a5   :  { %5408 = vmatmul.mubr.msk.bf16.gmra.mxu1 %vm1144_vm10, %v1309_v17 }
 0x3a6   :  { %2101 = vmatprep.mubr.bf16.mxu1 %v1275_v22 }
 0x3ed   :  { %v7714_v47 = vpop.f32.mrf.mxu1 }
 0x3ef   :  { %v7716_v0 = vpop.f32.mrf.mxu1 }
 0x3f0   :  { %v1557_v11 = vmax.f32 %v7714_v47, %v7716_v0 }
 0x3f1   :  { %v7718_v53 = vpop.f32.mrf.mxu1 }
 0x3f3   :  { %v7720_v49 = vpop.f32.mrf.mxu1 }
 0x3f4   :  { %10852 = vst [vmem:[#allocation64_spill] sm:$0xff] %v7720_v49  ;;  %v1560_v28 = vmax.f32 %v7718_v53, %v7720_v49 }
 0x3f5   :  { %v7722_v23 = vpop.f32.mrf.mxu1 }
 0x3f7   :  { %v7724_v45 = vpop.f32.mrf.mxu1 }
 0x3f8   :  { %v1563_v2 = vmax.f32 %v7722_v23, %v7724_v45 }
 0x3f9   :  { %v7726_v8 = vpop.f32.mrf.mxu1 }
 0x3fb   :  { %v7728_v19 = vpop.f32.mrf.mxu1 }
 0x3fd   :  { %v7730_v14 = vpop.f32.mrf.mxu1 }
 0x3ff   :  { %v7732_v6 = vpop.f32.mrf.mxu1 }
 0x400   :  { %v1569_v20 = vmax.f32 %v7730_v14, %v7732_v6 }
 0x401   :  { %v7734_v40 = vpop.f32.mrf.mxu1 }
 0x403   :  { %v7736_v37 = vpop.f32.mrf.mxu1 }
 0x405   :  { %v7738_v27 = vpop.f32.mrf.mxu1 }
 0x407   :  { %v7740_v21 = vpop.f32.mrf.mxu1 }
 0x408   :  { %v1575_v55 = vmax.f32 %v7738_v27, %v7740_v21 }
 0x409   :  { %v7742_v52 = vpop.f32.mrf.mxu1 }
 0x40b   :  { %v7744_v9 = vpop.f32.mrf.mxu1 }
 0x40d   :  { %v7746_v5 = vpop.f32.mrf.mxu1 }
 0x40f   :  { %v7748_v17 = vpop.f32.mrf.mxu1 }
 0x410   :  { %v1581_v10 = vmax.f32 %v7746_v5, %v7748_v17 }
 0x411   :  { %v7750_v22 = vpop.f32.mrf.mxu1 }
 0x413   :  { %v7752_v26 = vpop.f32.mrf.mxu1 }
 0x415   :  { %v7754_v58 = vpop.f32.mrf.mxu1 }
 0x417   :  { %v7756_v32 = vpop.f32.mrf.mxu1 }
 0x418   :  { %v1587_v57 = vmax.f32 %v7754_v58, %v7756_v32 }
 0x419   :  { %v7758_v54 = vpop.f32.mrf.mxu1 }
 0x41b   :  { %v7760_v63 = vpop.f32.mrf.mxu1 }
 0x41d   :  { %v7762_v48 = vpop.f32.mrf.mxu1 }
 0x41f   :  { %v7764_v36 = vpop.f32.mrf.mxu1 }
 0x420   :  { %v1593_v13 = vmax.f32 %v7762_v48, %v7764_v36 }
 0x421   :  { %v7766_v24 = vpop.f32.mrf.mxu1 }
 0x423   :  { %v7768_v34 = vpop.f32.mrf.mxu1 }
 0x425   :  { %v7770_v12 = vpop.f32.mrf.mxu1 }
 0x427   :  { %v7772_v59 = vpop.f32.mrf.mxu1 }
 0x428   :  { %v1599_v16 = vmax.f32 %v7770_v12, %v7772_v59 }
 0x429   :  { %v7776_v15 = vpop.f32.mrf.mxu1 }
 0x42a   :  { %1600 = vmax.xlane.f32.xlu0 %v1599_v16  ;;  %v1596_v16 = vmax.f32 %v7766_v24, %v7768_v34 }
 0x42b   :  { %v7778_v61 = vpop.f32.mrf.mxu1 }
 0x42c   :  { %v1602_v4 = vmax.f32 %v7776_v15, %v7778_v61 }
 0x42d   :  { %v7784_v51 = vpop.f32.mrf.mxu1 }
 0x42e   :  { %10853 = vst [vmem:[#allocation65_spill] sm:$0xff] %v7784_v51  ;;  %1594 = vmax.xlane.f32.xlu0 %v1593_v13  ;;  %1603 = vmax.xlane.f32.xlu1 %v1602_v4  ;;  %v1590_v13 = vmax.f32 %v7758_v54, %v7760_v63 }
 0x42f   :  { %v7786_v60 = vpop.f32.mrf.mxu1 }
 0x430   :  { %10854 = vst [vmem:[#allocation66_spill] sm:$0xff] %v7786_v60 }
 0x431   :  { %v7792_v41 = vpop.f32.mrf.mxu1 }
 0x432   :  { %10855 = vst [vmem:[#allocation67_spill] sm:$0xff] %v7792_v41  ;;  %1597 = vmax.xlane.f32.xlu0 %v1596_v16  ;;  %1588 = vmax.xlane.f32.xlu1 %v1587_v57  ;;  %v1584_v57 = vmax.f32 %v7750_v22, %v7752_v26 }
 0x433   :  { %v7794_v31 = vpop.f32.mrf.mxu1 }
 0x434   :  { %10856 = vst [vmem:[#allocation68_spill] sm:$0xff] %v7794_v31 }
 0x435   :  { %v7800_v4 = vpop.f32.mrf.mxu1 }
 0x436   :  { %1591 = vmax.xlane.f32.xlu0 %v1590_v13  ;;  %1582 = vmax.xlane.f32.xlu1 %v1581_v10  ;;  %v1578_v10 = vmax.f32 %v7742_v52, %v7744_v9 }
 0x437   :  { %v7802_v30 = vpop.f32.mrf.mxu1 }
 0x439   :  { %v7808_v16 = vpop.f32.mrf.mxu1 }
 0x43a   :  { %1585 = vmax.xlane.f32.xlu0 %v1584_v57  ;;  %1576 = vmax.xlane.f32.xlu1 %v1575_v55  ;;  %v1572_v55 = vmax.f32 %v7734_v40, %v7736_v37 }
 0x43b   :  { %v7810_v7 = vpop.f32.mrf.mxu1 }
 0x43d   :  { %v7816_v13 = vpop.f32.mrf.mxu1 }
 0x43e   :  { %1579 = vmax.xlane.f32.xlu0 %v1578_v10  ;;  %1570 = vmax.xlane.f32.xlu1 %v1569_v20  ;;  %v1566_v20 = vmax.f32 %v7726_v8, %v7728_v19 }
 0x43f   :  { %v7818_v33 = vpop.f32.mrf.mxu1 }
 0x441   :  { %v7824_v57 = vpop.f32.mrf.mxu1 }
 0x442   :  { %1573 = vmax.xlane.f32.xlu0 %v1572_v55  ;;  %1564 = vmax.xlane.f32.xlu1 %v1563_v2 }
 0x443   :  { %v7826_v1 = vpop.f32.mrf.mxu1 }
 0x445   :  { %v7832_v10 = vpop.f32.mrf.mxu1 }
 0x446   :  { %1567 = vmax.xlane.f32.xlu0 %v1566_v20  ;;  %1558 = vmax.xlane.f32.xlu1 %v1557_v11 }
 0x447   :  { %v7834_v44 = vpop.f32.mrf.mxu1 }
 0x449   :  { %v7838_v56 = vpop.f32.mrf.mxu1 }
 0x44a   :  { %1561 = vmax.xlane.f32.xlu0 %v1560_v28 }
 0x44b   :  { %v7840_v2 = vpop.f32.mrf.mxu1 }
 0x44d   :  { %v7842_v55 = vpop.f32.mrf.mxu1 }
 0x44f   :  { %v7844_v39 = vpop.f32.mrf.mxu1 }
 0x450   :  { %10857 = vst [vmem:[#allocation69_spill] sm:$0xff] %v7844_v39 }
 0x451   :  { %v7846_v29 = vpop.f32.mrf.mxu1 }
 0x452   :  { %10858 = vst [vmem:[#allocation70_spill] sm:$0xff] %v7846_v29 }
 0x453   :  { %v7848_v25 = vpop.f32.mrf.mxu1 }
 0x454   :  { %10859 = vst [vmem:[#allocation71_spill] sm:$0xff] %v7848_v25 }
 0x455   :  { %v7850_v20 = vpop.f32.mrf.mxu1 }
 0x456   :  { %10860 = vst [vmem:[#allocation72_spill] sm:$0xff] %v7850_v20 }
 0x457   :  { %v7852_v11 = vpop.f32.mrf.mxu1 }
 0x458   :  { %10861 = vst [vmem:[#allocation73_spill] sm:$0xff] %v7852_v11  ;;  %v1635_v60 = vmax.f32 %v7850_v20, %v7852_v11 }
 0x459   :  { %v7854_v50 = vpop.f32.mrf.mxu1 }
 0x45b   :  { %v7856_v3 = vpop.f32.mrf.mxu1 }
 0x45c   :  { %10862 = vst [vmem:[#allocation74_spill] sm:$0xff] %v7856_v3 }
 0x45d   :  { %v7858_v18 = vpop.f32.mrf.mxu1 }
 0x45f   :  { %v7860_v28 = vpop.f32.mrf.mxu1 }
 0x460   :  { %10863 = vst [vmem:[#allocation75_spill] sm:$0xff] %v7860_v28  ;;  %v1641_v41 = vmax.f32 %v7858_v18, %v7860_v28  ;;  %v1638_v28 = vmax.f32 %v7854_v50, %v7856_v3 }
 0x461   :  { %v7862_v35 = vpop.f32.mrf.mxu1 }
 0x462   :  { %10864 = vst [vmem:[#allocation76_spill] sm:$0xff] %v7862_v35 }
 0x463   :  { %v7864_v62 = vpop.f32.mrf.mxu1 }
 0x464   :  { %10865 = vst [vmem:[#allocation77_spill] sm:$0xff] %v7864_v62  ;;  %v1644_v49 = vmax.f32 %v7862_v35, %v7864_v62 }
 0x465   :  { %v7866_v38 = vpop.f32.mrf.mxu1 }
 0x467   :  { %v7868_v43 = vpop.f32.mrf.mxu1 }
 0x468   :  { %10866 = vst [vmem:[#allocation78_spill] sm:$0xff] %v7868_v43  ;;  %v1647_v46 = vmax.f32 %v7866_v38, %v7868_v43  ;;  %v1629_v43 = vmax.f32 %v7842_v55, %v7844_v39 }
 0x469   :  { %v7872_v42 = vpop.f32.mrf.mxu1 }
 0x46a   :  { %1648 = vmax.xlane.f32.xlu1 %v1647_v46  ;;  %v1632_v46 = vmax.f32 %v7846_v29, %v7848_v25 }
 0x46b   :  { %v7876_v31 = vpop.f32.mrf.mxu1 }
 0x46c   :  { %v1650_v51 = vmax.f32 %v7872_v42, %v7876_v31 }
 0x46e   :  { %1642 = vmax.xlane.f32.xlu1 %v1641_v41  ;;  %1651 = vmax.xlane.f32.xlu0 %v1650_v51 }
 0x472   :  { %1636 = vmax.xlane.f32.xlu1 %v1635_v60  ;;  %1645 = vmax.xlane.f32.xlu0 %v1644_v49 }
 0x476   :  { %1630 = vmax.xlane.f32.xlu1 %v1629_v43  ;;  %1639 = vmax.xlane.f32.xlu0 %v1638_v28 }
 0x47a   :  { %1633 = vmax.xlane.f32.xlu0 %v1632_v46 }
 0x4b3   :  { %v1601_v11 = vpop.xlane.xlu0 %1600 }
 0x4b4   :  { %v1681_v20 = vsub.f32 %v7770_v12, %v1601_v11  ;;  %v1682_v41 = vsub.f32 %v7772_v59, %v1601_v11 }
 0x4b6   :  { %v1773_v51 = vmul.f32 1.442695, %v1681_v20  ;;  %v1775_v62 = vmul.f32 1.442695, %v1682_v41 }
 0x4b7   :  { %v1595_v35 = vpop.xlane.xlu0 %1594  ;;  %v1604_v39 = vpop.xlane.xlu1 %1603 }
 0x4b8   :  { %5502 = vpow2.f32 %v1773_v51  ;;  %v1677_v3 = vsub.f32 %v7762_v48, %v1595_v35  ;;  %v1678_v60 = vsub.f32 %v7764_v36, %v1595_v35  ;;  %v1683_v49 = vsub.f32 %v7776_v15, %v1604_v39 }
 0x4b9   :  { %5504 = vpow2.f32 %v1775_v62  ;;  %v1684_v43 = vsub.f32 %v7778_v61, %v1604_v39 }
 0x4ba   :  { %v1765_v28 = vmul.f32 1.442695, %v1677_v3  ;;  %v1767_v46 = vmul.f32 1.442695, %v1678_v60  ;;  %v1777_v25 = vmul.f32 1.442695, %v1683_v49 }
 0x4bb   :  { %v1779_v12 = vmul.f32 1.442695, %v1684_v43  ;;  %v1598_v29 = vpop.xlane.xlu0 %1597  ;;  %v1589_v59 = vpop.xlane.xlu1 %1588 }
 0x4bc   :  { %5506 = vpow2.f32 %v1765_v28  ;;  %v1679_v20 = vsub.f32 %v7766_v24, %v1598_v29  ;;  %v1680_v11 = vsub.f32 %v7768_v34, %v1598_v29  ;;  %v1673_v35 = vsub.f32 %v7754_v58, %v1589_v59 }
 0x4bd   :  { %5508 = vpow2.f32 %v1767_v46  ;;  %v1674_v15 = vsub.f32 %v7756_v32, %v1589_v59 }
 0x4be   :  { %5510 = vpow2.f32 %v1777_v25  ;;  %v1769_v3 = vmul.f32 1.442695, %v1679_v20  ;;  %v1771_v61 = vmul.f32 1.442695, %v1680_v11  ;;  %v1757_v36 = vmul.f32 1.442695, %v1673_v35 }
 0x4bf   :  { %5512 = vpow2.f32 %v1779_v12  ;;  %v1592_v62 = vpop.xlane.xlu0 %1591  ;;  %v1583_v39 = vpop.xlane.xlu1 %1582  ;;  %v1759_v48 = vmul.f32 1.442695, %v1674_v15  ;;  %v1623_v12 = vmax.f32 %v7832_v10, %v7834_v44 }
 0x4c0   :  { %5514 = vpow2.f32 %v1769_v3  ;;  %v1675_v41 = vsub.f32 %v7758_v54, %v1592_v62  ;;  %v1676_v24 = vsub.f32 %v7760_v63, %v1592_v62  ;;  %v1669_v32 = vsub.f32 %v7746_v5, %v1583_v39 }
 0x4c1   :  { %5516 = vpow2.f32 %v1771_v61  ;;  %v1670_v58 = vsub.f32 %v7748_v17, %v1583_v39 }
 0x4c2   :  { %5518 = vpow2.f32 %v1757_v36  ;;  %v1761_v49 = vmul.f32 1.442695, %v1675_v41  ;;  %v1763_v43 = vmul.f32 1.442695, %v1676_v24  ;;  %v1749_v63 = vmul.f32 1.442695, %v1669_v32 }
 0x4c3   :  { %v1586_v34 = vpop.xlane.xlu0 %1585  ;;  %v1577_v29 = vpop.xlane.xlu1 %1576  ;;  %5520 = vpow2.f32 %v1759_v48  ;;  %v1751_v5 = vmul.f32 1.442695, %v1670_v58 }
 0x4c4   :  { %5522 = vpow2.f32 %v1761_v49  ;;  %v1671_v11 = vsub.f32 %v7750_v22, %v1586_v34  ;;  %v1672_v35 = vsub.f32 %v7752_v26, %v1586_v34  ;;  %v1665_v62 = vsub.f32 %v7738_v27, %v1577_v29 }
 0x4c5   :  { %v7901_v51 = vpop.eup %5502  ;;  %5524 = vpow2.f32 %v1763_v43  ;;  %v1666_v39 = vsub.f32 %v7740_v21, %v1577_v29  ;;  %v1626_v26 = vmax.f32 %v7838_v56, %v7840_v2  ;;  %v1617_v29 = vmax.f32 %v7816_v13, %v7818_v33 }
 0x4c6   :  { %v7904_v25 = vpop.eup %5504  ;;  %5526 = vpow2.f32 %v1749_v63  ;;  %v1753_v61 = vmul.f32 1.442695, %v1671_v11  ;;  %v1755_v22 = vmul.f32 1.442695, %v1672_v35  ;;  %v1741_v27 = vmul.f32 1.442695, %v1665_v62 }
 0x4c7   :  { %v1887_v60 = vadd.f32 %v7904_v25, %v7901_v51  ;;  %v1580_v59 = vpop.xlane.xlu0 %1579  ;;  %v1571_v20 = vpop.xlane.xlu1 %1570  ;;  %5528 = vpow2.f32 %v1751_v5  ;;  %v1743_v32 = vmul.f32 1.442695, %v1666_v39 }
 0x4c8   :  { %v1661_v34 = vsub.f32 %v7730_v14, %v1571_v20  ;;  %v1662_v58 = vsub.f32 %v7732_v6, %v1571_v20  ;;  %5530 = vpow2.f32 %v1753_v61  ;;  %v1667_v49 = vsub.f32 %v7742_v52, %v1580_v59 }
 0x4c9   :  { %v7910_v54 = vpop.eup %5506  ;;  %1888 = vadd.xlane.f32.xlu1 %v1887_v60  ;;  %5532 = vpow2.f32 %v1755_v22  ;;  %v1668_v43 = vsub.f32 %v7744_v9, %v1580_v59 }
 0x4ca   :  { %v7912_v28 = vpop.eup %5508  ;;  %5534 = vpow2.f32 %v1741_v27  ;;  %v1733_v63 = vmul.f32 1.442695, %v1661_v34  ;;  %v1735_v5 = vmul.f32 1.442695, %v1662_v58  ;;  %v1745_v35 = vmul.f32 1.442695, %v1667_v49 }
 0x4cb   :  { %v7914_v46 = vpop.eup %5510  ;;  %v1881_v3 = vadd.f32 %v7912_v28, %v7910_v54  ;;  %v1574_v48 = vpop.xlane.xlu0 %1573  ;;  %5536 = vpow2.f32 %v1743_v32  ;;  %v1747_v62 = vmul.f32 1.442695, %v1668_v43 }
 0x4cc   :  { %v7918_v17 = vpop.eup %5512  ;;  %v1565_v41 = vpop.xlane.xlu1 %1564  ;;  %v1663_v9 = vsub.f32 %v7734_v40, %v1574_v48  ;;  %5538 = vpow2.f32 %v1733_v63  ;;  %v1611_v40 = vmax.f32 %v7800_v4, %v7802_v30  ;;  %v10867_v63 = vld [vmem:[#allocation64_spill] sm:$0xff] }
 0x4cd   :  { %1624 = vmax.xlane.f32.xlu1 %v1623_v12  ;;  %v1890_v15 = vadd.f32 %v7918_v17, %v7914_v46  ;;  %v7928_v36 = vpop.eup %5514  ;;  %v1657_v12 = vsub.f32 %v7722_v23, %v1565_v41  ;;  %v1658_v6 = vsub.f32 %v7724_v45, %v1565_v41  ;;  %v1664_v23 = vsub.f32 %v7736_v37, %v1574_v48 }
 0x4ce   :  { %v7932_v24 = vpop.eup %5516  ;;  %5540 = vpow2.f32 %v1735_v5  ;;  %v1737_v37 = vmul.f32 1.442695, %v1663_v9 }
 0x4cf   :  { %1891 = vadd.xlane.f32.xlu0 %v1890_v15  ;;  %v7935_v21 = vpop.eup %5518  ;;  %v1884_v14 = vadd.f32 %v7932_v24, %v7928_v36  ;;  %v1568_v20 = vpop.xlane.xlu0 %1567  ;;  %v1620_v15 = vmax.f32 %v7824_v57, %v7826_v1  ;;  %v1725_v45 = vmul.f32 1.442695, %v1657_v12  ;;  %5542 = vpow2.f32 %v1745_v35 }
 0x4d0   :  { %v7940_v60 = vpop.eup %5520  ;;  %v1559_v11 = vpop.xlane.xlu1 %1558  ;;  %v1659_v48 = vsub.f32 %v7726_v8, %v1568_v20  ;;  %5544 = vpow2.f32 %v1747_v62  ;;  %v1739_v27 = vmul.f32 1.442695, %v1664_v23 }
 0x4d1   :  { %1882 = vadd.xlane.f32.xlu1 %v1881_v3  ;;  %v1875_v52 = vadd.f32 %v7940_v60, %v7935_v21  ;;  %v7951_v59 = vpop.eup %5522  ;;  %v1653_v3 = vsub.f32 %v7714_v47, %v1559_v11  ;;  %v1654_v22 = vsub.f32 %v7716_v0, %v1559_v11  ;;  %v1660_v47 = vsub.f32 %v7728_v19, %v1568_v20  ;;  %v10868_v20 = vld [vmem:[#allocation66_spill] sm:$0xff]  ;;  %v10869_v11 = vld [vmem:[#allocation65_spill] sm:$0xff] }
 0x4d2   :  { %v7956_v39 = vpop.eup %5524  ;;  %5546 = vpow2.f32 %v1725_v45  ;;  %v1729_v49 = vmul.f32 1.442695, %v1659_v48  ;;  %v1614_v19 = vmax.f32 %v7808_v16, %v7810_v7 }
 0x4d3   :  { %1627 = vmax.xlane.f32.xlu0 %v1626_v26  ;;  %v7959_v61 = vpop.eup %5526  ;;  %v1727_v26 = vmul.f32 1.442695, %v1658_v6  ;;  %v1562_v34 = vpop.xlane.xlu0 %1561  ;;  %v1717_v32 = vmul.f32 1.442695, %v1653_v3  ;;  %v1719_v0 = vmul.f32 1.442695, %v1654_v22 }
 0x4d4   :  { %v7964_v41 = vpop.eup %5528  ;;  %v1655_v8 = vsub.f32 %v7718_v53, %v1562_v34  ;;  %v1656_v12 = vsub.f32 %v10867_v63, %v1562_v34 }
 0x4d5   :  { %1618 = vmax.xlane.f32.xlu1 %v1617_v29  ;;  %v1878_v29 = vadd.f32 %v7956_v39, %v7951_v59  ;;  %5548 = vpow2.f32 %v1727_v26  ;;  %v1869_v58 = vadd.f32 %v7964_v41, %v7959_v61  ;;  %v7973_v43 = vpop.eup %5530  ;;  %v10872_v26 = vld [vmem:[#allocation67_spill] sm:$0xff] }
 0x4d6   :  { %5550 = vpow2.f32 %v1737_v37  ;;  %v7978_v5 = vpop.eup %5532  ;;  %v1721_v35 = vmul.f32 1.442695, %v1655_v8  ;;  %v1723_v9 = vmul.f32 1.442695, %v1656_v12 }
 0x4d7   :  { %1885 = vadd.xlane.f32.xlu0 %v1884_v14  ;;  %5552 = vpow2.f32 %v1739_v27  ;;  %v1731_v14 = vmul.f32 1.442695, %v1660_v47  ;;  %v7980_v6 = vpop.eup %5534 }
 0x4d8   :  { %5554 = vpow2.f32 %v1717_v32  ;;  %v7984_v53 = vpop.eup %5536 }
 0x4d9   :  { %1876 = vadd.xlane.f32.xlu1 %v1875_v52  ;;  %v1605_v52 = vmax.f32 %v10869_v11, %v10868_v20  ;;  %5556 = vpow2.f32 %v1719_v0  ;;  %v7988_v62 = vpop.eup %5538  ;;  %v1863_v23 = vadd.f32 %v7984_v53, %v7980_v6 }
 0x4da   :  { %5558 = vpow2.f32 %v1729_v49  ;;  %10870 = vst [vmem:[#allocation64_spill] sm:$0xff] %v7988_v62 }
 0x4db   :  { %1621 = vmax.xlane.f32.xlu0 %v1620_v15  ;;  %5560 = vpow2.f32 %v1731_v14  ;;  %v1872_v15 = vadd.f32 %v7978_v5, %v7973_v43  ;;  %v7992_v45 = vpop.eup %5540 }
 0x4dc   :  { %5562 = vpow2.f32 %v1721_v35  ;;  %v7994_v3 = vpop.eup %5542  ;;  %v1857_v27 = vadd.f32 %v7992_v45, %v7988_v62  ;;  %v10878_v35 = vld [vmem:[#allocation78_spill] sm:$0xff]  ;;  %v10882_v62 = vld [vmem:[#allocation73_spill] sm:$0xff] }
 0x4dd   :  { %1612 = vmax.xlane.f32.xlu1 %v1611_v40  ;;  %v10871_v40 = vld [vmem:[#allocation68_spill] sm:$0xff]  ;;  %5564 = vpow2.f32 %v1723_v9  ;;  %v7998_v37 = vpop.eup %5544 }
 0x4de   :  { %v1608_v22 = vmax.f32 %v10872_v26, %v10871_v40 }
 0x4df   :  { %1879 = vadd.xlane.f32.xlu0 %v1878_v29  ;;  %v8000_v48 = vpop.eup %5546  ;;  %v1866_v29 = vadd.f32 %v7998_v37, %v7994_v3 }
 0x4e0   :  { %10873 = vst [vmem:[#allocation66_spill] sm:$0xff] %v8000_v48 }
 0x4e1   :  { %1870 = vadd.xlane.f32.xlu1 %v1869_v58 }
 0x4e2   :  { %v8004_v47 = vpop.eup %5548 }
 0x4e3   :  { %1615 = vmax.xlane.f32.xlu0 %v1614_v19  ;;  %10874 = vst [vmem:[#allocation65_spill] sm:$0xff] %v8004_v47  ;;  %v8006_v34 = vpop.eup %5550  ;;  %v1851_v58 = vadd.f32 %v8004_v47, %v8000_v48 }
 0x4e4   :  { %v8010_v32 = vpop.eup %5552 }
 0x4e5   :  { %1606 = vmax.xlane.f32.xlu1 %v1605_v52  ;;  %v8012_v0 = vpop.eup %5554  ;;  %v1860_v19 = vadd.f32 %v8010_v32, %v8006_v34 }
 0x4e6   :  { %10875 = vst [vmem:[#allocation68_spill] sm:$0xff] %v8012_v0  ;;  %v8016_v49 = vpop.eup %5556 }
 0x4e7   :  { %1873 = vadd.xlane.f32.xlu0 %v1872_v15  ;;  %10876 = vst [vmem:[#allocation67_spill] sm:$0xff] %v8016_v49  ;;  %v8018_v8 = vpop.eup %5558  ;;  %v1845_v12 = vadd.f32 %v8016_v49, %v8012_v0  ;;  %v10880_v49 = vld [vmem:[#allocation75_spill] sm:$0xff] }
 0x4e8   :  { %10877 = vst [vmem:[#allocation79_spill] sm:$0xff] %v8018_v8  ;;  %v8022_v14 = vpop.eup %5560 }
 0x4e9   :  { %1864 = vadd.xlane.f32.xlu1 %v1863_v23  ;;  %v8028_v15 = vpop.eup %5562  ;;  %v1854_v23 = vadd.f32 %v8022_v14, %v8018_v8 }
 0x4ea   :  { %10879 = vst [vmem:[#allocation78_spill] sm:$0xff] %v8028_v15 }
 0x4eb   :  { %1609 = vmax.xlane.f32.xlu0 %v1608_v22  ;;  %v8032_v22 = vpop.eup %5564 }
 0x4ed   :  { %1858 = vadd.xlane.f32.xlu1 %v1857_v27 }
 0x4ef   :  { %1867 = vadd.xlane.f32.xlu0 %v1866_v29 }
 0x4f1   :  { %1852 = vadd.xlane.f32.xlu1 %v1851_v58 }
 0x4f3   :  { %1861 = vadd.xlane.f32.xlu0 %v1860_v19  ;;  %v1649_v63 = vpop.xlane.xlu1 %1648 }
 0x4f4   :  { %v1713_v52 = vsub.f32 %v7866_v38, %v1649_v63  ;;  %v1714_v9 = vsub.f32 %v10878_v35, %v1649_v63  ;;  %v1848_v35 = vadd.f32 %v8032_v22, %v8028_v15 }
 0x4f5   :  { %1846 = vadd.xlane.f32.xlu1 %v1845_v12 }
 0x4f6   :  { %v1837_v27 = vmul.f32 1.442695, %v1713_v52  ;;  %v1839_v29 = vmul.f32 1.442695, %v1714_v9 }
 0x4f7   :  { %1855 = vadd.xlane.f32.xlu0 %v1854_v23  ;;  %v1643_v58 = vpop.xlane.xlu1 %1642  ;;  %v1652_v19 = vpop.xlane.xlu0 %1651 }
 0x4f8   :  { %5566 = vpow2.f32 %v1837_v27  ;;  %v1709_v0 = vsub.f32 %v7858_v18, %v1643_v58  ;;  %v1710_v38 = vsub.f32 %v10880_v49, %v1643_v58  ;;  %v1715_v63 = vsub.f32 %v7872_v42, %v1652_v19  ;;  %v10881_v27 = vld [vmem:[#allocation72_spill] sm:$0xff] }
 0x4f9   :  { %5568 = vpow2.f32 %v1839_v29  ;;  %v1716_v12 = vsub.f32 %v7876_v31, %v1652_v19  ;;  %v10883_v58 = vld [vmem:[#allocation76_spill] sm:$0xff]  ;;  %v10884_v29 = vld [vmem:[#allocation77_spill] sm:$0xff] }
 0x4fa   :  { %v1829_v48 = vmul.f32 1.442695, %v1709_v0  ;;  %v1831_v8 = vmul.f32 1.442695, %v1710_v38  ;;  %v1841_v52 = vmul.f32 1.442695, %v1715_v63 }
 0x4fb   :  { %v1843_v9 = vmul.f32 1.442695, %v1716_v12  ;;  %1849 = vadd.xlane.f32.xlu0 %v1848_v35  ;;  %v1637_v23 = vpop.xlane.xlu1 %1636  ;;  %v1646_v47 = vpop.xlane.xlu0 %1645  ;;  %v10885_v35 = vld [vmem:[#allocation69_spill] sm:$0xff] }
 0x4fc   :  { %5570 = vpow2.f32 %v1829_v48  ;;  %v1705_v18 = vsub.f32 %v10881_v27, %v1637_v23  ;;  %v1706_v49 = vsub.f32 %v10882_v62, %v1637_v23  ;;  %v1711_v42 = vsub.f32 %v10883_v58, %v1646_v47  ;;  %v10886_v23 = vld [vmem:[#allocation74_spill] sm:$0xff] }
 0x4fd   :  { %5572 = vpow2.f32 %v1831_v8  ;;  %v1712_v31 = vsub.f32 %v10884_v29, %v1646_v47  ;;  %v10887_v58 = vld [vmem:[#allocation70_spill] sm:$0xff]  ;;  %v10888_v29 = vld [vmem:[#allocation71_spill] sm:$0xff] }
 0x4fe   :  { %5574 = vpow2.f32 %v1841_v52  ;;  %v1821_v19 = vmul.f32 1.442695, %v1705_v18  ;;  %v1823_v15 = vmul.f32 1.442695, %v1706_v49  ;;  %v1833_v0 = vmul.f32 1.442695, %v1711_v42 }
 0x4ff   :  { %5576 = vpow2.f32 %v1843_v9  ;;  %v1835_v38 = vmul.f32 1.442695, %v1712_v31  ;;  %v1631_v63 = vpop.xlane.xlu1 %1630  ;;  %v1640_v12 = vpop.xlane.xlu0 %1639 }
 0x500   :  { %5578 = vpow2.f32 %v1821_v19  ;;  %v1701_v48 = vsub.f32 %v7842_v55, %v1631_v63  ;;  %v1702_v27 = vsub.f32 %v10885_v35, %v1631_v63  ;;  %v1707_v62 = vsub.f32 %v7854_v50, %v1640_v12 }
 0x501   :  { %5580 = vpow2.f32 %v1823_v15  ;;  %v1708_v8 = vsub.f32 %v10886_v23, %v1640_v12 }
 0x502   :  { %5582 = vpow2.f32 %v1833_v0  ;;  %v1813_v47 = vmul.f32 1.442695, %v1701_v48  ;;  %v1815_v52 = vmul.f32 1.442695, %v1702_v27  ;;  %v1825_v18 = vmul.f32 1.442695, %v1707_v62 }
 0x503   :  { %5584 = vpow2.f32 %v1835_v38  ;;  %v1827_v49 = vmul.f32 1.442695, %v1708_v8  ;;  %v1634_v9 = vpop.xlane.xlu0 %1633 }
 0x504   :  { %5586 = vpow2.f32 %v1813_v47  ;;  %v1703_v42 = vsub.f32 %v10887_v58, %v1634_v9  ;;  %v1704_v31 = vsub.f32 %v10888_v29, %v1634_v9 }
 0x505   :  { %v8050_v55 = vpop.eup %5566  ;;  %5588 = vpow2.f32 %v1815_v52 }
 0x506   :  { %v8052_v19 = vpop.eup %5568  ;;  %5590 = vpow2.f32 %v1825_v18  ;;  %v1817_v50 = vmul.f32 1.442695, %v1703_v42  ;;  %v1819_v15 = vmul.f32 1.442695, %v1704_v31 }
 0x507   :  { %5592 = vpow2.f32 %v1827_v49  ;;  %v1935_v0 = vadd.f32 %v8052_v19, %v8050_v55 }
 0x508   :  { %5594 = vpow2.f32 %v1817_v50 }
 0x509   :  { %v8056_v38 = vpop.eup %5570  ;;  %5596 = vpow2.f32 %v1819_v15  ;;  %1936 = vadd.xlane.f32.xlu1 %v1935_v0 }
 0x50a   :  { %10889 = vst [vmem:[#allocation75_spill] sm:$0xff] %v8056_v38  ;;  %v8058_v63 = vpop.eup %5572 }
 0x50b   :  { %v8060_v12 = vpop.eup %5574  ;;  %v1929_v48 = vadd.f32 %v8058_v63, %v8056_v38 }
 0x50c   :  { %v8064_v35 = vpop.eup %5576 }
 0x50d   :  { %v8066_v27 = vpop.eup %5578  ;;  %1930 = vadd.xlane.f32.xlu1 %v1929_v48  ;;  %v1938_v62 = vadd.f32 %v8064_v35, %v8060_v12  ;;  %v8098_v48 = vpop.f32.mrf.mxu0 }
 0x50e   :  { %10890 = vst [vmem:[#allocation72_spill] sm:$0xff] %v8066_v27  ;;  %v8070_v23 = vpop.eup %5580 }
 0x50f   :  { %10891 = vst [vmem:[#allocation73_spill] sm:$0xff] %v8070_v23  ;;  %v8072_v8 = vpop.eup %5582  ;;  %1939 = vadd.xlane.f32.xlu0 %v1938_v62  ;;  %v1923_v47 = vadd.f32 %v8070_v23, %v8066_v27  ;;  %v8100_v62 = vpop.f32.mrf.mxu0 }
 0x510   :  { %v8076_v52 = vpop.eup %5584  ;;  %10897 = vst [vmem:[#allocation71_spill] sm:$0xff] %v8100_v62 }
 0x511   :  { %v8078_v18 = vpop.eup %5586  ;;  %1924 = vadd.xlane.f32.xlu1 %v1923_v47  ;;  %v1932_v49 = vadd.f32 %v8076_v52, %v8072_v8  ;;  %v1253_v47 = vpop.f32.mrf.mxu0 }
 0x512   :  { %10892 = vst [vmem:[#allocation76_spill] sm:$0xff] %v8078_v18  ;;  %v8082_v9 = vpop.eup %5588 }
 0x513   :  { %10893 = vst [vmem:[#allocation77_spill] sm:$0xff] %v8082_v9  ;;  %v8084_v58 = vpop.eup %5590  ;;  %1933 = vadd.xlane.f32.xlu0 %v1932_v49  ;;  %v1917_v42 = vadd.f32 %v8082_v9, %v8078_v18  ;;  %v1255_v49 = vpop.f32.mrf.mxu0  ;;  %v1272_v18 = vpack.c.bf16 %v1253_v47, %v1253_v47 }
 0x514   :  { %10894 = vst [vmem:[#allocation69_spill] sm:$0xff] %v8084_v58  ;;  %v8088_v29 = vpop.eup %5592  ;;  %v1273_v9 = vpack.c.bf16 %v1255_v49, %v1255_v49 }
 0x515   :  { %v8090_v31 = vpop.eup %5594  ;;  %1918 = vadd.xlane.f32.xlu1 %v1917_v42  ;;  %v1926_v50 = vadd.f32 %v8088_v29, %v8084_v58  ;;  %v2191_v42 = vsel %vm1151_vm9, %v1272_v18, 0 }
 0x516   :  { %10895 = vst [vmem:[#allocation74_spill] sm:$0xff] %v8090_v31  ;;  %v8094_v15 = vpop.eup %5596  ;;  %5409 = vmatprep.subr.msk.bf16.mxu0 %vm1151_vm9, %v1273_v9 }
 0x517   :  { %10896 = vst [vmem:[#allocation70_spill] sm:$0xff] %v8094_v15  ;;  %1927 = vadd.xlane.f32.xlu0 %v1926_v50  ;;  %v1920_v0 = vadd.f32 %v8094_v15, %v8090_v31  ;;  %2211 = vmatpush1.bf16.msra.mxu0 %v2191_v42 }
 0x51b   :  { %1921 = vadd.xlane.f32.xlu0 %v1920_v0 }
 0x552   :  { %v1889_v27 = vpop.xlane.xlu1 %1888 }
 0x553   :  { %5598 = vrcp.f32 %v1889_v27 }
 0x556   :  { %v1625_v50 = vpop.xlane.xlu1 %1624 }
 0x557   :  { %v1697_v58 = vsub.f32 %v7832_v10, %v1625_v50  ;;  %v1698_v0 = vsub.f32 %v7834_v44, %v1625_v50 }
 0x558   :  { %v1892_v31 = vpop.xlane.xlu0 %1891 }
 0x559   :  { %v1805_v15 = vmul.f32 1.442695, %v1697_v58  ;;  %v1807_v23 = vmul.f32 1.442695, %v1698_v0  ;;  %5600 = vrcp.f32 %v1892_v31 }
 0x55a   :  { %v1883_v62 = vpop.xlane.xlu1 %1882 }
 0x55b   :  { %5602 = vpow2.f32 %v1805_v15 }
 0x55c   :  { %5604 = vpow2.f32 %v1807_v23  ;;  %v1628_v47 = vpop.xlane.xlu0 %1627 }
 0x55d   :  { %v1699_v18 = vsub.f32 %v7838_v56, %v1628_v47  ;;  %v1700_v9 = vsub.f32 %v7840_v2, %v1628_v47  ;;  %5606 = vrcp.f32 %v1883_v62 }
 0x55e   :  { %v1619_v49 = vpop.xlane.xlu1 %1618 }
 0x55f   :  { %v1809_v42 = vmul.f32 1.442695, %v1699_v18  ;;  %v1811_v27 = vmul.f32 1.442695, %v1700_v9  ;;  %v1693_v38 = vsub.f32 %v7816_v13, %v1619_v49  ;;  %v1694_v10 = vsub.f32 %v7818_v33, %v1619_v49 }
 0x560   :  { %v1886_v44 = vpop.xlane.xlu0 %1885  ;;  %v5599_v23 = vpop.eup %5598 }
 0x561   :  { %5608 = vpow2.f32 %v1809_v42  ;;  %v1797_v58 = vmul.f32 1.442695, %v1693_v38  ;;  %v1799_v31 = vmul.f32 1.442695, %v1694_v10  ;;  %v2002_v33 = vmul.f32 %v5599_v23, %v7904_v25 }
 0x562   :  { %5610 = vpow2.f32 %v1811_v27  ;;  %v1877_v15 = vpop.xlane.xlu1 %1876 }
 0x563   :  { %5612 = vpow2.f32 %v1797_v58 }
 0x564   :  { %5614 = vpow2.f32 %v1799_v31  ;;  %v1622_v56 = vpop.xlane.xlu0 %1621 }
 0x565   :  { %5616 = vrcp.f32 %v1886_v44  ;;  %v1695_v2 = vsub.f32 %v7824_v57, %v1622_v56  ;;  %v1696_v50 = vsub.f32 %v7826_v1, %v1622_v56  ;;  %v2001_v57 = vmul.f32 %v5599_v23, %v7901_v51 }
 0x566   :  { %v5601_v0 = vpop.eup %5600  ;;  %v1613_v13 = vpop.xlane.xlu1 %1612  ;;  %5618 = vrcp.f32 %v1877_v15 }
 0x567   :  { %v1801_v62 = vmul.f32 1.442695, %v1695_v2  ;;  %v1803_v47 = vmul.f32 1.442695, %v1696_v50  ;;  %v1689_v38 = vsub.f32 %v7800_v4, %v1613_v13  ;;  %v1690_v18 = vsub.f32 %v7802_v30, %v1613_v13 }
 0x568   :  { %v8115_v9 = vpop.eup %5602  ;;  %v1880_v49 = vpop.xlane.xlu0 %1879  ;;  %v2004_v42 = vmul.f32 %v5601_v0, %v7918_v17  ;;  %v2003_v1 = vmul.f32 %v5601_v0, %v7914_v46 }
 0x569   :  { %v8120_v27 = vpop.eup %5604  ;;  %5620 = vpow2.f32 %v1801_v62  ;;  %v1789_v25 = vmul.f32 1.442695, %v1689_v38  ;;  %v1791_v10 = vmul.f32 1.442695, %v1690_v18 }
 0x56a   :  { %5622 = vpow2.f32 %v1803_v47  ;;  %v2052_v44 = vpack.c.bf16 %v2004_v42, %v2002_v33  ;;  %v1871_v4 = vpop.xlane.xlu1 %1870  ;;  %v2051_v58 = vpack.c.bf16 %v2003_v1, %v2001_v57  ;;  %v1911_v30 = vadd.f32 %v8120_v27, %v8115_v9  ;;  %v5607_v51 = vpop.eup %5606 }
 0x56b   :  { %5624 = vpow2.f32 %v1789_v25  ;;  %v1997_v57 = vmul.f32 %v5607_v51, %v7910_v54 }
 0x56c   :  { %5626 = vpow2.f32 %v1791_v10  ;;  %2069 = vmatprep.subr.bf16.mxu1 %v2052_v44  ;;  %v1616_v17 = vpop.xlane.xlu0 %1615  ;;  %1912 = vadd.xlane.f32.xlu1 %v1911_v30 }
 0x56d   :  { %5628 = vrcp.f32 %v1880_v49  ;;  %2070 = vmatpush1.bf16.xpose.msra.mxu1 %v2051_v58  ;;  %v1691_v46 = vsub.f32 %v7808_v16, %v1616_v17  ;;  %v1692_v31 = vsub.f32 %v7810_v7, %v1616_v17  ;;  %v1998_v49 = vmul.f32 %v5607_v51, %v7912_v28 }
 0x56e   :  { %v8126_v15 = vpop.eup %5608  ;;  %v1607_v23 = vpop.xlane.xlu1 %1606  ;;  %5630 = vrcp.f32 %v1871_v4 }
 0x56f   :  { %v8128_v56 = vpop.eup %5610  ;;  %v1793_v2 = vmul.f32 1.442695, %v1691_v46  ;;  %v1795_v50 = vmul.f32 1.442695, %v1692_v31  ;;  %v1685_v0 = vsub.f32 %v10869_v11, %v1607_v23  ;;  %v1686_v13 = vsub.f32 %v10868_v20, %v1607_v23 }
 0x570   :  { %v8132_v33 = vpop.eup %5612  ;;  %v1874_v62 = vpop.xlane.xlu0 %1873  ;;  %v1914_v16 = vadd.f32 %v8128_v56, %v8126_v15 }
 0x571   :  { %v8136_v47 = vpop.eup %5614  ;;  %5632 = vpow2.f32 %v1793_v2  ;;  %v1781_v7 = vmul.f32 1.442695, %v1685_v0  ;;  %v1783_v38 = vmul.f32 1.442695, %v1686_v13 }
 0x572   :  { %v5617_v18 = vpop.eup %5616  ;;  %5634 = vpow2.f32 %v1795_v50  ;;  %1915 = vadd.xlane.f32.xlu0 %v1914_v16  ;;  %v1865_v11 = vpop.xlane.xlu1 %1864  ;;  %v1905_v20 = vadd.f32 %v8136_v47, %v8132_v33 }
 0x573   :  { %5636 = vpow2.f32 %v1781_v7  ;;  %v2000_v42 = vmul.f32 %v5617_v18, %v7932_v24  ;;  %v1999_v1 = vmul.f32 %v5617_v18, %v7928_v36  ;;  %v5619_v10 = vpop.eup %5618 }
 0x574   :  { %5638 = vpow2.f32 %v1783_v38  ;;  %v1610_v25 = vpop.xlane.xlu0 %1609  ;;  %1906 = vadd.xlane.f32.xlu1 %v1905_v20  ;;  %v1993_v0 = vmul.f32 %v5619_v10, %v7935_v21 }
 0x575   :  { %5640 = vrcp.f32 %v1874_v62  ;;  %v2050_v44 = vpack.c.bf16 %v2000_v42, %v1998_v49  ;;  %v2049_v4 = vpack.c.bf16 %v1999_v1, %v1997_v57  ;;  %v1687_v28 = vsub.f32 %v10872_v26, %v1610_v25 }
 0x576   :  { %v8145_v58 = vpop.eup %5620  ;;  %v1688_v30 = vsub.f32 %v10871_v40, %v1610_v25  ;;  %v1859_v17 = vpop.xlane.xlu1 %1858  ;;  %5642 = vrcp.f32 %v1865_v11  ;;  %v1994_v40 = vmul.f32 %v5619_v10, %v7940_v60 }
 0x577   :  { %v8148_v46 = vpop.eup %5622  ;;  %2071 = vmatprep.subr.bf16.mxu1 %v2050_v44  ;;  %v1785_v54 = vmul.f32 1.442695, %v1687_v28  ;;  %5644 = vrcp.f32 %v1859_v17 }
 0x578   :  { %v8150_v36 = vpop.eup %5624  ;;  %2072 = vmatpush1.bf16.xpose.msra.mxu1 %v2049_v4  ;;  %v1787_v24 = vmul.f32 1.442695, %v1688_v30  ;;  %v1868_v51 = vpop.xlane.xlu0 %1867  ;;  %v1908_v31 = vadd.f32 %v8148_v46, %v8145_v58 }
 0x579   :  { %v8154_v26 = vpop.eup %5626  ;;  %5646 = vpow2.f32 %v1785_v54 }
 0x57a   :  { %v5629_v23 = vpop.eup %5628  ;;  %5648 = vpow2.f32 %v1787_v24  ;;  %1909 = vadd.xlane.f32.xlu0 %v1908_v31  ;;  %v1899_v2 = vadd.f32 %v8154_v26, %v8150_v36  ;;  %v1853_v20 = vpop.xlane.xlu1 %1852 }
 0x57b   :  { %5650 = vrcp.f32 %v1868_v51  ;;  %v1996_v50 = vmul.f32 %v5629_v23, %v7956_v39  ;;  %v1995_v13 = vmul.f32 %v5629_v23, %v7951_v59  ;;  %v5631_v16 = vpop.eup %5630 }
 0x57c   :  { %v1862_v62 = vpop.xlane.xlu0 %1861  ;;  %1900 = vadd.xlane.f32.xlu1 %v1899_v2  ;;  %v1990_v42 = vmul.f32 %v5631_v16, %v7964_v41  ;;  %v1989_v25 = vmul.f32 %v5631_v16, %v7959_v61 }
 0x57d   :  { %v2048_v7 = vpack.c.bf16 %v1996_v50, %v1994_v40  ;;  %v2047_v38 = vpack.c.bf16 %v1995_v13, %v1993_v0  ;;  %5652 = vrcp.f32 %v1862_v62 }
 0x57e   :  { %v8162_v18 = vpop.eup %5632  ;;  %v1847_v23 = vpop.xlane.xlu1 %1846 }
 0x57f   :  { %v8164_v49 = vpop.eup %5634  ;;  %2073 = vmatprep.subr.bf16.mxu1 %v2048_v7 }
 0x580   :  { %v8166_v60 = vpop.eup %5636  ;;  %2074 = vmatpush1.bf16.xpose.msra.mxu1 %v2047_v38  ;;  %v1856_v11 = vpop.xlane.xlu0 %1855  ;;  %v1902_v21 = vadd.f32 %v8164_v49, %v8162_v18 }
 0x581   :  { %v8170_v39 = vpop.eup %5638  ;;  %5654 = vrcp.f32 %v1856_v11  ;;  %v10899_v11 = vld [vmem:[#allocation65_spill] sm:$0xff] }
 0x582   :  { %v5641_v59 = vpop.eup %5640  ;;  %1903 = vadd.xlane.f32.xlu0 %v1902_v21  ;;  %v1893_v57 = vadd.f32 %v8170_v39, %v8166_v60  ;;  %5656 = vrcp.f32 %v1853_v20 }
 0x583   :  { %v1992_v1 = vmul.f32 %v5641_v59, %v7978_v5  ;;  %v1991_v10 = vmul.f32 %v5641_v59, %v7973_v43  ;;  %v5643_v44 = vpop.eup %5642 }
 0x584   :  { %1894 = vadd.xlane.f32.xlu1 %v1893_v57  ;;  %v5645_v4 = vpop.eup %5644  ;;  %v1850_v24 = vpop.xlane.xlu0 %1849  ;;  %v1986_v61 = vmul.f32 %v5643_v44, %v7984_v53  ;;  %v1985_v40 = vmul.f32 %v5643_v44, %v7980_v6  ;;  %v10898_v6 = vld [vmem:[#allocation64_spill] sm:$0xff] }
 0x585   :  { %v2046_v28 = vpack.c.bf16 %v1992_v1, %v1990_v42  ;;  %v2045_v30 = vpack.c.bf16 %v1991_v10, %v1989_v25  ;;  %5658 = vrcp.f32 %v1850_v24  ;;  %v1982_v50 = vmul.f32 %v5645_v4, %v7992_v45  ;;  %v10900_v1 = vld [vmem:[#allocation79_spill] sm:$0xff] }
 0x586   :  { %v8178_v17 = vpop.eup %5646  ;;  %5660 = vrcp.f32 %v1847_v23  ;;  %v1981_v38 = vmul.f32 %v5645_v4, %v10898_v6  ;;  %v10902_v4 = vld [vmem:[#allocation67_spill] sm:$0xff] }
 0x587   :  { %v8180_v54 = vpop.eup %5648  ;;  %2075 = vmatprep.subr.bf16.mxu1 %v2046_v28 }
 0x588   :  { %v5651_v41 = vpop.eup %5650  ;;  %2076 = vmatpush1.bf16.xpose.msra.mxu1 %v2045_v30  ;;  %v1896_v5 = vadd.f32 %v8180_v54, %v8178_v17 }
 0x589   :  { %v1988_v43 = vmul.f32 %v5651_v41, %v7998_v37  ;;  %v1987_v51 = vmul.f32 %v5651_v41, %v7994_v3 }
 0x58a   :  { %v5653_v31 = vpop.eup %5652  ;;  %1897 = vadd.xlane.f32.xlu0 %v1896_v5 }
 0x58b   :  { %v2044_v2 = vpack.c.bf16 %v1988_v43, %v1986_v61  ;;  %v1984_v0 = vmul.f32 %v5653_v31, %v8010_v32  ;;  %v2043_v13 = vpack.c.bf16 %v1987_v51, %v1985_v40  ;;  %v1983_v16 = vmul.f32 %v5653_v31, %v8006_v34  ;;  %v10903_v61 = vld [vmem:[#allocation78_spill] sm:$0xff]  ;;  %v10904_v31 = vld [vmem:[#allocation68_spill] sm:$0xff] }
 0x58d   :  { %2077 = vmatprep.subr.bf16.mxu1 %v2044_v2  ;;  %v2042_v62 = vpack.c.bf16 %v1984_v0, %v1982_v50  ;;  %v2041_v45 = vpack.c.bf16 %v1983_v16, %v1981_v38 }
 0x58e   :  { %v5655_v53 = vpop.eup %5654 }
 0x58f   :  { %v5657_v37 = vpop.eup %5656  ;;  %v1980_v7 = vmul.f32 %v5655_v53, %v8022_v14  ;;  %v1979_v25 = vmul.f32 %v5655_v53, %v10900_v1  ;;  %v10901_v14 = vld [vmem:[#allocation66_spill] sm:$0xff] }
 0x590   :  { %2078 = vmatpush1.bf16.xpose.msra.mxu1 %v2043_v13  ;;  %v1978_v21 = vmul.f32 %v5657_v37, %v10899_v11  ;;  %v1977_v10 = vmul.f32 %v5657_v37, %v10901_v14  ;;  %v10909_v14 = vld [vmem:[#allocation70_spill] sm:$0xff] }
 0x591   :  { %2079 = vmatprep.subr.bf16.mxu1 %v2042_v62 }
 0x592   :  { %v1937_v3 = vpop.xlane.xlu1 %1936  ;;  %v2040_v32 = vpack.c.bf16 %v1980_v7, %v1978_v21  ;;  %v5659_v59 = vpop.eup %5658  ;;  %v2039_v30 = vpack.c.bf16 %v1979_v25, %v1977_v10  ;;  %v10908_v25 = vld [vmem:[#allocation69_spill] sm:$0xff]  ;;  %v10910_v10 = vld [vmem:[#allocation72_spill] sm:$0xff] }
 0x593   :  { %5662 = vrcp.f32 %v1937_v3  ;;  %v5661_v57 = vpop.eup %5660  ;;  %v1976_v34 = vmul.f32 %v5659_v59, %v8032_v22  ;;  %v1975_v43 = vmul.f32 %v5659_v59, %v10903_v61 }
 0x594   :  { %v1974_v28 = vmul.f32 %v5661_v57, %v10902_v4  ;;  %v1973_v23 = vmul.f32 %v5661_v57, %v10904_v31 }
 0x596   :  { %v1931_v20 = vpop.xlane.xlu1 %1930  ;;  %v2038_v41 = vpack.c.bf16 %v1976_v34, %v1974_v28  ;;  %v2037_v40 = vpack.c.bf16 %v1975_v43, %v1973_v23 }
 0x598   :  { %2080 = vmatpush1.bf16.xpose.msra.mxu1 %v2041_v45  ;;  %v1940_v42 = vpop.xlane.xlu0 %1939  ;;  %v10905_v45 = vld [vmem:[#allocation75_spill] sm:$0xff] }
 0x599   :  { %2081 = vmatprep.subr.bf16.mxu1 %v2040_v32  ;;  %5664 = vrcp.f32 %v1940_v42 }
 0x59a   :  { %5666 = vrcp.f32 %v1931_v20  ;;  %v1925_v5 = vpop.xlane.xlu1 %1924 }
 0x59c   :  { %v1934_v44 = vpop.xlane.xlu0 %1933 }
 0x59d   :  { %5668 = vrcp.f32 %v1934_v44  ;;  %v10911_v44 = vld [vmem:[#allocation77_spill] sm:$0xff] }
 0x59e   :  { %v1919_v3 = vpop.xlane.xlu1 %1918 }
 0x5a0   :  { %2082 = vmatpush1.bf16.xpose.msra.mxu1 %v2039_v30  ;;  %v1928_v24 = vpop.xlane.xlu0 %1927  ;;  %v5663_v51 = vpop.eup %5662 }
 0x5a1   :  { %2083 = vmatprep.subr.bf16.mxu1 %v2038_v41  ;;  %5670 = vrcp.f32 %v1928_v24  ;;  %v2034_v2 = vmul.f32 %v5663_v51, %v8052_v19  ;;  %v2033_v16 = vmul.f32 %v5663_v51, %v8050_v55  ;;  %v1268_v19 = vpack.c.bf16 %v8098_v48, %v8098_v48  ;;  %v10912_v41 = vld [vmem:[#allocation74_spill] sm:$0xff] }
 0x5a2   :  { %5672 = vrcp.f32 %v1925_v5  ;;  %v10913_v5 = vld [vmem:[#allocation76_spill] sm:$0xff] }
 0x5a4   :  { %v1922_v13 = vpop.xlane.xlu0 %1921 }
 0x5a5   :  { %5674 = vrcp.f32 %v1922_v13 }
 0x5a6   :  { %v5665_v22 = vpop.eup %5664  ;;  %5676 = vrcp.f32 %v1919_v3 }
 0x5a7   :  { %v2036_v50 = vmul.f32 %v5665_v22, %v8064_v35  ;;  %v5667_v0 = vpop.eup %5666  ;;  %v2035_v62 = vmul.f32 %v5665_v22, %v8060_v12 }
 0x5a8   :  { %2084 = vmatpush1.bf16.xpose.msra.mxu1 %v2037_v40  ;;  %v2030_v7 = vmul.f32 %v5667_v0, %v8058_v63  ;;  %v2029_v32 = vmul.f32 %v5667_v0, %v10905_v45  ;;  %v10906_v63 = vld [vmem:[#allocation73_spill] sm:$0xff] }
 0x5a9   :  { %v2068_v53 = vpack.c.bf16 %v2036_v50, %v2034_v2  ;;  %v2067_v38 = vpack.c.bf16 %v2035_v62, %v2033_v16 }
 0x5aa   :  { %v5669_v37 = vpop.eup %5668 }
 0x5ab   :  { %2085 = vmatprep.subr.bf16.mxu1 %v2068_v53  ;;  %v2032_v6 = vmul.f32 %v5669_v37, %v8076_v52  ;;  %v2031_v21 = vmul.f32 %v5669_v37, %v8072_v8  ;;  %v10907_v52 = vld [vmem:[#allocation71_spill] sm:$0xff] }
 0x5ac   :  { %v1269_v20 = vpack.c.bf16 %v10907_v52, %v10907_v52 }
 0x5ad   :  { %v2066_v35 = vpack.c.bf16 %v2032_v6, %v2030_v7  ;;  %v2065_v42 = vpack.c.bf16 %v2031_v21, %v2029_v32  ;;  %v8224_v7 = vpop.f32.mrf.mxu0 }
 0x5ae   :  { %v5671_v11 = vpop.eup %5670  ;;  %10914 = vst [vmem:[#allocation64_spill] sm:$0xff] %v8224_v7 }
 0x5af   :  { %v5673_v12 = vpop.eup %5672  ;;  %v2028_v55 = vmul.f32 %v5671_v11, %v8088_v29  ;;  %v2027_v34 = vmul.f32 %v5671_v11, %v10908_v25 }
 0x5b0   :  { %2086 = vmatpush2.bf16.xpose.msra.mxu1 %v2067_v38  ;;  %v2026_v59 = vmul.f32 %v5673_v12, %v10906_v63  ;;  %v2025_v29 = vmul.f32 %v5673_v12, %v10910_v10  ;;  %v8226_v38 = vpop.f32.mrf.mxu0  ;;  %v10915_v63 = vmov 0   ;;  %v10916_v10 = vld [vmem:[#allocation63_spill] sm:$0xff] }
 0x5b1   :  { %2087 = vmatprep.subr.bf16.mxu1 %v2066_v35  ;;  %2110 = vxpose.xlu1.c.b16.start.end [1/1] (short) %v1268_v19, 128 }
 0x5b2   :  { %v2064_v57 = vpack.c.bf16 %v2028_v55, %v2026_v59  ;;  %v5675_v48 = vpop.eup %5674  ;;  %v2063_v28 = vpack.c.bf16 %v2027_v34, %v2025_v29  ;;  %v1274_v29 = vpack.c.bf16 %v10916_v10, %v10916_v10 }
 0x5b3   :  { %v5677_v1 = vpop.eup %5676  ;;  %v2024_v8 = vmul.f32 %v5675_v48, %v10909_v14  ;;  %v2023_v24 = vmul.f32 %v5675_v48, %v10912_v41 }
 0x5b4   :  { %v2022_v4 = vmul.f32 %v5677_v1, %v10911_v44  ;;  %v2021_v61 = vmul.f32 %v5677_v1, %v10913_v5 }
 0x5b6   :  { %v2062_v30 = vpack.c.bf16 %v2024_v8, %v2022_v4  ;;  %v2061_v43 = vpack.c.bf16 %v2023_v24, %v2021_v61 }
 0x5b7   :  { %2126 = vxpose.xlu0.c.b16.start.end [1/1] (short) %v1269_v20, 128 }
 0x5b8   :  { %2088 = vmatpush2.bf16.xpose.msra.mxu1 %v2065_v42 }
 0x5b9   :  { %2089 = vmatprep.subr.bf16.mxu1 %v2064_v57 }
 0x5c0   :  { %2090 = vmatpush2.bf16.xpose.msra.mxu1 %v2063_v28 }
 0x5c1   :  { %2091 = vmatprep.subr.bf16.mxu1 %v2062_v30 }
 0x5c8   :  { %2092 = vmatpush2.bf16.xpose.msra.mxu1 %v2061_v43  ;;  %v1277_v43 = vpack.c.bf16 %v8226_v38, %v8226_v38  ;;  %v10920_v38 = vld [vmem:[#allocation25_spill] sm:$0xff] }
 0x5f5   :  { %v1913_v51 = vpop.xlane.xlu1 %1912 }
 0x5f6   :  { %5678 = vrcp.f32 %v1913_v51 }
 0x5fb   :  { %v1916_v31 = vpop.xlane.xlu0 %1915 }
 0x5fc   :  { %5680 = vrcp.f32 %v1916_v31 }
 0x5fd   :  { %v1907_v23 = vpop.xlane.xlu1 %1906 }
 0x5fe   :  { %5682 = vrcp.f32 %v1907_v23 }
 0x603   :  { %v1910_v22 = vpop.xlane.xlu0 %1909  ;;  %v5679_v40 = vpop.eup %5678 }
 0x604   :  { %5684 = vrcp.f32 %v1910_v22  ;;  %v2018_v0 = vmul.f32 %v5679_v40, %v8120_v27  ;;  %v2017_v62 = vmul.f32 %v5679_v40, %v8115_v9  ;;  %v1263_v27 = vpop.f32.mrf.mxu0 }
 0x605   :  { %v1901_v2 = vpop.xlane.xlu1 %1900 }
 0x606   :  { %5686 = vrcp.f32 %v1901_v2  ;;  %v1264_v12 = vpop.f32.mrf.mxu0 }
 0x609   :  { %v5681_v50 = vpop.eup %5680 }
 0x60a   :  { %v2020_v13 = vmul.f32 %v5681_v50, %v8128_v56  ;;  %v2019_v53 = vmul.f32 %v5681_v50, %v8126_v15 }
 0x60b   :  { %v1904_v37 = vpop.xlane.xlu0 %1903  ;;  %v5683_v6 = vpop.eup %5682 }
 0x60c   :  { %5688 = vrcp.f32 %v1904_v37  ;;  %v2060_v3 = vpack.c.bf16 %v2020_v13, %v2018_v0  ;;  %v2059_v16 = vpack.c.bf16 %v2019_v53, %v2017_v62  ;;  %v2014_v56 = vmul.f32 %v5683_v6, %v8136_v47 }
 0x60d   :  { %v1895_v19 = vpop.xlane.xlu1 %1894  ;;  %v2013_v15 = vmul.f32 %v5683_v6, %v8132_v33 }
 0x60e   :  { %2093 = vmatprep.subr.bf16.mxu1 %v2060_v3  ;;  %5690 = vrcp.f32 %v1895_v19 }
 0x60f   :  { %2094 = vmatpush2.bf16.xpose.msra.mxu1 %v2059_v16 }
 0x611   :  { %v5685_v35 = vpop.eup %5684 }
 0x612   :  { %v2016_v9 = vmul.f32 %v5685_v35, %v8148_v46  ;;  %v2015_v11 = vmul.f32 %v5685_v35, %v8145_v58 }
 0x613   :  { %v1898_v21 = vpop.xlane.xlu0 %1897  ;;  %v2118_v55 = vpop.trf.xlu1 }
 0x614   :  { %5692 = vrcp.f32 %v1898_v21  ;;  %v2058_v45 = vpack.c.bf16 %v2016_v9, %v2014_v56  ;;  %5410 = vmatmul.mubr.msk.bf16.vlgmr.msra.gmra.mxu0 %vm1144_vm10, %v2118_v55  ;;  %v2057_v32 = vpack.c.bf16 %v2015_v11, %v2013_v15  ;;  %v5687_v59 = vpop.eup %5686  ;;  %v10922_v9 = vld [vmem:[#allocation24_spill] sm:$0xff] }
 0x615   :  { %2238 = vmatprep.mubr.bf16.mxu0 %v10915_v63  ;;  %v2010_v46 = vmul.f32 %v5687_v59, %v8154_v26  ;;  %v2009_v58 = vmul.f32 %v5687_v59, %v8150_v36 }
 0x616   :  { %2095 = vmatprep.subr.bf16.mxu1 %v2058_v45 }
 0x617   :  { %2096 = vmatpush2.bf16.xpose.msra.mxu1 %v2057_v32  ;;  %v2119_v52 = vpop.trf.xlu1 }
 0x619   :  { %v5689_v47 = vpop.eup %5688  ;;  %v2134_v44 = vpop.trf.xlu0 }
 0x61a   :  { %v2012_v33 = vmul.f32 %v5689_v47, %v8164_v49  ;;  %v2011_v20 = vmul.f32 %v5689_v47, %v8162_v18 }
 0x61b   :  { %v5691_v48 = vpop.eup %5690  ;;  %v2120_v25 = vpop.trf.xlu1 }
 0x61c   :  { %v2056_v42 = vpack.c.bf16 %v2012_v33, %v2010_v46  ;;  %5411 = vmatmul.mubr.msk.bf16.gmra.mxu0 %vm1144_vm10, %v2119_v52  ;;  %v2055_v57 = vpack.c.bf16 %v2011_v20, %v2009_v58  ;;  %v2006_v34 = vmul.f32 %v5691_v48, %v8170_v39  ;;  %v2005_v49 = vmul.f32 %v5691_v48, %v8166_v60  ;;  %v6278_v52 = vld [vmem:[%s10494_s4] sm:$0xff]  }
 0x61d   :  { %2248 = vmatprep.mubr.bf16.mxu0 %v10915_v63  ;;  %v2135_v4 = vpop.trf.xlu0 }
 0x61e   :  { %2097 = vmatprep.subr.bf16.mxu1 %v2056_v42  ;;  %v6279_v42 = vld [vmem:[%s10494_s4 + $0x8] ss:$0 sps:$4 sm:$0xff]  }
 0x61f   :  { %2098 = vmatpush2.bf16.xpose.msra.mxu1 %v2055_v57  ;;  %v2121_v8 = vpop.trf.xlu1 }
 0x621   :  { %v5693_v1 = vpop.eup %5692  ;;  %v2136_v28 = vpop.trf.xlu0 }
 0x622   :  { %v2008_v26 = vmul.f32 %v5693_v1, %v8180_v54  ;;  %v2007_v36 = vmul.f32 %v5693_v1, %v8178_v17 }
 0x623   :  { %v2122_v60 = vpop.trf.xlu1 }
 0x624   :  { %v2054_v18 = vpack.c.bf16 %v2008_v26, %v2006_v34  ;;  %5412 = vmatmul.mubr.msk.bf16.gmra.mxu0 %vm1144_vm10, %v2120_v25  ;;  %v2053_v14 = vpack.c.bf16 %v2007_v36, %v2005_v49 }
 0x625   :  { %2258 = vmatprep.mubr.bf16.mxu0 %v10915_v63  ;;  %v2137_v30 = vpop.trf.xlu0 }
 0x626   :  { %2099 = vmatprep.subr.bf16.mxu1 %v2054_v18 }
 0x627   :  { %2100 = vmatpush2.bf16.xpose.msra.mxu1 %v2053_v14  ;;  %v2123_v39 = vpop.trf.xlu1 }
 0x629   :  { %v2138_v41 = vpop.trf.xlu0 }
 0x62b   :  { %v2124_v17 = vpop.trf.xlu1 }
 0x62c   :  { %5413 = vmatmul.mubr.msk.bf16.gmra.mxu0 %vm1144_vm10, %v2121_v8 }
 0x62d   :  { %2268 = vmatprep.mubr.bf16.mxu0 %v10915_v63  ;;  %v2139_v24 = vpop.trf.xlu0 }
 0x62e   :  { %2102 = vmatmul.mubr.bf16.vlgmr.msra.gmra.mxu1 %v1274_v29 }
 0x62f   :  { %2990 = vmatprep.mubr.bf16.mxu1 %v10915_v63  ;;  %v2125_v54 = vpop.trf.xlu1 }
 0x631   :  { %v2140_v5 = vpop.trf.xlu0 }
 0x634   :  { %5414 = vmatmul.mubr.msk.bf16.gmra.mxu0 %vm1144_vm10, %v2122_v60 }
 0x635   :  { %2278 = vmatprep.mubr.bf16.mxu0 %v10915_v63  ;;  %v2141_v61 = vpop.trf.xlu0 }
 0x63c   :  { %5415 = vmatmul.mubr.msk.bf16.gmra.mxu0 %vm1144_vm10, %v2123_v39 }
 0x63d   :  { %2288 = vmatprep.mubr.bf16.mxu0 %v10915_v63 }
 0x644   :  { %5416 = vmatmul.mubr.msk.bf16.gmra.mxu0 %vm1144_vm10, %v2124_v17 }
 0x645   :  { %2298 = vmatprep.mubr.bf16.mxu0 %v10915_v63 }
 0x64c   :  { %5417 = vmatmul.mubr.msk.bf16.gmra.mxu0 %vm1144_vm10, %v2125_v54 }
 0x64d   :  { %2308 = vmatprep.mubr.bf16.mxu0 %v10915_v63 }
 0x654   :  { %5418 = vmatmul.mubr.msk.bf16.gmra.mxu0 %vm1144_vm10, %v2134_v44 }
 0x655   :  { %2318 = vmatprep.mubr.bf16.mxu0 %v10915_v63 }
 0x65c   :  { %5419 = vmatmul.mubr.msk.bf16.gmra.mxu0 %vm1144_vm10, %v2135_v4 }
 0x65d   :  { %2328 = vmatprep.mubr.bf16.mxu0 %v10915_v63 }
 0x664   :  { %5420 = vmatmul.mubr.msk.bf16.gmra.mxu0 %vm1144_vm10, %v2136_v28 }
 0x665   :  { %2338 = vmatprep.mubr.bf16.mxu0 %v10915_v63 }
 0x66c   :  { %5421 = vmatmul.mubr.msk.bf16.gmra.mxu0 %vm1144_vm10, %v2137_v30 }
 0x66d   :  { %2348 = vmatprep.mubr.bf16.mxu0 %v10915_v63 }
 0x674   :  { %5422 = vmatmul.mubr.msk.bf16.gmra.mxu0 %vm1144_vm10, %v2138_v41 }
 0x675   :  { %2358 = vmatprep.mubr.bf16.mxu0 %v10915_v63 }
 0x67c   :  { %5423 = vmatmul.mubr.msk.bf16.gmra.mxu0 %vm1144_vm10, %v2139_v24 }
 0x67d   :  { %2368 = vmatprep.mubr.bf16.mxu0 %v10915_v63 }
 0x684   :  { %5424 = vmatmul.mubr.msk.bf16.gmra.mxu0 %vm1144_vm10, %v2140_v5 }
 0x685   :  { %2378 = vmatprep.mubr.bf16.mxu0 %v10915_v63 }
 0x68c   :  { %5425 = vmatmul.mubr.msk.bf16.gmra.mxu0 %vm1144_vm10, %v2141_v61 }
 0x68d   :  { %2933 = vmatprep.mubr.bf16.mxu0 %v1277_v43 }
 0x6d4   :  { %v8276_v51 = vpop.f32.mrf.mxu0 }
 0x6d6   :  { %v8278_v31 = vpop.f32.mrf.mxu0 }
 0x6d7   :  { %10917 = vst [vmem:[#allocation65_spill] sm:$0xff] %v8278_v31 }
 0x6d8   :  { %v8280_v23 = vpop.f32.mrf.mxu0 }
 0x6d9   :  { %10918 = vst [vmem:[#allocation79_spill] sm:$0xff] %v8280_v23 }
 0x6da   :  { %v8282_v22 = vpop.f32.mrf.mxu0 }
 0x6db   :  { %10919 = vst [vmem:[#allocation66_spill] sm:$0xff] %v8282_v22 }
 0x6dc   :  { %v8284_v40 = vpop.f32.mrf.mxu0 }
 0x6de   :  { %v8286_v2 = vpop.f32.mrf.mxu0 }
 0x6e0   :  { %v8288_v50 = vpop.f32.mrf.mxu0 }
 0x6e2   :  { %v8290_v0 = vpop.f32.mrf.mxu0 }
 0x6e4   :  { %v8292_v13 = vpop.f32.mrf.mxu0 }
 0x6e6   :  { %v8294_v62 = vpop.f32.mrf.mxu0 }
 0x6e8   :  { %v8296_v53 = vpop.f32.mrf.mxu0 }
 0x6ea   :  { %v8298_v37 = vpop.f32.mrf.mxu0 }
 0x6ec   :  { %v8300_v3 = vpop.f32.mrf.mxu0 }
 0x6ee   :  { %v2103_v16 = vpop.f32.mrf.mxu1  ;;  %v8302_v6 = vpop.f32.mrf.mxu0 }
 0x6ef   :  { %v8305_v19 = vadd.f32 %v2103_v16, %v10920_v38  ;;  %v2407_v24 = vmax.f32 %v8300_v3, %v8302_v6  ;;  %v2401_v16 = vmax.f32 %v8292_v13, %v8294_v62 }
 0x6f0   :  { %v2105_v27 = vpop.f32.mrf.mxu1  ;;  %v8307_v35 = vpop.f32.mrf.mxu0 }
 0x6f1   :  { %10921 = vst [vmem:[#allocation67_spill] sm:$0xff] %v8305_v19  ;;  %v2942_v56 = vpack.c.bf16 %v8305_v19, %v8305_v19  ;;  %v8312_v15 = vadd.f32 %v2105_v27, %v10922_v9  ;;  %v2395_v9 = vmax.f32 %v8284_v40, %v8286_v2 }
 0x6f2   :  { %v2107_v11 = vpop.f32.mrf.mxu1  ;;  %v8314_v12 = vpop.f32.mrf.mxu0 }
 0x6f3   :  { %10923 = vst [vmem:[#allocation78_spill] sm:$0xff] %v8312_v15  ;;  %v2943_v21 = vpack.c.bf16 %v8312_v15, %v8312_v15  ;;  %v2947_v32 = vsel %vm1151_vm9, %v2942_v56, 0  ;;  %v2410_v38 = vmax.f32 %v8307_v35, %v8314_v12  ;;  %v2404_v11 = vmax.f32 %v8296_v53, %v8298_v37 }
 0x6f4   :  { %v2108_v55 = vpop.f32.mrf.mxu1  ;;  %v8318_v45 = vpop.f32.mrf.mxu0 }
 0x6f5   :  { %5426 = vmatprep.subr.msk.bf16.mxu1 %vm1151_vm9, %v2943_v21 }
 0x6f6   :  { %2973 = vmatpush1.bf16.msra.mxu1 %v2947_v32  ;;  %v8322_v59 = vpop.f32.mrf.mxu0  ;;  %v2389_v32 = vmax.f32 %v8276_v51, %v8278_v31 }
 0x6f7   :  { %v2413_v4 = vmax.f32 %v8318_v45, %v8322_v59 }
 0x6f8   :  { %v8324_v47 = vpop.f32.mrf.mxu0 }
 0x6f9   :  { %5427 = vmatmul.mubr.msk.bf16.vlgmr.msra.gmra.mxu1 %vm1144_vm10, %v6278_v52  ;;  %v2398_v52 = vmax.f32 %v8288_v50, %v8290_v0 }
 0x6fa   :  { %v8330_v46 = vpop.f32.mrf.mxu0  ;;  %3000 = vmatprep.mubr.bf16.mxu1 %v10915_v63 }
 0x6fb   :  { %v2416_v5 = vmax.f32 %v8324_v47, %v8330_v46 }
 0x6fc   :  { %v8333_v33 = vpop.f32.mrf.mxu0 }
 0x6fe   :  { %v8335_v58 = vpop.f32.mrf.mxu0 }
 0x6ff   :  { %v2419_v39 = vmax.f32 %v8333_v33, %v8335_v58 }
 0x700   :  { %v8337_v20 = vpop.f32.mrf.mxu0 }
 0x701   :  { %5428 = vmatmul.mubr.msk.bf16.gmra.mxu1 %vm1144_vm10, %v6279_v42 }
 0x702   :  { %v8343_v57 = vpop.f32.mrf.mxu0  ;;  %3190 = vmatprep.mubr.bf16.mxu1 %v10915_v63 }
 0x703   :  { %v2422_v28 = vmax.f32 %v8337_v20, %v8343_v57 }
 0x704   :  { %v8346_v48 = vpop.f32.mrf.mxu0 }
 0x706   :  { %v8348_v1 = vpop.f32.mrf.mxu0 }
 0x707   :  { %v2425_v8 = vmax.f32 %v8346_v48, %v8348_v1 }
 0x708   :  { %v8350_v25 = vpop.f32.mrf.mxu0 }
 0x70a   :  { %v8352_v34 = vpop.f32.mrf.mxu0 }
 0x70b   :  { %v2428_v17 = vmax.f32 %v8350_v25, %v8352_v34 }
 0x70c   :  { %v8354_v26 = vpop.f32.mrf.mxu0 }
 0x70e   :  { %v8356_v49 = vpop.f32.mrf.mxu0 }
 0x70f   :  { %v2431_v36 = vmax.f32 %v8354_v26, %v8356_v49 }
 0x710   :  { %v8360_v18 = vpop.f32.mrf.mxu0 }
 0x711   :  { %2432 = vmax.xlane.f32.xlu1 %v2431_v36 }
 0x712   :  { %v8362_v14 = vpop.f32.mrf.mxu0 }
 0x713   :  { %v2434_v10 = vmax.f32 %v8360_v18, %v8362_v14 }
 0x714   :  { %v8368_v29 = vpop.f32.mrf.mxu0 }
 0x715   :  { %2426 = vmax.xlane.f32.xlu1 %v2425_v8  ;;  %2435 = vmax.xlane.f32.xlu0 %v2434_v10  ;;  %v2392_v8 = vmax.f32 %v8280_v23, %v8282_v22 }
 0x716   :  { %v8370_v60 = vpop.f32.mrf.mxu0 }
 0x718   :  { %v8376_v54 = vpop.f32.mrf.mxu0 }
 0x719   :  { %10924 = vst [vmem:[#allocation68_spill] sm:$0xff] %v8376_v54  ;;  %2420 = vmax.xlane.f32.xlu1 %v2419_v39  ;;  %2429 = vmax.xlane.f32.xlu0 %v2428_v17 }
 0x71a   :  { %v8378_v44 = vpop.f32.mrf.mxu0 }
 0x71b   :  { %10925 = vst [vmem:[#allocation75_spill] sm:$0xff] %v8378_v44 }
 0x71c   :  { %v8384_v30 = vpop.f32.mrf.mxu0 }
 0x71d   :  { %2414 = vmax.xlane.f32.xlu1 %v2413_v4  ;;  %2423 = vmax.xlane.f32.xlu0 %v2422_v28 }
 0x71e   :  { %v8386_v41 = vpop.f32.mrf.mxu0 }
 0x720   :  { %v8392_v61 = vpop.f32.mrf.mxu0 }
 0x721   :  { %2408 = vmax.xlane.f32.xlu1 %v2407_v24  ;;  %2417 = vmax.xlane.f32.xlu0 %v2416_v5 }
 0x722   :  { %v8394_v43 = vpop.f32.mrf.mxu0 }
 0x724   :  { %v8400_v27 = vpop.f32.mrf.mxu0 }
 0x725   :  { %2402 = vmax.xlane.f32.xlu1 %v2401_v16  ;;  %2411 = vmax.xlane.f32.xlu0 %v2410_v38 }
 0x726   :  { %v8402_v56 = vpop.f32.mrf.mxu0 }
 0x728   :  { %v8408_v21 = vpop.f32.mrf.mxu0 }
 0x729   :  { %2396 = vmax.xlane.f32.xlu1 %v2395_v9  ;;  %2405 = vmax.xlane.f32.xlu0 %v2404_v11 }
 0x72a   :  { %v8410_v55 = vpop.f32.mrf.mxu0 }
 0x72c   :  { %v8416_v42 = vpop.f32.mrf.mxu0 }
 0x72d   :  { %2390 = vmax.xlane.f32.xlu1 %v2389_v32  ;;  %2399 = vmax.xlane.f32.xlu0 %v2398_v52 }
 0x72e   :  { %v8418_v36 = vpop.f32.mrf.mxu0 }
 0x730   :  { %v8422_v10 = vpop.f32.mrf.mxu0 }
 0x731   :  { %2393 = vmax.xlane.f32.xlu0 %v2392_v8 }
 0x732   :  { %v8424_v39 = vpop.f32.mrf.mxu0 }
 0x734   :  { %v8426_v17 = vpop.f32.mrf.mxu0 }
 0x735   :  { %10926 = vst [vmem:[#allocation73_spill] sm:$0xff] %v8426_v17 }
 0x736   :  { %v8428_v4 = vpop.f32.mrf.mxu0 }
 0x737   :  { %10927 = vst [vmem:[#allocation71_spill] sm:$0xff] %v8428_v4 }
 0x738   :  { %v8430_v28 = vpop.f32.mrf.mxu0 }
 0x739   :  { %10928 = vst [vmem:[#allocation69_spill] sm:$0xff] %v8430_v28 }
 0x73a   :  { %v8432_v24 = vpop.f32.mrf.mxu0 }
 0x73b   :  { %10929 = vst [vmem:[#allocation70_spill] sm:$0xff] %v8432_v24 }
 0x73c   :  { %v8434_v5 = vpop.f32.mrf.mxu0 }
 0x73d   :  { %10930 = vst [vmem:[#allocation72_spill] sm:$0xff] %v8434_v5 }
 0x73e   :  { %v8436_v16 = vpop.f32.mrf.mxu0 }
 0x73f   :  { %10931 = vst [vmem:[#allocation77_spill] sm:$0xff] %v8436_v16  ;;  %v2467_v23 = vmax.f32 %v8434_v5, %v8436_v16 }
 0x740   :  { %v8438_v38 = vpop.f32.mrf.mxu0 }
 0x742   :  { %v8440_v9 = vpop.f32.mrf.mxu0 }
 0x744   :  { %v8442_v11 = vpop.f32.mrf.mxu0 }
 0x746   :  { %v8444_v32 = vpop.f32.mrf.mxu0 }
 0x747   :  { %10932 = vst [vmem:[#allocation74_spill] sm:$0xff] %v8444_v32  ;;  %v2473_v22 = vmax.f32 %v8442_v11, %v8444_v32  ;;  %v2470_v32 = vmax.f32 %v8438_v38, %v8440_v9 }
 0x748   :  { %v8446_v52 = vpop.f32.mrf.mxu0 }
 0x749   :  { %10933 = vst [vmem:[#allocation76_spill] sm:$0xff] %v8446_v52 }
 0x74a   :  { %v8448_v8 = vpop.f32.mrf.mxu0 }
 0x74b   :  { %10934 = vst [vmem:[#allocation63_spill] sm:$0xff] %v8448_v8  ;;  %v2476_v31 = vmax.f32 %v8446_v52, %v8448_v8 }
 0x74c   :  { %v8450_v15 = vpop.f32.mrf.mxu0 }
 0x74e   :  { %v8452_v19 = vpop.f32.mrf.mxu0 }
 0x74f   :  { %10935 = vst [vmem:[#allocation25_spill] sm:$0xff] %v8452_v19  ;;  %v2479_v7 = vmax.f32 %v8450_v15, %v8452_v19  ;;  %v2461_v19 = vmax.f32 %v8426_v17, %v8428_v4 }
 0x750   :  { %v8456_v63 = vpop.f32.mrf.mxu0 }
 0x751   :  { %2480 = vmax.xlane.f32.xlu1 %v2479_v7  ;;  %v2464_v7 = vmax.f32 %v8430_v28, %v8432_v24 }
 0x752   :  { %v8460_v54 = vpop.f32.mrf.mxu0 }
 0x753   :  { %v2482_v44 = vmax.f32 %v8456_v63, %v8460_v54 }
 0x755   :  { %2474 = vmax.xlane.f32.xlu1 %v2473_v22  ;;  %2483 = vmax.xlane.f32.xlu0 %v2482_v44 }
 0x759   :  { %2468 = vmax.xlane.f32.xlu1 %v2467_v23  ;;  %2477 = vmax.xlane.f32.xlu0 %v2476_v31 }
 0x75d   :  { %2462 = vmax.xlane.f32.xlu1 %v2461_v19  ;;  %2471 = vmax.xlane.f32.xlu0 %v2470_v32 }
 0x761   :  { %2465 = vmax.xlane.f32.xlu0 %v2464_v7 }
 0x79a   :  { %v2433_v16 = vpop.xlane.xlu1 %2432 }
 0x79b   :  { %v2513_v5 = vsub.f32 %v8354_v26, %v2433_v16  ;;  %v2514_v22 = vsub.f32 %v8356_v49, %v2433_v16 }
 0x79d   :  { %v2605_v44 = vmul.f32 1.442695, %v2513_v5  ;;  %v2607_v8 = vmul.f32 1.442695, %v2514_v22 }
 0x79e   :  { %v2427_v52 = vpop.xlane.xlu1 %2426  ;;  %v2436_v4 = vpop.xlane.xlu0 %2435 }
 0x79f   :  { %5694 = vpow2.f32 %v2605_v44  ;;  %v2509_v17 = vsub.f32 %v8346_v48, %v2427_v52  ;;  %v2510_v31 = vsub.f32 %v8348_v1, %v2427_v52  ;;  %v2515_v23 = vsub.f32 %v8360_v18, %v2436_v4 }
 0x7a0   :  { %5696 = vpow2.f32 %v2607_v8  ;;  %v2516_v19 = vsub.f32 %v8362_v14, %v2436_v4 }
 0x7a1   :  { %v2597_v32 = vmul.f32 1.442695, %v2509_v17  ;;  %v2599_v7 = vmul.f32 1.442695, %v2510_v31  ;;  %v2609_v24 = vmul.f32 1.442695, %v2515_v23 }
 0x7a2   :  { %v2611_v26 = vmul.f32 1.442695, %v2516_v19  ;;  %v2421_v28 = vpop.xlane.xlu1 %2420  ;;  %v2430_v49 = vpop.xlane.xlu0 %2429 }
 0x7a3   :  { %5698 = vpow2.f32 %v2597_v32  ;;  %v2511_v5 = vsub.f32 %v8350_v25, %v2430_v49  ;;  %v2512_v16 = vsub.f32 %v8352_v34, %v2430_v49  ;;  %v2505_v48 = vsub.f32 %v8333_v33, %v2421_v28 }
 0x7a4   :  { %5700 = vpow2.f32 %v2599_v7  ;;  %v2506_v1 = vsub.f32 %v8335_v58, %v2421_v28 }
 0x7a5   :  { %5702 = vpow2.f32 %v2609_v24  ;;  %v2601_v18 = vmul.f32 1.442695, %v2511_v5  ;;  %v2603_v14 = vmul.f32 1.442695, %v2512_v16  ;;  %v2589_v4 = vmul.f32 1.442695, %v2505_v48 }
 0x7a6   :  { %5704 = vpow2.f32 %v2611_v26  ;;  %v2424_v17 = vpop.xlane.xlu0 %2423  ;;  %v2591_v52 = vmul.f32 1.442695, %v2506_v1  ;;  %v2415_v8 = vpop.xlane.xlu1 %2414 }
 0x7a7   :  { %5706 = vpow2.f32 %v2601_v18  ;;  %v2507_v22 = vsub.f32 %v8337_v20, %v2424_v17  ;;  %v2508_v25 = vsub.f32 %v8343_v57, %v2424_v17  ;;  %v2501_v33 = vsub.f32 %v8318_v45, %v2415_v8 }
 0x7a8   :  { %5708 = vpow2.f32 %v2603_v14  ;;  %v2502_v58 = vsub.f32 %v8322_v59, %v2415_v8  ;;  %v2455_v45 = vmax.f32 %v8416_v42, %v8418_v36 }
 0x7a9   :  { %5710 = vpow2.f32 %v2589_v4  ;;  %v2593_v24 = vmul.f32 1.442695, %v2507_v22  ;;  %v2595_v20 = vmul.f32 1.442695, %v2508_v25  ;;  %v2581_v57 = vmul.f32 1.442695, %v2501_v33 }
 0x7aa   :  { %5712 = vpow2.f32 %v2591_v52  ;;  %v2409_v23 = vpop.xlane.xlu1 %2408  ;;  %v2418_v19 = vpop.xlane.xlu0 %2417  ;;  %v2583_v26 = vmul.f32 1.442695, %v2502_v58  ;;  %v2449_v33 = vmax.f32 %v8400_v27, %v8402_v56 }
 0x7ab   :  { %5714 = vpow2.f32 %v2593_v24  ;;  %v2503_v49 = vsub.f32 %v8324_v47, %v2418_v19  ;;  %v2504_v5 = vsub.f32 %v8330_v46, %v2418_v19  ;;  %v2497_v48 = vsub.f32 %v8300_v3, %v2409_v23 }
 0x7ac   :  { %v8485_v44 = vpop.eup %5694  ;;  %5716 = vpow2.f32 %v2595_v20  ;;  %v2498_v1 = vsub.f32 %v8302_v6, %v2409_v23  ;;  %v2458_v46 = vmax.f32 %v8422_v10, %v8424_v39 }
 0x7ad   :  { %v8488_v34 = vpop.eup %5696  ;;  %5718 = vpow2.f32 %v2581_v57  ;;  %v2585_v47 = vmul.f32 1.442695, %v2503_v49  ;;  %v2587_v52 = vmul.f32 1.442695, %v2504_v5  ;;  %v2573_v3 = vmul.f32 1.442695, %v2497_v48 }
 0x7ae   :  { %v2719_v28 = vadd.f32 %v8488_v34, %v8485_v44  ;;  %5720 = vpow2.f32 %v2583_v26  ;;  %v2403_v18 = vpop.xlane.xlu1 %2402  ;;  %v2412_v14 = vpop.xlane.xlu0 %2411  ;;  %v2575_v58 = vmul.f32 1.442695, %v2498_v1  ;;  %v2452_v5 = vmax.f32 %v8408_v21, %v8410_v55 }
 0x7af   :  { %v2493_v22 = vsub.f32 %v8292_v13, %v2403_v18  ;;  %5722 = vpow2.f32 %v2585_v47  ;;  %v2499_v20 = vsub.f32 %v8307_v35, %v2412_v14  ;;  %v2500_v13 = vsub.f32 %v8314_v12, %v2412_v14 }
 0x7b0   :  { %v8494_v31 = vpop.eup %5698  ;;  %2720 = vadd.xlane.f32.xlu1 %v2719_v28  ;;  %v2494_v28 = vsub.f32 %v8294_v62, %v2403_v18  ;;  %5724 = vpow2.f32 %v2587_v52 }
 0x7b1   :  { %v8496_v32 = vpop.eup %5700  ;;  %5726 = vpow2.f32 %v2573_v3  ;;  %v2579_v18 = vmul.f32 1.442695, %v2500_v13 }
 0x7b2   :  { %v8498_v7 = vpop.eup %5702  ;;  %v2713_v17 = vadd.f32 %v8496_v32, %v8494_v31  ;;  %v2406_v19 = vpop.xlane.xlu0 %2405  ;;  %5728 = vpow2.f32 %v2575_v58  ;;  %v2567_v62 = vmul.f32 1.442695, %v2494_v28 }
 0x7b3   :  { %v8502_v59 = vpop.eup %5704  ;;  %v2495_v12 = vsub.f32 %v8296_v53, %v2406_v19  ;;  %v2397_v14 = vpop.xlane.xlu1 %2396 }
 0x7b4   :  { %2456 = vmax.xlane.f32.xlu1 %v2455_v45  ;;  %v2722_v16 = vadd.f32 %v8502_v59, %v8498_v7  ;;  %v8512_v4 = vpop.eup %5706  ;;  %v2565_v45 = vmul.f32 1.442695, %v2493_v22  ;;  %v2443_v22 = vmax.f32 %v8384_v30, %v8386_v41  ;;  %v2490_v58 = vsub.f32 %v8286_v2, %v2397_v14 }
 0x7b5   :  { %v8516_v8 = vpop.eup %5708 }
 0x7b6   :  { %2723 = vadd.xlane.f32.xlu0 %v2722_v16  ;;  %v8521_v25 = vpop.eup %5710  ;;  %v2716_v57 = vadd.f32 %v8516_v8, %v8512_v4  ;;  %v2577_v16 = vmul.f32 1.442695, %v2499_v20  ;;  %5730 = vpow2.f32 %v2565_v45  ;;  %v2400_v20 = vpop.xlane.xlu0 %2399  ;;  %v2559_v2 = vmul.f32 1.442695, %v2490_v58 }
 0x7b7   :  { %v8526_v24 = vpop.eup %5712  ;;  %5732 = vpow2.f32 %v2567_v62  ;;  %v2491_v45 = vsub.f32 %v8288_v50, %v2400_v20  ;;  %v2391_v62 = vpop.xlane.xlu1 %2390 }
 0x7b8   :  { %2714 = vadd.xlane.f32.xlu1 %v2713_v17  ;;  %v2707_v49 = vadd.f32 %v8526_v24, %v8521_v25  ;;  %v8539_v1 = vpop.eup %5714  ;;  %v2496_v17 = vsub.f32 %v8298_v37, %v2406_v19  ;;  %5734 = vpow2.f32 %v2577_v16  ;;  %v2489_v37 = vsub.f32 %v8284_v40, %v2397_v14 }
 0x7b9   :  { %v8519_v6 = vpop.f32.mrf.mxu1  ;;  %v8543_v52 = vpop.eup %5716  ;;  %5736 = vpow2.f32 %v2579_v18  ;;  %v2437_v16 = vmax.f32 %v8368_v29, %v8370_v60  ;;  %v10937_v18 = vld [vmem:[#allocation65_spill] sm:$0xff] }
 0x7ba   :  { %2459 = vmax.xlane.f32.xlu0 %v2458_v46  ;;  %v8545_v3 = vpop.eup %5718  ;;  %v2571_v28 = vmul.f32 1.442695, %v2496_v17  ;;  %v2710_v13 = vadd.f32 %v8543_v52, %v8539_v1  ;;  %v2486_v14 = vsub.f32 %v10937_v18, %v2391_v62 }
 0x7bb   :  { %v8529_v23 = vpop.f32.mrf.mxu1  ;;  %v8550_v53 = vpop.eup %5720 }
 0x7bc   :  { %10936 = vst [vmem:[#allocation24_spill] sm:$0xff] %v8529_v23  ;;  %2450 = vmax.xlane.f32.xlu1 %v2449_v33  ;;  %v2569_v33 = vmul.f32 1.442695, %v2495_v12  ;;  %v2701_v19 = vadd.f32 %v8550_v53, %v8545_v3  ;;  %v8559_v40 = vpop.eup %5722  ;;  %v2485_v12 = vsub.f32 %v8276_v51, %v2391_v62  ;;  %v10939_v51 = vld [vmem:[#allocation79_spill] sm:$0xff] }
 0x7bd   :  { %v2996_v26 = vpop.f32.mrf.mxu1 }
 0x7be   :  { %2717 = vadd.xlane.f32.xlu0 %v2716_v57  ;;  %v3064_v35 = vpack.c.bf16 %v2996_v26, %v2996_v26  ;;  %v2557_v57 = vmul.f32 1.442695, %v2489_v37  ;;  %5738 = vpow2.f32 %v2569_v33  ;;  %v2446_v26 = vmax.f32 %v8392_v61, %v8394_v43 }
 0x7bf   :  { %v2998_v48 = vpop.f32.mrf.mxu1  ;;  %5740 = vpow2.f32 %v2571_v28  ;;  %v2549_v33 = vmul.f32 1.442695, %v2485_v12 }
 0x7c0   :  { %2708 = vadd.xlane.f32.xlu1 %v2707_v49  ;;  %v3153_v47 = vsel %vm1151_vm9, %v3064_v35, 0  ;;  %v3065_v46 = vpack.c.bf16 %v2998_v48, %v2998_v48  ;;  %v2492_v49 = vsub.f32 %v8290_v0, %v2400_v20  ;;  %v8564_v35 = vpop.eup %5724  ;;  %5742 = vpow2.f32 %v2557_v57  ;;  %v2394_v0 = vpop.xlane.xlu0 %2393  ;;  %v10940_v20 = vld [vmem:[#allocation75_spill] sm:$0xff] }
 0x7c1   :  { %v2561_v48 = vmul.f32 1.442695, %v2491_v45  ;;  %5744 = vpow2.f32 %v2559_v2  ;;  %v2487_v58 = vsub.f32 %v10939_v51, %v2394_v0  ;;  %v2551_v57 = vmul.f32 1.442695, %v2486_v14  ;;  %v10942_v45 = vld [vmem:[#allocation66_spill] sm:$0xff] }
 0x7c2   :  { %2453 = vmax.xlane.f32.xlu0 %v2452_v5  ;;  %5432 = vmatprep.subr.msk.bf16.mxu1 %vm1151_vm9, %v3065_v46  ;;  %v8566_v5 = vpop.eup %5726  ;;  %v2563_v17 = vmul.f32 1.442695, %v2492_v49 }
 0x7c3   :  { %3173 = vmatpush1.bf16.msra.mxu1 %v3153_v47  ;;  %v8570_v50 = vpop.eup %5728  ;;  %v2704_v47 = vadd.f32 %v8564_v35, %v8559_v40  ;;  %5746 = vpow2.f32 %v2561_v48  ;;  %v2553_v49 = vmul.f32 1.442695, %v2487_v58 }
 0x7c4   :  { %2444 = vmax.xlane.f32.xlu1 %v2443_v22  ;;  %v8576_v46 = vpop.eup %5730  ;;  %v2695_v22 = vadd.f32 %v8570_v50, %v8566_v5  ;;  %5748 = vpow2.f32 %v2563_v17 }
 0x7c5   :  { %10938 = vst [vmem:[#allocation65_spill] sm:$0xff] %v8576_v46  ;;  %v8580_v37 = vpop.eup %5732  ;;  %5750 = vpow2.f32 %v2549_v33  ;;  %v10946_v33 = vld [vmem:[#allocation25_spill] sm:$0xff] }
 0x7c6   :  { %2711 = vadd.xlane.f32.xlu0 %v2710_v13  ;;  %v8583_v28 = vpop.eup %5734  ;;  %v10941_v13 = vld [vmem:[#allocation68_spill] sm:$0xff]  ;;  %v2689_v62 = vadd.f32 %v8580_v37, %v8576_v46  ;;  %5752 = vpow2.f32 %v2551_v57 }
 0x7c7   :  { %v8588_v2 = vpop.eup %5736  ;;  %5754 = vpow2.f32 %v2553_v49 }
 0x7c8   :  { %2702 = vadd.xlane.f32.xlu1 %v2701_v19  ;;  %v2440_v19 = vmax.f32 %v10941_v13, %v10940_v20  ;;  %v2698_v48 = vadd.f32 %v8588_v2, %v8583_v28 }
 0x7ca   :  { %2447 = vmax.xlane.f32.xlu0 %v2446_v26  ;;  %v2488_v26 = vsub.f32 %v10942_v45, %v2394_v0 }
 0x7cc   :  { %2438 = vmax.xlane.f32.xlu1 %v2437_v16  ;;  %v8592_v16 = vpop.eup %5738  ;;  %v2555_v12 = vmul.f32 1.442695, %v2488_v26 }
 0x7cd   :  { %10943 = vst [vmem:[#allocation79_spill] sm:$0xff] %v8592_v16  ;;  %v8596_v18 = vpop.eup %5740 }
 0x7ce   :  { %2705 = vadd.xlane.f32.xlu0 %v2704_v47  ;;  %v8598_v14 = vpop.eup %5742  ;;  %5756 = vpow2.f32 %v2555_v12  ;;  %v2692_v17 = vadd.f32 %v8596_v18, %v8592_v16  ;;  %v10950_v16 = vld [vmem:[#allocation63_spill] sm:$0xff] }
 0x7cf   :  { %10944 = vst [vmem:[#allocation75_spill] sm:$0xff] %v8598_v14  ;;  %v8602_v0 = vpop.eup %5744 }
 0x7d0   :  { %2696 = vadd.xlane.f32.xlu1 %v2695_v22  ;;  %10945 = vst [vmem:[#allocation68_spill] sm:$0xff] %v8602_v0  ;;  %v8606_v58 = vpop.eup %5746 }
 0x7d1   :  { %v8610_v57 = vpop.eup %5748 }
 0x7d2   :  { %2441 = vmax.xlane.f32.xlu0 %v2440_v19  ;;  %v2683_v19 = vadd.f32 %v8602_v0, %v8598_v14  ;;  %v2686_v23 = vadd.f32 %v8610_v57, %v8606_v58 }
 0x7d4   :  { %2690 = vadd.xlane.f32.xlu1 %v2689_v62 }
 0x7d6   :  { %2699 = vadd.xlane.f32.xlu0 %v2698_v48 }
 0x7da   :  { %2693 = vadd.xlane.f32.xlu0 %v2692_v17  ;;  %v2481_v47 = vpop.xlane.xlu1 %2480  ;;  %v10948_v17 = vld [vmem:[#allocation74_spill] sm:$0xff] }
 0x7db   :  { %v2545_v22 = vsub.f32 %v8450_v15, %v2481_v47  ;;  %v2546_v51 = vsub.f32 %v10946_v33, %v2481_v47  ;;  %v8614_v15 = vpop.eup %5750 }
 0x7dc   :  { %10947 = vst [vmem:[#allocation66_spill] sm:$0xff] %v8614_v15 }
 0x7dd   :  { %v2669_v45 = vmul.f32 1.442695, %v2545_v22  ;;  %v2671_v26 = vmul.f32 1.442695, %v2546_v51  ;;  %v8620_v22 = vpop.eup %5752 }
 0x7de   :  { %2684 = vadd.xlane.f32.xlu0 %v2683_v19  ;;  %v2475_v62 = vpop.xlane.xlu1 %2474  ;;  %v2484_v49 = vpop.xlane.xlu0 %2483 }
 0x7df   :  { %5758 = vpow2.f32 %v2669_v45  ;;  %v2541_v12 = vsub.f32 %v8442_v11, %v2475_v62  ;;  %v2547_v48 = vsub.f32 %v8456_v63, %v2484_v49  ;;  %v2542_v47 = vsub.f32 %v10948_v17, %v2475_v62  ;;  %v10949_v11 = vld [vmem:[#allocation76_spill] sm:$0xff]  ;;  %v8623_v63 = vpop.eup %5754  ;;  %v10952_v17 = vld [vmem:[#allocation77_spill] sm:$0xff] }
 0x7e0   :  { %5760 = vpow2.f32 %v2671_v26  ;;  %v2548_v33 = vsub.f32 %v8460_v54, %v2484_v49  ;;  %v2677_v54 = vadd.f32 %v8620_v22, %v8614_v15  ;;  %v8628_v49 = vpop.eup %5756 }
 0x7e1   :  { %v2673_v51 = vmul.f32 1.442695, %v2547_v48  ;;  %v2661_v14 = vmul.f32 1.442695, %v2541_v12  ;;  %v2663_v0 = vmul.f32 1.442695, %v2542_v47 }
 0x7e2   :  { %v2675_v19 = vmul.f32 1.442695, %v2548_v33  ;;  %2687 = vadd.xlane.f32.xlu0 %v2686_v23  ;;  %v2478_v45 = vpop.xlane.xlu0 %2477  ;;  %v2469_v26 = vpop.xlane.xlu1 %2468  ;;  %v10951_v23 = vld [vmem:[#allocation72_spill] sm:$0xff] }
 0x7e3   :  { %v2543_v46 = vsub.f32 %v10949_v11, %v2478_v45  ;;  %v2544_v62 = vsub.f32 %v10950_v16, %v2478_v45  ;;  %5762 = vpow2.f32 %v2673_v51  ;;  %v2537_v48 = vsub.f32 %v10951_v23, %v2469_v26 }
 0x7e4   :  { %5764 = vpow2.f32 %v2675_v19  ;;  %v2538_v33 = vsub.f32 %v10952_v17, %v2469_v26  ;;  %v2680_v16 = vadd.f32 %v8628_v49, %v8623_v63 }
 0x7e5   :  { %5766 = vpow2.f32 %v2661_v14  ;;  %v2665_v12 = vmul.f32 1.442695, %v2543_v46  ;;  %v2667_v11 = vmul.f32 1.442695, %v2544_v62  ;;  %v2653_v45 = vmul.f32 1.442695, %v2537_v48 }
 0x7e6   :  { %2678 = vadd.xlane.f32.xlu0 %v2677_v54  ;;  %5768 = vpow2.f32 %v2663_v0  ;;  %v2472_v47 = vpop.xlane.xlu0 %2471  ;;  %v2655_v19 = vmul.f32 1.442695, %v2538_v33  ;;  %v2463_v14 = vpop.xlane.xlu1 %2462  ;;  %v10953_v62 = vld [vmem:[#allocation73_spill] sm:$0xff]  ;;  %v10954_v48 = vld [vmem:[#allocation71_spill] sm:$0xff] }
 0x7e7   :  { %5770 = vpow2.f32 %v2665_v12  ;;  %v2539_v15 = vsub.f32 %v8438_v38, %v2472_v47  ;;  %v2540_v46 = vsub.f32 %v8440_v9, %v2472_v47  ;;  %v2533_v54 = vsub.f32 %v10953_v62, %v2463_v14 }
 0x7e8   :  { %5772 = vpow2.f32 %v2667_v11  ;;  %v2534_v12 = vsub.f32 %v10954_v48, %v2463_v14 }
 0x7e9   :  { %5774 = vpow2.f32 %v2653_v45  ;;  %v2657_v23 = vmul.f32 1.442695, %v2539_v15  ;;  %v2659_v38 = vmul.f32 1.442695, %v2540_v46  ;;  %v2645_v11 = vmul.f32 1.442695, %v2533_v54 }
 0x7ea   :  { %2681 = vadd.xlane.f32.xlu0 %v2680_v16  ;;  %5776 = vpow2.f32 %v2655_v19  ;;  %v2647_v47 = vmul.f32 1.442695, %v2534_v12  ;;  %v3060_v54 = vpack.c.bf16 %v8519_v6, %v8519_v6 }
 0x7eb   :  { %5778 = vpow2.f32 %v2657_v23 }
 0x7ec   :  { %v8635_v51 = vpop.eup %5758  ;;  %5780 = vpow2.f32 %v2659_v38 }
 0x7ed   :  { %v8638_v0 = vpop.eup %5760  ;;  %5782 = vpow2.f32 %v2645_v11 }
 0x7ee   :  { %v2767_v26 = vadd.f32 %v8638_v0, %v8635_v51  ;;  %5784 = vpow2.f32 %v2647_v47 }
 0x7f0   :  { %2768 = vadd.xlane.f32.xlu0 %v2767_v26  ;;  %v8644_v17 = vpop.eup %5762 }
 0x7f1   :  { %v8646_v33 = vpop.eup %5764 }
 0x7f2   :  { %v8648_v9 = vpop.eup %5766  ;;  %v2770_v16 = vadd.f32 %v8646_v33, %v8644_v17 }
 0x7f3   :  { %10955 = vst [vmem:[#allocation25_spill] sm:$0xff] %v8648_v9  ;;  %v8652_v45 = vpop.eup %5768 }
 0x7f4   :  { %2771 = vadd.xlane.f32.xlu0 %v2770_v16  ;;  %v8654_v15 = vpop.eup %5770  ;;  %v2761_v19 = vadd.f32 %v8652_v45, %v8648_v9  ;;  %v2466_v16 = vpop.xlane.xlu0 %2465 }
 0x7f5   :  { %10956 = vst [vmem:[#allocation74_spill] sm:$0xff] %v8654_v15  ;;  %v8658_v14 = vpop.eup %5772 }
 0x7f6   :  { %v8660_v46 = vpop.eup %5774  ;;  %v2764_v26 = vadd.f32 %v8658_v14, %v8654_v15 }
 0x7f7   :  { %10957 = vst [vmem:[#allocation76_spill] sm:$0xff] %v8660_v46  ;;  %v8664_v62 = vpop.eup %5776 }
 0x7f8   :  { %2762 = vadd.xlane.f32.xlu0 %v2761_v19  ;;  %10958 = vst [vmem:[#allocation63_spill] sm:$0xff] %v8664_v62  ;;  %v8668_v23 = vpop.eup %5778  ;;  %v2755_v48 = vadd.f32 %v8664_v62, %v8660_v46  ;;  %v10962_v19 = vld [vmem:[#allocation69_spill] sm:$0xff]  ;;  %v10963_v46 = vld [vmem:[#allocation70_spill] sm:$0xff] }
 0x7f9   :  { %10959 = vst [vmem:[#allocation72_spill] sm:$0xff] %v8668_v23  ;;  %v8672_v12 = vpop.eup %5780  ;;  %v2536_v62 = vsub.f32 %v10963_v46, %v2466_v16 }
 0x7fa   :  { %v8674_v38 = vpop.eup %5782  ;;  %v2758_v11 = vadd.f32 %v8672_v12, %v8668_v23 }
 0x7fb   :  { %10960 = vst [vmem:[#allocation77_spill] sm:$0xff] %v8674_v38  ;;  %v8678_v47 = vpop.eup %5784 }
 0x7fc   :  { %2765 = vadd.xlane.f32.xlu0 %v2764_v26  ;;  %10961 = vst [vmem:[#allocation73_spill] sm:$0xff] %v8678_v47  ;;  %v2749_v6 = vadd.f32 %v8678_v47, %v8674_v38  ;;  %v2535_v26 = vsub.f32 %v10962_v19, %v2466_v16 }
 0x7fe   :  { %v2649_v9 = vmul.f32 1.442695, %v2535_v26 }
 0x800   :  { %2756 = vadd.xlane.f32.xlu0 %v2755_v48  ;;  %5786 = vpow2.f32 %v2649_v9 }
 0x801   :  { %3072 = vxpose.xlu1.c.b16.start.end [1/1] (short) %v3060_v54, 128  ;;  %v2651_v54 = vmul.f32 1.442695, %v2536_v62 }
 0x803   :  { %5788 = vpow2.f32 %v2651_v54 }
 0x804   :  { %2759 = vadd.xlane.f32.xlu0 %v2758_v11 }
 0x808   :  { %2750 = vadd.xlane.f32.xlu0 %v2749_v6 }
 0x80d   :  { %v8684_v48 = vpop.eup %5786 }
 0x80e   :  { %10964 = vst [vmem:[#allocation71_spill] sm:$0xff] %v8684_v48 }
 0x810   :  { %v8686_v15 = vpop.eup %5788 }
 0x811   :  { %10965 = vst [vmem:[#allocation69_spill] sm:$0xff] %v8686_v15  ;;  %v2752_v11 = vadd.f32 %v8686_v15, %v8684_v48 }
 0x82a   :  { %2753 = vadd.xlane.f32.xlu1 %v2752_v11 }
 0x839   :  { %v2721_v23 = vpop.xlane.xlu1 %2720 }
 0x83a   :  { %5790 = vrcp.f32 %v2721_v23 }
 0x83d   :  { %v2457_v6 = vpop.xlane.xlu1 %2456 }
 0x83e   :  { %v2529_v38 = vsub.f32 %v8416_v42, %v2457_v6  ;;  %v2530_v19 = vsub.f32 %v8418_v36, %v2457_v6 }
 0x83f   :  { %v2724_v46 = vpop.xlane.xlu0 %2723 }
 0x840   :  { %v2637_v16 = vmul.f32 1.442695, %v2529_v38  ;;  %v2639_v62 = vmul.f32 1.442695, %v2530_v19  ;;  %5792 = vrcp.f32 %v2724_v46 }
 0x841   :  { %v2715_v9 = vpop.xlane.xlu1 %2714 }
 0x842   :  { %5794 = vpow2.f32 %v2637_v16 }
 0x843   :  { %5796 = vpow2.f32 %v2639_v62  ;;  %v2460_v26 = vpop.xlane.xlu0 %2459 }
 0x844   :  { %v2531_v54 = vsub.f32 %v8422_v10, %v2460_v26  ;;  %v2532_v48 = vsub.f32 %v8424_v39, %v2460_v26  ;;  %5798 = vrcp.f32 %v2715_v9 }
 0x845   :  { %v2451_v11 = vpop.xlane.xlu1 %2450 }
 0x846   :  { %v2641_v15 = vmul.f32 1.442695, %v2531_v54  ;;  %v2643_v23 = vmul.f32 1.442695, %v2532_v48  ;;  %v2525_v47 = vsub.f32 %v8400_v27, %v2451_v11  ;;  %v2526_v42 = vsub.f32 %v8402_v56, %v2451_v11 }
 0x847   :  { %v2718_v36 = vpop.xlane.xlu0 %2717  ;;  %v5791_v46 = vpop.eup %5790 }
 0x848   :  { %5800 = vpow2.f32 %v2641_v15  ;;  %v2629_v38 = vmul.f32 1.442695, %v2525_v47  ;;  %v2631_v6 = vmul.f32 1.442695, %v2526_v42  ;;  %v2834_v56 = vmul.f32 %v5791_v46, %v8488_v34 }
 0x849   :  { %5802 = vpow2.f32 %v2643_v23  ;;  %v2709_v19 = vpop.xlane.xlu1 %2708 }
 0x84a   :  { %5804 = vpow2.f32 %v2629_v38 }
 0x84b   :  { %5806 = vpow2.f32 %v2631_v6  ;;  %v2454_v10 = vpop.xlane.xlu0 %2453 }
 0x84c   :  { %5808 = vrcp.f32 %v2718_v36  ;;  %v2527_v39 = vsub.f32 %v8408_v21, %v2454_v10  ;;  %v2528_v48 = vsub.f32 %v8410_v55, %v2454_v10  ;;  %v2833_v21 = vmul.f32 %v5791_v46, %v8485_v44 }
 0x84d   :  { %v5793_v16 = vpop.eup %5792  ;;  %v2445_v27 = vpop.xlane.xlu1 %2444  ;;  %5810 = vrcp.f32 %v2709_v19 }
 0x84e   :  { %v2633_v62 = vmul.f32 1.442695, %v2527_v39  ;;  %v2635_v9 = vmul.f32 1.442695, %v2528_v48  ;;  %v2521_v15 = vsub.f32 %v8384_v30, %v2445_v27  ;;  %v2522_v47 = vsub.f32 %v8386_v41, %v2445_v27 }
 0x84f   :  { %v8701_v26 = vpop.eup %5794  ;;  %v2712_v54 = vpop.xlane.xlu0 %2711  ;;  %v2836_v11 = vmul.f32 %v5793_v16, %v8502_v59  ;;  %v2835_v55 = vmul.f32 %v5793_v16, %v8498_v7 }
 0x850   :  { %v8706_v23 = vpop.eup %5796  ;;  %5812 = vpow2.f32 %v2633_v62  ;;  %v2621_v34 = vmul.f32 1.442695, %v2521_v15  ;;  %v2623_v42 = vmul.f32 1.442695, %v2522_v47 }
 0x851   :  { %5814 = vpow2.f32 %v2635_v9  ;;  %v2884_v36 = vpack.c.bf16 %v2836_v11, %v2834_v56  ;;  %v2703_v30 = vpop.xlane.xlu1 %2702  ;;  %v2883_v38 = vpack.c.bf16 %v2835_v55, %v2833_v21  ;;  %v2743_v41 = vadd.f32 %v8706_v23, %v8701_v26  ;;  %v5799_v44 = vpop.eup %5798 }
 0x852   :  { %5816 = vpow2.f32 %v2621_v34  ;;  %v2829_v21 = vmul.f32 %v5799_v44, %v8494_v31 }
 0x853   :  { %5818 = vpow2.f32 %v2623_v42  ;;  %2901 = vmatprep.subr.bf16.mxu0 %v2884_v36  ;;  %v2448_v59 = vpop.xlane.xlu0 %2447  ;;  %2744 = vadd.xlane.f32.xlu0 %v2743_v41 }
 0x854   :  { %5820 = vrcp.f32 %v2712_v54  ;;  %2902 = vmatpush1.bf16.xpose.msra.mxu0 %v2883_v38  ;;  %v2523_v7 = vsub.f32 %v8392_v61, %v2448_v59  ;;  %v2524_v6 = vsub.f32 %v8394_v43, %v2448_v59  ;;  %v2830_v54 = vmul.f32 %v5799_v44, %v8496_v32 }
 0x855   :  { %v8712_v19 = vpop.eup %5800  ;;  %v2439_v46 = vpop.xlane.xlu1 %2438  ;;  %5822 = vrcp.f32 %v2703_v30 }
 0x856   :  { %v8714_v10 = vpop.eup %5802  ;;  %v2625_v39 = vmul.f32 1.442695, %v2523_v7  ;;  %v2627_v48 = vmul.f32 1.442695, %v2524_v6  ;;  %v2517_v16 = vsub.f32 %v8368_v29, %v2439_v46  ;;  %v2518_v27 = vsub.f32 %v8370_v60, %v2439_v46 }
 0x857   :  { %v8718_v56 = vpop.eup %5804  ;;  %v2706_v62 = vpop.xlane.xlu0 %2705  ;;  %v2746_v61 = vadd.f32 %v8714_v10, %v8712_v19 }
 0x858   :  { %v8722_v9 = vpop.eup %5806  ;;  %5824 = vpow2.f32 %v2625_v39  ;;  %v2613_v43 = vmul.f32 1.442695, %v2517_v16  ;;  %v2615_v15 = vmul.f32 1.442695, %v2518_v27 }
 0x859   :  { %v5809_v47 = vpop.eup %5808  ;;  %5826 = vpow2.f32 %v2627_v48  ;;  %2747 = vadd.xlane.f32.xlu0 %v2746_v61  ;;  %v2697_v29 = vpop.xlane.xlu1 %2696  ;;  %v2737_v60 = vadd.f32 %v8722_v9, %v8718_v56 }
 0x85a   :  { %5828 = vpow2.f32 %v2613_v43  ;;  %v2832_v11 = vmul.f32 %v5809_v47, %v8516_v8  ;;  %v2831_v55 = vmul.f32 %v5809_v47, %v8512_v4  ;;  %v5811_v42 = vpop.eup %5810 }
 0x85b   :  { %5830 = vpow2.f32 %v2615_v15  ;;  %v2442_v34 = vpop.xlane.xlu0 %2441  ;;  %v2826_v46 = vmul.f32 %v5811_v42, %v8526_v24  ;;  %v2825_v16 = vmul.f32 %v5811_v42, %v8521_v25 }
 0x85c   :  { %5832 = vrcp.f32 %v2706_v62  ;;  %v2882_v36 = vpack.c.bf16 %v2832_v11, %v2830_v54  ;;  %v2881_v30 = vpack.c.bf16 %v2831_v55, %v2829_v21  ;;  %v2519_v38 = vsub.f32 %v10941_v13, %v2442_v34 }
 0x85d   :  { %v8731_v32 = vpop.eup %5812  ;;  %v2520_v41 = vsub.f32 %v10940_v20, %v2442_v34  ;;  %2738 = vadd.xlane.f32.xlu0 %v2737_v60  ;;  %v2691_v59 = vpop.xlane.xlu1 %2690  ;;  %5834 = vrcp.f32 %v2697_v29  ;;  %v10966_v54 = vmov 0  }
 0x85e   :  { %v8734_v7 = vpop.eup %5814  ;;  %2903 = vmatprep.subr.bf16.mxu0 %v2882_v36  ;;  %v2617_v31 = vmul.f32 1.442695, %v2519_v38  ;;  %5836 = vrcp.f32 %v2691_v59 }
 0x85f   :  { %v8736_v4 = vpop.eup %5816  ;;  %2904 = vmatpush1.bf16.xpose.msra.mxu0 %v2881_v30  ;;  %v2619_v8 = vmul.f32 1.442695, %v2520_v41  ;;  %v2700_v44 = vpop.xlane.xlu0 %2699  ;;  %v2740_v13 = vadd.f32 %v8734_v7, %v8731_v32 }
 0x860   :  { %v8740_v6 = vpop.eup %5818  ;;  %5838 = vpow2.f32 %v2617_v31 }
 0x861   :  { %v5821_v20 = vpop.eup %5820  ;;  %5840 = vpow2.f32 %v2619_v8  ;;  %2741 = vadd.xlane.f32.xlu0 %v2740_v13  ;;  %v2731_v39 = vadd.f32 %v8740_v6, %v8736_v4 }
 0x862   :  { %5842 = vrcp.f32 %v2700_v44  ;;  %v2828_v48 = vmul.f32 %v5821_v20, %v8543_v52  ;;  %v2827_v27 = vmul.f32 %v5821_v20, %v8539_v1  ;;  %v5823_v43 = vpop.eup %5822 }
 0x863   :  { %v2694_v62 = vpop.xlane.xlu0 %2693  ;;  %2732 = vadd.xlane.f32.xlu1 %v2731_v39  ;;  %v3080_v61 = vpop.trf.xlu1  ;;  %v2822_v21 = vmul.f32 %v5823_v43, %v8550_v53  ;;  %v2821_v36 = vmul.f32 %v5823_v43, %v8545_v3 }
 0x864   :  { %v2880_v15 = vpack.c.bf16 %v2828_v48, %v2826_v46  ;;  %v2879_v47 = vpack.c.bf16 %v2827_v27, %v2825_v16  ;;  %5844 = vrcp.f32 %v2694_v62  ;;  %5433 = vmatmul.mubr.msk.bf16.vlgmr.msra.gmra.mxu1 %vm1144_vm10, %v3080_v61 }
 0x865   :  { %v8749_v24 = vpop.eup %5824  ;;  %3200 = vmatprep.mubr.bf16.mxu1 %v10966_v54 }
 0x866   :  { %v8752_v29 = vpop.eup %5826  ;;  %2905 = vmatprep.subr.bf16.mxu0 %v2880_v15 }
 0x867   :  { %v8754_v52 = vpop.eup %5828  ;;  %2906 = vmatpush1.bf16.xpose.msra.mxu0 %v2879_v47  ;;  %v2685_v25 = vpop.xlane.xlu0 %2684  ;;  %v2734_v1 = vadd.f32 %v8752_v29, %v8749_v24 }
 0x868   :  { %v8758_v60 = vpop.eup %5830  ;;  %v3081_v34 = vpop.trf.xlu1  ;;  %5846 = vrcp.f32 %v2685_v25 }
 0x869   :  { %v5833_v11 = vpop.eup %5832  ;;  %2735 = vadd.xlane.f32.xlu1 %v2734_v1  ;;  %v2725_v55 = vadd.f32 %v8758_v60, %v8754_v52 }
 0x86a   :  { %v2824_v42 = vmul.f32 %v5833_v11, %v8564_v35  ;;  %v2823_v30 = vmul.f32 %v5833_v11, %v8559_v40  ;;  %v5835_v38 = vpop.eup %5834 }
 0x86b   :  { %v2688_v41 = vpop.xlane.xlu0 %2687  ;;  %v5837_v59 = vpop.eup %5836  ;;  %v2818_v13 = vmul.f32 %v5835_v38, %v8570_v50  ;;  %v2817_v48 = vmul.f32 %v5835_v38, %v8566_v5 }
 0x86c   :  { %v2878_v31 = vpack.c.bf16 %v2824_v42, %v2822_v21  ;;  %v2877_v8 = vpack.c.bf16 %v2823_v30, %v2821_v36  ;;  %5848 = vrcp.f32 %v2688_v41  ;;  %5434 = vmatmul.mubr.msk.bf16.gmra.mxu1 %vm1144_vm10, %v3081_v34  ;;  %v3082_v16 = vpop.trf.xlu1  ;;  %v2814_v62 = vmul.f32 %v5837_v59, %v8580_v37  ;;  %v10968_v37 = vld [vmem:[#allocation68_spill] sm:$0xff]  ;;  %v10969_v21 = vld [vmem:[#allocation65_spill] sm:$0xff] }
 0x86d   :  { %v8767_v53 = vpop.eup %5838  ;;  %2726 = vadd.xlane.f32.xlu1 %v2725_v55  ;;  %3210 = vmatprep.mubr.bf16.mxu1 %v10966_v54  ;;  %v2813_v55 = vmul.f32 %v5837_v59, %v10969_v21 }
 0x86e   :  { %v8770_v44 = vpop.eup %5840  ;;  %2907 = vmatprep.subr.bf16.mxu0 %v2878_v31 }
 0x86f   :  { %v5843_v35 = vpop.eup %5842  ;;  %2908 = vmatpush1.bf16.xpose.msra.mxu0 %v2877_v8  ;;  %v2679_v3 = vpop.xlane.xlu0 %2678  ;;  %v2728_v40 = vadd.f32 %v8770_v44, %v8767_v53  ;;  %v10970_v8 = vld [vmem:[#allocation75_spill] sm:$0xff] }
 0x870   :  { %v2820_v20 = vmul.f32 %v5843_v35, %v8588_v2  ;;  %v2819_v46 = vmul.f32 %v5843_v35, %v8583_v28  ;;  %5850 = vrcp.f32 %v2679_v3  ;;  %v10967_v2 = vld [vmem:[#allocation79_spill] sm:$0xff]  ;;  %v3083_v1 = vpop.trf.xlu1 }
 0x871   :  { %v5845_v39 = vpop.eup %5844  ;;  %2729 = vadd.xlane.f32.xlu1 %v2728_v40 }
 0x872   :  { %v2876_v27 = vpack.c.bf16 %v2820_v20, %v2818_v13  ;;  %v2816_v61 = vmul.f32 %v5845_v39, %v8596_v18  ;;  %v2875_v43 = vpack.c.bf16 %v2819_v46, %v2817_v48  ;;  %v2815_v47 = vmul.f32 %v5845_v39, %v10967_v2  ;;  %v10971_v39 = vld [vmem:[#allocation66_spill] sm:$0xff] }
 0x873   :  { %v2682_v15 = vpop.xlane.xlu0 %2681 }
 0x874   :  { %2909 = vmatprep.subr.bf16.mxu0 %v2876_v27  ;;  %5852 = vrcp.f32 %v2682_v15  ;;  %v2874_v50 = vpack.c.bf16 %v2816_v61, %v2814_v62  ;;  %5435 = vmatmul.mubr.msk.bf16.gmra.mxu1 %vm1144_vm10, %v3082_v16  ;;  %v2873_v42 = vpack.c.bf16 %v2815_v47, %v2813_v55  ;;  %v3084_v31 = vpop.trf.xlu1  ;;  %v10972_v16 = vld [vmem:[#allocation24_spill] sm:$0xff]  ;;  %v8810_v55 = vpop.f32.mrf.mxu1 }
 0x875   :  { %3220 = vmatprep.mubr.bf16.mxu1 %v10966_v54  ;;  %v5847_v28 = vpop.eup %5846  ;;  %v3061_v27 = vpack.c.bf16 %v10972_v16, %v10972_v16  ;;  %10975 = vst [vmem:[#allocation70_spill] sm:$0xff] %v8810_v55 }
 0x876   :  { %v2810_v11 = vmul.f32 %v5847_v28, %v10968_v37  ;;  %v2809_v35 = vmul.f32 %v5847_v28, %v10970_v8  ;;  %v10973_v37 = vld [vmem:[#allocation74_spill] sm:$0xff] }
 0x877   :  { %2910 = vmatpush1.bf16.xpose.msra.mxu0 %v2875_v43 }
 0x878   :  { %2911 = vmatprep.subr.bf16.mxu0 %v2874_v50  ;;  %v3085_v46 = vpop.trf.xlu1 }
 0x879   :  { %v5849_v5 = vpop.eup %5848  ;;  %v2769_v25 = vpop.xlane.xlu0 %2768 }
 0x87a   :  { %v2812_v18 = vmul.f32 %v5849_v5, %v8610_v57  ;;  %5854 = vrcp.f32 %v2769_v25  ;;  %v2811_v41 = vmul.f32 %v5849_v5, %v8606_v58 }
 0x87c   :  { %v2872_v34 = vpack.c.bf16 %v2812_v18, %v2810_v11  ;;  %5436 = vmatmul.mubr.msk.bf16.gmra.mxu1 %vm1144_vm10, %v3083_v1  ;;  %v2871_v13 = vpack.c.bf16 %v2811_v41, %v2809_v35  ;;  %v3086_v2 = vpop.trf.xlu1  ;;  %v10974_v18 = vld [vmem:[#allocation25_spill] sm:$0xff]  ;;  %v10978_v35 = vld [vmem:[#allocation76_spill] sm:$0xff] }
 0x87d   :  { %3230 = vmatprep.mubr.bf16.mxu1 %v10966_v54  ;;  %v5851_v36 = vpop.eup %5850  ;;  %v2772_v30 = vpop.xlane.xlu0 %2771 }
 0x87e   :  { %5856 = vrcp.f32 %v2772_v30  ;;  %v2806_v57 = vmul.f32 %v5851_v36, %v8620_v22 }
 0x87f   :  { %2912 = vmatpush1.bf16.xpose.msra.mxu0 %v2873_v42 }
 0x880   :  { %2913 = vmatprep.subr.bf16.mxu0 %v2872_v34 }
 0x881   :  { %v5853_v38 = vpop.eup %5852  ;;  %v2763_v3 = vpop.xlane.xlu0 %2762 }
 0x882   :  { %v2808_v59 = vmul.f32 %v5853_v38, %v8628_v49  ;;  %5858 = vrcp.f32 %v2763_v3  ;;  %v2807_v58 = vmul.f32 %v5853_v38, %v8623_v63  ;;  %v2805_v49 = vmul.f32 %v5851_v36, %v10971_v39  ;;  %v8812_v36 = vpop.f32.mrf.mxu1 }
 0x884   :  { %v2870_v40 = vpack.c.bf16 %v2808_v59, %v2806_v57  ;;  %5437 = vmatmul.mubr.msk.bf16.gmra.mxu1 %vm1144_vm10, %v3084_v31  ;;  %v2869_v61 = vpack.c.bf16 %v2807_v58, %v2805_v49  ;;  %v10977_v31 = vld [vmem:[#allocation72_spill] sm:$0xff]  ;;  %v10980_v49 = vld [vmem:[#allocation69_spill] sm:$0xff] }
 0x885   :  { %3240 = vmatprep.mubr.bf16.mxu1 %v10966_v54  ;;  %v2766_v20 = vpop.xlane.xlu0 %2765 }
 0x886   :  { %5860 = vrcp.f32 %v2766_v20 }
 0x887   :  { %2914 = vmatpush1.bf16.xpose.msra.mxu0 %v2871_v13  ;;  %v5855_v22 = vpop.eup %5854 }
 0x888   :  { %2915 = vmatprep.subr.bf16.mxu0 %v2870_v40  ;;  %v2866_v43 = vmul.f32 %v5855_v22, %v8638_v0  ;;  %v2865_v5 = vmul.f32 %v5855_v22, %v8635_v51  ;;  %v3087_v51 = vpop.trf.xlu1  ;;  %v10979_v22 = vld [vmem:[#allocation73_spill] sm:$0xff] }
 0x889   :  { %v2757_v48 = vpop.xlane.xlu0 %2756 }
 0x88a   :  { %5862 = vrcp.f32 %v2757_v48  ;;  %v10981_v48 = vld [vmem:[#allocation77_spill] sm:$0xff] }
 0x88b   :  { %v5857_v62 = vpop.eup %5856 }
 0x88c   :  { %5438 = vmatmul.mubr.msk.bf16.gmra.mxu1 %vm1144_vm10, %v3085_v46  ;;  %v2868_v63 = vmul.f32 %v5857_v62, %v8646_v33  ;;  %v2867_v50 = vmul.f32 %v5857_v62, %v8644_v17 }
 0x88d   :  { %3250 = vmatprep.mubr.bf16.mxu1 %v10966_v54  ;;  %v2760_v15 = vpop.xlane.xlu0 %2759 }
 0x88e   :  { %3088 = vxpose.xlu0.c.b16.start.end [1/1] (short) %v3061_v27, 128  ;;  %5864 = vrcp.f32 %v2760_v15  ;;  %v2900_v28 = vpack.c.bf16 %v2868_v63, %v2866_v43  ;;  %v2899_v25 = vpack.c.bf16 %v2867_v50, %v2865_v5  ;;  %v10982_v27 = vld [vmem:[#allocation71_spill] sm:$0xff] }
 0x88f   :  { %2916 = vmatpush1.bf16.xpose.msra.mxu0 %v2869_v61  ;;  %v5859_v47 = vpop.eup %5858 }
 0x890   :  { %2917 = vmatprep.subr.bf16.mxu0 %v2900_v28  ;;  %v2862_v0 = vmul.f32 %v5859_v47, %v8652_v45  ;;  %v2861_v21 = vmul.f32 %v5859_v47, %v10974_v18  ;;  %v3006_v45 = vpop.f32.mrf.mxu1 }
 0x891   :  { %v2751_v13 = vpop.xlane.xlu0 %2750 }
 0x892   :  { %v3007_v59 = vpop.f32.mrf.mxu1  ;;  %5866 = vrcp.f32 %v2751_v13 }
 0x893   :  { %v5861_v1 = vpop.eup %5860 }
 0x894   :  { %5439 = vmatmul.mubr.msk.bf16.gmra.mxu1 %vm1144_vm10, %v3086_v2  ;;  %v2864_v33 = vmul.f32 %v5861_v1, %v8658_v14  ;;  %v2863_v17 = vmul.f32 %v5861_v1, %v10973_v37  ;;  %v10976_v14 = vld [vmem:[#allocation63_spill] sm:$0xff] }
 0x895   :  { %3260 = vmatprep.mubr.bf16.mxu1 %v10966_v54 }
 0x896   :  { %v2898_v11 = vpack.c.bf16 %v2864_v33, %v2862_v0  ;;  %v2897_v42 = vpack.c.bf16 %v2863_v17, %v2861_v21 }
 0x897   :  { %2918 = vmatpush2.bf16.xpose.msra.mxu0 %v2899_v25  ;;  %v5863_v34 = vpop.eup %5862 }
 0x898   :  { %2919 = vmatprep.subr.bf16.mxu0 %v2898_v11  ;;  %v2858_v38 = vmul.f32 %v5863_v34, %v10976_v14  ;;  %v2857_v3 = vmul.f32 %v5863_v34, %v10978_v35 }
 0x89b   :  { %v5865_v30 = vpop.eup %5864 }
 0x89c   :  { %5440 = vmatmul.mubr.msk.bf16.gmra.mxu1 %vm1144_vm10, %v3087_v51  ;;  %v2860_v41 = vmul.f32 %v5865_v30, %v8672_v12  ;;  %v2859_v57 = vmul.f32 %v5865_v30, %v10977_v31 }
 0x89d   :  { %3270 = vmatprep.mubr.bf16.mxu1 %v10966_v54 }
 0x89e   :  { %v2896_v8 = vpack.c.bf16 %v2860_v41, %v2858_v38  ;;  %v2895_v40 = vpack.c.bf16 %v2859_v57, %v2857_v3 }
 0x89f   :  { %2920 = vmatpush2.bf16.xpose.msra.mxu0 %v2897_v42  ;;  %v5867_v58 = vpop.eup %5866 }
 0x8a0   :  { %2921 = vmatprep.subr.bf16.mxu0 %v2896_v8  ;;  %v2854_v39 = vmul.f32 %v5867_v58, %v10979_v22  ;;  %v2853_v16 = vmul.f32 %v5867_v58, %v10981_v48  ;;  %v10983_v58 = vld [vmem:[#allocation64_spill] sm:$0xff] }
 0x8a7   :  { %2922 = vmatpush2.bf16.xpose.msra.mxu0 %v2895_v40 }
 0x8b3   :  { %v2754_v20 = vpop.xlane.xlu1 %2753 }
 0x8b4   :  { %5868 = vrcp.f32 %v2754_v20 }
 0x8c1   :  { %v5869_v46 = vpop.eup %5868 }
 0x8c2   :  { %v2856_v12 = vmul.f32 %v5869_v46, %v10980_v49  ;;  %v2855_v62 = vmul.f32 %v5869_v46, %v10982_v27 }
 0x8c4   :  { %v2894_v61 = vpack.c.bf16 %v2856_v12, %v2854_v39  ;;  %v2893_v43 = vpack.c.bf16 %v2855_v62, %v2853_v16 }
 0x8c6   :  { %2923 = vmatprep.subr.bf16.mxu0 %v2894_v61 }
 0x8c7   :  { %2924 = vmatpush2.bf16.xpose.msra.mxu0 %v2893_v43 }
 0x8dc   :  { %v2745_v63 = vpop.xlane.xlu0 %2744 }
 0x8dd   :  { %5870 = vrcp.f32 %v2745_v63 }
 0x8e2   :  { %v2748_v15 = vpop.xlane.xlu0 %2747 }
 0x8e3   :  { %5872 = vrcp.f32 %v2748_v15 }
 0x8e6   :  { %v2739_v50 = vpop.xlane.xlu0 %2738 }
 0x8e7   :  { %5874 = vrcp.f32 %v2739_v50 }
 0x8ea   :  { %v2742_v28 = vpop.xlane.xlu0 %2741  ;;  %v5871_v2 = vpop.eup %5870 }
 0x8eb   :  { %5876 = vrcp.f32 %v2742_v28  ;;  %v2850_v1 = vmul.f32 %v5871_v2, %v8706_v23  ;;  %v2849_v33 = vmul.f32 %v5871_v2, %v8701_v26 }
 0x8ec   :  { %v2733_v5 = vpop.xlane.xlu1 %2732 }
 0x8ed   :  { %5878 = vrcp.f32 %v2733_v5 }
 0x8f0   :  { %v5873_v47 = vpop.eup %5872  ;;  %v3096_v25 = vpop.trf.xlu0 }
 0x8f1   :  { %5441 = vmatmul.mubr.msk.bf16.gmra.mxu1 %vm1144_vm10, %v3096_v25  ;;  %v2852_v0 = vmul.f32 %v5873_v47, %v8714_v10  ;;  %v2851_v37 = vmul.f32 %v5873_v47, %v8712_v19 }
 0x8f2   :  { %v2736_v17 = vpop.xlane.xlu1 %2735  ;;  %3280 = vmatprep.mubr.bf16.mxu1 %v10966_v54 }
 0x8f3   :  { %5880 = vrcp.f32 %v2736_v17  ;;  %v2892_v11 = vpack.c.bf16 %v2852_v0, %v2850_v1  ;;  %v2891_v18 = vpack.c.bf16 %v2851_v37, %v2849_v33 }
 0x8f4   :  { %v5875_v21 = vpop.eup %5874  ;;  %v3097_v23 = vpop.trf.xlu0 }
 0x8f5   :  { %2925 = vmatprep.subr.bf16.mxu0 %v2892_v11  ;;  %v2846_v42 = vmul.f32 %v5875_v21, %v8722_v9  ;;  %v2845_v19 = vmul.f32 %v5875_v21, %v8718_v56 }
 0x8f6   :  { %v2727_v51 = vpop.xlane.xlu1 %2726  ;;  %2926 = vmatpush2.bf16.xpose.msra.mxu0 %v2891_v18 }
 0x8f7   :  { %5882 = vrcp.f32 %v2727_v51 }
 0x8f8   :  { %v5877_v34 = vpop.eup %5876  ;;  %v3098_v41 = vpop.trf.xlu0 }
 0x8f9   :  { %5442 = vmatmul.mubr.msk.bf16.gmra.mxu1 %vm1144_vm10, %v3097_v23  ;;  %v2848_v26 = vmul.f32 %v5877_v34, %v8734_v7  ;;  %v2847_v10 = vmul.f32 %v5877_v34, %v8731_v32 }
 0x8fa   :  { %v2730_v30 = vpop.xlane.xlu1 %2729  ;;  %3290 = vmatprep.mubr.bf16.mxu1 %v10966_v54  ;;  %v5879_v38 = vpop.eup %5878 }
 0x8fb   :  { %5884 = vrcp.f32 %v2730_v30  ;;  %v2890_v45 = vpack.c.bf16 %v2848_v26, %v2846_v42  ;;  %v2889_v14 = vpack.c.bf16 %v2847_v10, %v2845_v19  ;;  %v2842_v31 = vmul.f32 %v5879_v38, %v8740_v6 }
 0x8fc   :  { %v2841_v56 = vmul.f32 %v5879_v38, %v8736_v4  ;;  %v3099_v35 = vpop.trf.xlu0 }
 0x8fd   :  { %2927 = vmatprep.subr.bf16.mxu0 %v2890_v45 }
 0x8fe   :  { %2928 = vmatpush2.bf16.xpose.msra.mxu0 %v2889_v14 }
 0x900   :  { %v5881_v9 = vpop.eup %5880  ;;  %v3100_v20 = vpop.trf.xlu0 }
 0x901   :  { %5443 = vmatmul.mubr.msk.bf16.gmra.mxu1 %vm1144_vm10, %v3098_v41  ;;  %v2844_v7 = vmul.f32 %v5881_v9, %v8752_v29  ;;  %v2843_v32 = vmul.f32 %v5881_v9, %v8749_v24 }
 0x902   :  { %3300 = vmatprep.mubr.bf16.mxu1 %v10966_v54 }
 0x903   :  { %v2888_v57 = vpack.c.bf16 %v2844_v7, %v2842_v31  ;;  %v2887_v59 = vpack.c.bf16 %v2843_v32, %v2841_v56 }
 0x904   :  { %v5883_v8 = vpop.eup %5882 }
 0x905   :  { %2929 = vmatprep.subr.bf16.mxu0 %v2888_v57  ;;  %v2838_v40 = vmul.f32 %v5883_v8, %v8758_v60  ;;  %v2837_v29 = vmul.f32 %v5883_v8, %v8754_v52  ;;  %v1276_v60 = vpack.c.bf16 %v10983_v58, %v10983_v58 }
 0x906   :  { %2930 = vmatpush2.bf16.xpose.msra.mxu0 %v2887_v59 }
 0x908   :  { %v5885_v3 = vpop.eup %5884 }
 0x909   :  { %5444 = vmatmul.mubr.msk.bf16.gmra.mxu1 %vm1144_vm10, %v3099_v35  ;;  %v2840_v6 = vmul.f32 %v5885_v3, %v8770_v44  ;;  %v2839_v4 = vmul.f32 %v5885_v3, %v8767_v53  ;;  %v3101_v44 = vpop.trf.xlu0 }
 0x90a   :  { %3310 = vmatprep.mubr.bf16.mxu1 %v10966_v54 }
 0x90b   :  { %v2886_v24 = vpack.c.bf16 %v2840_v6, %v2838_v40  ;;  %v2885_v13 = vpack.c.bf16 %v2839_v4, %v2837_v29 }
 0x90d   :  { %2931 = vmatprep.subr.bf16.mxu0 %v2886_v24  ;;  %v3102_v52 = vpop.trf.xlu0 }
 0x90e   :  { %2932 = vmatpush2.bf16.xpose.msra.mxu0 %v2885_v13 }
 0x911   :  { %5445 = vmatmul.mubr.msk.bf16.gmra.mxu1 %vm1144_vm10, %v3100_v20  ;;  %v3103_v46 = vpop.trf.xlu0 }
 0x912   :  { %3320 = vmatprep.mubr.bf16.mxu1 %v10966_v54 }
 0x915   :  { %2934 = vmatmul.mubr.bf16.vlgmr.msra.gmra.mxu0 %v1276_v60 }
 0x916   :  { %3041 = vmatprep.mubr.bf16.mxu0 %v10966_v54 }
 0x919   :  { %5446 = vmatmul.mubr.msk.bf16.gmra.mxu1 %vm1144_vm10, %v3101_v44 }
 0x91a   :  { %3330 = vmatprep.mubr.bf16.mxu1 %v10966_v54 }
 0x921   :  { %5447 = vmatmul.mubr.msk.bf16.gmra.mxu1 %vm1144_vm10, %v3102_v52 }
 0x922   :  { %3340 = vmatprep.mubr.bf16.mxu1 %v10966_v54 }
 0x924   :  { %v8857_v53 = vpop.f32.mrf.mxu1 }
 0x925   :  { %10984 = vst [vmem:[#allocation79_spill] sm:$0xff] %v8857_v53 }
 0x926   :  { %v8859_v22 = vpop.f32.mrf.mxu1 }
 0x927   :  { %10985 = vst [vmem:[#allocation68_spill] sm:$0xff] %v8859_v22  ;;  %v3351_v35 = vmax.f32 %v8857_v53, %v8859_v22 }
 0x928   :  { %v8861_v39 = vpop.f32.mrf.mxu1 }
 0x929   :  { %5448 = vmatmul.mubr.msk.bf16.gmra.mxu1 %vm1144_vm10, %v3103_v46 }
 0x92a   :  { %v8864_v49 = vpop.f32.mrf.mxu1 }
 0x92b   :  { %10986 = vst [vmem:[#allocation65_spill] sm:$0xff] %v8864_v49  ;;  %v3354_v19 = vmax.f32 %v8861_v39, %v8864_v49 }
 0x92c   :  { %v8866_v12 = vpop.f32.mrf.mxu1 }
 0x92d   :  { %10987 = vst [vmem:[#allocation75_spill] sm:$0xff] %v8866_v12 }
 0x92e   :  { %v8868_v48 = vpop.f32.mrf.mxu1 }
 0x92f   :  { %10988 = vst [vmem:[#allocation66_spill] sm:$0xff] %v8868_v48  ;;  %v3357_v8 = vmax.f32 %v8866_v12, %v8868_v48 }
 0x930   :  { %v8870_v16 = vpop.f32.mrf.mxu1 }
 0x932   :  { %v8872_v27 = vpop.f32.mrf.mxu1 }
 0x933   :  { %v3360_v34 = vmax.f32 %v8870_v16, %v8872_v27 }
 0x934   :  { %v8874_v62 = vpop.f32.mrf.mxu1 }
 0x936   :  { %v8876_v61 = vpop.f32.mrf.mxu1 }
 0x937   :  { %v3363_v57 = vmax.f32 %v8874_v62, %v8876_v61 }
 0x938   :  { %v8878_v43 = vpop.f32.mrf.mxu1 }
 0x93a   :  { %v8880_v63 = vpop.f32.mrf.mxu1 }
 0x93b   :  { %v3366_v59 = vmax.f32 %v8878_v43, %v8880_v63 }
 0x93c   :  { %v8882_v15 = vpop.f32.mrf.mxu1 }
 0x93e   :  { %v8884_v50 = vpop.f32.mrf.mxu1 }
 0x93f   :  { %v3369_v56 = vmax.f32 %v8882_v15, %v8884_v50 }
 0x940   :  { %v8886_v28 = vpop.f32.mrf.mxu1 }
 0x942   :  { %v8888_v5 = vpop.f32.mrf.mxu1 }
 0x943   :  { %v3372_v32 = vmax.f32 %v8886_v28, %v8888_v5 }
 0x944   :  { %v8890_v2 = vpop.f32.mrf.mxu1 }
 0x946   :  { %v8892_v47 = vpop.f32.mrf.mxu1 }
 0x947   :  { %v3375_v31 = vmax.f32 %v8890_v2, %v8892_v47 }
 0x948   :  { %v8894_v25 = vpop.f32.mrf.mxu1 }
 0x94a   :  { %v8896_v1 = vpop.f32.mrf.mxu1 }
 0x94b   :  { %v3378_v7 = vmax.f32 %v8894_v25, %v8896_v1 }
 0x94c   :  { %v8898_v0 = vpop.f32.mrf.mxu1 }
 0x94e   :  { %v8900_v33 = vpop.f32.mrf.mxu1 }
 0x94f   :  { %v3381_v41 = vmax.f32 %v8898_v0, %v8900_v33 }
 0x950   :  { %v8902_v37 = vpop.f32.mrf.mxu1 }
 0x952   :  { %v8904_v17 = vpop.f32.mrf.mxu1 }
 0x953   :  { %v3384_v9 = vmax.f32 %v8902_v37, %v8904_v17 }
 0x954   :  { %v8906_v11 = vpop.f32.mrf.mxu1 }
 0x956   :  { %v8908_v18 = vpop.f32.mrf.mxu1 }
 0x957   :  { %v3387_v21 = vmax.f32 %v8906_v11, %v8908_v18 }
 0x958   :  { %v8912_v51 = vpop.f32.mrf.mxu1 }
 0x959   :  { %3388 = vmax.xlane.f32.xlu0 %v3387_v21 }
 0x95a   :  { %v8914_v23 = vpop.f32.mrf.mxu1 }
 0x95b   :  { %v3390_v38 = vmax.f32 %v8912_v51, %v8914_v23 }
 0x95c   :  { %v8918_v42 = vpop.f32.mrf.mxu1 }
 0x95d   :  { %3361 = vmax.xlane.f32.xlu0 %v3360_v34 }
 0x95e   :  { %v8920_v26 = vpop.f32.mrf.mxu1 }
 0x95f   :  { %v3393_v10 = vmax.f32 %v8918_v42, %v8920_v26 }
 0x960   :  { %v8926_v30 = vpop.f32.mrf.mxu1 }
 0x961   :  { %3355 = vmax.xlane.f32.xlu0 %v3354_v19  ;;  %3394 = vmax.xlane.f32.xlu1 %v3393_v10 }
 0x962   :  { %v8928_v45 = vpop.f32.mrf.mxu1 }
 0x963   :  { %v3396_v14 = vmax.f32 %v8926_v30, %v8928_v45 }
 0x965   :  { %3397 = vmax.xlane.f32.xlu1 %v3396_v14 }
 0x969   :  { %3391 = vmax.xlane.f32.xlu1 %v3390_v38 }
 0x96d   :  { %3382 = vmax.xlane.f32.xlu1 %v3381_v41 }
 0x971   :  { %3385 = vmax.xlane.f32.xlu1 %v3384_v9  ;;  %v10994_v9 = vld [vmem:[#allocation40_spill] sm:$0xff] }
 0x975   :  { %3376 = vmax.xlane.f32.xlu1 %v3375_v31 }
 0x979   :  { %3379 = vmax.xlane.f32.xlu1 %v3378_v7 }
 0x97d   :  { %3370 = vmax.xlane.f32.xlu1 %v3369_v56 }
 0x981   :  { %3373 = vmax.xlane.f32.xlu1 %v3372_v32 }
 0x985   :  { %3364 = vmax.xlane.f32.xlu1 %v3363_v57  ;;  %v10996_v57 = vld [vmem:[#allocation42_spill] sm:$0xff] }
 0x989   :  { %3367 = vmax.xlane.f32.xlu1 %v3366_v59 }
 0x98d   :  { %3358 = vmax.xlane.f32.xlu1 %v3357_v8 }
 0x991   :  { %3352 = vmax.xlane.f32.xlu1 %v3351_v35 }
 0x9b1   :  { %v8954_v3 = vpop.f32.mrf.mxu1 }
 0x9b2   :  { %10989 = vst [vmem:[#allocation24_spill] sm:$0xff] %v8954_v3 }
 0x9b3   :  { %v8956_v40 = vpop.f32.mrf.mxu1 }
 0x9b4   :  { %10990 = vst [vmem:[#allocation74_spill] sm:$0xff] %v8956_v40 }
 0x9b5   :  { %v8958_v6 = vpop.f32.mrf.mxu1 }
 0x9b6   :  { %10991 = vst [vmem:[#allocation25_spill] sm:$0xff] %v8958_v6 }
 0x9b7   :  { %v8960_v29 = vpop.f32.mrf.mxu1 }
 0x9b8   :  { %10992 = vst [vmem:[#allocation63_spill] sm:$0xff] %v8960_v29 }
 0x9b9   :  { %v8962_v4 = vpop.f32.mrf.mxu1 }
 0x9bb   :  { %v8964_v24 = vpop.f32.mrf.mxu1 }
 0x9bd   :  { %v8966_v13 = vpop.f32.mrf.mxu1 }
 0x9be   :  { %10993 = vst [vmem:[#allocation72_spill] sm:$0xff] %v8966_v13 }
 0x9bf   :  { %v8968_v20 = vpop.f32.mrf.mxu1 }
 0x9c1   :  { %v8970_v58 = vpop.f32.mrf.mxu1 }
 0x9c3   :  { %v8972_v60 = vpop.f32.mrf.mxu1 }
 0x9c5   :  { %v8974_v44 = vpop.f32.mrf.mxu1 }
 0x9c7   :  { %v8976_v52 = vpop.f32.mrf.mxu1 }
 0x9c9   :  { %v8978_v46 = vpop.f32.mrf.mxu1 }
 0x9cb   :  { %v8980_v21 = vpop.f32.mrf.mxu1 }
 0x9cd   :  { %v8982_v34 = vpop.f32.mrf.mxu1 }
 0x9cf   :  { %v8984_v19 = vpop.f32.mrf.mxu1 }
 0x9d1   :  { %v8986_v10 = vpop.f32.mrf.mxu1 }
 0x9d3   :  { %v8988_v14 = vpop.f32.mrf.mxu1 }
 0x9d5   :  { %v2935_v38 = vpop.f32.mrf.mxu0  ;;  %v8990_v41 = vpop.f32.mrf.mxu1 }
 0x9d6   :  { %v8993_v31 = vadd.f32 %v2935_v38, %v10994_v9 }
 0x9d7   :  { %v2937_v7 = vpop.f32.mrf.mxu0  ;;  %v8995_v56 = vpop.f32.mrf.mxu1 }
 0x9d8   :  { %10995 = vst [vmem:[#allocation76_spill] sm:$0xff] %v8993_v31  ;;  %v2944_v32 = vpack.c.bf16 %v8993_v31, %v8993_v31  ;;  %v9000_v59 = vadd.f32 %v2937_v7, %v10996_v57  ;;  %v6280_v7 = vld [vmem:[%s10494_s4] sm:$0xff]  }
 0x9d9   :  { %v2939_v8 = vpop.f32.mrf.mxu0  ;;  %v9002_v35 = vpop.f32.mrf.mxu1 }
 0x9da   :  { %10997 = vst [vmem:[#allocation73_spill] sm:$0xff] %v9000_v59  ;;  %v2945_v55 = vpack.c.bf16 %v9000_v59, %v9000_v59  ;;  %v2953_v38 = vsel %vm1151_vm9, %v2944_v32, 0  ;;  %v3069_v32 = vpack.c.bf16 %v8812_v36, %v8812_v36 }
 0x9db   :  { %v2940_v6 = vpop.f32.mrf.mxu0  ;;  %v9006_v29 = vpop.f32.mrf.mxu1 }
 0x9dc   :  { %5429 = vmatprep.subr.msk.bf16.mxu0 %vm1151_vm9, %v2945_v55 }
 0x9dd   :  { %3024 = vmatpush1.bf16.msra.mxu0 %v2953_v38  ;;  %v9010_v9 = vpop.f32.mrf.mxu1  ;;  %v6281_v38 = vld [vmem:[%s10494_s4 + $0x8] ss:$0 sps:$4 sm:$0xff]  }
 0x9df   :  { %v9012_v31 = vpop.f32.mrf.mxu1 }
 0x9e0   :  { %5430 = vmatmul.mubr.msk.bf16.vlgmr.msra.gmra.mxu0 %vm1144_vm10, %v6280_v7 }
 0x9e1   :  { %v9018_v57 = vpop.f32.mrf.mxu1  ;;  %3051 = vmatprep.mubr.bf16.mxu0 %v10966_v54 }
 0x9e2   :  { %v3389_v59 = vpop.xlane.xlu0 %3388 }
 0x9e3   :  { %v9021_v6 = vpop.f32.mrf.mxu1  ;;  %v3471_v40 = vsub.f32 %v8906_v11, %v3389_v59 }
 0x9e5   :  { %v9023_v55 = vpop.f32.mrf.mxu1  ;;  %v3559_v11 = vmul.f32 1.442695, %v3471_v40 }
 0x9e7   :  { %v9027_v8 = vpop.f32.mrf.mxu1 }
 0x9e8   :  { %5431 = vmatmul.mubr.msk.bf16.gmra.mxu0 %vm1144_vm10, %v6281_v38  ;;  %v3472_v38 = vsub.f32 %v8908_v18, %v3389_v59 }
 0x9e9   :  { %v9033_v7 = vpop.f32.mrf.mxu1  ;;  %3895 = vmatprep.mubr.bf16.mxu0 %v3069_v32 }
 0x9ea   :  { %v3395_v54 = vpop.xlane.xlu1 %3394  ;;  %v3561_v18 = vmul.f32 1.442695, %v3472_v38 }
 0x9eb   :  { %v9035_v22 = vpop.f32.mrf.mxu1  ;;  %v3475_v53 = vsub.f32 %v8918_v42, %v3395_v54  ;;  %v3476_v3 = vsub.f32 %v8920_v26, %v3395_v54  ;;  %v3435_v26 = vmax.f32 %v9018_v57, %v9021_v6 }
 0x9ec   :  { %10998 = vst [vmem:[#allocation69_spill] sm:$0xff] %v9035_v22  ;;  %v3441_v36 = vmax.f32 %v9033_v7, %v9035_v22 }
 0x9ed   :  { %v3567_v48 = vmul.f32 1.442695, %v3475_v53  ;;  %v3569_v12 = vmul.f32 1.442695, %v3476_v3  ;;  %v9042_v49 = vpop.f32.mrf.mxu1 }
 0x9ee   :  { %3442 = vmax.xlane.f32.xlu1 %v3441_v36  ;;  %v3398_v32 = vpop.xlane.xlu1 %3397 }
 0x9ef   :  { %5886 = vpow2.f32 %v3567_v48  ;;  %v9045_v13 = vpop.f32.mrf.mxu1  ;;  %v3477_v42 = vsub.f32 %v8926_v30, %v3398_v32  ;;  %v3478_v54 = vsub.f32 %v8928_v45, %v3398_v32  ;;  %v3429_v45 = vmax.f32 %v9002_v35, %v9006_v29 }
 0x9f0   :  { %5888 = vpow2.f32 %v3569_v12  ;;  %v3444_v53 = vmax.f32 %v9042_v49, %v9045_v13  ;;  %v3438_v12 = vmax.f32 %v9023_v55, %v9027_v8 }
 0x9f1   :  { %v3571_v3 = vmul.f32 1.442695, %v3477_v42  ;;  %v3573_v22 = vmul.f32 1.442695, %v3478_v54  ;;  %v3432_v42 = vmax.f32 %v9010_v9, %v9012_v31 }
 0x9f2   :  { %3436 = vmax.xlane.f32.xlu1 %v3435_v26  ;;  %3445 = vmax.xlane.f32.xlu0 %v3444_v53  ;;  %v3392_v48 = vpop.xlane.xlu1 %3391 }
 0x9f3   :  { %5890 = vpow2.f32 %v3571_v3  ;;  %v3473_v59 = vsub.f32 %v8912_v51, %v3392_v48  ;;  %v3474_v30 = vsub.f32 %v8914_v23, %v3392_v48  ;;  %v3423_v23 = vmax.f32 %v8986_v10, %v8988_v14 }
 0x9f4   :  { %5892 = vpow2.f32 %v3573_v22 }
 0x9f5   :  { %5894 = vpow2.f32 %v3559_v11  ;;  %v3563_v40 = vmul.f32 1.442695, %v3473_v59  ;;  %v3565_v36 = vmul.f32 1.442695, %v3474_v30 }
 0x9f6   :  { %5896 = vpow2.f32 %v3561_v18  ;;  %3430 = vmax.xlane.f32.xlu1 %v3429_v45  ;;  %3439 = vmax.xlane.f32.xlu0 %v3438_v12  ;;  %v3383_v38 = vpop.xlane.xlu1 %3382 }
 0x9f7   :  { %v3467_v32 = vsub.f32 %v8898_v0, %v3383_v38  ;;  %v3468_v51 = vsub.f32 %v8900_v33, %v3383_v38  ;;  %5898 = vpow2.f32 %v3563_v40  ;;  %v3426_v33 = vmax.f32 %v8990_v41, %v8995_v56 }
 0x9f8   :  { %5900 = vpow2.f32 %v3565_v36  ;;  %v3417_v38 = vmax.f32 %v8978_v46, %v8980_v21 }
 0x9f9   :  { %v3551_v54 = vmul.f32 1.442695, %v3467_v32  ;;  %v3553_v22 = vmul.f32 1.442695, %v3468_v51 }
 0x9fa   :  { %3424 = vmax.xlane.f32.xlu1 %v3423_v23  ;;  %3433 = vmax.xlane.f32.xlu0 %v3432_v42  ;;  %v3386_v26 = vpop.xlane.xlu1 %3385 }
 0x9fb   :  { %v3469_v53 = vsub.f32 %v8902_v37, %v3386_v26  ;;  %v3470_v11 = vsub.f32 %v8904_v17, %v3386_v26  ;;  %5902 = vpow2.f32 %v3551_v54  ;;  %v3420_v26 = vmax.f32 %v8982_v34, %v8984_v19 }
 0x9fc   :  { %v9067_v0 = vpop.eup %5886  ;;  %5904 = vpow2.f32 %v3553_v22 }
 0x9fd   :  { %v9071_v3 = vpop.eup %5888  ;;  %v3555_v18 = vmul.f32 1.442695, %v3469_v53  ;;  %v3557_v48 = vmul.f32 1.442695, %v3470_v11 }
 0x9fe   :  { %3427 = vmax.xlane.f32.xlu0 %v3426_v33  ;;  %v3377_v59 = vpop.xlane.xlu1 %3376  ;;  %v3681_v30 = vadd.f32 %v9071_v3, %v9067_v0 }
 0x9ff   :  { %v3463_v37 = vsub.f32 %v8890_v2, %v3377_v59  ;;  %v3464_v17 = vsub.f32 %v8892_v47, %v3377_v59  ;;  %5906 = vpow2.f32 %v3555_v18 }
 0xa00   :  { %v9077_v45 = vpop.eup %5890  ;;  %3682 = vadd.xlane.f32.xlu1 %v3681_v30  ;;  %5908 = vpow2.f32 %v3557_v48  ;;  %v3411_v30 = vmax.f32 %v8970_v58, %v8972_v60 }
 0xa01   :  { %v9079_v12 = vpop.eup %5892  ;;  %v3543_v40 = vmul.f32 1.442695, %v3463_v37  ;;  %v3545_v32 = vmul.f32 1.442695, %v3464_v17 }
 0xa02   :  { %v9081_v36 = vpop.eup %5894  ;;  %v3380_v51 = vpop.xlane.xlu1 %3379  ;;  %v3684_v2 = vadd.f32 %v9079_v12, %v9077_v45 }
 0xa03   :  { %v9087_v23 = vpop.eup %5896  ;;  %v3465_v47 = vsub.f32 %v8894_v25, %v3380_v51  ;;  %v3466_v42 = vsub.f32 %v8896_v1, %v3380_v51  ;;  %5910 = vpow2.f32 %v3543_v40 }
 0xa04   :  { %3418 = vmax.xlane.f32.xlu1 %v3417_v38  ;;  %3685 = vadd.xlane.f32.xlu0 %v3684_v2  ;;  %v9091_v22 = vpop.eup %5898  ;;  %5912 = vpow2.f32 %v3545_v32  ;;  %v3675_v33 = vadd.f32 %v9087_v23, %v9081_v36  ;;  %v3362_v32 = vpop.xlane.xlu0 %3361 }
 0xa05   :  { %v3547_v54 = vmul.f32 1.442695, %v3465_v47  ;;  %v3549_v53 = vmul.f32 1.442695, %v3466_v42  ;;  %v9097_v18 = vpop.eup %5900  ;;  %v3414_v47 = vmax.f32 %v8974_v44, %v8976_v52 }
 0xa06   :  { %v3371_v11 = vpop.xlane.xlu1 %3370  ;;  %v3678_v40 = vadd.f32 %v9097_v18, %v9091_v22 }
 0xa07   :  { %v3459_v25 = vsub.f32 %v8882_v15, %v3371_v11  ;;  %v3460_v1 = vsub.f32 %v8884_v50, %v3371_v11  ;;  %5914 = vpow2.f32 %v3547_v54  ;;  %v3453_v11 = vsub.f32 %v8870_v16, %v3362_v32 }
 0xa08   :  { %3421 = vmax.xlane.f32.xlu0 %v3420_v26  ;;  %3676 = vadd.xlane.f32.xlu1 %v3675_v33  ;;  %v9101_v59 = vpop.eup %5902  ;;  %5916 = vpow2.f32 %v3549_v53 }
 0xa09   :  { %v3535_v48 = vmul.f32 1.442695, %v3459_v25  ;;  %v3537_v37 = vmul.f32 1.442695, %v3460_v1  ;;  %v9107_v38 = vpop.eup %5904 }
 0xa0a   :  { %v3374_v17 = vpop.xlane.xlu1 %3373  ;;  %v3669_v26 = vadd.f32 %v9107_v38, %v9101_v59 }
 0xa0b   :  { %v3461_v15 = vsub.f32 %v8886_v28, %v3374_v17  ;;  %v3462_v50 = vsub.f32 %v8888_v5, %v3374_v17  ;;  %5918 = vpow2.f32 %v3535_v48  ;;  %v3405_v48 = vmax.f32 %v8962_v4, %v8964_v24 }
 0xa0c   :  { %3679 = vadd.xlane.f32.xlu0 %v3678_v40  ;;  %3412 = vmax.xlane.f32.xlu1 %v3411_v30  ;;  %v9111_v2 = vpop.eup %5906  ;;  %5920 = vpow2.f32 %v3537_v37  ;;  %v3454_v30 = vsub.f32 %v8872_v27, %v3362_v32  ;;  %v3356_v37 = vpop.xlane.xlu0 %3355 }
 0xa0d   :  { %v3539_v51 = vmul.f32 1.442695, %v3461_v15  ;;  %v3541_v42 = vmul.f32 1.442695, %v3462_v50  ;;  %v9117_v53 = vpop.eup %5908  ;;  %v3523_v15 = vmul.f32 1.442695, %v3453_v11  ;;  %v3449_v50 = vsub.f32 %v8861_v39, %v3356_v37 }
 0xa0e   :  { %v3365_v54 = vpop.xlane.xlu1 %3364  ;;  %v11002_v11 = vld [vmem:[#allocation75_spill] sm:$0xff]  ;;  %v11003_v39 = vld [vmem:[#allocation66_spill] sm:$0xff] }
 0xa0f   :  { %v3455_v28 = vsub.f32 %v8874_v62, %v3365_v54  ;;  %v3456_v5 = vsub.f32 %v8876_v61, %v3365_v54  ;;  %5922 = vpow2.f32 %v3539_v51  ;;  %v3672_v62 = vadd.f32 %v9117_v53, %v9111_v2 }
 0xa10   :  { %3415 = vmax.xlane.f32.xlu0 %v3414_v47  ;;  %3670 = vadd.xlane.f32.xlu1 %v3669_v26  ;;  %v9122_v1 = vpop.eup %5910  ;;  %5924 = vpow2.f32 %v3541_v42  ;;  %v11000_v47 = vld [vmem:[#allocation72_spill] sm:$0xff]  ;;  %v3525_v54 = vmul.f32 1.442695, %v3454_v30  ;;  %v11001_v26 = vld [vmem:[#allocation65_spill] sm:$0xff] }
 0xa11   :  { %v3527_v33 = vmul.f32 1.442695, %v3455_v28  ;;  %v3529_v25 = vmul.f32 1.442695, %v3456_v5  ;;  %10999 = vst [vmem:[#allocation77_spill] sm:$0xff] %v9122_v1  ;;  %v9129_v61 = vpop.eup %5912  ;;  %v3408_v42 = vmax.f32 %v11000_v47, %v8968_v20  ;;  %v3450_v28 = vsub.f32 %v11001_v26, %v3356_v37  ;;  %v11005_v37 = vld [vmem:[#allocation74_spill] sm:$0xff] }
 0xa12   :  { %v3368_v17 = vpop.xlane.xlu1 %3367 }
 0xa13   :  { %5926 = vpow2.f32 %v3527_v33  ;;  %v3457_v16 = vsub.f32 %v8878_v43, %v3368_v17  ;;  %v3458_v40 = vsub.f32 %v8880_v63, %v3368_v17  ;;  %v3663_v43 = vadd.f32 %v9129_v61, %v9122_v1 }
 0xa14   :  { %5928 = vpow2.f32 %v3529_v25  ;;  %3673 = vadd.xlane.f32.xlu0 %v3672_v62  ;;  %3406 = vmax.xlane.f32.xlu1 %v3405_v48  ;;  %v9134_v51 = vpop.eup %5914  ;;  %v3515_v48 = vmul.f32 1.442695, %v3449_v50  ;;  %v3517_v26 = vmul.f32 1.442695, %v3450_v28  ;;  %v11011_v28 = vld [vmem:[#allocation25_spill] sm:$0xff] }
 0xa15   :  { %v3531_v27 = vmul.f32 1.442695, %v3457_v16  ;;  %v3533_v32 = vmul.f32 1.442695, %v3458_v40  ;;  %v9141_v63 = vpop.eup %5916  ;;  %v11006_v16 = vld [vmem:[#allocation24_spill] sm:$0xff] }
 0xa16   :  { %v3359_v5 = vpop.xlane.xlu1 %3358  ;;  %v3399_v40 = vmax.f32 %v11006_v16, %v11005_v37 }
 0xa17   :  { %5930 = vpow2.f32 %v3531_v27  ;;  %v3451_v33 = vsub.f32 %v11002_v11, %v3359_v5  ;;  %v3452_v25 = vsub.f32 %v11003_v39, %v3359_v5  ;;  %v3666_v27 = vadd.f32 %v9141_v63, %v9134_v51 }
 0xa18   :  { %5932 = vpow2.f32 %v3533_v32  ;;  %3409 = vmax.xlane.f32.xlu0 %v3408_v42  ;;  %3664 = vadd.xlane.f32.xlu1 %v3663_v43  ;;  %v9145_v62 = vpop.eup %5918  ;;  %v11007_v32 = vld [vmem:[#allocation79_spill] sm:$0xff] }
 0xa19   :  { %5934 = vpow2.f32 %v3523_v15  ;;  %v3519_v17 = vmul.f32 1.442695, %v3451_v33  ;;  %v3521_v30 = vmul.f32 1.442695, %v3452_v25  ;;  %11004 = vst [vmem:[#allocation71_spill] sm:$0xff] %v9145_v62  ;;  %v9151_v11 = vpop.eup %5920  ;;  %v11008_v15 = vld [vmem:[#allocation68_spill] sm:$0xff] }
 0xa1a   :  { %5936 = vpow2.f32 %v3525_v54  ;;  %v3353_v1 = vpop.xlane.xlu1 %3352  ;;  %v11010_v54 = vld [vmem:[#allocation63_spill] sm:$0xff]  ;;  %v3657_v25 = vadd.f32 %v9151_v11, %v9145_v62 }
 0xa1b   :  { %5938 = vpow2.f32 %v3519_v17  ;;  %v3447_v42 = vsub.f32 %v11007_v32, %v3353_v1  ;;  %v3448_v50 = vsub.f32 %v11008_v15, %v3353_v1  ;;  %v3402_v39 = vmax.f32 %v11011_v28, %v11010_v54 }
 0xa1c   :  { %5940 = vpow2.f32 %v3521_v30  ;;  %3667 = vadd.xlane.f32.xlu0 %v3666_v27  ;;  %3400 = vmax.xlane.f32.xlu1 %v3399_v40  ;;  %v9155_v33 = vpop.eup %5922 }
 0xa1d   :  { %5942 = vpow2.f32 %v3515_v48  ;;  %v3511_v5 = vmul.f32 1.442695, %v3447_v42  ;;  %v3513_v43 = vmul.f32 1.442695, %v3448_v50  ;;  %11009 = vst [vmem:[#allocation64_spill] sm:$0xff] %v9155_v33  ;;  %v9161_v17 = vpop.eup %5924 }
 0xa1e   :  { %5944 = vpow2.f32 %v3517_v26  ;;  %v3660_v48 = vadd.f32 %v9161_v17, %v9155_v33 }
 0xa1f   :  { %5946 = vpow2.f32 %v3511_v5 }
 0xa20   :  { %v9163_v32 = vpop.eup %5926  ;;  %5948 = vpow2.f32 %v3513_v43  ;;  %3403 = vmax.xlane.f32.xlu0 %v3402_v39  ;;  %3658 = vadd.xlane.f32.xlu1 %v3657_v25 }
 0xa21   :  { %11012 = vst [vmem:[#allocation40_spill] sm:$0xff] %v9163_v32  ;;  %v9165_v1 = vpop.eup %5928 }
 0xa22   :  { %11013 = vst [vmem:[#allocation42_spill] sm:$0xff] %v9165_v1  ;;  %v3651_v30 = vadd.f32 %v9165_v1, %v9163_v32 }
 0xa24   :  { %v9171_v40 = vpop.eup %5930  ;;  %3661 = vadd.xlane.f32.xlu0 %v3660_v48  ;;  %3652 = vadd.xlane.f32.xlu1 %v3651_v30 }
 0xa25   :  { %11014 = vst [vmem:[#allocation72_spill] sm:$0xff] %v9171_v40  ;;  %v9173_v26 = vpop.eup %5932 }
 0xa26   :  { %11015 = vst [vmem:[#allocation65_spill] sm:$0xff] %v9173_v26  ;;  %v9175_v27 = vpop.eup %5934  ;;  %v3654_v42 = vadd.f32 %v9173_v26, %v9171_v40 }
 0xa27   :  { %11016 = vst [vmem:[#allocation75_spill] sm:$0xff] %v9175_v27  ;;  %v9179_v15 = vpop.eup %5936 }
 0xa28   :  { %11017 = vst [vmem:[#allocation66_spill] sm:$0xff] %v9179_v15  ;;  %v9181_v50 = vpop.eup %5938  ;;  %3655 = vadd.xlane.f32.xlu0 %v3654_v42  ;;  %v3648_v25 = vadd.f32 %v9179_v15, %v9175_v27  ;;  %v11024_v27 = vld [vmem:[#allocation69_spill] sm:$0xff] }
 0xa29   :  { %11018 = vst [vmem:[#allocation74_spill] sm:$0xff] %v9181_v50  ;;  %v9183_v5 = vpop.eup %5940 }
 0xa2a   :  { %11019 = vst [vmem:[#allocation24_spill] sm:$0xff] %v9183_v5  ;;  %v9185_v43 = vpop.eup %5942  ;;  %v3645_v39 = vadd.f32 %v9183_v5, %v9181_v50 }
 0xa2b   :  { %11020 = vst [vmem:[#allocation79_spill] sm:$0xff] %v9185_v43  ;;  %v9191_v48 = vpop.eup %5944 }
 0xa2c   :  { %11021 = vst [vmem:[#allocation68_spill] sm:$0xff] %v9191_v48  ;;  %v9193_v30 = vpop.eup %5946  ;;  %3646 = vadd.xlane.f32.xlu1 %v3645_v39  ;;  %3649 = vadd.xlane.f32.xlu0 %v3648_v25  ;;  %v3642_v40 = vadd.f32 %v9191_v48, %v9185_v43 }
 0xa2d   :  { %11022 = vst [vmem:[#allocation63_spill] sm:$0xff] %v9193_v30  ;;  %v9195_v32 = vpop.eup %5948 }
 0xa2e   :  { %11023 = vst [vmem:[#allocation25_spill] sm:$0xff] %v9195_v32  ;;  %v3639_v42 = vadd.f32 %v9195_v32, %v9193_v30 }
 0xa30   :  { %3640 = vadd.xlane.f32.xlu1 %v3639_v42  ;;  %3643 = vadd.xlane.f32.xlu0 %v3642_v40 }
 0xa77   :  { %v3443_v50 = vpop.xlane.xlu1 %3442 }
 0xa78   :  { %v3507_v5 = vsub.f32 %v9033_v7, %v3443_v50  ;;  %v3508_v15 = vsub.f32 %v11024_v27, %v3443_v50 }
 0xa7a   :  { %v3631_v26 = vmul.f32 1.442695, %v3507_v5  ;;  %v3633_v1 = vmul.f32 1.442695, %v3508_v15 }
 0xa7b   :  { %v3437_v33 = vpop.xlane.xlu1 %3436  ;;  %v3446_v39 = vpop.xlane.xlu0 %3445 }
 0xa7c   :  { %5950 = vpow2.f32 %v3631_v26  ;;  %v3503_v25 = vsub.f32 %v9018_v57, %v3437_v33  ;;  %v3504_v62 = vsub.f32 %v9021_v6, %v3437_v33  ;;  %v3509_v30 = vsub.f32 %v9042_v49, %v3446_v39 }
 0xa7d   :  { %5952 = vpow2.f32 %v3633_v1  ;;  %v3510_v42 = vsub.f32 %v9045_v13, %v3446_v39 }
 0xa7e   :  { %v3623_v40 = vmul.f32 1.442695, %v3503_v25  ;;  %v3625_v43 = vmul.f32 1.442695, %v3504_v62  ;;  %v3635_v48 = vmul.f32 1.442695, %v3509_v30 }
 0xa7f   :  { %v3637_v7 = vmul.f32 1.442695, %v3510_v42  ;;  %v3431_v32 = vpop.xlane.xlu1 %3430  ;;  %v3440_v27 = vpop.xlane.xlu0 %3439 }
 0xa80   :  { %5954 = vpow2.f32 %v3623_v40  ;;  %v3499_v15 = vsub.f32 %v9002_v35, %v3431_v32  ;;  %v3500_v26 = vsub.f32 %v9006_v29, %v3431_v32  ;;  %v3505_v57 = vsub.f32 %v9023_v55, %v3440_v27 }
 0xa81   :  { %5956 = vpow2.f32 %v3625_v43  ;;  %v3506_v6 = vsub.f32 %v9027_v8, %v3440_v27 }
 0xa82   :  { %5958 = vpow2.f32 %v3635_v48  ;;  %v3615_v49 = vmul.f32 1.442695, %v3499_v15  ;;  %v3617_v33 = vmul.f32 1.442695, %v3500_v26  ;;  %v3627_v13 = vmul.f32 1.442695, %v3505_v57 }
 0xa83   :  { %5960 = vpow2.f32 %v3637_v7  ;;  %v3629_v62 = vmul.f32 1.442695, %v3506_v6  ;;  %v3425_v1 = vpop.xlane.xlu1 %3424  ;;  %v3434_v50 = vpop.xlane.xlu0 %3433 }
 0xa84   :  { %5962 = vpow2.f32 %v3615_v49  ;;  %v3495_v5 = vsub.f32 %v8986_v10, %v3425_v1  ;;  %v3496_v35 = vsub.f32 %v8988_v14, %v3425_v1  ;;  %v3501_v29 = vsub.f32 %v9010_v9, %v3434_v50 }
 0xa85   :  { %5964 = vpow2.f32 %v3617_v33  ;;  %v3502_v55 = vsub.f32 %v9012_v31, %v3434_v50 }
 0xa86   :  { %5966 = vpow2.f32 %v3627_v13  ;;  %v3607_v8 = vmul.f32 1.442695, %v3495_v5  ;;  %v3609_v32 = vmul.f32 1.442695, %v3496_v35  ;;  %v3619_v43 = vmul.f32 1.442695, %v3501_v29 }
 0xa87   :  { %5968 = vpow2.f32 %v3629_v62  ;;  %v3621_v48 = vmul.f32 1.442695, %v3502_v55  ;;  %v3428_v30 = vpop.xlane.xlu0 %3427 }
 0xa88   :  { %5970 = vpow2.f32 %v3607_v8  ;;  %v3497_v39 = vsub.f32 %v8990_v41, %v3428_v30  ;;  %v3498_v25 = vsub.f32 %v8995_v56, %v3428_v30 }
 0xa89   :  { %v9217_v10 = vpop.eup %5950  ;;  %5972 = vpow2.f32 %v3609_v32  ;;  %v3683_v14 = vpop.xlane.xlu1 %3682 }
 0xa8a   :  { %v9219_v9 = vpop.eup %5952  ;;  %5974 = vpow2.f32 %v3619_v43  ;;  %v3611_v31 = vmul.f32 1.442695, %v3497_v39  ;;  %v3613_v42 = vmul.f32 1.442695, %v3498_v25 }
 0xa8b   :  { %5976 = vpow2.f32 %v3621_v48  ;;  %v3729_v40 = vadd.f32 %v9219_v9, %v9217_v10 }
 0xa8c   :  { %5978 = vpow2.f32 %v3611_v31 }
 0xa8d   :  { %v9223_v7 = vpop.eup %5954  ;;  %5980 = vpow2.f32 %v3613_v42  ;;  %3730 = vadd.xlane.f32.xlu1 %v3729_v40  ;;  %v3419_v41 = vpop.xlane.xlu1 %3418 }
 0xa8e   :  { %v3686_v56 = vpop.xlane.xlu0 %3685  ;;  %v9225_v27 = vpop.eup %5956  ;;  %5982 = vrcp.f32 %v3683_v14  ;;  %v3491_v15 = vsub.f32 %v8978_v46, %v3419_v41  ;;  %v3492_v26 = vsub.f32 %v8980_v21, %v3419_v41 }
 0xa8f   :  { %v9229_v57 = vpop.eup %5958  ;;  %5984 = vrcp.f32 %v3686_v56  ;;  %v3723_v6 = vadd.f32 %v9225_v27, %v9223_v7 }
 0xa90   :  { %v9233_v49 = vpop.eup %5960  ;;  %v3599_v33 = vmul.f32 1.442695, %v3491_v15  ;;  %v3601_v13 = vmul.f32 1.442695, %v3492_v26 }
 0xa91   :  { %v9235_v62 = vpop.eup %5962  ;;  %3724 = vadd.xlane.f32.xlu1 %v3723_v6  ;;  %v3732_v1 = vadd.f32 %v9233_v49, %v9229_v57  ;;  %v3677_v50 = vpop.xlane.xlu1 %3676 }
 0xa92   :  { %v3422_v46 = vpop.xlane.xlu0 %3421  ;;  %v9239_v5 = vpop.eup %5964  ;;  %5986 = vpow2.f32 %v3599_v33 }
 0xa93   :  { %v3493_v21 = vsub.f32 %v8982_v34, %v3422_v46  ;;  %v3494_v35 = vsub.f32 %v8984_v19, %v3422_v46  ;;  %v9243_v29 = vpop.eup %5966  ;;  %5988 = vpow2.f32 %v3601_v13  ;;  %3733 = vadd.xlane.f32.xlu0 %v3732_v1  ;;  %v3717_v55 = vadd.f32 %v9239_v5, %v9235_v62 }
 0xa94   :  { %v9247_v8 = vpop.eup %5968  ;;  %5990 = vrcp.f32 %v3677_v50 }
 0xa95   :  { %v3603_v32 = vmul.f32 1.442695, %v3493_v21  ;;  %v3605_v43 = vmul.f32 1.442695, %v3494_v35  ;;  %v9249_v48 = vpop.eup %5970  ;;  %3718 = vadd.xlane.f32.xlu1 %v3717_v55  ;;  %v3726_v34 = vadd.f32 %v9247_v8, %v9243_v29  ;;  %v3413_v30 = vpop.xlane.xlu1 %3412 }
 0xa96   :  { %v3680_v19 = vpop.xlane.xlu0 %3679  ;;  %v9253_v39 = vpop.eup %5972  ;;  %v3487_v25 = vsub.f32 %v8970_v58, %v3413_v30  ;;  %v3488_v14 = vsub.f32 %v8972_v60, %v3413_v30 }
 0xa97   :  { %5992 = vpow2.f32 %v3603_v32  ;;  %v9257_v31 = vpop.eup %5974  ;;  %3727 = vadd.xlane.f32.xlu0 %v3726_v34  ;;  %v3711_v42 = vadd.f32 %v9253_v39, %v9249_v48 }
 0xa98   :  { %5994 = vpow2.f32 %v3605_v43  ;;  %v9261_v40 = vpop.eup %5976  ;;  %v3591_v41 = vmul.f32 1.442695, %v3487_v25  ;;  %v3593_v56 = vmul.f32 1.442695, %v3488_v14 }
 0xa99   :  { %5996 = vrcp.f32 %v3680_v19  ;;  %v9263_v15 = vpop.eup %5978  ;;  %3712 = vadd.xlane.f32.xlu1 %v3711_v42  ;;  %v3720_v58 = vadd.f32 %v9261_v40, %v9257_v31  ;;  %v3671_v26 = vpop.xlane.xlu1 %3670 }
 0xa9a   :  { %v3416_v60 = vpop.xlane.xlu0 %3415  ;;  %v9267_v6 = vpop.eup %5980  ;;  %5998 = vpow2.f32 %v3591_v41 }
 0xa9b   :  { %v3489_v33 = vsub.f32 %v8974_v44, %v3416_v60  ;;  %v3490_v13 = vsub.f32 %v8976_v52, %v3416_v60  ;;  %v5983_v1 = vpop.eup %5982  ;;  %6000 = vpow2.f32 %v3593_v56  ;;  %3721 = vadd.xlane.f32.xlu0 %v3720_v58  ;;  %v3714_v50 = vadd.f32 %v9267_v6, %v9263_v15 }
 0xa9c   :  { %v5985_v46 = vpop.eup %5984  ;;  %6002 = vrcp.f32 %v3671_v26  ;;  %v3796_v43 = vmul.f32 %v5983_v1, %v9071_v3  ;;  %v3795_v44 = vmul.f32 %v5983_v1, %v9067_v0 }
 0xa9d   :  { %v3595_v21 = vmul.f32 1.442695, %v3489_v33  ;;  %v3597_v35 = vmul.f32 1.442695, %v3490_v13  ;;  %v3407_v55 = vpop.xlane.xlu1 %3406  ;;  %v3798_v34 = vmul.f32 %v5985_v46, %v9079_v12  ;;  %v3797_v52 = vmul.f32 %v5985_v46, %v9077_v45 }
 0xa9e   :  { %v3674_v32 = vpop.xlane.xlu0 %3673  ;;  %v3483_v30 = vsub.f32 %v8962_v4, %v3407_v55  ;;  %v3484_v19 = vsub.f32 %v8964_v24, %v3407_v55 }
 0xa9f   :  { %6004 = vpow2.f32 %v3595_v21  ;;  %v9279_v25 = vpop.eup %5986  ;;  %3715 = vadd.xlane.f32.xlu0 %v3714_v50  ;;  %v3846_v14 = vpack.c.bf16 %v3798_v34, %v3796_v43  ;;  %v3845_v42 = vpack.c.bf16 %v3797_v52, %v3795_v44 }
 0xaa0   :  { %6006 = vpow2.f32 %v3597_v35  ;;  %v9281_v41 = vpop.eup %5988  ;;  %v3583_v3 = vmul.f32 1.442695, %v3483_v30  ;;  %v3585_v56 = vmul.f32 1.442695, %v3484_v19 }
 0xaa1   :  { %6008 = vrcp.f32 %v3674_v32  ;;  %3863 = vmatprep.subr.bf16.mxu0 %v3846_v14  ;;  %v3665_v0 = vpop.xlane.xlu1 %3664  ;;  %v3705_v45 = vadd.f32 %v9281_v41, %v9279_v25  ;;  %v5991_v4 = vpop.eup %5990 }
 0xaa2   :  { %v3410_v12 = vpop.xlane.xlu0 %3409  ;;  %6010 = vpow2.f32 %v3583_v3  ;;  %3864 = vmatpush1.bf16.xpose.msra.mxu0 %v3845_v42  ;;  %v3792_v35 = vmul.f32 %v5991_v4, %v9087_v23  ;;  %v3791_v43 = vmul.f32 %v5991_v4, %v9081_v36 }
 0xaa3   :  { %v3485_v24 = vsub.f32 %v11000_v47, %v3410_v12  ;;  %v3486_v58 = vsub.f32 %v8968_v20, %v3410_v12  ;;  %6012 = vpow2.f32 %v3585_v56  ;;  %3706 = vadd.xlane.f32.xlu1 %v3705_v45 }
 0xaa4   :  { %v9287_v26 = vpop.eup %5992  ;;  %6014 = vrcp.f32 %v3665_v0 }
 0xaa5   :  { %v9289_v60 = vpop.eup %5994  ;;  %v3587_v33 = vmul.f32 1.442695, %v3485_v24  ;;  %v3589_v13 = vmul.f32 1.442695, %v3486_v58  ;;  %v3401_v50 = vpop.xlane.xlu1 %3400 }
 0xaa6   :  { %v5997_v1 = vpop.eup %5996  ;;  %v3668_v46 = vpop.xlane.xlu0 %3667  ;;  %v3708_v21 = vadd.f32 %v9289_v60, %v9287_v26  ;;  %v3479_v20 = vsub.f32 %v11006_v16, %v3401_v50  ;;  %v3480_v47 = vsub.f32 %v11005_v37, %v3401_v50 }
 0xaa7   :  { %6016 = vpow2.f32 %v3587_v33  ;;  %v3794_v55 = vmul.f32 %v5997_v1, %v9097_v18  ;;  %v9297_v32 = vpop.eup %5998  ;;  %v3793_v34 = vmul.f32 %v5997_v1, %v9091_v22 }
 0xaa8   :  { %6018 = vpow2.f32 %v3589_v13  ;;  %3709 = vadd.xlane.f32.xlu0 %v3708_v21  ;;  %v9301_v44 = vpop.eup %6000  ;;  %v3575_v52 = vmul.f32 1.442695, %v3479_v20  ;;  %v3577_v30 = vmul.f32 1.442695, %v3480_v47 }
 0xaa9   :  { %6020 = vrcp.f32 %v3668_v46  ;;  %v3844_v23 = vpack.c.bf16 %v3794_v55, %v3792_v35  ;;  %v6003_v19 = vpop.eup %6002  ;;  %v3659_v16 = vpop.xlane.xlu1 %3658  ;;  %v3843_v14 = vpack.c.bf16 %v3793_v34, %v3791_v43  ;;  %v3699_v18 = vadd.f32 %v9301_v44, %v9297_v32 }
 0xaaa   :  { %v3404_v37 = vpop.xlane.xlu0 %3403  ;;  %6022 = vpow2.f32 %v3575_v52  ;;  %v3787_v58 = vmul.f32 %v6003_v19, %v9101_v59  ;;  %v11025_v52 = vld [vmem:[#allocation77_spill] sm:$0xff] }
 0xaab   :  { %3865 = vmatprep.subr.bf16.mxu0 %v3844_v23  ;;  %v3481_v42 = vsub.f32 %v11011_v28, %v3404_v37  ;;  %v3482_v36 = vsub.f32 %v11010_v54, %v3404_v37  ;;  %6024 = vpow2.f32 %v3577_v30  ;;  %3700 = vadd.xlane.f32.xlu1 %v3699_v18  ;;  %v3788_v28 = vmul.f32 %v6003_v19, %v9107_v38 }
 0xaac   :  { %v9307_v22 = vpop.eup %6004  ;;  %3866 = vmatpush1.bf16.xpose.msra.mxu0 %v3843_v14  ;;  %6026 = vrcp.f32 %v3659_v16 }
 0xaad   :  { %v9309_v3 = vpop.eup %6006  ;;  %v3579_v56 = vmul.f32 1.442695, %v3481_v42  ;;  %v3581_v0 = vmul.f32 1.442695, %v3482_v36  ;;  %v3653_v45 = vpop.xlane.xlu1 %3652 }
 0xaae   :  { %v6009_v12 = vpop.eup %6008  ;;  %v3662_v4 = vpop.xlane.xlu0 %3661  ;;  %v3702_v24 = vadd.f32 %v9309_v3, %v9307_v22 }
 0xaaf   :  { %6028 = vpow2.f32 %v3579_v56  ;;  %v3790_v54 = vmul.f32 %v6009_v12, %v9117_v53  ;;  %v3789_v33 = vmul.f32 %v6009_v12, %v9111_v2  ;;  %v9317_v13 = vpop.eup %6010 }
 0xab0   :  { %6030 = vpow2.f32 %v3581_v0  ;;  %3703 = vadd.xlane.f32.xlu0 %v3702_v24  ;;  %v9319_v1 = vpop.eup %6012 }
 0xab1   :  { %6032 = vrcp.f32 %v3653_v45  ;;  %v3842_v50 = vpack.c.bf16 %v3790_v54, %v3788_v28  ;;  %v3841_v46 = vpack.c.bf16 %v3789_v33, %v3787_v58  ;;  %v3693_v38 = vadd.f32 %v9319_v1, %v9317_v13  ;;  %v6015_v35 = vpop.eup %6014  ;;  %v11026_v28 = vld [vmem:[#allocation71_spill] sm:$0xff]  ;;  %v11027_v58 = vld [vmem:[#allocation64_spill] sm:$0xff] }
 0xab2   :  { %6034 = vrcp.f32 %v3662_v4  ;;  %v3656_v21 = vpop.xlane.xlu0 %3655  ;;  %v3784_v43 = vmul.f32 %v6015_v35, %v9129_v61  ;;  %v3783_v30 = vmul.f32 %v6015_v35, %v11025_v52  ;;  %v11032_v52 = vld [vmem:[#allocation66_spill] sm:$0xff] }
 0xab3   :  { %3867 = vmatprep.subr.bf16.mxu0 %v3842_v50  ;;  %6036 = vrcp.f32 %v3656_v21  ;;  %3694 = vadd.xlane.f32.xlu1 %v3693_v38  ;;  %v11028_v50 = vld [vmem:[#allocation42_spill] sm:$0xff]  ;;  %v11029_v21 = vld [vmem:[#allocation65_spill] sm:$0xff] }
 0xab4   :  { %v9323_v59 = vpop.eup %6016  ;;  %3868 = vmatpush1.bf16.xpose.msra.mxu0 %v3841_v46 }
 0xab5   :  { %v9325_v2 = vpop.eup %6018  ;;  %v3647_v20 = vpop.xlane.xlu1 %3646 }
 0xab6   :  { %v6021_v53 = vpop.eup %6020  ;;  %v3650_v47 = vpop.xlane.xlu0 %3649  ;;  %v3696_v55 = vadd.f32 %v9325_v2, %v9323_v59  ;;  %6038 = vrcp.f32 %v3647_v20 }
 0xab7   :  { %v3786_v34 = vmul.f32 %v6021_v53, %v9141_v63  ;;  %v3785_v23 = vmul.f32 %v6021_v53, %v9134_v51  ;;  %v9333_v19 = vpop.eup %6022  ;;  %6040 = vrcp.f32 %v3650_v47 }
 0xab8   :  { %3697 = vadd.xlane.f32.xlu0 %v3696_v55  ;;  %v9335_v16 = vpop.eup %6024 }
 0xab9   :  { %v3840_v14 = vpack.c.bf16 %v3786_v34, %v3784_v43  ;;  %v3839_v37 = vpack.c.bf16 %v3785_v23, %v3783_v30  ;;  %v3687_v18 = vadd.f32 %v9335_v16, %v9333_v19  ;;  %v6027_v42 = vpop.eup %6026  ;;  %v3641_v63 = vpop.xlane.xlu1 %3640  ;;  %v11031_v34 = vld [vmem:[#allocation24_spill] sm:$0xff] }
 0xaba   :  { %v3644_v51 = vpop.xlane.xlu0 %3643  ;;  %6042 = vrcp.f32 %v3641_v63  ;;  %v3780_v45 = vmul.f32 %v6027_v42, %v9151_v11  ;;  %v3779_v54 = vmul.f32 %v6027_v42, %v11026_v28  ;;  %v11030_v11 = vld [vmem:[#allocation72_spill] sm:$0xff] }
 0xabb   :  { %3869 = vmatprep.subr.bf16.mxu0 %v3840_v14  ;;  %3688 = vadd.xlane.f32.xlu1 %v3687_v18  ;;  %6044 = vrcp.f32 %v3644_v51  ;;  %v11033_v23 = vld [vmem:[#allocation40_spill] sm:$0xff]  ;;  %v11034_v51 = vld [vmem:[#allocation74_spill] sm:$0xff] }
 0xabc   :  { %v9339_v61 = vpop.eup %6028  ;;  %3870 = vmatpush1.bf16.xpose.msra.mxu0 %v3839_v37 }
 0xabd   :  { %v9341_v36 = vpop.eup %6030 }
 0xabe   :  { %v6033_v56 = vpop.eup %6032  ;;  %v3690_v0 = vadd.f32 %v9341_v36, %v9339_v61 }
 0xabf   :  { %v6035_v12 = vpop.eup %6034  ;;  %v3776_v46 = vmul.f32 %v6033_v56, %v11028_v50  ;;  %v3775_v14 = vmul.f32 %v6033_v56, %v11033_v23  ;;  %v11038_v50 = vld [vmem:[#allocation63_spill] sm:$0xff] }
 0xac0   :  { %v6037_v4 = vpop.eup %6036  ;;  %3691 = vadd.xlane.f32.xlu0 %v3690_v0  ;;  %v3782_v24 = vmul.f32 %v6035_v12, %v9161_v17  ;;  %v3781_v33 = vmul.f32 %v6035_v12, %v11027_v58  ;;  %v11035_v12 = vld [vmem:[#allocation75_spill] sm:$0xff] }
 0xac1   :  { %v3778_v38 = vmul.f32 %v6037_v4, %v11029_v21  ;;  %v3777_v43 = vmul.f32 %v6037_v4, %v11030_v11 }
 0xac2   :  { %v3838_v35 = vpack.c.bf16 %v3782_v24, %v3780_v45  ;;  %v3837_v53 = vpack.c.bf16 %v3781_v33, %v3779_v54  ;;  %v11036_v24 = vld [vmem:[#allocation25_spill] sm:$0xff]  ;;  %v11037_v54 = vld [vmem:[#allocation68_spill] sm:$0xff] }
 0xac3   :  { %v3836_v20 = vpack.c.bf16 %v3778_v38, %v3776_v46  ;;  %v6039_v47 = vpop.eup %6038  ;;  %v3835_v37 = vpack.c.bf16 %v3777_v43, %v3775_v14  ;;  %v11039_v46 = vld [vmem:[#allocation79_spill] sm:$0xff] }
 0xac4   :  { %3871 = vmatprep.subr.bf16.mxu0 %v3838_v35  ;;  %v6041_v55 = vpop.eup %6040  ;;  %v3772_v17 = vmul.f32 %v6039_v47, %v11031_v34  ;;  %v3771_v0 = vmul.f32 %v6039_v47, %v11034_v51  ;;  %v3043_v35 = vpop.f32.mrf.mxu0 }
 0xac5   :  { %3872 = vmatpush1.bf16.xpose.msra.mxu0 %v3837_v53  ;;  %v3774_v30 = vmul.f32 %v6041_v55, %v11032_v52  ;;  %v3773_v45 = vmul.f32 %v6041_v55, %v11035_v12  ;;  %v3062_v53 = vpack.c.bf16 %v3043_v35, %v3043_v35 }
 0xac6   :  { %3873 = vmatprep.subr.bf16.mxu0 %v3836_v20  ;;  %v3045_v20 = vpop.f32.mrf.mxu0 }
 0xac7   :  { %v6043_v18 = vpop.eup %6042  ;;  %v3834_v42 = vpack.c.bf16 %v3774_v30, %v3772_v17  ;;  %v3833_v58 = vpack.c.bf16 %v3773_v45, %v3771_v0  ;;  %v3063_v47 = vpack.c.bf16 %v3045_v20, %v3045_v20 }
 0xac8   :  { %v6045_v63 = vpop.eup %6044  ;;  %v3768_v28 = vmul.f32 %v6043_v18, %v11036_v24  ;;  %v3767_v56 = vmul.f32 %v6043_v18, %v11038_v50 }
 0xac9   :  { %v3770_v4 = vmul.f32 %v6045_v63, %v11037_v54  ;;  %v3769_v21 = vmul.f32 %v6045_v63, %v11039_v46 }
 0xacb   :  { %v3832_v33 = vpack.c.bf16 %v3770_v4, %v3768_v28  ;;  %v3831_v38 = vpack.c.bf16 %v3769_v21, %v3767_v56 }
 0xacd   :  { %3874 = vmatpush1.bf16.xpose.msra.mxu0 %v3835_v37 }
 0xace   :  { %3875 = vmatprep.subr.bf16.mxu0 %v3834_v42 }
 0xad5   :  { %3876 = vmatpush1.bf16.xpose.msra.mxu0 %v3833_v58 }
 0xad6   :  { %3877 = vmatprep.subr.bf16.mxu0 %v3832_v33 }
 0xadd   :  { %3878 = vmatpush1.bf16.xpose.msra.mxu0 %v3831_v38 }
 0xae8   :  { %3904 = vxpose.xlu1.c.b16.start.end [1/1] (short) %v3062_v53, 128 }
 0xaed   :  { %3920 = vxpose.xlu0.c.b16.start.end [1/1] (short) %v3063_v47, 128 }
 0xb16   :  { %v3731_v55 = vpop.xlane.xlu1 %3730 }
 0xb17   :  { %6046 = vrcp.f32 %v3731_v55 }
 0xb1a   :  { %v3725_v11 = vpop.xlane.xlu1 %3724 }
 0xb1c   :  { %v3734_v43 = vpop.xlane.xlu0 %3733 }
 0xb1d   :  { %6048 = vrcp.f32 %v3734_v43 }
 0xb1e   :  { %6050 = vrcp.f32 %v3725_v11  ;;  %v3719_v17 = vpop.xlane.xlu1 %3718 }
 0xb20   :  { %v3728_v34 = vpop.xlane.xlu0 %3727 }
 0xb21   :  { %6052 = vrcp.f32 %v3728_v34 }
 0xb22   :  { %6054 = vrcp.f32 %v3719_v17  ;;  %v3713_v37 = vpop.xlane.xlu1 %3712 }
 0xb24   :  { %v3722_v52 = vpop.xlane.xlu0 %3721  ;;  %v6047_v30 = vpop.eup %6046 }
 0xb25   :  { %6056 = vrcp.f32 %v3722_v52  ;;  %v3828_v18 = vmul.f32 %v6047_v30, %v9219_v9  ;;  %v3827_v63 = vmul.f32 %v6047_v30, %v9217_v10 }
 0xb28   :  { %v3716_v23 = vpop.xlane.xlu0 %3715 }
 0xb29   :  { %6058 = vrcp.f32 %v3716_v23 }
 0xb2a   :  { %v6049_v14 = vpop.eup %6048  ;;  %6060 = vrcp.f32 %v3713_v37 }
 0xb2b   :  { %v3830_v42 = vmul.f32 %v6049_v14, %v9233_v49  ;;  %v3829_v51 = vmul.f32 %v6049_v14, %v9229_v57  ;;  %v6051_v0 = vpop.eup %6050 }
 0xb2c   :  { %v3824_v28 = vmul.f32 %v6051_v0, %v9225_v27  ;;  %v3707_v49 = vpop.xlane.xlu1 %3706  ;;  %v3823_v50 = vmul.f32 %v6051_v0, %v9223_v7 }
 0xb2d   :  { %v3862_v12 = vpack.c.bf16 %v3830_v42, %v3828_v18  ;;  %v3861_v45 = vpack.c.bf16 %v3829_v51, %v3827_v63 }
 0xb2e   :  { %v6053_v24 = vpop.eup %6052 }
 0xb2f   :  { %3879 = vmatprep.subr.bf16.mxu0 %v3862_v12  ;;  %v3826_v54 = vmul.f32 %v6053_v24, %v9247_v8  ;;  %v6055_v9 = vpop.eup %6054  ;;  %v3825_v10 = vmul.f32 %v6053_v24, %v9243_v29 }
 0xb30   :  { %3880 = vmatpush2.bf16.xpose.msra.mxu0 %v3861_v45  ;;  %v3820_v56 = vmul.f32 %v6055_v9, %v9239_v5 }
 0xb31   :  { %v3710_v4 = vpop.xlane.xlu0 %3709  ;;  %v3860_v58 = vpack.c.bf16 %v3826_v54, %v3824_v28  ;;  %v3859_v27 = vpack.c.bf16 %v3825_v10, %v3823_v50 }
 0xb32   :  { %v6057_v33 = vpop.eup %6056  ;;  %6062 = vrcp.f32 %v3710_v4 }
 0xb33   :  { %3881 = vmatprep.subr.bf16.mxu0 %v3860_v58  ;;  %v3822_v57 = vmul.f32 %v6057_v33, %v9261_v40  ;;  %6064 = vrcp.f32 %v3707_v49  ;;  %v3821_v53 = vmul.f32 %v6057_v33, %v9257_v31  ;;  %v3819_v40 = vmul.f32 %v6055_v9, %v9235_v62  ;;  %v3047_v9 = vpop.f32.mrf.mxu0 }
 0xb34   :  { %v3701_v35 = vpop.xlane.xlu1 %3700 }
 0xb35   :  { %v3858_v46 = vpack.c.bf16 %v3822_v57, %v3820_v56  ;;  %v3857_v20 = vpack.c.bf16 %v3821_v53, %v3819_v40  ;;  %v11042_v57 = vmov 0  }
 0xb36   :  { %v6059_v8 = vpop.eup %6058 }
 0xb37   :  { %v6061_v38 = vpop.eup %6060  ;;  %v3818_v29 = vmul.f32 %v6059_v8, %v9267_v6  ;;  %v3817_v34 = vmul.f32 %v6059_v8, %v9263_v15 }
 0xb38   :  { %3882 = vmatpush2.bf16.xpose.msra.mxu0 %v3859_v27  ;;  %v3816_v7 = vmul.f32 %v6061_v38, %v9253_v39  ;;  %v3815_v6 = vmul.f32 %v6061_v38, %v9249_v48 }
 0xb39   :  { %v3704_v21 = vpop.xlane.xlu0 %3703  ;;  %3883 = vmatprep.subr.bf16.mxu0 %v3858_v46 }
 0xb3a   :  { %6066 = vrcp.f32 %v3704_v21  ;;  %v3856_v5 = vpack.c.bf16 %v3818_v29, %v3816_v7  ;;  %v3855_v17 = vpack.c.bf16 %v3817_v34, %v3815_v6 }
 0xb3b   :  { %6068 = vrcp.f32 %v3701_v35 }
 0xb3c   :  { %v3695_v43 = vpop.xlane.xlu1 %3694 }
 0xb3f   :  { %v6063_v47 = vpop.eup %6062 }
 0xb40   :  { %3884 = vmatpush2.bf16.xpose.msra.mxu0 %v3857_v20  ;;  %v6065_v11 = vpop.eup %6064  ;;  %v3814_v31 = vmul.f32 %v6063_v47, %v9289_v60  ;;  %v3813_v37 = vmul.f32 %v6063_v47, %v9287_v26 }
 0xb41   :  { %v3698_v55 = vpop.xlane.xlu0 %3697  ;;  %3885 = vmatprep.subr.bf16.mxu0 %v3856_v5  ;;  %v3812_v62 = vmul.f32 %v6065_v11, %v9281_v41  ;;  %v3811_v60 = vmul.f32 %v6065_v11, %v9279_v25 }
 0xb42   :  { %6070 = vrcp.f32 %v3698_v55 }
 0xb43   :  { %6072 = vrcp.f32 %v3695_v43  ;;  %v3854_v39 = vpack.c.bf16 %v3814_v31, %v3812_v62  ;;  %v3853_v18 = vpack.c.bf16 %v3813_v37, %v3811_v60 }
 0xb44   :  { %v3689_v14 = vpop.xlane.xlu1 %3688 }
 0xb47   :  { %v6067_v52 = vpop.eup %6066 }
 0xb48   :  { %3886 = vmatpush2.bf16.xpose.msra.mxu0 %v3855_v17  ;;  %v6069_v23 = vpop.eup %6068  ;;  %v3810_v15 = vmul.f32 %v6067_v52, %v9309_v3  ;;  %v3809_v51 = vmul.f32 %v6067_v52, %v9307_v22 }
 0xb49   :  { %v3692_v30 = vpop.xlane.xlu0 %3691  ;;  %3887 = vmatprep.subr.bf16.mxu0 %v3854_v39  ;;  %v3808_v48 = vmul.f32 %v6069_v23, %v9301_v44  ;;  %v3807_v26 = vmul.f32 %v6069_v23, %v9297_v32 }
 0xb4a   :  { %6074 = vrcp.f32 %v3692_v30  ;;  %v3912_v56 = vpop.trf.xlu1 }
 0xb4b   :  { %6076 = vrcp.f32 %v3689_v14  ;;  %v3852_v41 = vpack.c.bf16 %v3810_v15, %v3808_v48  ;;  %v3851_v3 = vpack.c.bf16 %v3809_v51, %v3807_v26 }
 0xb4e   :  { %v3913_v46 = vpop.trf.xlu1 }
 0xb4f   :  { %v6071_v42 = vpop.eup %6070  ;;  %v3928_v40 = vpop.trf.xlu0 }
 0xb50   :  { %3888 = vmatpush2.bf16.xpose.msra.mxu0 %v3853_v18  ;;  %v6073_v63 = vpop.eup %6072  ;;  %v3806_v0 = vmul.f32 %v6071_v42, %v9325_v2  ;;  %v3805_v24 = vmul.f32 %v6071_v42, %v9323_v59  ;;  %v3066_v59 = vpack.c.bf16 %v3047_v9, %v3047_v9 }
 0xb51   :  { %3889 = vmatprep.subr.bf16.mxu0 %v3852_v41  ;;  %v3804_v12 = vmul.f32 %v6073_v63, %v9319_v1  ;;  %v3803_v54 = vmul.f32 %v6073_v63, %v9317_v13  ;;  %v3049_v1 = vpop.f32.mrf.mxu0 }
 0xb52   :  { %v3067_v49 = vpack.c.bf16 %v3049_v1, %v3049_v1  ;;  %v3914_v8 = vpop.trf.xlu1 }
 0xb53   :  { %v3850_v45 = vpack.c.bf16 %v3806_v0, %v3804_v12  ;;  %v3849_v4 = vpack.c.bf16 %v3805_v24, %v3803_v54  ;;  %v9397_v10 = vpop.f32.mrf.mxu0  ;;  %v3929_v7 = vpop.trf.xlu0 }
 0xb54   :  { %11041 = vst [vmem:[#allocation69_spill] sm:$0xff] %v9397_v10 }
 0xb56   :  { %v3915_v21 = vpop.trf.xlu1 }
 0xb57   :  { %v6075_v25 = vpop.eup %6074  ;;  %v3930_v20 = vpop.trf.xlu0 }
 0xb58   :  { %3890 = vmatpush2.bf16.xpose.msra.mxu0 %v3851_v3  ;;  %v6077_v44 = vpop.eup %6076  ;;  %v3802_v28 = vmul.f32 %v6075_v25, %v9341_v36  ;;  %v3801_v32 = vmul.f32 %v6075_v25, %v9339_v61  ;;  %v11040_v36 = vld [vmem:[#allocation70_spill] sm:$0xff]  ;;  %v3055_v61 = vpop.f32.mrf.mxu0 }
 0xb59   :  { %3891 = vmatprep.subr.bf16.mxu0 %v3850_v45  ;;  %v3800_v22 = vmul.f32 %v6077_v44, %v9335_v16  ;;  %v3799_v58 = vmul.f32 %v6077_v44, %v9333_v19  ;;  %v3068_v13 = vpack.c.bf16 %v11040_v36, %v11040_v36  ;;  %v3985_v16 = vsel %vm1151_vm9, %v3066_v59, 0 }
 0xb5a   :  { %v3071_v50 = vpack.c.bf16 %v3055_v61, %v3055_v61  ;;  %v3057_v19 = vpop.f32.mrf.mxu0  ;;  %v3916_v38 = vpop.trf.xlu1 }
 0xb5b   :  { %v3848_v2 = vpack.c.bf16 %v3802_v28, %v3800_v22  ;;  %v3847_v33 = vpack.c.bf16 %v3801_v32, %v3799_v58  ;;  %v3931_v5 = vpop.trf.xlu0 }
 0xb5c   :  { %4727 = vmatprep.mubr.bf16.mxu1 %v3071_v50  ;;  %v3058_v27 = vpop.f32.mrf.mxu0 }
 0xb5e   :  { %v3917_v35 = vpop.trf.xlu1 }
 0xb5f   :  { %v3932_v47 = vpop.trf.xlu0 }
 0xb60   :  { %3892 = vmatpush2.bf16.xpose.msra.mxu0 %v3849_v4 }
 0xb61   :  { %3893 = vmatprep.subr.bf16.mxu0 %v3848_v2 }
 0xb62   :  { %v3918_v53 = vpop.trf.xlu1 }
 0xb63   :  { %v3933_v55 = vpop.trf.xlu0 }
 0xb66   :  { %v3919_v29 = vpop.trf.xlu1 }
 0xb67   :  { %v3934_v11 = vpop.trf.xlu0 }
 0xb68   :  { %3894 = vmatpush2.bf16.xpose.msra.mxu0 %v3847_v33 }
 0xb69   :  { %5449 = vmatprep.subr.msk.bf16.mxu0 %vm1151_vm9, %v3067_v49 }
 0xb6b   :  { %v3935_v43 = vpop.trf.xlu0 }
 0xb6f   :  { %3896 = vmatmul.mubr.bf16.vlgmr.msra.gmra.mxu0 %v3068_v13 }
 0xb70   :  { %4005 = vmatpush1.bf16.msra.mxu0 %v3985_v16  ;;  %4022 = vmatprep.mubr.bf16.mxu0 %v11042_v57 }
 0xb77   :  { %5450 = vmatmul.mubr.msk.bf16.vlgmr.msra.gmra.mxu0 %vm1144_vm10, %v3912_v56 }
 0xb78   :  { %4032 = vmatprep.mubr.bf16.mxu0 %v11042_v57 }
 0xb7f   :  { %5451 = vmatmul.mubr.msk.bf16.gmra.mxu0 %vm1144_vm10, %v3913_v46 }
 0xb80   :  { %4042 = vmatprep.mubr.bf16.mxu0 %v11042_v57 }
 0xb87   :  { %5452 = vmatmul.mubr.msk.bf16.gmra.mxu0 %vm1144_vm10, %v3914_v8 }
 0xb88   :  { %4052 = vmatprep.mubr.bf16.mxu0 %v11042_v57 }
 0xb8f   :  { %5453 = vmatmul.mubr.msk.bf16.gmra.mxu0 %vm1144_vm10, %v3915_v21 }
 0xb90   :  { %4062 = vmatprep.mubr.bf16.mxu0 %v11042_v57 }
 0xb97   :  { %5454 = vmatmul.mubr.msk.bf16.gmra.mxu0 %vm1144_vm10, %v3916_v38 }
 0xb98   :  { %4072 = vmatprep.mubr.bf16.mxu0 %v11042_v57 }
 0xb9f   :  { %5455 = vmatmul.mubr.msk.bf16.gmra.mxu0 %vm1144_vm10, %v3917_v35 }
 0xba0   :  { %4082 = vmatprep.mubr.bf16.mxu0 %v11042_v57 }
 0xba7   :  { %5456 = vmatmul.mubr.msk.bf16.gmra.mxu0 %vm1144_vm10, %v3918_v53 }
 0xba8   :  { %4092 = vmatprep.mubr.bf16.mxu0 %v11042_v57 }
 0xbaf   :  { %5457 = vmatmul.mubr.msk.bf16.gmra.mxu0 %vm1144_vm10, %v3919_v29 }
 0xbb0   :  { %4102 = vmatprep.mubr.bf16.mxu0 %v11042_v57 }
 0xbb7   :  { %5458 = vmatmul.mubr.msk.bf16.gmra.mxu0 %vm1144_vm10, %v3928_v40 }
 0xbb8   :  { %4112 = vmatprep.mubr.bf16.mxu0 %v11042_v57 }
 0xbbf   :  { %5459 = vmatmul.mubr.msk.bf16.gmra.mxu0 %vm1144_vm10, %v3929_v7 }
 0xbc0   :  { %4122 = vmatprep.mubr.bf16.mxu0 %v11042_v57 }
 0xbc7   :  { %5460 = vmatmul.mubr.msk.bf16.gmra.mxu0 %vm1144_vm10, %v3930_v20 }
 0xbc8   :  { %4132 = vmatprep.mubr.bf16.mxu0 %v11042_v57 }
 0xbcf   :  { %5461 = vmatmul.mubr.msk.bf16.gmra.mxu0 %vm1144_vm10, %v3931_v5 }
 0xbd0   :  { %4142 = vmatprep.mubr.bf16.mxu0 %v11042_v57 }
 0xbd7   :  { %5462 = vmatmul.mubr.msk.bf16.gmra.mxu0 %vm1144_vm10, %v3932_v47 }
 0xbd8   :  { %4152 = vmatprep.mubr.bf16.mxu0 %v11042_v57 }
 0xbdf   :  { %5463 = vmatmul.mubr.msk.bf16.gmra.mxu0 %vm1144_vm10, %v3933_v55 }
 0xbe0   :  { %4162 = vmatprep.mubr.bf16.mxu0 %v11042_v57 }
 0xbe7   :  { %5464 = vmatmul.mubr.msk.bf16.gmra.mxu0 %vm1144_vm10, %v3934_v11 }
 0xbe8   :  { %4172 = vmatprep.mubr.bf16.mxu0 %v11042_v57 }
 0xbef   :  { %5465 = vmatmul.mubr.msk.bf16.gmra.mxu0 %vm1144_vm10, %v3935_v43 }
 0xc2f   :  { %v9431_v34 = vpop.f32.mrf.mxu0 }
 0xc30   :  { %11043 = vst [vmem:[#allocation77_spill] sm:$0xff] %v9431_v34 }
 0xc31   :  { %v9433_v31 = vpop.f32.mrf.mxu0 }
 0xc32   :  { %11044 = vst [vmem:[#allocation71_spill] sm:$0xff] %v9433_v31 }
 0xc33   :  { %v3901_v6 = vpop.f32.mrf.mxu0 }
 0xc35   :  { %v3902_v62 = vpop.f32.mrf.mxu0 }
 0xc37   :  { %v9435_v17 = vpop.f32.mrf.mxu0 }
 0xc39   :  { %v9437_v39 = vpop.f32.mrf.mxu0 }
 0xc3a   :  { %v4183_v43 = vmax.f32 %v9435_v17, %v9437_v39 }
 0xc3b   :  { %v9439_v52 = vpop.f32.mrf.mxu0 }
 0xc3d   :  { %v9441_v30 = vpop.f32.mrf.mxu0 }
 0xc3e   :  { %11045 = vst [vmem:[#allocation64_spill] sm:$0xff] %v9441_v30 }
 0xc3f   :  { %v9443_v23 = vpop.f32.mrf.mxu0 }
 0xc41   :  { %v9445_v14 = vpop.f32.mrf.mxu0 }
 0xc42   :  { %v4189_v5 = vmax.f32 %v9443_v23, %v9445_v14 }
 0xc43   :  { %v9447_v37 = vpop.f32.mrf.mxu0 }
 0xc45   :  { %v9449_v15 = vpop.f32.mrf.mxu0 }
 0xc46   :  { %v4192_v6 = vmax.f32 %v9447_v37, %v9449_v15 }
 0xc47   :  { %v9451_v60 = vpop.f32.mrf.mxu0 }
 0xc49   :  { %v9453_v48 = vpop.f32.mrf.mxu0 }
 0xc4a   :  { %v4195_v29 = vmax.f32 %v9451_v60, %v9453_v48 }
 0xc4b   :  { %v9455_v18 = vpop.f32.mrf.mxu0 }
 0xc4d   :  { %v9457_v41 = vpop.f32.mrf.mxu0 }
 0xc4e   :  { %v4198_v47 = vmax.f32 %v9455_v18, %v9457_v41 }
 0xc4f   :  { %v9459_v42 = vpop.f32.mrf.mxu0 }
 0xc51   :  { %v9461_v63 = vpop.f32.mrf.mxu0 }
 0xc52   :  { %v4201_v21 = vmax.f32 %v9459_v42, %v9461_v63 }
 0xc53   :  { %v9463_v51 = vpop.f32.mrf.mxu0 }
 0xc55   :  { %v9465_v0 = vpop.f32.mrf.mxu0 }
 0xc56   :  { %v4204_v40 = vmax.f32 %v9463_v51, %v9465_v0 }
 0xc57   :  { %v9467_v26 = vpop.f32.mrf.mxu0 }
 0xc59   :  { %v9469_v12 = vpop.f32.mrf.mxu0 }
 0xc5a   :  { %v4207_v56 = vmax.f32 %v9467_v26, %v9469_v12 }
 0xc5b   :  { %v9471_v3 = vpop.f32.mrf.mxu0 }
 0xc5d   :  { %v9473_v45 = vpop.f32.mrf.mxu0 }
 0xc5e   :  { %v4210_v38 = vmax.f32 %v9471_v3, %v9473_v45 }
 0xc5f   :  { %v9475_v25 = vpop.f32.mrf.mxu0 }
 0xc61   :  { %v9477_v44 = vpop.f32.mrf.mxu0 }
 0xc62   :  { %v4213_v16 = vmax.f32 %v9475_v25, %v9477_v44 }
 0xc63   :  { %v9479_v24 = vpop.f32.mrf.mxu0 }
 0xc65   :  { %v9481_v28 = vpop.f32.mrf.mxu0 }
 0xc66   :  { %v4216_v27 = vmax.f32 %v9479_v24, %v9481_v28 }
 0xc67   :  { %v9483_v54 = vpop.f32.mrf.mxu0 }
 0xc69   :  { %v9485_v22 = vpop.f32.mrf.mxu0 }
 0xc6a   :  { %v4219_v49 = vmax.f32 %v9483_v54, %v9485_v22 }
 0xc6b   :  { %v9487_v4 = vpop.f32.mrf.mxu0 }
 0xc6d   :  { %v9489_v2 = vpop.f32.mrf.mxu0 }
 0xc6e   :  { %v4222_v61 = vmax.f32 %v9487_v4, %v9489_v2 }
 0xc6f   :  { %v9491_v9 = vpop.f32.mrf.mxu0 }
 0xc71   :  { %v9493_v32 = vpop.f32.mrf.mxu0 }
 0xc72   :  { %v4225_v1 = vmax.f32 %v9491_v9, %v9493_v32 }
 0xc73   :  { %v9497_v58 = vpop.f32.mrf.mxu0 }
 0xc74   :  { %4226 = vmax.xlane.f32.xlu1 %v4225_v1 }
 0xc75   :  { %v9499_v33 = vpop.f32.mrf.mxu0 }
 0xc76   :  { %v4228_v59 = vmax.f32 %v9497_v58, %v9499_v33 }
 0xc77   :  { %v9505_v36 = vpop.f32.mrf.mxu0 }
 0xc78   :  { %11046 = vst [vmem:[#allocation42_spill] sm:$0xff] %v9505_v36  ;;  %4220 = vmax.xlane.f32.xlu1 %v4219_v49  ;;  %4229 = vmax.xlane.f32.xlu0 %v4228_v59  ;;  %v4186_v49 = vmax.f32 %v9439_v52, %v9441_v30 }
 0xc79   :  { %v9507_v13 = vpop.f32.mrf.mxu0 }
 0xc7a   :  { %11047 = vst [vmem:[#allocation65_spill] sm:$0xff] %v9507_v13 }
 0xc7b   :  { %v9513_v50 = vpop.f32.mrf.mxu0 }
 0xc7c   :  { %11048 = vst [vmem:[#allocation72_spill] sm:$0xff] %v9513_v50  ;;  %4214 = vmax.xlane.f32.xlu1 %v4213_v16  ;;  %4223 = vmax.xlane.f32.xlu0 %v4222_v61 }
 0xc7d   :  { %v9515_v19 = vpop.f32.mrf.mxu0 }
 0xc7e   :  { %11049 = vst [vmem:[#allocation24_spill] sm:$0xff] %v9515_v19 }
 0xc7f   :  { %v9521_v46 = vpop.f32.mrf.mxu0 }
 0xc80   :  { %4208 = vmax.xlane.f32.xlu1 %v4207_v56  ;;  %4217 = vmax.xlane.f32.xlu0 %v4216_v27 }
 0xc81   :  { %v9523_v8 = vpop.f32.mrf.mxu0 }
 0xc83   :  { %v9529_v35 = vpop.f32.mrf.mxu0 }
 0xc84   :  { %4202 = vmax.xlane.f32.xlu1 %v4201_v21  ;;  %4211 = vmax.xlane.f32.xlu0 %v4210_v38 }
 0xc85   :  { %v9531_v53 = vpop.f32.mrf.mxu0 }
 0xc87   :  { %v9537_v7 = vpop.f32.mrf.mxu0 }
 0xc88   :  { %4196 = vmax.xlane.f32.xlu1 %v4195_v29  ;;  %4205 = vmax.xlane.f32.xlu0 %v4204_v40 }
 0xc89   :  { %v9539_v20 = vpop.f32.mrf.mxu0 }
 0xc8b   :  { %v9545_v55 = vpop.f32.mrf.mxu0 }
 0xc8c   :  { %4190 = vmax.xlane.f32.xlu1 %v4189_v5  ;;  %4199 = vmax.xlane.f32.xlu0 %v4198_v47 }
 0xc8d   :  { %v9547_v11 = vpop.f32.mrf.mxu0 }
 0xc8f   :  { %v9553_v62 = vpop.f32.mrf.mxu0 }
 0xc90   :  { %4184 = vmax.xlane.f32.xlu1 %v4183_v43  ;;  %4193 = vmax.xlane.f32.xlu0 %v4192_v6 }
 0xc91   :  { %v9555_v1 = vpop.f32.mrf.mxu0 }
 0xc93   :  { %v9559_v59 = vpop.f32.mrf.mxu0 }
 0xc94   :  { %4187 = vmax.xlane.f32.xlu0 %v4186_v49 }
 0xc95   :  { %v9561_v16 = vpop.f32.mrf.mxu0 }
 0xc97   :  { %v9563_v61 = vpop.f32.mrf.mxu0 }
 0xc99   :  { %v9565_v56 = vpop.f32.mrf.mxu0 }
 0xc9a   :  { %11050 = vst [vmem:[#allocation66_spill] sm:$0xff] %v9565_v56 }
 0xc9b   :  { %v9567_v27 = vpop.f32.mrf.mxu0 }
 0xc9c   :  { %11051 = vst [vmem:[#allocation40_spill] sm:$0xff] %v9567_v27 }
 0xc9d   :  { %v9569_v21 = vpop.f32.mrf.mxu0 }
 0xc9e   :  { %11052 = vst [vmem:[#allocation74_spill] sm:$0xff] %v9569_v21 }
 0xc9f   :  { %v9571_v38 = vpop.f32.mrf.mxu0 }
 0xca0   :  { %11053 = vst [vmem:[#allocation75_spill] sm:$0xff] %v9571_v38 }
 0xca1   :  { %v9573_v29 = vpop.f32.mrf.mxu0 }
 0xca2   :  { %11054 = vst [vmem:[#allocation25_spill] sm:$0xff] %v9573_v29  ;;  %v4261_v13 = vmax.f32 %v9571_v38, %v9573_v29 }
 0xca3   :  { %v9575_v40 = vpop.f32.mrf.mxu0 }
 0xca5   :  { %v9577_v5 = vpop.f32.mrf.mxu0 }
 0xca6   :  { %11055 = vst [vmem:[#allocation68_spill] sm:$0xff] %v9577_v5 }
 0xca7   :  { %v9579_v47 = vpop.f32.mrf.mxu0 }
 0xca9   :  { %v9581_v43 = vpop.f32.mrf.mxu0 }
 0xcaa   :  { %11056 = vst [vmem:[#allocation63_spill] sm:$0xff] %v9581_v43  ;;  %v4267_v50 = vmax.f32 %v9579_v47, %v9581_v43  ;;  %v4264_v43 = vmax.f32 %v9575_v40, %v9577_v5 }
 0xcab   :  { %v9583_v6 = vpop.f32.mrf.mxu0 }
 0xcac   :  { %11057 = vst [vmem:[#allocation79_spill] sm:$0xff] %v9583_v6 }
 0xcad   :  { %v9585_v49 = vpop.f32.mrf.mxu0 }
 0xcae   :  { %11058 = vst [vmem:[#allocation70_spill] sm:$0xff] %v9585_v49  ;;  %v4270_v30 = vmax.f32 %v9583_v6, %v9585_v49 }
 0xcaf   :  { %v9587_v57 = vpop.f32.mrf.mxu0 }
 0xcb1   :  { %v9589_v10 = vpop.f32.mrf.mxu0 }
 0xcb2   :  { %11059 = vst [vmem:[#allocation80_spill] sm:$0xff] %v9589_v10  ;;  %v4273_v31 = vmax.f32 %v9587_v57, %v9589_v10  ;;  %v4255_v10 = vmax.f32 %v9563_v61, %v9565_v56 }
 0xcb3   :  { %v9593_v34 = vpop.f32.mrf.mxu0 }
 0xcb4   :  { %4274 = vmax.xlane.f32.xlu1 %v4273_v31  ;;  %v4258_v31 = vmax.f32 %v9567_v27, %v9569_v21 }
 0xcb5   :  { %v9597_v19 = vpop.f32.mrf.mxu0 }
 0xcb6   :  { %v4276_v36 = vmax.f32 %v9593_v34, %v9597_v19 }
 0xcb8   :  { %4268 = vmax.xlane.f32.xlu1 %v4267_v50  ;;  %4277 = vmax.xlane.f32.xlu0 %v4276_v36 }
 0xcbc   :  { %4262 = vmax.xlane.f32.xlu1 %v4261_v13  ;;  %4271 = vmax.xlane.f32.xlu0 %v4270_v30 }
 0xcc0   :  { %4256 = vmax.xlane.f32.xlu1 %v4255_v10  ;;  %4265 = vmax.xlane.f32.xlu0 %v4264_v43 }
 0xcc4   :  { %4259 = vmax.xlane.f32.xlu0 %v4258_v31 }
 0xcfd   :  { %v4227_v29 = vpop.xlane.xlu1 %4226 }
 0xcfe   :  { %v4307_v38 = vsub.f32 %v9491_v9, %v4227_v29  ;;  %v4308_v50 = vsub.f32 %v9493_v32, %v4227_v29 }
 0xd00   :  { %v4399_v36 = vmul.f32 1.442695, %v4307_v38  ;;  %v4401_v49 = vmul.f32 1.442695, %v4308_v50 }
 0xd01   :  { %v4221_v6 = vpop.xlane.xlu1 %4220  ;;  %v4230_v56 = vpop.xlane.xlu0 %4229 }
 0xd02   :  { %6078 = vpow2.f32 %v4399_v36  ;;  %v4303_v5 = vsub.f32 %v9483_v54, %v4221_v6  ;;  %v4304_v30 = vsub.f32 %v9485_v22, %v4221_v6  ;;  %v4309_v13 = vsub.f32 %v9497_v58, %v4230_v56 }
 0xd03   :  { %6080 = vpow2.f32 %v4401_v49  ;;  %v4310_v10 = vsub.f32 %v9499_v33, %v4230_v56 }
 0xd04   :  { %v4391_v43 = vmul.f32 1.442695, %v4303_v5  ;;  %v4393_v31 = vmul.f32 1.442695, %v4304_v30  ;;  %v4403_v21 = vmul.f32 1.442695, %v4309_v13 }
 0xd05   :  { %v4405_v9 = vmul.f32 1.442695, %v4310_v10  ;;  %v4215_v27 = vpop.xlane.xlu1 %4214  ;;  %v4224_v32 = vpop.xlane.xlu0 %4223 }
 0xd06   :  { %6082 = vpow2.f32 %v4391_v43  ;;  %v4305_v38 = vsub.f32 %v9487_v4, %v4224_v32  ;;  %v4306_v29 = vsub.f32 %v9489_v2, %v4224_v32  ;;  %v4299_v54 = vsub.f32 %v9475_v25, %v4215_v27 }
 0xd07   :  { %6084 = vpow2.f32 %v4393_v31  ;;  %v4300_v22 = vsub.f32 %v9477_v44, %v4215_v27 }
 0xd08   :  { %6086 = vpow2.f32 %v4403_v21  ;;  %v4395_v56 = vmul.f32 1.442695, %v4305_v38  ;;  %v4397_v5 = vmul.f32 1.442695, %v4306_v29  ;;  %v4383_v6 = vmul.f32 1.442695, %v4299_v54 }
 0xd09   :  { %6088 = vpow2.f32 %v4405_v9  ;;  %v4209_v58 = vpop.xlane.xlu1 %4208  ;;  %v4218_v33 = vpop.xlane.xlu0 %4217  ;;  %v4385_v49 = vmul.f32 1.442695, %v4300_v22  ;;  %v4249_v9 = vmax.f32 %v9553_v62, %v9555_v1 }
 0xd0a   :  { %6090 = vpow2.f32 %v4395_v56  ;;  %v4301_v50 = vsub.f32 %v9479_v24, %v4218_v33  ;;  %v4302_v4 = vsub.f32 %v9481_v28, %v4218_v33  ;;  %v4295_v44 = vsub.f32 %v9467_v26, %v4209_v58 }
 0xd0b   :  { %6092 = vpow2.f32 %v4397_v5  ;;  %v4296_v27 = vsub.f32 %v9469_v12, %v4209_v58 }
 0xd0c   :  { %6094 = vpow2.f32 %v4383_v6  ;;  %v4387_v13 = vmul.f32 1.442695, %v4301_v50  ;;  %v4389_v10 = vmul.f32 1.442695, %v4302_v4  ;;  %v4375_v28 = vmul.f32 1.442695, %v4295_v44 }
 0xd0d   :  { %v4203_v2 = vpop.xlane.xlu1 %4202  ;;  %v4212_v21 = vpop.xlane.xlu0 %4211  ;;  %6096 = vpow2.f32 %v4385_v49  ;;  %v4377_v26 = vmul.f32 1.442695, %v4296_v27 }
 0xd0e   :  { %6098 = vpow2.f32 %v4387_v13  ;;  %v4297_v29 = vsub.f32 %v9471_v3, %v4212_v21  ;;  %v4298_v54 = vsub.f32 %v9473_v45, %v4212_v21  ;;  %v4291_v58 = vsub.f32 %v9459_v42, %v4203_v2 }
 0xd0f   :  { %v9622_v36 = vpop.eup %6078  ;;  %6100 = vpow2.f32 %v4389_v10  ;;  %v4292_v33 = vsub.f32 %v9461_v63, %v4203_v2  ;;  %v4252_v3 = vmax.f32 %v9559_v59, %v9561_v16  ;;  %v4243_v2 = vmax.f32 %v9537_v7, %v9539_v20 }
 0xd10   :  { %v9625_v25 = vpop.eup %6080  ;;  %6102 = vpow2.f32 %v4375_v28  ;;  %v4379_v5 = vmul.f32 1.442695, %v4297_v29  ;;  %v4381_v45 = vmul.f32 1.442695, %v4298_v54  ;;  %v4367_v42 = vmul.f32 1.442695, %v4291_v58 }
 0xd11   :  { %v4513_v30 = vadd.f32 %v9625_v25, %v9622_v36  ;;  %v4197_v32 = vpop.xlane.xlu1 %4196  ;;  %v4206_v38 = vpop.xlane.xlu0 %4205  ;;  %6104 = vpow2.f32 %v4377_v26  ;;  %v4369_v44 = vmul.f32 1.442695, %v4292_v33 }
 0xd12   :  { %v4287_v21 = vsub.f32 %v9451_v60, %v4197_v32  ;;  %v4288_v27 = vsub.f32 %v9453_v48, %v4197_v32  ;;  %6106 = vpow2.f32 %v4379_v5  ;;  %v4293_v13 = vsub.f32 %v9463_v51, %v4206_v38 }
 0xd13   :  { %v9631_v24 = vpop.eup %6082  ;;  %4514 = vadd.xlane.f32.xlu1 %v4513_v30  ;;  %6108 = vpow2.f32 %v4381_v45  ;;  %v4294_v10 = vsub.f32 %v9465_v0, %v4206_v38 }
 0xd14   :  { %v9633_v43 = vpop.eup %6084  ;;  %6110 = vpow2.f32 %v4367_v42  ;;  %v4359_v28 = vmul.f32 1.442695, %v4287_v21  ;;  %v4361_v26 = vmul.f32 1.442695, %v4288_v27  ;;  %v4371_v54 = vmul.f32 1.442695, %v4293_v13 }
 0xd15   :  { %v9635_v31 = vpop.eup %6086  ;;  %v4507_v56 = vadd.f32 %v9633_v43, %v9631_v24  ;;  %v4191_v49 = vpop.xlane.xlu1 %4190  ;;  %6112 = vpow2.f32 %v4369_v44  ;;  %v4373_v58 = vmul.f32 1.442695, %v4294_v10 }
 0xd16   :  { %v9639_v12 = vpop.eup %6088  ;;  %v4200_v50 = vpop.xlane.xlu0 %4199  ;;  %v4284_v48 = vsub.f32 %v9445_v14, %v4191_v49  ;;  %6114 = vpow2.f32 %v4359_v28  ;;  %v11060_v28 = vld [vmem:[#allocation64_spill] sm:$0xff] }
 0xd17   :  { %4250 = vmax.xlane.f32.xlu1 %v4249_v9  ;;  %v4516_v22 = vadd.f32 %v9639_v12, %v9635_v31  ;;  %v9649_v6 = vpop.eup %6090  ;;  %v4283_v9 = vsub.f32 %v9443_v23, %v4191_v49  ;;  %v4289_v0 = vsub.f32 %v9455_v18, %v4200_v50  ;;  %v4290_v23 = vsub.f32 %v9457_v41, %v4200_v50 }
 0xd18   :  { %v9653_v4 = vpop.eup %6092  ;;  %v4237_v18 = vmax.f32 %v9521_v46, %v9523_v8  ;;  %6116 = vpow2.f32 %v4361_v26 }
 0xd19   :  { %4517 = vadd.xlane.f32.xlu0 %v4516_v22  ;;  %v9656_v63 = vpop.eup %6094  ;;  %v4510_v60 = vadd.f32 %v9653_v4, %v9649_v6  ;;  %v4185_v32 = vpop.xlane.xlu1 %4184  ;;  %v4246_v22 = vmax.f32 %v9545_v55, %v9547_v11  ;;  %v4351_v14 = vmul.f32 1.442695, %v4283_v9  ;;  %6118 = vpow2.f32 %v4371_v54 }
 0xd1a   :  { %v9661_v30 = vpop.eup %6096  ;;  %v4194_v29 = vpop.xlane.xlu0 %4193  ;;  %v4280_v45 = vsub.f32 %v9437_v39, %v4185_v32  ;;  %v4363_v41 = vmul.f32 1.442695, %v4289_v0  ;;  %6120 = vpow2.f32 %v4373_v58  ;;  %v4365_v42 = vmul.f32 1.442695, %v4290_v23 }
 0xd1b   :  { %4508 = vadd.xlane.f32.xlu1 %v4507_v56  ;;  %v4501_v51 = vadd.f32 %v9661_v30, %v9656_v63  ;;  %v9672_v38 = vpop.eup %6098  ;;  %v4279_v56 = vsub.f32 %v9435_v17, %v4185_v32  ;;  %v4285_v50 = vsub.f32 %v9447_v37, %v4194_v29  ;;  %v4286_v17 = vsub.f32 %v9449_v15, %v4194_v29  ;;  %v11061_v32 = vld [vmem:[#allocation65_spill] sm:$0xff]  ;;  %v11062_v29 = vld [vmem:[#allocation42_spill] sm:$0xff] }
 0xd1c   :  { %v9677_v33 = vpop.eup %6100  ;;  %6122 = vpow2.f32 %v4351_v14  ;;  %v4345_v39 = vmul.f32 1.442695, %v4280_v45  ;;  %v4240_v15 = vmax.f32 %v9529_v35, %v9531_v53 }
 0xd1d   :  { %4253 = vmax.xlane.f32.xlu0 %v4252_v3  ;;  %v9680_v5 = vpop.eup %6102  ;;  %v4353_v3 = vmul.f32 1.442695, %v4284_v48  ;;  %v4343_v44 = vmul.f32 1.442695, %v4279_v56  ;;  %v4355_v13 = vmul.f32 1.442695, %v4285_v50 }
 0xd1e   :  { %v9685_v49 = vpop.eup %6104  ;;  %v4188_v21 = vpop.xlane.xlu0 %4187 }
 0xd1f   :  { %4244 = vmax.xlane.f32.xlu1 %v4243_v2  ;;  %v4504_v2 = vadd.f32 %v9677_v33, %v9672_v38  ;;  %6124 = vpow2.f32 %v4353_v3  ;;  %v4495_v27 = vadd.f32 %v9685_v49, %v9680_v5  ;;  %v4281_v37 = vsub.f32 %v9439_v52, %v4188_v21  ;;  %v9694_v10 = vpop.eup %6106  ;;  %v11065_v3 = vld [vmem:[#allocation72_spill] sm:$0xff] }
 0xd20   :  { %6126 = vpow2.f32 %v4363_v41  ;;  %v4282_v9 = vsub.f32 %v11060_v28, %v4188_v21  ;;  %v9699_v26 = vpop.eup %6108 }
 0xd21   :  { %4511 = vadd.xlane.f32.xlu0 %v4510_v60  ;;  %6128 = vpow2.f32 %v4365_v42  ;;  %v4357_v60 = vmul.f32 1.442695, %v4286_v17  ;;  %v9701_v48 = vpop.eup %6110  ;;  %v4347_v54 = vmul.f32 1.442695, %v4281_v37 }
 0xd22   :  { %6130 = vpow2.f32 %v4343_v44  ;;  %v9705_v52 = vpop.eup %6112  ;;  %v4349_v0 = vmul.f32 1.442695, %v4282_v9 }
 0xd23   :  { %4502 = vadd.xlane.f32.xlu1 %v4501_v51  ;;  %v4231_v51 = vmax.f32 %v11062_v29, %v11061_v32  ;;  %6132 = vpow2.f32 %v4345_v39  ;;  %v9709_v58 = vpop.eup %6114  ;;  %v4489_v23 = vadd.f32 %v9705_v52, %v9701_v48 }
 0xd24   :  { %6134 = vpow2.f32 %v4355_v13  ;;  %11063 = vst [vmem:[#allocation64_spill] sm:$0xff] %v9709_v58 }
 0xd25   :  { %4247 = vmax.xlane.f32.xlu0 %v4246_v22  ;;  %6136 = vpow2.f32 %v4357_v60  ;;  %v4498_v22 = vadd.f32 %v9699_v26, %v9694_v10  ;;  %v9713_v14 = vpop.eup %6116 }
 0xd26   :  { %6138 = vpow2.f32 %v4347_v54  ;;  %v9715_v56 = vpop.eup %6118  ;;  %v4483_v42 = vadd.f32 %v9713_v14, %v9709_v58  ;;  %v11071_v54 = vld [vmem:[#allocation80_spill] sm:$0xff]  ;;  %v11075_v58 = vld [vmem:[#allocation25_spill] sm:$0xff] }
 0xd27   :  { %4238 = vmax.xlane.f32.xlu1 %v4237_v18  ;;  %v11064_v18 = vld [vmem:[#allocation24_spill] sm:$0xff]  ;;  %6140 = vpow2.f32 %v4349_v0  ;;  %v9719_v41 = vpop.eup %6120 }
 0xd28   :  { %v4234_v45 = vmax.f32 %v11065_v3, %v11064_v18 }
 0xd29   :  { %4505 = vadd.xlane.f32.xlu0 %v4504_v2  ;;  %v9721_v50 = vpop.eup %6122  ;;  %v4492_v2 = vadd.f32 %v9719_v41, %v9715_v56 }
 0xd2a   :  { %11066 = vst [vmem:[#allocation65_spill] sm:$0xff] %v9721_v50 }
 0xd2b   :  { %4496 = vadd.xlane.f32.xlu1 %v4495_v27 }
 0xd2c   :  { %v9725_v17 = vpop.eup %6124 }
 0xd2d   :  { %4241 = vmax.xlane.f32.xlu0 %v4240_v15  ;;  %11067 = vst [vmem:[#allocation42_spill] sm:$0xff] %v9725_v17  ;;  %v9727_v21 = vpop.eup %6126  ;;  %v4477_v27 = vadd.f32 %v9725_v17, %v9721_v50 }
 0xd2e   :  { %v9731_v44 = vpop.eup %6128 }
 0xd2f   :  { %4232 = vmax.xlane.f32.xlu1 %v4231_v51  ;;  %v9733_v39 = vpop.eup %6130  ;;  %v4486_v15 = vadd.f32 %v9731_v44, %v9727_v21 }
 0xd30   :  { %11068 = vst [vmem:[#allocation24_spill] sm:$0xff] %v9733_v39  ;;  %v9737_v13 = vpop.eup %6132 }
 0xd31   :  { %4499 = vadd.xlane.f32.xlu0 %v4498_v22  ;;  %11069 = vst [vmem:[#allocation72_spill] sm:$0xff] %v9737_v13  ;;  %v9739_v37 = vpop.eup %6134  ;;  %v4471_v9 = vadd.f32 %v9737_v13, %v9733_v39  ;;  %v11073_v13 = vld [vmem:[#allocation63_spill] sm:$0xff] }
 0xd32   :  { %11070 = vst [vmem:[#allocation81_spill] sm:$0xff] %v9739_v37  ;;  %v9743_v60 = vpop.eup %6136 }
 0xd33   :  { %4490 = vadd.xlane.f32.xlu1 %v4489_v23  ;;  %v9749_v22 = vpop.eup %6138  ;;  %v4480_v23 = vadd.f32 %v9743_v60, %v9739_v37 }
 0xd34   :  { %11072 = vst [vmem:[#allocation80_spill] sm:$0xff] %v9749_v22 }
 0xd35   :  { %4235 = vmax.xlane.f32.xlu0 %v4234_v45  ;;  %v9753_v45 = vpop.eup %6140 }
 0xd37   :  { %4484 = vadd.xlane.f32.xlu1 %v4483_v42 }
 0xd39   :  { %4493 = vadd.xlane.f32.xlu0 %v4492_v2 }
 0xd3b   :  { %4478 = vadd.xlane.f32.xlu1 %v4477_v27 }
 0xd3d   :  { %4487 = vadd.xlane.f32.xlu0 %v4486_v15  ;;  %v4275_v28 = vpop.xlane.xlu1 %4274 }
 0xd3e   :  { %v4339_v51 = vsub.f32 %v9587_v57, %v4275_v28  ;;  %v4340_v0 = vsub.f32 %v11071_v54, %v4275_v28  ;;  %v4474_v54 = vadd.f32 %v9753_v45, %v9749_v22 }
 0xd3f   :  { %4472 = vadd.xlane.f32.xlu1 %v4471_v9 }
 0xd40   :  { %v4463_v42 = vmul.f32 1.442695, %v4339_v51  ;;  %v4465_v2 = vmul.f32 1.442695, %v4340_v0 }
 0xd41   :  { %4481 = vadd.xlane.f32.xlu0 %v4480_v23  ;;  %v4269_v27 = vpop.xlane.xlu1 %4268  ;;  %v4278_v15 = vpop.xlane.xlu0 %4277 }
 0xd42   :  { %6142 = vpow2.f32 %v4463_v42  ;;  %v4335_v39 = vsub.f32 %v9579_v47, %v4269_v27  ;;  %v4336_v57 = vsub.f32 %v11073_v13, %v4269_v27  ;;  %v4341_v28 = vsub.f32 %v9593_v34, %v4278_v15  ;;  %v11074_v42 = vld [vmem:[#allocation75_spill] sm:$0xff] }
 0xd43   :  { %6144 = vpow2.f32 %v4465_v2  ;;  %v4342_v9 = vsub.f32 %v9597_v19, %v4278_v15  ;;  %v11076_v27 = vld [vmem:[#allocation79_spill] sm:$0xff]  ;;  %v11077_v2 = vld [vmem:[#allocation70_spill] sm:$0xff] }
 0xd44   :  { %v4455_v50 = vmul.f32 1.442695, %v4335_v39  ;;  %v4457_v37 = vmul.f32 1.442695, %v4336_v57  ;;  %v4467_v51 = vmul.f32 1.442695, %v4341_v28 }
 0xd45   :  { %v4469_v0 = vmul.f32 1.442695, %v4342_v9  ;;  %4475 = vadd.xlane.f32.xlu0 %v4474_v54  ;;  %v4263_v23 = vpop.xlane.xlu1 %4262  ;;  %v4272_v17 = vpop.xlane.xlu0 %4271  ;;  %v11078_v54 = vld [vmem:[#allocation66_spill] sm:$0xff] }
 0xd46   :  { %6146 = vpow2.f32 %v4455_v50  ;;  %v4331_v47 = vsub.f32 %v11074_v42, %v4263_v23  ;;  %v4332_v13 = vsub.f32 %v11075_v58, %v4263_v23  ;;  %v4337_v34 = vsub.f32 %v11076_v27, %v4272_v17  ;;  %v11079_v23 = vld [vmem:[#allocation68_spill] sm:$0xff] }
 0xd47   :  { %6148 = vpow2.f32 %v4457_v37  ;;  %v4338_v19 = vsub.f32 %v11077_v2, %v4272_v17  ;;  %v11080_v27 = vld [vmem:[#allocation40_spill] sm:$0xff]  ;;  %v11081_v2 = vld [vmem:[#allocation74_spill] sm:$0xff] }
 0xd48   :  { %6150 = vpow2.f32 %v4467_v51  ;;  %v4447_v15 = vmul.f32 1.442695, %v4331_v47  ;;  %v4449_v22 = vmul.f32 1.442695, %v4332_v13  ;;  %v4459_v39 = vmul.f32 1.442695, %v4337_v34 }
 0xd49   :  { %6152 = vpow2.f32 %v4469_v0  ;;  %v4461_v57 = vmul.f32 1.442695, %v4338_v19  ;;  %v4257_v28 = vpop.xlane.xlu1 %4256  ;;  %v4266_v9 = vpop.xlane.xlu0 %4265 }
 0xd4a   :  { %6154 = vpow2.f32 %v4447_v15  ;;  %v4327_v50 = vsub.f32 %v9563_v61, %v4257_v28  ;;  %v4328_v42 = vsub.f32 %v11078_v54, %v4257_v28  ;;  %v4333_v58 = vsub.f32 %v9575_v40, %v4266_v9 }
 0xd4b   :  { %6156 = vpow2.f32 %v4449_v22  ;;  %v4334_v37 = vsub.f32 %v11079_v23, %v4266_v9 }
 0xd4c   :  { %6158 = vpow2.f32 %v4459_v39  ;;  %v4439_v17 = vmul.f32 1.442695, %v4327_v50  ;;  %v4441_v51 = vmul.f32 1.442695, %v4328_v42  ;;  %v4451_v47 = vmul.f32 1.442695, %v4333_v58 }
 0xd4d   :  { %6160 = vpow2.f32 %v4461_v57  ;;  %v4453_v13 = vmul.f32 1.442695, %v4334_v37  ;;  %v4260_v0 = vpop.xlane.xlu0 %4259 }
 0xd4e   :  { %6162 = vpow2.f32 %v4439_v17  ;;  %v4329_v34 = vsub.f32 %v11080_v27, %v4260_v0  ;;  %v4330_v19 = vsub.f32 %v11081_v2, %v4260_v0 }
 0xd4f   :  { %v9771_v61 = vpop.eup %6142  ;;  %6164 = vpow2.f32 %v4441_v51 }
 0xd50   :  { %v9773_v15 = vpop.eup %6144  ;;  %6166 = vpow2.f32 %v4451_v47  ;;  %v4443_v40 = vmul.f32 1.442695, %v4329_v34  ;;  %v4445_v22 = vmul.f32 1.442695, %v4330_v19 }
 0xd51   :  { %6168 = vpow2.f32 %v4453_v13  ;;  %v4561_v39 = vadd.f32 %v9773_v15, %v9771_v61 }
 0xd52   :  { %6170 = vpow2.f32 %v4443_v40 }
 0xd53   :  { %v9777_v57 = vpop.eup %6146  ;;  %6172 = vpow2.f32 %v4445_v22  ;;  %4562 = vadd.xlane.f32.xlu1 %v4561_v39 }
 0xd54   :  { %v9779_v28 = vpop.eup %6148 }
 0xd55   :  { %v9781_v9 = vpop.eup %6150  ;;  %v4555_v50 = vadd.f32 %v9779_v28, %v9777_v57 }
 0xd56   :  { %v9785_v54 = vpop.eup %6152 }
 0xd57   :  { %v9787_v42 = vpop.eup %6154  ;;  %4556 = vadd.xlane.f32.xlu1 %v4555_v50  ;;  %v4564_v58 = vadd.f32 %v9785_v54, %v9781_v9 }
 0xd58   :  { %11082 = vst [vmem:[#allocation63_spill] sm:$0xff] %v9787_v42  ;;  %v9791_v23 = vpop.eup %6156 }
 0xd59   :  { %11083 = vst [vmem:[#allocation75_spill] sm:$0xff] %v9791_v23  ;;  %v9793_v37 = vpop.eup %6158  ;;  %4565 = vadd.xlane.f32.xlu0 %v4564_v58  ;;  %v4549_v17 = vadd.f32 %v9791_v23, %v9787_v42 }
 0xd5a   :  { %v9797_v51 = vpop.eup %6160 }
 0xd5b   :  { %v9799_v47 = vpop.eup %6162  ;;  %4550 = vadd.xlane.f32.xlu1 %v4549_v17  ;;  %v4558_v13 = vadd.f32 %v9797_v51, %v9793_v37 }
 0xd5c   :  { %11084 = vst [vmem:[#allocation25_spill] sm:$0xff] %v9799_v47  ;;  %v9803_v0 = vpop.eup %6164 }
 0xd5d   :  { %11085 = vst [vmem:[#allocation79_spill] sm:$0xff] %v9803_v0  ;;  %v9805_v27 = vpop.eup %6166  ;;  %4559 = vadd.xlane.f32.xlu0 %v4558_v13  ;;  %v4543_v34 = vadd.f32 %v9803_v0, %v9799_v47 }
 0xd5e   :  { %11086 = vst [vmem:[#allocation70_spill] sm:$0xff] %v9805_v27  ;;  %v9809_v2 = vpop.eup %6168 }
 0xd5f   :  { %v9811_v19 = vpop.eup %6170  ;;  %4544 = vadd.xlane.f32.xlu1 %v4543_v34  ;;  %v4552_v40 = vadd.f32 %v9809_v2, %v9805_v27 }
 0xd60   :  { %11087 = vst [vmem:[#allocation66_spill] sm:$0xff] %v9811_v19  ;;  %v9815_v22 = vpop.eup %6172 }
 0xd61   :  { %11088 = vst [vmem:[#allocation68_spill] sm:$0xff] %v9815_v22  ;;  %4553 = vadd.xlane.f32.xlu0 %v4552_v40  ;;  %v4546_v39 = vadd.f32 %v9815_v22, %v9811_v19 }
 0xd65   :  { %4547 = vadd.xlane.f32.xlu0 %v4546_v39 }
 0xd9c   :  { %v4515_v50 = vpop.xlane.xlu1 %4514 }
 0xd9d   :  { %6174 = vrcp.f32 %v4515_v50 }
 0xda0   :  { %v4251_v58 = vpop.xlane.xlu1 %4250 }
 0xda1   :  { %v4323_v17 = vsub.f32 %v9553_v62, %v4251_v58  ;;  %v4324_v13 = vsub.f32 %v9555_v1, %v4251_v58 }
 0xda2   :  { %v4518_v47 = vpop.xlane.xlu0 %4517 }
 0xda3   :  { %v4431_v0 = vmul.f32 1.442695, %v4323_v17  ;;  %v4433_v34 = vmul.f32 1.442695, %v4324_v13  ;;  %6176 = vrcp.f32 %v4518_v47 }
 0xda4   :  { %v4509_v42 = vpop.xlane.xlu1 %4508 }
 0xda5   :  { %6178 = vpow2.f32 %v4431_v0 }
 0xda6   :  { %6180 = vpow2.f32 %v4433_v34  ;;  %v4254_v27 = vpop.xlane.xlu0 %4253 }
 0xda7   :  { %v4325_v40 = vsub.f32 %v9559_v59, %v4254_v27  ;;  %v4326_v19 = vsub.f32 %v9561_v16, %v4254_v27  ;;  %6182 = vrcp.f32 %v4509_v42 }
 0xda8   :  { %v4245_v39 = vpop.xlane.xlu1 %4244 }
 0xda9   :  { %v4435_v22 = vmul.f32 1.442695, %v4325_v40  ;;  %v4437_v50 = vmul.f32 1.442695, %v4326_v19  ;;  %v4319_v23 = vsub.f32 %v9537_v7, %v4245_v39  ;;  %v4320_v62 = vsub.f32 %v9539_v20, %v4245_v39 }
 0xdaa   :  { %v4512_v1 = vpop.xlane.xlu0 %4511  ;;  %v6175_v17 = vpop.eup %6174 }
 0xdab   :  { %6184 = vpow2.f32 %v4435_v22  ;;  %v4423_v58 = vmul.f32 1.442695, %v4319_v23  ;;  %v4425_v47 = vmul.f32 1.442695, %v4320_v62  ;;  %v4628_v20 = vmul.f32 %v6175_v17, %v9625_v25 }
 0xdac   :  { %6186 = vpow2.f32 %v4437_v50  ;;  %v4503_v0 = vpop.xlane.xlu1 %4502 }
 0xdad   :  { %6188 = vpow2.f32 %v4423_v58 }
 0xdae   :  { %6190 = vpow2.f32 %v4425_v47  ;;  %v4248_v59 = vpop.xlane.xlu0 %4247 }
 0xdaf   :  { %6192 = vrcp.f32 %v4512_v1  ;;  %v4321_v16 = vsub.f32 %v9545_v55, %v4248_v59  ;;  %v4322_v27 = vsub.f32 %v9547_v11, %v4248_v59  ;;  %v4627_v55 = vmul.f32 %v6175_v17, %v9622_v36 }
 0xdb0   :  { %v6177_v19 = vpop.eup %6176  ;;  %v4239_v7 = vpop.xlane.xlu1 %4238  ;;  %6194 = vrcp.f32 %v4503_v0 }
 0xdb1   :  { %v4427_v42 = vmul.f32 1.442695, %v4321_v16  ;;  %v4429_v13 = vmul.f32 1.442695, %v4322_v27  ;;  %v4315_v23 = vsub.f32 %v9521_v46, %v4239_v7  ;;  %v4316_v22 = vsub.f32 %v9523_v8, %v4239_v7 }
 0xdb2   :  { %v9830_v34 = vpop.eup %6178  ;;  %v4506_v40 = vpop.xlane.xlu0 %4505  ;;  %v4630_v39 = vmul.f32 %v6177_v19, %v9639_v12  ;;  %v4629_v11 = vmul.f32 %v6177_v19, %v9635_v31 }
 0xdb3   :  { %v9835_v50 = vpop.eup %6180  ;;  %6196 = vpow2.f32 %v4427_v42  ;;  %v4415_v25 = vmul.f32 1.442695, %v4315_v23  ;;  %v4417_v62 = vmul.f32 1.442695, %v4316_v22 }
 0xdb4   :  { %6198 = vpow2.f32 %v4429_v13  ;;  %v4678_v1 = vpack.c.bf16 %v4630_v39, %v4628_v20  ;;  %v4497_v46 = vpop.xlane.xlu1 %4496  ;;  %v4677_v58 = vpack.c.bf16 %v4629_v11, %v4627_v55  ;;  %v4537_v8 = vadd.f32 %v9835_v50, %v9830_v34  ;;  %v6183_v36 = vpop.eup %6182 }
 0xdb5   :  { %6200 = vpow2.f32 %v4415_v25  ;;  %v4623_v55 = vmul.f32 %v6183_v36, %v9631_v24 }
 0xdb6   :  { %6202 = vpow2.f32 %v4417_v62  ;;  %4695 = vmatprep.subr.bf16.mxu1 %v4678_v1  ;;  %v4242_v12 = vpop.xlane.xlu0 %4241  ;;  %4538 = vadd.xlane.f32.xlu1 %v4537_v8 }
 0xdb7   :  { %6204 = vrcp.f32 %v4506_v40  ;;  %4696 = vmatpush1.bf16.xpose.msra.mxu1 %v4677_v58  ;;  %v4317_v31 = vsub.f32 %v9529_v35, %v4242_v12  ;;  %v4318_v47 = vsub.f32 %v9531_v53, %v4242_v12  ;;  %v4624_v40 = vmul.f32 %v6183_v36, %v9633_v43 }
 0xdb8   :  { %v9841_v0 = vpop.eup %6184  ;;  %v4233_v17 = vpop.xlane.xlu1 %4232  ;;  %6206 = vrcp.f32 %v4497_v46 }
 0xdb9   :  { %v9843_v59 = vpop.eup %6186  ;;  %v4419_v16 = vmul.f32 1.442695, %v4317_v31  ;;  %v4421_v27 = vmul.f32 1.442695, %v4318_v47  ;;  %v4311_v19 = vsub.f32 %v11062_v29, %v4233_v17  ;;  %v4312_v7 = vsub.f32 %v11061_v32, %v4233_v17 }
 0xdba   :  { %v9847_v20 = vpop.eup %6188  ;;  %v4500_v42 = vpop.xlane.xlu0 %4499  ;;  %v4540_v35 = vadd.f32 %v9843_v59, %v9841_v0 }
 0xdbb   :  { %v9851_v13 = vpop.eup %6190  ;;  %6208 = vpow2.f32 %v4419_v16  ;;  %v4407_v53 = vmul.f32 1.442695, %v4311_v19  ;;  %v4409_v23 = vmul.f32 1.442695, %v4312_v7 }
 0xdbc   :  { %v6193_v22 = vpop.eup %6192  ;;  %6210 = vpow2.f32 %v4421_v27  ;;  %4541 = vadd.xlane.f32.xlu0 %v4540_v35  ;;  %v4491_v29 = vpop.xlane.xlu1 %4490  ;;  %v4531_v32 = vadd.f32 %v9851_v13, %v9847_v20 }
 0xdbd   :  { %6212 = vpow2.f32 %v4407_v53  ;;  %v4626_v39 = vmul.f32 %v6193_v22, %v9653_v4  ;;  %v4625_v11 = vmul.f32 %v6193_v22, %v9649_v6  ;;  %v6195_v62 = vpop.eup %6194 }
 0xdbe   :  { %6214 = vpow2.f32 %v4409_v23  ;;  %v4236_v25 = vpop.xlane.xlu0 %4235  ;;  %4532 = vadd.xlane.f32.xlu1 %v4531_v32  ;;  %v4619_v19 = vmul.f32 %v6195_v62, %v9656_v63 }
 0xdbf   :  { %6216 = vrcp.f32 %v4500_v42  ;;  %v4676_v1 = vpack.c.bf16 %v4626_v39, %v4624_v40  ;;  %v4675_v46 = vpack.c.bf16 %v4625_v11, %v4623_v55  ;;  %v4313_v43 = vsub.f32 %v11065_v3, %v4236_v25 }
 0xdc0   :  { %v9860_v58 = vpop.eup %6196  ;;  %v4314_v8 = vsub.f32 %v11064_v18, %v4236_v25  ;;  %v4485_v12 = vpop.xlane.xlu1 %4484  ;;  %6218 = vrcp.f32 %v4491_v29  ;;  %v4620_v18 = vmul.f32 %v6195_v62, %v9661_v30 }
 0xdc1   :  { %v9863_v31 = vpop.eup %6198  ;;  %4697 = vmatprep.subr.bf16.mxu1 %v4676_v1  ;;  %v4411_v24 = vmul.f32 1.442695, %v4313_v43  ;;  %6220 = vrcp.f32 %v4485_v12 }
 0xdc2   :  { %v9865_v6 = vpop.eup %6200  ;;  %4698 = vmatpush1.bf16.xpose.msra.mxu1 %v4675_v46  ;;  %v4413_v4 = vmul.f32 1.442695, %v4314_v8  ;;  %v4494_v36 = vpop.xlane.xlu0 %4493  ;;  %v4534_v47 = vadd.f32 %v9863_v31, %v9860_v58 }
 0xdc3   :  { %v9869_v3 = vpop.eup %6202  ;;  %6222 = vpow2.f32 %v4411_v24 }
 0xdc4   :  { %v6205_v17 = vpop.eup %6204  ;;  %6224 = vpow2.f32 %v4413_v4  ;;  %4535 = vadd.xlane.f32.xlu0 %v4534_v47  ;;  %v4525_v16 = vadd.f32 %v9869_v3, %v9865_v6  ;;  %v4479_v32 = vpop.xlane.xlu1 %4478 }
 0xdc5   :  { %6226 = vrcp.f32 %v4494_v36  ;;  %v4622_v27 = vmul.f32 %v6205_v17, %v9677_v33  ;;  %v4621_v7 = vmul.f32 %v6205_v17, %v9672_v38  ;;  %v6207_v35 = vpop.eup %6206 }
 0xdc6   :  { %v4488_v42 = vpop.xlane.xlu0 %4487  ;;  %4526 = vadd.xlane.f32.xlu1 %v4525_v16  ;;  %v4616_v39 = vmul.f32 %v6207_v35, %v9685_v49  ;;  %v4615_v25 = vmul.f32 %v6207_v35, %v9680_v5 }
 0xdc7   :  { %v4674_v53 = vpack.c.bf16 %v4622_v27, %v4620_v18  ;;  %v4673_v23 = vpack.c.bf16 %v4621_v7, %v4619_v19  ;;  %6228 = vrcp.f32 %v4488_v42 }
 0xdc8   :  { %v9877_v22 = vpop.eup %6208  ;;  %v4473_v17 = vpop.xlane.xlu1 %4472 }
 0xdc9   :  { %v9879_v40 = vpop.eup %6210  ;;  %4699 = vmatprep.subr.bf16.mxu1 %v4674_v53  ;;  %v11089_v53 = vld [vmem:[#allocation67_spill] sm:$0xff] }
 0xdca   :  { %v9881_v30 = vpop.eup %6212  ;;  %4700 = vmatpush1.bf16.xpose.msra.mxu1 %v4673_v23  ;;  %v4482_v29 = vpop.xlane.xlu0 %4481  ;;  %v4528_v63 = vadd.f32 %v9879_v40, %v9877_v22  ;;  %v11090_v23 = vld [vmem:[#allocation77_spill] sm:$0xff] }
 0xdcb   :  { %v9885_v33 = vpop.eup %6214  ;;  %6230 = vrcp.f32 %v4482_v29 }
 0xdcc   :  { %v6217_v38 = vpop.eup %6216  ;;  %4529 = vadd.xlane.f32.xlu0 %v4528_v63  ;;  %v4519_v55 = vadd.f32 %v9885_v33, %v9881_v30  ;;  %6232 = vrcp.f32 %v4479_v32 }
 0xdcd   :  { %v4618_v11 = vmul.f32 %v6217_v38, %v9699_v26  ;;  %v4617_v62 = vmul.f32 %v6217_v38, %v9694_v10  ;;  %v6219_v1 = vpop.eup %6218 }
 0xdce   :  { %4520 = vadd.xlane.f32.xlu1 %v4519_v55  ;;  %v6221_v46 = vpop.eup %6220  ;;  %v4476_v4 = vpop.xlane.xlu0 %4475  ;;  %v4612_v5 = vmul.f32 %v6219_v1, %v9705_v52  ;;  %v4611_v18 = vmul.f32 %v6219_v1, %v9701_v48  ;;  %v9908_v48 = vadd.f32 %v11090_v23, %v11089_v53  ;;  %v11094_v55 = vld [vmem:[#allocation71_spill] sm:$0xff] }
 0xdcf   :  { %v4672_v43 = vpack.c.bf16 %v4618_v11, %v4616_v39  ;;  %v4671_v8 = vpack.c.bf16 %v4617_v62, %v4615_v25  ;;  %6234 = vrcp.f32 %v4476_v4  ;;  %v4608_v27 = vmul.f32 %v6221_v46, %v9713_v14  ;;  %v11091_v14 = vld [vmem:[#allocation64_spill] sm:$0xff]  ;;  %v11093_v39 = vld [vmem:[#allocation78_spill] sm:$0xff] }
 0xdd0   :  { %v9893_v12 = vpop.eup %6222  ;;  %6236 = vrcp.f32 %v4473_v17  ;;  %v4607_v63 = vmul.f32 %v6221_v46, %v11091_v14  ;;  %v9917_v11 = vadd.f32 %v11094_v55, %v11093_v39  ;;  %v11095_v46 = vld [vmem:[#allocation81_spill] sm:$0xff]  ;;  %v11100_v55 = vld [vmem:[#allocation75_spill] sm:$0xff] }
 0xdd1   :  { %v9895_v24 = vpop.eup %6224  ;;  %4701 = vmatprep.subr.bf16.mxu1 %v4672_v43 }
 0xdd2   :  { %v6227_v49 = vpop.eup %6226  ;;  %4702 = vmatpush1.bf16.xpose.msra.mxu1 %v4671_v8  ;;  %v4522_v26 = vadd.f32 %v9895_v24, %v9893_v12 }
 0xdd3   :  { %v4614_v10 = vmul.f32 %v6227_v49, %v9719_v41  ;;  %v4613_v36 = vmul.f32 %v6227_v49, %v9715_v56  ;;  %v11096_v49 = vld [vmem:[#allocation65_spill] sm:$0xff] }
 0xdd4   :  { %v6229_v47 = vpop.eup %6228  ;;  %4523 = vadd.xlane.f32.xlu0 %v4522_v26 }
 0xdd5   :  { %v4670_v16 = vpack.c.bf16 %v4614_v10, %v4612_v5  ;;  %v4610_v19 = vmul.f32 %v6229_v47, %v9731_v44  ;;  %v4669_v7 = vpack.c.bf16 %v4613_v36, %v4611_v18  ;;  %v4609_v35 = vmul.f32 %v6229_v47, %v9727_v21  ;;  %v11092_v44 = vld [vmem:[#allocation42_spill] sm:$0xff]  ;;  %v11097_v5 = vld [vmem:[#allocation72_spill] sm:$0xff] }
 0xdd6   :  { %v11098_v18 = vld [vmem:[#allocation80_spill] sm:$0xff] }
 0xdd7   :  { %4703 = vmatprep.subr.bf16.mxu1 %v4670_v16  ;;  %v4668_v42 = vpack.c.bf16 %v4610_v19, %v4608_v27  ;;  %v4667_v32 = vpack.c.bf16 %v4609_v35, %v4607_v63  ;;  %v11099_v19 = vld [vmem:[#allocation24_spill] sm:$0xff] }
 0xdd8   :  { %v6231_v52 = vpop.eup %6230 }
 0xdd9   :  { %v6233_v41 = vpop.eup %6232  ;;  %v4606_v29 = vmul.f32 %v6231_v52, %v9743_v60  ;;  %v4605_v43 = vmul.f32 %v6231_v52, %v11095_v46  ;;  %v11101_v46 = vld [vmem:[#allocation70_spill] sm:$0xff] }
 0xdda   :  { %4704 = vmatpush1.bf16.xpose.msra.mxu1 %v4669_v7  ;;  %v4604_v38 = vmul.f32 %v6233_v41, %v11092_v44  ;;  %v4603_v4 = vmul.f32 %v6233_v41, %v11096_v49 }
 0xddb   :  { %4705 = vmatprep.subr.bf16.mxu1 %v4668_v42 }
 0xddc   :  { %v4563_v56 = vpop.xlane.xlu1 %4562  ;;  %v4666_v21 = vpack.c.bf16 %v4606_v29, %v4604_v38  ;;  %v6235_v25 = vpop.eup %6234  ;;  %v4665_v36 = vpack.c.bf16 %v4605_v43, %v4603_v4 }
 0xddd   :  { %6238 = vrcp.f32 %v4563_v56  ;;  %v6237_v60 = vpop.eup %6236  ;;  %v4602_v8 = vmul.f32 %v6235_v25, %v9753_v45  ;;  %v4601_v16 = vmul.f32 %v6235_v25, %v11098_v18 }
 0xdde   :  { %v4600_v10 = vmul.f32 %v6237_v60, %v11097_v5  ;;  %v4599_v7 = vmul.f32 %v6237_v60, %v11099_v19 }
 0xddf   :  { %4849 = vrot.lane.b32.xlu1 %v9908_v48, %s6289_s24 }
 0xde0   :  { %v4557_v62 = vpop.xlane.xlu1 %4556  ;;  %v4664_v47 = vpack.c.bf16 %v4602_v8, %v4600_v10  ;;  %v4663_v52 = vpack.c.bf16 %v4601_v16, %v4599_v7  ;;  %v11102_v8 = vld [vmem:[#allocation68_spill] sm:$0xff] }
 0xde2   :  { %4706 = vmatpush1.bf16.xpose.msra.mxu1 %v4667_v32  ;;  %v4566_v1 = vpop.xlane.xlu0 %4565 }
 0xde3   :  { %4707 = vmatprep.subr.bf16.mxu1 %v4666_v21  ;;  %6240 = vrcp.f32 %v4566_v1  ;;  %4819 = vrot.lane.b32.xlu1 %v9917_v11, %s6287_s18 }
 0xde4   :  { %6242 = vrcp.f32 %v4557_v62  ;;  %v4551_v45 = vpop.xlane.xlu1 %4550 }
 0xde6   :  { %v4560_v26 = vpop.xlane.xlu0 %4559 }
 0xde7   :  { %6244 = vrcp.f32 %v4560_v26  ;;  %4835 = vrot.lane.b32.xlu1 %v9917_v11, %s6286_s30 }
 0xde8   :  { %v4545_v63 = vpop.xlane.xlu1 %4544 }
 0xdea   :  { %4708 = vmatpush1.bf16.xpose.msra.mxu1 %v4665_v36  ;;  %4851 = vrot.lane.b32.xlu0 %v9917_v11, %s6289_s24  ;;  %v4554_v17 = vpop.xlane.xlu0 %4553  ;;  %v6239_v27 = vpop.eup %6238 }
 0xdeb   :  { %4709 = vmatprep.subr.bf16.mxu1 %v4664_v47  ;;  %4817 = vrot.lane.b32.xlu1 %v9908_v48, %s6287_s18  ;;  %6246 = vrcp.f32 %v4554_v17  ;;  %v4660_v41 = vmul.f32 %v6239_v27, %v9773_v15  ;;  %v4659_v44 = vmul.f32 %v6239_v27, %v9771_v61  ;;  %v11106_v47 = vld [vmem:[#allocation25_spill] sm:$0xff] }
 0xdec   :  { %6248 = vrcp.f32 %v4551_v45 }
 0xdee   :  { %4833 = vrot.lane.b32.xlu0 %v9908_v48, %s6286_s30  ;;  %v4548_v53 = vpop.xlane.xlu0 %4547 }
 0xdef   :  { %4803 = vrot.lane.b32.xlu1 %v9917_v11, %s6288_s21  ;;  %6250 = vrcp.f32 %v4548_v53 }
 0xdf0   :  { %v6241_v42 = vpop.eup %6240  ;;  %6252 = vrcp.f32 %v4545_v63 }
 0xdf1   :  { %v4662_v56 = vmul.f32 %v6241_v42, %v9785_v54  ;;  %v6243_v35 = vpop.eup %6242  ;;  %v4661_v23 = vmul.f32 %v6241_v42, %v9781_v9 }
 0xdf2   :  { %4710 = vmatpush1.bf16.xpose.msra.mxu1 %v4663_v52  ;;  %4769 = vrot.lane.b32.xlu0 %v9908_v48, %s6283_s26  ;;  %v4656_v15 = vmul.f32 %v6243_v35, %v9779_v28  ;;  %v4655_v39 = vmul.f32 %v6243_v35, %v9777_v57  ;;  %v11105_v57 = vld [vmem:[#allocation66_spill] sm:$0xff] }
 0xdf3   :  { %4801 = vrot.lane.b32.xlu1 %v9908_v48, %s6288_s21  ;;  %v4694_v29 = vpack.c.bf16 %v4662_v56, %v4660_v41  ;;  %v4693_v38 = vpack.c.bf16 %v4661_v23, %v4659_v44 }
 0xdf4   :  { %v6245_v14 = vpop.eup %6244 }
 0xdf5   :  { %4711 = vmatprep.subr.bf16.mxu1 %v4694_v29  ;;  %v4658_v54 = vmul.f32 %v6245_v14, %v9797_v51  ;;  %v4657_v28 = vmul.f32 %v6245_v14, %v9793_v37  ;;  %v11103_v37 = vld [vmem:[#allocation63_spill] sm:$0xff] }
 0xdf6   :  { %4785 = vrot.lane.b32.xlu0 %v9908_v48, %s6282_s28 }
 0xdf7   :  { %4771 = vrot.lane.b32.xlu1 %v9917_v11, %s6283_s26  ;;  %v4692_v9 = vpack.c.bf16 %v4658_v54, %v4656_v15  ;;  %v4691_v25 = vpack.c.bf16 %v4657_v28, %v4655_v39 }
 0xdf8   :  { %v6247_v32 = vpop.eup %6246 }
 0xdf9   :  { %v6249_v61 = vpop.eup %6248  ;;  %v4654_v51 = vmul.f32 %v6247_v32, %v9809_v2  ;;  %v4653_v43 = vmul.f32 %v6247_v32, %v11101_v46  ;;  %v11104_v2 = vld [vmem:[#allocation79_spill] sm:$0xff] }
 0xdfa   :  { %4712 = vmatpush2.bf16.xpose.msra.mxu1 %v4693_v38  ;;  %4737 = vrot.lane.b32.xlu0 %v9908_v48, %s6285_s29  ;;  %v4652_v21 = vmul.f32 %v6249_v61, %v11100_v55  ;;  %v4651_v4 = vmul.f32 %v6249_v61, %v11103_v37 }
 0xdfb   :  { %4713 = vmatprep.subr.bf16.mxu1 %v4692_v9 }
 0xdfc   :  { %v4690_v62 = vpack.c.bf16 %v4654_v51, %v4652_v21  ;;  %v6251_v1 = vpop.eup %6250  ;;  %v4689_v5 = vpack.c.bf16 %v4653_v43, %v4651_v4  ;;  %v11109_v43 = vld [vmem:[#allocation76_spill] sm:$0xff] }
 0xdfd   :  { %v6253_v60 = vpop.eup %6252  ;;  %v4650_v49 = vmul.f32 %v6251_v1, %v11102_v8  ;;  %v4649_v36 = vmul.f32 %v6251_v1, %v11105_v57 }
 0xdfe   :  { %4753 = vrot.lane.b32.xlu0 %v9908_v48, %s6284_s27  ;;  %v4648_v26 = vmul.f32 %v6253_v60, %v11104_v2  ;;  %v4647_v17 = vmul.f32 %v6253_v60, %v11106_v47  ;;  %v11108_v60 = vmov 0  }
 0xe00   :  { %v4688_v10 = vpack.c.bf16 %v4650_v49, %v4648_v26  ;;  %v4687_v45 = vpack.c.bf16 %v4649_v36, %v4647_v17 }
 0xe02   :  { %4714 = vmatpush2.bf16.xpose.msra.mxu1 %v4691_v25 }
 0xe03   :  { %4715 = vmatprep.subr.bf16.mxu1 %v4690_v62 }
 0xe0a   :  { %4716 = vmatpush2.bf16.xpose.msra.mxu1 %v4689_v5 }
 0xe0b   :  { %4717 = vmatprep.subr.bf16.mxu1 %v4688_v10 }
 0xe12   :  { %4718 = vmatpush2.bf16.xpose.msra.mxu1 %v4687_v45 }
 0xe3f   :  { %v4539_v18 = vpop.xlane.xlu1 %4538 }
 0xe40   :  { %6254 = vrcp.f32 %v4539_v18  ;;  %v43_v18 = vld [vmem:[%s10497_s2] sm:$0xf] }
 0xe45   :  { %v4542_v16 = vpop.xlane.xlu0 %4541 }
 0xe46   :  { %6256 = vrcp.f32 %v4542_v16 }
 0xe47   :  { %v4533_v27 = vpop.xlane.xlu1 %4532 }
 0xe48   :  { %6258 = vrcp.f32 %v4533_v27 }
 0xe4d   :  { %v4536_v19 = vpop.xlane.xlu0 %4535  ;;  %v6255_v7 = vpop.eup %6254 }
 0xe4e   :  { %6260 = vrcp.f32 %v4536_v19  ;;  %v4644_v41 = vmul.f32 %v6255_v7, %v9835_v50  ;;  %v4643_v35 = vmul.f32 %v6255_v7, %v9830_v34  ;;  %v11112_v7 = vld [vmem:[#allocation45_spill] sm:$0xff] }
 0xe4f   :  { %v4527_v42 = vpop.xlane.xlu1 %4526 }
 0xe50   :  { %6262 = vrcp.f32 %v4527_v42 }
 0xe53   :  { %v6257_v52 = vpop.eup %6256 }
 0xe54   :  { %v4646_v56 = vmul.f32 %v6257_v52, %v9843_v59  ;;  %v4645_v53 = vmul.f32 %v6257_v52, %v9841_v0 }
 0xe55   :  { %v4530_v23 = vpop.xlane.xlu0 %4529  ;;  %v6259_v63 = vpop.eup %6258 }
 0xe56   :  { %6264 = vrcp.f32 %v4530_v23  ;;  %v4686_v29 = vpack.c.bf16 %v4646_v56, %v4644_v41  ;;  %v4685_v14 = vpack.c.bf16 %v4645_v53, %v4643_v35  ;;  %v4640_v54 = vmul.f32 %v6259_v63, %v9851_v13  ;;  %v11113_v23 = vld [vmem:[#allocation44_spill] sm:$0xff] }
 0xe57   :  { %v4521_v44 = vpop.xlane.xlu1 %4520  ;;  %v4639_v59 = vmul.f32 %v6259_v63, %v9847_v20 }
 0xe58   :  { %4719 = vmatprep.subr.bf16.mxu1 %v4686_v29  ;;  %6266 = vrcp.f32 %v4521_v44 }
 0xe59   :  { %4720 = vmatpush2.bf16.xpose.msra.mxu1 %v4685_v14 }
 0xe5b   :  { %v6261_v15 = vpop.eup %6260  ;;  %v10028_v37 = vpop.permute.xlu1 %4849 }
 0xe5c   :  { %v4642_v50 = vmul.f32 %v6261_v15, %v9863_v31  ;;  %v4641_v34 = vmul.f32 %v6261_v15, %v9860_v58 }
 0xe5d   :  { %v4524_v38 = vpop.xlane.xlu0 %4523  ;;  %v6263_v32 = vpop.eup %6262 }
 0xe5e   :  { %6268 = vrcp.f32 %v4524_v38  ;;  %v4684_v0 = vpack.c.bf16 %v4642_v50, %v4640_v54  ;;  %v4683_v9 = vpack.c.bf16 %v4641_v34, %v4639_v59  ;;  %v4636_v28 = vmul.f32 %v6263_v32, %v9869_v3  ;;  %v11114_v50 = vld [vmem:[#allocation31_spill] sm:$0xff] }
 0xe5f   :  { %v4635_v13 = vmul.f32 %v6263_v32, %v9865_v6  ;;  %v11107_v6 = vld [vmem:[#allocation69_spill] sm:$0xff]  ;;  %v4820_v4 = vpop.permute.xlu1 %4819  ;;  %v11116_v32 = vld [vmem:[#allocation19_spill] sm:$0xff] }
 0xe60   :  { %4721 = vmatprep.subr.bf16.mxu1 %v4684_v0  ;;  %v11115_v0 = vld [vmem:[#allocation28_spill] sm:$0xff] }
 0xe61   :  { %4722 = vmatpush2.bf16.xpose.msra.mxu1 %v4683_v9  ;;  %v4852_v2 = vpop.permute.xlu0 %4851 }
 0xe62   :  { %v4859_v16 = vsel %vm716_vm7, %v10028_v37, %v4852_v2 }
 0xe63   :  { %v6265_v61 = vpop.eup %6264  ;;  %v4836_v26 = vpop.permute.xlu1 %4835  ;;  %v4861_v42 = vmul.f32 %v4859_v16, %v11112_v7 }
 0xe64   :  { %v4638_v51 = vmul.f32 %v6265_v61, %v9879_v40  ;;  %v4637_v31 = vmul.f32 %v6265_v61, %v9877_v22  ;;  %v3070_v22 = vpack.c.bf16 %v11107_v6, %v11107_v6  ;;  %v11120_v6 = vld [vmem:[#allocation38_spill] sm:$0xff] }
 0xe65   :  { %v6267_v58 = vpop.eup %6266  ;;  %v10030_v5 = vpop.permute.xlu0 %4833  ;;  %v4881_v35 = vpack.c.bf16 %v4861_v42, %v4861_v42 }
 0xe66   :  { %v4682_v39 = vpack.c.bf16 %v4638_v51, %v4636_v28  ;;  %v4681_v20 = vpack.c.bf16 %v4637_v31, %v4635_v13  ;;  %v4632_v21 = vmul.f32 %v6267_v58, %v9885_v33  ;;  %v4631_v62 = vmul.f32 %v6267_v58, %v9881_v30  ;;  %v11117_v51 = vld [vmem:[#allocation22_spill] sm:$0xff] }
 0xe67   :  { %v10032_v10 = vpop.permute.xlu1 %4817  ;;  %v4843_v63 = vsel %vm651_vm4, %v10030_v5, %v4836_v26  ;;  %v4890_v28 = vsel %vm1151_vm9, %v4881_v35, 0  ;;  %v11123_v35 = vld [vmem:[#allocation8_spill] sm:$0xff] }
 0xe68   :  { %4723 = vmatprep.subr.bf16.mxu1 %v4682_v39  ;;  %v4827_v53 = vsel %vm586_vm5, %v10032_v10, %v4820_v4  ;;  %v4845_v13 = vmul.f32 %v4843_v63, %v11117_v51  ;;  %v11125_v63 = vld [vmem:[#allocation11_spill] sm:$0xff] }
 0xe69   :  { %4724 = vmatpush2.bf16.xpose.msra.mxu1 %v4681_v20  ;;  %v4770_v57 = vpop.permute.xlu0 %4769  ;;  %v4829_v59 = vmul.f32 %v4827_v53, %v11114_v50 }
 0xe6b   :  { %v6269_v55 = vpop.eup %6268  ;;  %v4804_v36 = vpop.permute.xlu1 %4803 }
 0xe6c   :  { %v4634_v25 = vmul.f32 %v6269_v55, %v9895_v24  ;;  %v4633_v3 = vmul.f32 %v6269_v55, %v9893_v12  ;;  %v11110_v24 = vld [vmem:[#allocation73_spill] sm:$0xff]  ;;  %v4877_v55 = vpack.c.bf16 %v4845_v13, %v4829_v59 }
 0xe6d   :  { %v4786_v47 = vpop.permute.xlu0 %4785  ;;  %v11126_v13 = vld [vmem:[#allocation13_spill] sm:$0xff] }
 0xe6e   :  { %v4680_v1 = vpack.c.bf16 %v4634_v25, %v4632_v21  ;;  %v4679_v40 = vpack.c.bf16 %v4633_v3, %v4631_v62  ;;  %v11118_v21 = vld [vmem:[#allocation41_spill] sm:$0xff] }
 0xe6f   :  { %v10034_v17 = vpop.permute.xlu1 %4801 }
 0xe70   :  { %4725 = vmatprep.subr.bf16.mxu1 %v4680_v1  ;;  %v4811_v38 = vsel %vm521_vm6, %v10034_v17, %v4804_v36  ;;  %v11119_v1 = vld [vmem:[#allocation4_spill] sm:$0xff] }
 0xe71   :  { %4726 = vmatpush2.bf16.xpose.msra.mxu1 %v4679_v40  ;;  %v4738_v45 = vpop.permute.xlu0 %4737  ;;  %v4813_v25 = vmul.f32 %v4811_v38, %v11118_v21 }
 0xe73   :  { %v10039_v27 = vpop.permute.xlu1 %4771 }
 0xe74   :  { %v4779_v62 = vsel %vm391_vm1, %v4770_v57, %v10039_v27 }
 0xe75   :  { %v4754_v19 = vpop.permute.xlu0 %4753 }
 0xe78   :  { %4728 = vmatmul.mubr.bf16.vlgmr.msra.gmra.mxu1 %v3070_v22 }
 0xe79   :  { %4933 = vmatprep.mubr.bf16.mxu1 %v11108_v60 }
 0xf38   :  { %v4729_v46 = vpop.f32.mrf.mxu1 }
 0xf39   :  { %v9985_v8 = vadd.f32 %v4729_v46, %v11109_v43  ;;  %v11121_v46 = vld [vmem:[#allocation7_spill] sm:$0xff] }
 0xf3a   :  { %v4731_v33 = vpop.f32.mrf.mxu1  ;;  %v4782_v43 = vmul.f32 %v4779_v62, %v11121_v46  ;;  %v11129_v62 = vld [vmem:[#allocation20_spill] sm:$0xff] }
 0xf3b   :  { %4821 = vrot.lane.b32.xlu0 %v9985_v8, %s6287_s18  ;;  %4853 = vrot.lane.b32.xlu1 %v9985_v8, %s6289_s24  ;;  %v10000_v49 = vadd.f32 %v4731_v33, %v11110_v24  ;;  %v4873_v24 = vpack.c.bf16 %v4813_v25, %v9908_v48  ;;  %v11128_v25 = vld [vmem:[#allocation21_spill] sm:$0xff] }
 0xf3c   :  { %v4733_v30 = vpop.f32.mrf.mxu1 }
 0xf3e   :  { %v4734_v12 = vpop.f32.mrf.mxu1 }
 0xf3f   :  { %4837 = vrot.lane.b32.xlu0 %v9985_v8, %s6286_s30  ;;  %4787 = vrot.lane.b32.xlu1 %v9917_v11, %s6282_s28 }
 0xf43   :  { %4805 = vrot.lane.b32.xlu0 %v9985_v8, %s6288_s21  ;;  %4739 = vrot.lane.b32.xlu1 %v9917_v11, %s6285_s29 }
 0xf47   :  { %4775 = vrot.lane.b32.xlu0 %v10000_v49, %s6283_s26  ;;  %4755 = vrot.lane.b32.xlu1 %v9917_v11, %s6284_s27 }
 0xf4b   :  { %4743 = vrot.lane.b32.xlu0 %v10000_v49, %s6285_s29  ;;  %4791 = vrot.lane.b32.xlu1 %v10000_v49, %s6282_s28 }
 0xf4f   :  { %4855 = vrot.lane.b32.xlu0 %v10000_v49, %s6289_s24  ;;  %4759 = vrot.lane.b32.xlu1 %v10000_v49, %s6284_s27 }
 0xf53   :  { %4839 = vrot.lane.b32.xlu0 %v10000_v49, %s6286_s30  ;;  %4823 = vrot.lane.b32.xlu1 %v10000_v49, %s6287_s18 }
 0xf57   :  { %4773 = vrot.lane.b32.xlu0 %v9985_v8, %s6283_s26  ;;  %4807 = vrot.lane.b32.xlu1 %v10000_v49, %s6288_s21 }
 0xf5b   :  { %4741 = vrot.lane.b32.xlu0 %v9985_v8, %s6285_s29  ;;  %4789 = vrot.lane.b32.xlu1 %v9985_v8, %s6282_s28 }
 0xf5f   :  { %4757 = vrot.lane.b32.xlu1 %v9985_v8, %s6284_s27 }
 0xfad   :  { %v4854_v52 = vpop.permute.xlu1 %4853  ;;  %v10042_v41 = vpop.permute.xlu0 %4821 }
 0xfae   :  { %v4858_v56 = vsel %vm716_vm7, %v4852_v2, %v4854_v52  ;;  %v4826_v14 = vsel %vm586_vm5, %v4820_v4, %v10042_v41 }
 0xfaf   :  { %v4862_v29 = vmul.f32 %v4858_v56, %v11113_v23  ;;  %v4830_v9 = vmul.f32 %v4826_v14, %v11115_v0 }
 0xfb1   :  { %v4882_v44 = vpack.c.bf16 %v4862_v29, %v4862_v29  ;;  %v10056_v15 = vpop.permute.xlu1 %4787  ;;  %v10058_v54 = vpop.permute.xlu0 %4837  ;;  %v11124_v29 = vld [vmem:[#allocation6_spill] sm:$0xff] }
 0xfb2   :  { %v4842_v34 = vsel %vm651_vm4, %v4836_v26, %v10058_v54  ;;  %v4795_v31 = vsel %vm456_vm0, %v4786_v47, %v10056_v15 }
 0xfb3   :  { %v4846_v61 = vmul.f32 %v4842_v34, %v11116_v32  ;;  %5466 = vmatprep.subr.msk.bf16.mxu1 %vm1151_vm9, %v4882_v44  ;;  %v4798_v40 = vmul.f32 %v4795_v31, %v11119_v1 }
 0xfb4   :  { %4908 = vmatpush1.bf16.msra.mxu1 %v4890_v28 }
 0xfb5   :  { %v10075_v39 = vpop.permute.xlu1 %4739  ;;  %v10077_v20 = vpop.permute.xlu0 %4805  ;;  %v4878_v58 = vpack.c.bf16 %v4846_v61, %v4830_v9  ;;  %v4870_v2 = vpack.c.bf16 %v4798_v40, %v4782_v43 }
 0xfb6   :  { %v4810_v3 = vsel %vm521_vm6, %v4804_v36, %v10077_v20  ;;  %v4747_v36 = vsel %vm261_vm3, %v4738_v45, %v10075_v39 }
 0xfb7   :  { %v4814_v22 = vmul.f32 %v4810_v3, %v11120_v6  ;;  %4909 = vmatprep.subr.bf16.mxu1 %v4878_v58  ;;  %v4750_v44 = vmul.f32 %v4747_v36, %v11125_v63  ;;  %v11127_v58 = vld [vmem:[#allocation10_spill] sm:$0xff]  ;;  %v11131_v36 = vld [vmem:[#allocation12_spill] sm:$0xff] }
 0xfb8   :  { %4910 = vmatpush1.bf16.msra.mxu1 %v4877_v55 }
 0xfb9   :  { %v10089_v33 = vpop.permute.xlu1 %4755  ;;  %v4776_v30 = vpop.permute.xlu0 %4775  ;;  %v4874_v12 = vpack.c.bf16 %v4814_v22, %v9917_v11  ;;  %v11122_v11 = vld [vmem:[#allocation9_spill] sm:$0xff] }
 0xfba   :  { %v4763_v4 = vsel %vm326_vm2, %v4754_v19, %v10089_v33  ;;  %v4780_v26 = vsel %vm391_vm1, %v4776_v30, %v4770_v57 }
 0xfbb   :  { %4911 = vmatprep.subr.bf16.mxu1 %v4874_v12  ;;  %v4766_v56 = vmul.f32 %v4763_v4, %v11122_v11  ;;  %v4781_v53 = vmul.f32 %v4780_v26, %v11123_v35 }
 0xfbc   :  { %4912 = vmatpush1.bf16.msra.mxu1 %v4873_v24 }
 0xfbd   :  { %v4792_v16 = vpop.permute.xlu1 %4791  ;;  %4913 = vmatprep.subr.bf16.mxu1 %v4870_v2  ;;  %v4744_v42 = vpop.permute.xlu0 %4743  ;;  %v4866_v28 = vpack.c.bf16 %v4766_v56, %v4750_v44  ;;  %v11130_v2 = vld [vmem:[#allocation15_spill] sm:$0xff] }
 0xfbe   :  { %v4796_v48 = vsel %vm456_vm0, %v4792_v16, %v4786_v47  ;;  %v4748_v57 = vsel %vm261_vm3, %v4744_v42, %v4738_v45 }
 0xfbf   :  { %v4797_v14 = vmul.f32 %v4796_v48, %v11124_v29  ;;  %v4749_v31 = vmul.f32 %v4748_v57, %v11126_v13 }
 0xfc1   :  { %v4869_v59 = vpack.c.bf16 %v4797_v14, %v4781_v53  ;;  %v4760_v34 = vpop.permute.xlu1 %4759  ;;  %v4856_v38 = vpop.permute.xlu0 %4855  ;;  %v11133_v53 = vld [vmem:[#allocation14_spill] sm:$0xff] }
 0xfc2   :  { %v4764_v9 = vsel %vm326_vm2, %v4760_v34, %v4754_v19  ;;  %v4857_v61 = vsel %vm716_vm7, %v4854_v52, %v4856_v38  ;;  %v4860_v47 = vsel %vm716_vm7, %v4856_v38, %v10028_v37 }
 0xfc3   :  { %v4765_v55 = vmul.f32 %v4764_v9, %v11127_v58  ;;  %v4863_v45 = vmul.f32 %v4857_v61, %v11128_v25  ;;  %v4864_v3 = vmul.f32 %v4860_v47, %v11129_v62  ;;  %4914 = vmatpush1.bf16.msra.mxu1 %v4869_v59  ;;  %v11134_v9 = vld [vmem:[#allocation16_spill] sm:$0xff] }
 0xfc4   :  { %4915 = vmatprep.subr.bf16.mxu1 %v4866_v28 }
 0xfc5   :  { %v4865_v40 = vpack.c.bf16 %v4765_v55, %v4749_v31  ;;  %v4883_v19 = vpack.c.bf16 %v4863_v45, %v4863_v45  ;;  %v4884_v22 = vpack.c.bf16 %v4864_v3, %v4864_v3  ;;  %v4824_v43 = vpop.permute.xlu1 %4823  ;;  %v4840_v52 = vpop.permute.xlu0 %4839  ;;  %v11135_v31 = vld [vmem:[#allocation18_spill] sm:$0xff] }
 0xfc6   :  { %v4825_v37 = vsel %vm586_vm5, %v10042_v41, %v4824_v43  ;;  %v4828_v12 = vsel %vm586_vm5, %v4824_v43, %v10032_v10  ;;  %v4841_v24 = vsel %vm651_vm4, %v10058_v54, %v4840_v52  ;;  %v4844_v4 = vsel %vm651_vm4, %v4840_v52, %v10030_v5  ;;  %v4736_v41 = vld [vmem:[%s10495_s5] sm:$0xf]  ;;  %v11132_v10 = vld [vmem:[#allocation17_spill] sm:$0xff] }
 0xfc7   :  { %v4832_v26 = vmul.f32 %v4828_v12, %v11130_v2  ;;  %v4848_v56 = vmul.f32 %v4844_v4, %v11131_v36  ;;  %4916 = vmatpush1.bf16.msra.mxu1 %v4865_v40  ;;  %v4831_v48 = vmul.f32 %v4825_v37, %v11132_v10  ;;  %v4847_v54 = vmul.f32 %v4841_v24, %v11133_v53 }
 0xfc8   :  { %5468 = vmatprep.subr.msk.bf16.mxu1 %vm1151_vm9, %v4884_v22  ;;  %v4896_v38 = vsel %vm1151_vm9, %v4883_v19, 0  ;;  %v11136_v19 = vld [vmem:[#allocation56_spill] sm:$0xff] }
 0xfc9   :  { %v4808_v14 = vpop.permute.xlu1 %4807  ;;  %v4774_v44 = vpop.permute.xlu0 %4773  ;;  %v4880_v57 = vpack.c.bf16 %v4848_v56, %v4832_v26  ;;  %v4879_v28 = vpack.c.bf16 %v4847_v54, %v4831_v48  ;;  %v11139_v56 = vld [vmem:[#allocation55_spill] sm:$0xff] }
 0xfca   :  { %v4809_v5 = vsel %vm521_vm6, %v10077_v20, %v4808_v14  ;;  %v4812_v59 = vsel %vm521_vm6, %v4808_v14, %v10034_v17  ;;  %5467 = vmatmul.mubr.msk.bf16.vlgmr.msra.gmra.mxu1 %vm4885_vm11, %v4736_v41  ;;  %v4777_v47 = vsel %vm391_vm1, %v4774_v44, %v4776_v30  ;;  %v11137_v30 = vld [vmem:[#allocation54_spill] sm:$0xff]  ;;  %v4778_v52 = vsel %vm391_vm1, %v10039_v27, %v4774_v44  ;;  %v11140_v27 = vld [vmem:[#allocation60_spill] sm:$0xff] }
 0xfcb   :  { %v4816_v61 = vmul.f32 %v4812_v59, %v11134_v9  ;;  %4949 = vmatpush1.bf16.msra.mxu1 %v4896_v38  ;;  %4974 = vmatprep.mubr.bf16.mxu1 %v11108_v60  ;;  %v4815_v20 = vmul.f32 %v4809_v5, %v11135_v31  ;;  %v4784_v22 = vmul.f32 %v4777_v47, %v11136_v19  ;;  %v11141_v14 = vld [vmem:[#allocation58_spill] sm:$0xff]  ;;  %v11143_v59 = vld [vmem:[#allocation59_spill] sm:$0xff] }
 0xfcc   :  { %4950 = vmatprep.subr.bf16.mxu1 %v4880_v57  ;;  %v4783_v48 = vmul.f32 %v4778_v52, %v11139_v56  ;;  %v11142_v57 = vld [vmem:[#allocation57_spill] sm:$0xff] }
 0xfcd   :  { %v4790_v55 = vpop.permute.xlu1 %4789  ;;  %v4742_v45 = vpop.permute.xlu0 %4741  ;;  %v4876_v17 = vpack.c.bf16 %v4816_v61, %v10000_v49  ;;  %v4875_v49 = vpack.c.bf16 %v4815_v20, %v9985_v8 }
 0xfce   :  { %v4793_v3 = vsel %vm456_vm0, %v4790_v55, %v4792_v16  ;;  %v4794_v40 = vsel %vm456_vm0, %v10056_v15, %v4790_v55  ;;  %v4745_v37 = vsel %vm261_vm3, %v4742_v45, %v4744_v42  ;;  %v11138_v16 = vld [vmem:[#allocation53_spill] sm:$0xff]  ;;  %v4746_v8 = vsel %vm261_vm3, %v10075_v39, %v4742_v45 }
 0xfcf   :  { %v4800_v43 = vmul.f32 %v4793_v3, %v11137_v30  ;;  %4951 = vmatpush1.bf16.msra.mxu1 %v4879_v28  ;;  %v4799_v12 = vmul.f32 %v4794_v40, %v11138_v16  ;;  %v4752_v54 = vmul.f32 %v4745_v37, %v11140_v27  ;;  %v4751_v38 = vmul.f32 %v4746_v8, %v11143_v59 }
 0xfd0   :  { %4952 = vmatprep.subr.bf16.mxu1 %v4876_v17 }
 0xfd1   :  { %v4758_v24 = vpop.permute.xlu1 %4757  ;;  %v4872_v4 = vpack.c.bf16 %v4800_v43, %v4784_v22  ;;  %v4871_v44 = vpack.c.bf16 %v4799_v12, %v4783_v48 }
 0xfd2   :  { %v4761_v15 = vsel %vm326_vm2, %v4758_v24, %v4760_v34  ;;  %v4762_v26 = vsel %vm326_vm2, %v10089_v33, %v4758_v24 }
 0xfd3   :  { %v4768_v42 = vmul.f32 %v4761_v15, %v11141_v14  ;;  %4953 = vmatpush1.bf16.msra.mxu1 %v4875_v49  ;;  %v4767_v5 = vmul.f32 %v4762_v26, %v11142_v57 }
 0xfd4   :  { %4954 = vmatprep.subr.bf16.mxu1 %v4872_v4 }
 0xfd5   :  { %v4868_v34 = vpack.c.bf16 %v4768_v42, %v4752_v54  ;;  %v4867_v33 = vpack.c.bf16 %v4767_v5, %v4751_v38 }
 0xfd7   :  { %4955 = vmatpush1.bf16.msra.mxu1 %v4871_v44 }
 0xfd8   :  { %4956 = vmatprep.subr.bf16.mxu1 %v4868_v34 }
 0xfdb   :  { %4957 = vmatpush1.bf16.msra.mxu1 %v4867_v33 }
 0xfde   :  { %5469 = vmatmul.mubr.msk.bf16.vlgmr.msra.gmra.mxu1 %vm4885_vm11, %v4736_v41 }
 0xfdf   :  { %5199 = vmatprep.mubr.bf16.mxu1 %v11108_v60 }
0x108a   :  { %v4935_v61 = vpop.f32.mrf.mxu1 }
0x108b   :  { %v10183_v47 = vmax.f32 %v4935_v61, 0.0 }
0x108c   :  { %v4937_v28 = vpop.f32.mrf.mxu1 }
0x108d   :  { %5071 = vrot.lane.b32.xlu1 %v10183_v47, %s6287_s18  ;;  %5103 = vrot.lane.b32.xlu0 %v10183_v47, %s6289_s24  ;;  %v10193_v41 = vmax.f32 %v4937_v28, 0.0 }
0x108e   :  { %v4939_v39 = vpop.f32.mrf.mxu1 }
0x1090   :  { %v4940_v20 = vpop.f32.mrf.mxu1 }
0x1091   :  { %5055 = vrot.lane.b32.xlu1 %v10183_v47, %s6288_s21  ;;  %5087 = vrot.lane.b32.xlu0 %v10183_v47, %s6286_s30 }
0x1095   :  { %5023 = vrot.lane.b32.xlu0 %v10183_v47, %s6283_s26  ;;  %5105 = vrot.lane.b32.xlu1 %v10193_v41, %s6289_s24 }
0x1099   :  { %5039 = vrot.lane.b32.xlu0 %v10183_v47, %s6282_s28  ;;  %5073 = vrot.lane.b32.xlu1 %v10193_v41, %s6287_s18 }
0x109d   :  { %4991 = vrot.lane.b32.xlu0 %v10183_v47, %s6285_s29  ;;  %5089 = vrot.lane.b32.xlu1 %v10193_v41, %s6286_s30 }
0x109e   :  { %v4976_v55 = vpop.f32.mrf.mxu1 }
0x109f   :  { %v10211_v17 = vmax.f32 %v4976_v55, 0.0 }
0x10a0   :  { %v4978_v45 = vpop.f32.mrf.mxu1 }
0x10a1   :  { %5007 = vrot.lane.b32.xlu0 %v10183_v47, %s6284_s27  ;;  %5057 = vrot.lane.b32.xlu1 %v10193_v41, %s6288_s21  ;;  %v10229_v22 = vmax.f32 %v4978_v45, 0.0 }
0x10a2   :  { %v4980_v3 = vpop.f32.mrf.mxu1 }
0x10a4   :  { %v4981_v40 = vpop.f32.mrf.mxu1 }
0x10a5   :  { %5025 = vrot.lane.b32.xlu1 %v10193_v41, %s6283_s26  ;;  %5107 = vrot.lane.b32.xlu0 %v10211_v17, %s6289_s24 }
0x10a9   :  { %5041 = vrot.lane.b32.xlu1 %v10193_v41, %s6282_s28  ;;  %5075 = vrot.lane.b32.xlu0 %v10211_v17, %s6287_s18 }
0x10ad   :  { %4993 = vrot.lane.b32.xlu1 %v10193_v41, %s6285_s29  ;;  %5091 = vrot.lane.b32.xlu0 %v10211_v17, %s6286_s30 }
0x10b1   :  { %5009 = vrot.lane.b32.xlu1 %v10193_v41, %s6284_s27  ;;  %5059 = vrot.lane.b32.xlu0 %v10211_v17, %s6288_s21 }
0x10b5   :  { %5045 = vrot.lane.b32.xlu1 %v10229_v22, %s6282_s28  ;;  %5029 = vrot.lane.b32.xlu0 %v10229_v22, %s6283_s26 }
0x10b9   :  { %5013 = vrot.lane.b32.xlu1 %v10229_v22, %s6284_s27  ;;  %4997 = vrot.lane.b32.xlu0 %v10229_v22, %s6285_s29 }
0x10bd   :  { %5077 = vrot.lane.b32.xlu1 %v10229_v22, %s6287_s18  ;;  %5109 = vrot.lane.b32.xlu0 %v10229_v22, %s6289_s24 }
0x10c1   :  { %5061 = vrot.lane.b32.xlu1 %v10229_v22, %s6288_s21  ;;  %5093 = vrot.lane.b32.xlu0 %v10229_v22, %s6286_s30 }
0x10c5   :  { %5043 = vrot.lane.b32.xlu1 %v10211_v17, %s6282_s28  ;;  %5027 = vrot.lane.b32.xlu0 %v10211_v17, %s6283_s26 }
0x10c9   :  { %5011 = vrot.lane.b32.xlu1 %v10211_v17, %s6284_s27  ;;  %4995 = vrot.lane.b32.xlu0 %v10211_v17, %s6285_s29 }
0x10ff   :  { %v10255_v43 = vpop.permute.xlu1 %5071  ;;  %v10257_v52 = vpop.permute.xlu0 %5103 }
0x1103   :  { %v10259_v37 = vpop.permute.xlu1 %5055  ;;  %v10261_v49 = vpop.permute.xlu0 %5087 }
0x1107   :  { %v5106_v12 = vpop.permute.xlu1 %5105  ;;  %v5024_v24 = vpop.permute.xlu0 %5023 }
0x1108   :  { %v5113_v54 = vsel %vm716_vm7, %v10257_v52, %v5106_v12 }
0x1109   :  { %v5115_v44 = vmul.f32 %v5113_v54, %v11112_v7 }
0x110b   :  { %v5074_v4 = vpop.permute.xlu1 %5073  ;;  %v5040_v15 = vpop.permute.xlu0 %5039  ;;  %v5135_v33 = vpack.c.bf16 %v5115_v44, %v5115_v44 }
0x110d   :  { %v5156_v55 = vsel %vm1151_vm9, %v5135_v33, 0 }
0x110f   :  { %v5090_v26 = vpop.permute.xlu1 %5089  ;;  %v4992_v48 = vpop.permute.xlu0 %4991 }
0x1110   :  { %v5097_v7 = vsel %vm651_vm4, %v10261_v49, %v5090_v26 }
0x1113   :  { %v5058_v42 = vpop.permute.xlu1 %5057  ;;  %v5008_v8 = vpop.permute.xlu0 %5007 }
0x1114   :  { %v5065_v44 = vsel %vm521_vm6, %v10259_v37, %v5058_v42 }
0x1117   :  { %v10267_v5 = vpop.permute.xlu1 %5025  ;;  %v10269_v34 = vpop.permute.xlu0 %5107 }
0x1118   :  { %v5112_v38 = vsel %vm716_vm7, %v5106_v12, %v10269_v34  ;;  %v5099_v12 = vmul.f32 %v5097_v7, %v11117_v51  ;;  %v5033_v59 = vsel %vm391_vm1, %v5024_v24, %v10267_v5 }
0x1119   :  { %v5116_v61 = vmul.f32 %v5112_v38, %v11113_v23  ;;  %v5081_v23 = vsel %vm586_vm5, %v10255_v43, %v5074_v4 }
0x111b   :  { %v5136_v28 = vpack.c.bf16 %v5116_v61, %v5116_v61  ;;  %v10275_v39 = vpop.permute.xlu1 %5041  ;;  %v10277_v20 = vpop.permute.xlu0 %5075 }
0x111c   :  { %v5080_v45 = vsel %vm586_vm5, %v5074_v4, %v10277_v20  ;;  %v5083_v4 = vmul.f32 %v5081_v23, %v11114_v50  ;;  %v5049_v61 = vsel %vm456_vm0, %v5040_v15, %v10275_v39  ;;  %v5036_v23 = vmul.f32 %v5033_v59, %v11121_v46 }
0x111d   :  { %5472 = vmatprep.subr.msk.bf16.mxu1 %vm1151_vm9, %v5136_v28  ;;  %v5084_v38 = vmul.f32 %v5080_v45, %v11115_v0  ;;  %v5052_v50 = vmul.f32 %v5049_v61, %v11119_v1 }
0x111e   :  { %5174 = vmatpush1.bf16.msra.mxu1 %v5156_v55  ;;  %v5131_v55 = vpack.c.bf16 %v5099_v12, %v5083_v4 }
0x111f   :  { %v10290_v3 = vpop.permute.xlu1 %4993  ;;  %v10292_v40 = vpop.permute.xlu0 %5091 }
0x1120   :  { %v5096_v54 = vsel %vm651_vm4, %v5090_v26, %v10292_v40  ;;  %v5067_v26 = vmul.f32 %v5065_v44, %v11118_v21  ;;  %v5001_v1 = vsel %vm261_vm3, %v4992_v48, %v10290_v3 }
0x1121   :  { %v5100_v33 = vmul.f32 %v5096_v54, %v11116_v32 }
0x1122   :  { %v5127_v44 = vpack.c.bf16 %v5067_v26, %v10183_v47  ;;  %v5004_v47 = vmul.f32 %v5001_v1, %v11125_v63 }
0x1123   :  { %v10307_v28 = vpop.permute.xlu1 %5009  ;;  %v5060_v51 = vpop.permute.xlu0 %5059  ;;  %v5132_v7 = vpack.c.bf16 %v5100_v33, %v5084_v38 }
0x1124   :  { %v5064_v0 = vsel %vm521_vm6, %v5058_v42, %v5060_v51  ;;  %v5017_v45 = vsel %vm326_vm2, %v5008_v8, %v10307_v28 }
0x1125   :  { %v5068_v32 = vmul.f32 %v5064_v0, %v11120_v6  ;;  %5175 = vmatprep.subr.bf16.mxu1 %v5132_v7  ;;  %v5020_v38 = vmul.f32 %v5017_v45, %v11122_v11 }
0x1126   :  { %5176 = vmatpush1.bf16.msra.mxu1 %v5131_v55 }
0x1127   :  { %v5046_v21 = vpop.permute.xlu1 %5045  ;;  %v5030_v12 = vpop.permute.xlu0 %5029  ;;  %v5128_v54 = vpack.c.bf16 %v5068_v32, %v10193_v41  ;;  %v5124_v41 = vpack.c.bf16 %v5052_v50, %v5036_v23 }
0x1128   :  { %v5050_v6 = vsel %vm456_vm0, %v5046_v21, %v5040_v15  ;;  %v5034_v42 = vsel %vm391_vm1, %v5030_v12, %v5024_v24 }
0x1129   :  { %v5051_v46 = vmul.f32 %v5050_v6, %v11124_v29  ;;  %v5035_v59 = vmul.f32 %v5034_v42, %v11123_v35  ;;  %5177 = vmatprep.subr.bf16.mxu1 %v5128_v54  ;;  %v5120_v35 = vpack.c.bf16 %v5020_v38, %v5004_v47  ;;  %v5501_v38 = vld [vmem:[%s10496_s6 + $0x8] sm:$0xff]  }
0x112a   :  { %5178 = vmatpush1.bf16.msra.mxu1 %v5127_v44 }
0x112b   :  { %v5123_v33 = vpack.c.bf16 %v5051_v46, %v5035_v59  ;;  %v5014_v4 = vpop.permute.xlu1 %5013  ;;  %5179 = vmatprep.subr.bf16.mxu1 %v5124_v41  ;;  %v4998_v61 = vpop.permute.xlu0 %4997 }
0x112c   :  { %v5018_v15 = vsel %vm326_vm2, %v5014_v4, %v5008_v8  ;;  %v5002_v24 = vsel %vm261_vm3, %v4998_v61, %v4992_v48 }
0x112d   :  { %v5019_v11 = vmul.f32 %v5018_v15, %v11127_v58  ;;  %v5003_v29 = vmul.f32 %v5002_v24, %v11126_v13  ;;  %v5500_v13 = vld [vmem:[%s10496_s6] sm:$0xff]  }
0x112e   :  { %5180 = vmatpush1.bf16.msra.mxu1 %v5123_v33 }
0x112f   :  { %v5119_v7 = vpack.c.bf16 %v5019_v11, %v5003_v29  ;;  %v5078_v55 = vpop.permute.xlu1 %5077  ;;  %5181 = vmatprep.subr.bf16.mxu1 %v5120_v35  ;;  %v5110_v63 = vpop.permute.xlu0 %5109  ;;  %v11147_v11 = vld [vmem:[#allocation26_spill] sm:$0xff]  ;;  %v11148_v35 = vld [vmem:[#allocation5_spill] sm:$0xff] }
0x1130   :  { %v5111_v26 = vsel %vm716_vm7, %v10269_v34, %v5110_v63  ;;  %v5114_v8 = vsel %vm716_vm7, %v5110_v63, %v10257_v52  ;;  %v5079_v0 = vsel %vm586_vm5, %v10277_v20, %v5078_v55  ;;  %v5082_v34 = vsel %vm586_vm5, %v5078_v55, %v10255_v43 }
0x1131   :  { %v5117_v48 = vmul.f32 %v5111_v26, %v11128_v25  ;;  %v5118_v58 = vmul.f32 %v5114_v8, %v11129_v62  ;;  %v5085_v23 = vmul.f32 %v5079_v0, %v11132_v10  ;;  %v5086_v43 = vmul.f32 %v5082_v34, %v11130_v2  ;;  %v11149_v8 = vld [vmem:[#allocation3_spill] sm:$0xff]  ;;  %v11150_v0 = vld [vmem:[#allocation30_spill] sm:$0xff] }
0x1132   :  { %5182 = vmatpush1.bf16.msra.mxu1 %v5119_v7  ;;  %v5309_v7 = vrot.slane %v43_v18, %v11148_v35  ;;  %v11163_v35 = vld [vmem:[#allocation46_spill] sm:$0xff] }
0x1133   :  { %v5137_v50 = vpack.c.bf16 %v5117_v48, %v5117_v48  ;;  %v5138_v32 = vpack.c.bf16 %v5118_v58, %v5118_v58  ;;  %v5062_v52 = vpop.permute.xlu1 %5061  ;;  %v5094_v45 = vpop.permute.xlu0 %5093  ;;  %v5313_v48 = vrot.slane %v43_v18, %v11149_v8 }
0x1134   :  { %v5066_v25 = vsel %vm521_vm6, %v5062_v52, %v10259_v37  ;;  %v5095_v62 = vsel %vm651_vm4, %v10292_v40, %v5094_v45  ;;  %v5098_v20 = vsel %vm651_vm4, %v5094_v45, %v10261_v49  ;;  %v5063_v37 = vsel %vm521_vm6, %v5060_v51, %v5062_v52  ;;  %v11151_v45 = vld [vmem:[#allocation32_spill] sm:$0xff] }
0x1135   :  { %v5101_v54 = vmul.f32 %v5095_v62, %v11133_v53  ;;  %v5102_v44 = vmul.f32 %v5098_v20, %v11131_v36  ;;  %5473 = vmatmul.mubr.msk.bf16.vlgmr.msra.gmra.mxu1 %vm4885_vm11, %v5500_v13  ;;  %v5070_v1 = vmul.f32 %v5066_v25, %v11134_v9  ;;  %5475 = vmatprep.subr.msk.bf16.mxu1 %vm1151_vm9, %v5138_v32  ;;  %v5162_v40 = vsel %vm1151_vm9, %v5137_v50, 0  ;;  %v11152_v20 = vld [vmem:[#allocation23_spill] sm:$0xff] }
0x1136   :  { %5209 = vmatprep.mubr.bf16.mxu1 %v11108_v60  ;;  %5227 = vmatpush1.bf16.msra.mxu1 %v5162_v40  ;;  %v5069_v51 = vmul.f32 %v5063_v37, %v11135_v31  ;;  %v11154_v37 = vld [vmem:[#allocation37_spill] sm:$0xff] }
0x1137   :  { %v5133_v10 = vpack.c.bf16 %v5101_v54, %v5085_v23  ;;  %v5044_v2 = vpop.permute.xlu1 %5043  ;;  %v5028_v49 = vpop.permute.xlu0 %5027  ;;  %v5134_v53 = vpack.c.bf16 %v5102_v44, %v5086_v43  ;;  %v11153_v23 = vld [vmem:[#allocation33_spill] sm:$0xff] }
0x1138   :  { %v5047_v36 = vsel %vm456_vm0, %v5044_v2, %v5046_v21  ;;  %v5031_v6 = vsel %vm391_vm1, %v5028_v49, %v5030_v12  ;;  %v5048_v46 = vsel %vm456_vm0, %v10275_v39, %v5044_v2  ;;  %v5032_v21 = vsel %vm391_vm1, %v10267_v5, %v5028_v49 }
0x1139   :  { %v5054_v9 = vmul.f32 %v5047_v36, %v11137_v30  ;;  %v5038_v42 = vmul.f32 %v5031_v6, %v11136_v19  ;;  %5228 = vmatprep.subr.bf16.mxu1 %v5134_v53  ;;  %v5130_v12 = vpack.c.bf16 %v5070_v1, %v10229_v22  ;;  %v5129_v41 = vpack.c.bf16 %v5069_v51, %v10211_v17  ;;  %v11144_v17 = vld [vmem:[#allocation59_spill] sm:$0xff] }
0x113a   :  { %5229 = vmatpush1.bf16.msra.mxu1 %v5133_v10  ;;  %v5053_v39 = vmul.f32 %v5048_v46, %v11138_v16  ;;  %v5037_v47 = vmul.f32 %v5032_v21, %v11139_v56  ;;  %v993_v43 = vadd.f32 %v11153_v23, %v11152_v20  ;;  %v11155_v51 = vld [vmem:[#allocation35_spill] sm:$0xff]  ;;  %v11156_v21 = vld [vmem:[#allocation34_spill] sm:$0xff] }
0x113b   :  { %v5012_v31 = vpop.permute.xlu1 %5011  ;;  %v4996_v30 = vpop.permute.xlu0 %4995  ;;  %5230 = vmatprep.subr.bf16.mxu1 %v5130_v12  ;;  %v5126_v5 = vpack.c.bf16 %v5054_v9, %v5038_v42 }
0x113c   :  { %v5015_v19 = vsel %vm326_vm2, %v5012_v31, %v5014_v4  ;;  %v4999_v59 = vsel %vm261_vm3, %v4996_v30, %v4998_v61  ;;  %v5016_v22 = vsel %vm326_vm2, %v10307_v28, %v5012_v31  ;;  %v5000_v4 = vsel %vm261_vm3, %v10290_v3, %v4996_v30 }
0x113d   :  { %5474 = vmatmul.mubr.msk.bf16.gmra.mxu1 %vm4885_vm11, %v5501_v38  ;;  %v5022_v33 = vmul.f32 %v5015_v19, %v11141_v14  ;;  %v5006_v61 = vmul.f32 %v4999_v59, %v11140_v27  ;;  %v5125_v16 = vpack.c.bf16 %v5053_v39, %v5037_v47  ;;  %v5021_v56 = vmul.f32 %v5016_v22, %v11142_v57  ;;  %v11145_v14 = vld [vmem:[#allocation27_spill] sm:$0xff]  ;;  %v11146_v57 = vld [vmem:[#allocation29_spill] sm:$0xff]  ;;  %v11158_v39 = vld [vmem:[#allocation48_spill] sm:$0xff] }
0x113e   :  { %5252 = vmatprep.mubr.bf16.mxu1 %v11108_v60  ;;  %5231 = vmatpush1.bf16.msra.mxu1 %v5129_v41  ;;  %v5005_v15 = vmul.f32 %v5000_v4, %v11144_v17  ;;  %v983_v3 = vadd.f32 %v11146_v57, %v11145_v14  ;;  %v11157_v41 = vld [vmem:[#allocation36_spill] sm:$0xff]  ;;  %v11161_v17 = vld [vmem:[#allocation51_spill] sm:$0xff]  ;;  %v11162_v14 = vld [vmem:[#allocation49_spill] sm:$0xff] }
0x113f   :  { %5232 = vmatprep.subr.bf16.mxu1 %v5126_v5  ;;  %v5122_v24 = vpack.c.bf16 %v5022_v33, %v5006_v61  ;;  %v1105_v47 = vadd.f32 %v11158_v39, %v11157_v41  ;;  %v11159_v5 = vld [vmem:[#allocation43_spill] sm:$0xff]  ;;  %v11160_v33 = vld [vmem:[#allocation50_spill] sm:$0xff] }
0x1140   :  { %v5121_v28 = vpack.c.bf16 %v5021_v56, %v5005_v15  ;;  %v5317_v4 = vrot.slane %v43_v18, %v11160_v33  ;;  %v5321_v15 = vrot.slane %v43_v18, %v11161_v17 }
0x1142   :  { %5233 = vmatpush1.bf16.msra.mxu1 %v5125_v16 }
0x1143   :  { %5234 = vmatprep.subr.bf16.mxu1 %v5122_v24 }
0x1146   :  { %5235 = vmatpush1.bf16.msra.mxu1 %v5121_v28 }
0x1149   :  { %5476 = vmatmul.mubr.msk.bf16.vlgmr.msra.gmra.mxu1 %vm4885_vm11, %v5500_v13 }
0x114a   :  { %5262 = vmatprep.mubr.bf16.mxu1 %v11108_v60 }
0x1151   :  { %5477 = vmatmul.mubr.msk.bf16.gmra.mxu1 %vm4885_vm11, %v5501_v38 }
0x11f5   :  { %v5201_v27 = vpop.f32.mrf.mxu1 }
0x11f6   :  { %v5273_v29 = vadd.f32 %v5201_v27, %v11147_v11 }
0x11f7   :  { %v5203_v55 = vpop.f32.mrf.mxu1 }
0x11f8   :  { %v5289_v63 = vmax.f32 %v5273_v29, 0.0  ;;  %v5274_v26 = vadd.f32 %v5203_v55, %v983_v3 }
0x11f9   :  { %v5205_v60 = vpop.f32.mrf.mxu1 }
0x11fa   :  { %v5326_v58 = vmul.f32 %v5309_v7, %v5289_v63  ;;  %v5290_v13 = vmax.f32 %v5274_v26, 0.0  ;;  %v5277_v34 = vadd.f32 %v5205_v60, %v11150_v0  ;;  %v11164_v63 = vld [vmem:[#allocation39_spill] sm:$0xff]  ;;  %v11165_v26 = vld [vmem:[#allocation52_spill] sm:$0xff] }
0x11fb   :  { %v5207_v50 = vpop.f32.mrf.mxu1  ;;  %v1115_v8 = vadd.f32 %v11165_v26, %v11164_v63  ;;  %v11166_v60 = vld [vmem:[#allocation47_spill] sm:$0xff] }
0x11fc   :  { %5342 = vst [vmem:[%s10498_s7] sm:$0xff] %v5326_v58  ;;  %v5327_v32 = vmul.f32 %v5313_v48, %v5290_v13  ;;  %v5293_v52 = vmax.f32 %v5277_v34, 0.0  ;;  %v5278_v25 = vadd.f32 %v5207_v50, %v11151_v45 }
0x11fd   :  { %v5211_v62 = vpop.f32.mrf.mxu1 }
0x11fe   :  { %5343 = vst [vmem:[%s10498_s7 + $0x8] sm:$0xff] %v5327_v32  ;;  %v5330_v54 = vmul.f32 %v5309_v7, %v5293_v52  ;;  %v5294_v44 = vmax.f32 %v5278_v25, 0.0  ;;  %v5281_v1 = vadd.f32 %v5211_v62, %v11154_v37  ;;  %v11167_v25 = vld [vmem:[#allocation61_spill] sm:$0xff] }
0x11ff   :  { %v5213_v40 = vpop.f32.mrf.mxu1 }
0x1200   :  { %5346 = vst [vmem:[%s10498_s7 + $0x20] sm:$0xff] %v5330_v54  ;;  %v5331_v10 = vmul.f32 %v5313_v48, %v5294_v44  ;;  %v5297_v2 = vmax.f32 %v5281_v1, 0.0  ;;  %v5282_v49 = vadd.f32 %v5213_v40, %v993_v43  ;;  %v11168_v54 = vld [vmem:[#allocation62_spill] sm:$0xff] }
0x1201   :  { %v5215_v53 = vpop.f32.mrf.mxu1 }
0x1202   :  { %5347 = vst [vmem:[%s10498_s7 + $0x28] sm:$0xff] %v5331_v10  ;;  %v5334_v36 = vmul.f32 %v5309_v7, %v5297_v2  ;;  %v5298_v6 = vmax.f32 %v5282_v49, 0.0  ;;  %v5285_v9 = vadd.f32 %v5215_v53, %v11155_v51 }
0x1203   :  { %v5217_v42 = vpop.f32.mrf.mxu1 }
0x1204   :  { %5350 = vst [vmem:[%s10498_s7 + $0x40] sm:$0xff] %v5334_v36  ;;  %v5335_v38 = vmul.f32 %v5313_v48, %v5298_v6  ;;  %v5301_v46 = vmax.f32 %v5285_v9, 0.0  ;;  %v5286_v12 = vadd.f32 %v5217_v42, %v11156_v21 }
0x1206   :  { %5351 = vst [vmem:[%s10498_s7 + $0x48] sm:$0xff] %v5335_v38  ;;  %v5338_v31 = vmul.f32 %v5309_v7, %v5301_v46  ;;  %v5302_v30 = vmax.f32 %v5286_v12, 0.0 }
0x1208   :  { %5354 = vst [vmem:[%s10498_s7 + $0x60] sm:$0xff] %v5338_v31  ;;  %v5339_v19 = vmul.f32 %v5313_v48, %v5302_v30 }
0x1209   :  { %v5254_v59 = vpop.f32.mrf.mxu1 }
0x120a   :  { %5355 = vst [vmem:[%s10498_s7 + $0x68] sm:$0xff] %v5339_v19  ;;  %v5275_v22 = vadd.f32 %v5254_v59, %v11159_v5 }
0x120b   :  { %v5256_v61 = vpop.f32.mrf.mxu1 }
0x120c   :  { %v5291_v16 = vmax.f32 %v5275_v22, 0.0  ;;  %v5276_v56 = vadd.f32 %v5256_v61, %v1105_v47 }
0x120d   :  { %v5258_v24 = vpop.f32.mrf.mxu1 }
0x120e   :  { %v5328_v28 = vmul.f32 %v5317_v4, %v5291_v16  ;;  %v5292_v27 = vmax.f32 %v5276_v56, 0.0  ;;  %v5279_v57 = vadd.f32 %v5258_v24, %v11162_v14 }
0x120f   :  { %v5260_v3 = vpop.f32.mrf.mxu1 }
0x1210   :  { %5344 = vst [vmem:[%s10498_s7 + $0x10] sm:$0xff] %v5328_v28  ;;  %v5329_v11 = vmul.f32 %v5321_v15, %v5292_v27  ;;  %v5295_v29 = vmax.f32 %v5279_v57, 0.0  ;;  %v5280_v7 = vadd.f32 %v5260_v3, %v11163_v35 }
0x1211   :  { %v5264_v55 = vpop.f32.mrf.mxu1 }
0x1212   :  { %5345 = vst [vmem:[%s10498_s7 + $0x18] sm:$0xff] %v5329_v11  ;;  %v5332_v18 = vmul.f32 %v5317_v4, %v5295_v29  ;;  %v5296_v48 = vmax.f32 %v5280_v7, 0.0  ;;  %v5283_v58 = vadd.f32 %v5264_v55, %v11166_v60 }
0x1213   :  { %v5266_v13 = vpop.f32.mrf.mxu1 }
0x1214   :  { %5348 = vst [vmem:[%s10498_s7 + $0x30] sm:$0xff] %v5332_v18  ;;  %v5333_v0 = vmul.f32 %v5321_v15, %v5296_v48  ;;  %v5299_v34 = vmax.f32 %v5283_v58, 0.0  ;;  %v5284_v50 = vadd.f32 %v5266_v13, %v1115_v8 }
0x1215   :  { %v5268_v32 = vpop.f32.mrf.mxu1 }
0x1216   :  { %5349 = vst [vmem:[%s10498_s7 + $0x38] sm:$0xff] %v5333_v0  ;;  %v5336_v52 = vmul.f32 %v5317_v4, %v5299_v34  ;;  %v5300_v45 = vmax.f32 %v5284_v50, 0.0  ;;  %v5287_v62 = vadd.f32 %v5268_v32, %v11167_v25 }
0x1217   :  { %v5270_v20 = vpop.f32.mrf.mxu1 }
0x1218   :  { %5352 = vst [vmem:[%s10498_s7 + $0x50] sm:$0xff] %v5336_v52  ;;  %v5337_v23 = vmul.f32 %v5321_v15, %v5300_v45  ;;  %v5303_v43 = vmax.f32 %v5287_v62, 0.0  ;;  %v5288_v44 = vadd.f32 %v5270_v20, %v11168_v54 }
0x121a   :  { %5353 = vst [vmem:[%s10498_s7 + $0x58] sm:$0xff] %v5337_v23  ;;  %v5340_v37 = vmul.f32 %v5317_v4, %v5303_v43  ;;  %v5304_v1 = vmax.f32 %v5288_v44, 0.0 }
0x121c   :  { %5356 = vst [vmem:[%s10498_s7 + $0x70] sm:$0xff] %v5340_v37  ;;  %v5341_v40 = vmul.f32 %v5321_v15, %v5304_v1 }
0x121e   :  { %5357 = vst [vmem:[%s10498_s7 + $0x78] sm:$0xff] %v5341_v40 }

</bundles_post_ra>
